<compile_context>
chip_gen: v5e
topology: v5e:2x2
jax: 0.10.0
libtpu: 0.0.40
codegen_flags: <defaults>
</compile_context>

<pallas_src>
import functools

import jax
import jax.numpy as jnp
from jax import lax
from jax.experimental import pallas as pl
from jax.experimental.pallas import tpu as pltpu

EPS = 1e-5
NEG_SLOPE = 0.2
LANE = 128
# Per-grid-step tile budget, sized with v7x's 64 MiB physical VMEM in mind.
VMEM_TILE_BUDGET = 20 * 1024 * 1024
VMEM_LIMIT_BYTES = 32 * 1024 * 1024


def _cdiv(a, b):
    return -(-a // b)


# ----------------------------------------------------------------------------
# Kernels
# ----------------------------------------------------------------------------
def _fused_kernel(p_ref, w_ref, b_ref, o_ref, *, apply_norm, apply_relu, inv_p):
    """Whole-sample(s) fused conv + bias [+ InstanceNorm] [+ LeakyReLU].

    p_ref: [TB, K, P] bf16, w_ref: [Cout, K] bf16, b_ref: [Cout, 1] f32,
    o_ref: [TB, Cout, P] f32.
    """
    w = w_ref[...]
    b = b_ref[...]
    for s in range(p_ref.shape[0]):                    # TB is static & small -> unrolled
        y = jnp.dot(w, p_ref[s], preferred_element_type=jnp.float32) + b   # [Cout, P]
        if apply_norm:
            # one-pass sum / sum-of-squares InstanceNorm over the spatial (lane) axis
            mean = jnp.sum(y, axis=1, keepdims=True) * inv_p
            var = jnp.sum(y * y, axis=1, keepdims=True) * inv_p - mean * mean
            y = (y - mean) * lax.rsqrt(var + EPS)
        if apply_relu:
            y = jnp.where(y > 0, y, NEG_SLOPE * y)
        o_ref[s] = y.astype(o_ref.dtype)


def _conv_tiled_kernel(p_ref, w_ref, b_ref, o_ref, *, apply_relu):
    """Spatially tiled conv + bias [+ LeakyReLU] (no norm). Blocks: [1,K,TP]->[1,Cout,TP]."""
    y = jnp.dot(w_ref[...], p_ref[0], preferred_element_type=jnp.float32) + b_ref[...]
    if apply_relu:
        y = jnp.where(y > 0, y, NEG_SLOPE * y)
    o_ref[0] = y.astype(o_ref.dtype)


def _conv_stats_kernel(p_ref, w_ref, b_ref, o_ref, sum_ref, ssq_ref, *, p_valid, tp):
    """Pass 1 of streamed InstanceNorm: conv + bias, plus per-channel sum / sumsq
    accumulated in resident output blocks across the (arbitrary) P-tile axis."""
    pi = pl.program_id(1)
    y = jnp.dot(w_ref[...], p_ref[0], preferred_element_type=jnp.float32) + b_ref[...]
    o_ref[0] = y.astype(o_ref.dtype)

    if p_valid % tp == 0:
        ym = y
    else:
        col = pi * tp + lax.broadcasted_iota(jnp.int32, y.shape, 1)
        ym = jnp.where(col < p_valid, y, 0.0)          # mask padded spatial columns
    s = jnp.sum(ym, axis=1, keepdims=True)             # [Cout, 1]
    ss = jnp.sum(ym * ym, axis=1, keepdims=True)       # [Cout, 1]

    @pl.when(pi == 0)
    def _():
        sum_ref[...] = jnp.zeros_like(sum_ref)
        ssq_ref[...] = jnp.zeros_like(ssq_ref)

    sum_ref[0] += s
    ssq_ref[0] += ss


def _norm_relu_kernel(y_ref, sum_ref, ssq_ref, o_ref, *, apply_relu, inv_p):
    """Pass 2 of streamed InstanceNorm: normalize + LeakyReLU per spatial tile."""
    y = y_ref[0]
    mean = sum_ref[0] * inv_p
    var = ssq_ref[0] * inv_p - mean * mean
    y = (y - mean) * lax.rsqrt(var + EPS)
    if apply_relu:
        y = jnp.where(y > 0, y, NEG_SLOPE * y)
    o_ref[0] = y.astype(o_ref.dtype)


# ----------------------------------------------------------------------------
# Plain-JAX glue: transposed im2col + per-layer pallas_call wrapper
# ----------------------------------------------------------------------------
def _im2col_T(x, k, stride, pad):
    """x: [N, C, H, W] -> transposed patches [N, C*k*k, Ho*Wo] in bf16."""
    N, C, H, W = x.shape
    xb = x.astype(jnp.bfloat16)                        # halve HBM traffic of im2col
    xp = jnp.pad(xb, ((0, 0), (0, 0), (pad, pad), (pad, pad)))
    Ho = (H + 2 * pad - k) // stride + 1
    Wo = (W + 2 * pad - k) // stride + 1
    cols = []
    for i in range(k):
        for j in range(k):
            cols.append(xp[:, :, i:i + stride * Ho:stride, j:j + stride * Wo:stride])
    # [N, C, k*k, Ho, Wo] -> [N, C*k*k, Ho*Wo]; (c, i, j) ordering matches OIHW reshape.
    pT = jnp.stack(cols, axis=2).reshape(N, C * k * k, Ho * Wo)
    return pT, Ho, Wo


def _plan_tiles(N, K, Cout, P, max_tp):
    """Choose whole-sample ('fused') vs spatially tiled execution for a layer."""
    col_bytes = 2 * (K * 2) + 2 * (Cout * 4)   # dbl-buffered bf16 patch col + f32 out col
    w_bytes = 2 * Cout * K * 2                 # dbl-buffered bf16 weights (resident)
    budget = max(VMEM_TILE_BUDGET - w_bytes, LANE * col_bytes)
    tp = max(LANE, (budget // col_bytes) // LANE * LANE)
    if max_tp is not None:
        tp = min(tp, max(LANE, (max_tp // LANE) * LANE))
    if P <= tp:
        tb = N if N * P * col_bytes <= budget else 1   # batch several samples if cheap
        return "fused", tb, None
    return "tiled", None, tp


def conv_block(x, w2, b2, *, k, stride, pad, apply_norm, apply_relu, max_tp=None):
    """x: [N, Cin, H, W] f32; w2: [Cout, Cin*k*k] bf16; b2: [Cout, 1] f32 -> NCHW f32."""
    Cout, K = w2.shape
    pT, Ho, Wo = _im2col_T(x, k, stride, pad)
    N, _, P = pT.shape

    mode, tb, tp = _plan_tiles(N, K, Cout, P, max_tp)

    if mode == "fused":
        kern = functools.partial(_fused_kernel, apply_norm=apply_norm,
                                 apply_relu=apply_relu, inv_p=1.0 / P)
        out = pl.pallas_call(
            kern,
            out_shape=jax.ShapeDtypeStruct((N, Cout, P), jnp.float32),
            grid=(N // tb,),
            in_specs=[
                pl.BlockSpec((tb, K, P), lambda n: (n, 0, 0)),
                pl.BlockSpec((Cout, K), lambda n: (0, 0)),
                pl.BlockSpec((Cout, 1), lambda n: (0, 0)),
            ],
            out_specs=pl.BlockSpec((tb, Cout, P), lambda n: (n, 0, 0)),
            compiler_params=pltpu.CompilerParams(
                dimension_semantics=("parallel",),
                vmem_limit_bytes=VMEM_LIMIT_BYTES),
        )(pT, w2, b2)
        return out.reshape(N, Cout, Ho, Wo)

    # ---- spatially tiled path ------------------------------------------------
    n_pt = _cdiv(P, tp)
    P_pad = n_pt * tp
    if P_pad != P:
        pT = jnp.pad(pT, ((0, 0), (0, 0), (0, P_pad - P)))

    if not apply_norm:
        kern = functools.partial(_conv_tiled_kernel, apply_relu=apply_relu)
        out = pl.pallas_call(
            kern,
            out_shape=jax.ShapeDtypeStruct((N, Cout, P_pad), jnp.float32),
            grid=(N, n_pt),
            in_specs=[
                pl.BlockSpec((1, K, tp), lambda n, p: (n, 0, p)),
                pl.BlockSpec((Cout, K), lambda n, p: (0, 0)),
                pl.BlockSpec((Cout, 1), lambda n, p: (0, 0)),
            ],
            out_specs=pl.BlockSpec((1, Cout, tp), lambda n, p: (n, 0, p)),
            compiler_params=pltpu.CompilerParams(
                dimension_semantics=("parallel", "parallel"),
                vmem_limit_bytes=VMEM_LIMIT_BYTES),
        )(pT, w2, b2)
        out = out[:, :, :P] if P_pad != P else out
        return out.reshape(N, Cout, Ho, Wo)

    # norm layer: pass 1 = conv + streamed per-channel sum / sumsq
    kern1 = functools.partial(_conv_stats_kernel, p_valid=P, tp=tp)
    y_raw, psum, pssq = pl.pallas_call(
        kern1,
        out_shape=(
            jax.ShapeDtypeStruct((N, Cout, P_pad), jnp.float32),
            jax.ShapeDtypeStruct((N, Cout, 1), jnp.float32),
            jax.ShapeDtypeStruct((N, Cout, 1), jnp.float32),
        ),
        grid=(N, n_pt),
        in_specs=[
            pl.BlockSpec((1, K, tp), lambda n, p: (n, 0, p)),
            pl.BlockSpec((Cout, K), lambda n, p: (0, 0)),
            pl.BlockSpec((Cout, 1), lambda n, p: (0, 0)),
        ],
        out_specs=(
            pl.BlockSpec((1, Cout, tp), lambda n, p: (n, 0, p)),
            pl.BlockSpec((1, Cout, 1), lambda n, p: (n, 0, 0)),
            pl.BlockSpec((1, Cout, 1), lambda n, p: (n, 0, 0)),
        ),
        compiler_params=pltpu.CompilerParams(
            dimension_semantics=("parallel", "arbitrary"),
            vmem_limit_bytes=VMEM_LIMIT_BYTES),
    )(pT, w2, b2)

    # pass 2 = normalize + LeakyReLU, written in-place via aliasing
    kern2 = functools.partial(_norm_relu_kernel, apply_relu=apply_relu, inv_p=1.0 / P)
    out = pl.pallas_call(
        kern2,
        out_shape=jax.ShapeDtypeStruct((N, Cout, P_pad), jnp.float32),
        grid=(N, n_pt),
        in_specs=[
            pl.BlockSpec((1, Cout, tp), lambda n, p: (n, 0, p)),
            pl.BlockSpec((1, Cout, 1), lambda n, p: (n, 0, 0)),
            pl.BlockSpec((1, Cout, 1), lambda n, p: (n, 0, 0)),
        ],
        out_specs=pl.BlockSpec((1, Cout, tp), lambda n, p: (n, 0, p)),
        input_output_aliases={0: 0},
        compiler_params=pltpu.CompilerParams(
            dimension_semantics=("parallel", "parallel"),
            vmem_limit_bytes=VMEM_LIMIT_BYTES),
    )(y_raw, psum, pssq)
    out = out[:, :, :P] if P_pad != P else out
    return out.reshape(N, Cout, Ho, Wo)


# ----------------------------------------------------------------------------
# DiscriminatorN_IN forward (n_layers=3, InstanceNorm, bias=True, k=4, pad=1)
# ----------------------------------------------------------------------------
def make_layer_specs(num_filters, input_channels, n_layers):
    """[(Cin, Cout, stride, norm?, relu?)], mirroring make_net()."""
    specs = [(input_channels, num_filters, 2, False, True)]                    # conv0
    flt_mult, flt_mult_prev = 1, 1
    for l in range(1, n_layers):                                               # conv_1..
        flt_mult_prev = flt_mult
        flt_mult = min(2 ** l, 8)
        specs.append((num_filters * flt_mult_prev, num_filters * flt_mult, 2, True, True))
    flt_mult_prev = flt_mult
    flt_mult = min(2 ** n_layers, 8)
    specs.append((num_filters * flt_mult_prev, num_filters * flt_mult, 1, True, True))
    specs.append((num_filters * flt_mult, 1, 1, False, False))                 # conv_out
    return specs


def init_params(key, specs, k=4):
    params = []
    for (cin, cout, _, _, _) in specs:
        key, kw, kb = jax.random.split(key, 3)
        w = 0.02 * jax.random.normal(kw, (cout, cin, k, k), dtype=jnp.float32)
        b = 0.02 * jax.random.normal(kb, (cout,), dtype=jnp.float32)
        params.append((w, b))
    return params


def prepare_params(params):
    """One-time layout prep: OIHW f32 -> [Cout, Cin*k*k] bf16, bias -> [Cout, 1] f32."""
    prepped = []
    for w, b in params:
        cout = w.shape[0]
        prepped.append((w.reshape(cout, -1).astype(jnp.bfloat16),
                        b.reshape(cout, 1).astype(jnp.float32)))
    return prepped


def discriminator_forward(x, prepped_params, specs, k=4, max_tp=None):
    y = x
    for (w2, b2), (_, _, stride, norm, relu) in zip(prepped_params, specs):
        y = conv_block(y, w2, b2, k=k, stride=stride, pad=1,
                       apply_norm=norm, apply_relu=relu, max_tp=max_tp)
    return y, None                       # matches PyTorch forward's (out, None)


# ----------------------------------------------------------------------------
# Pure-JAX f32 reference (correctness check only)
# ----------------------------------------------------------------------------
def reference_forward(x, params, specs):
    y = x
    for (w, b), (_, _, stride, norm, relu) in zip(params, specs):
        y = lax.conv_general_dilated(y, w, (stride, stride), ((1, 1), (1, 1)),
                                     dimension_numbers=("NCHW", "OIHW", "NCHW"))
        y = y + b.reshape(1, -1, 1, 1)
        if norm:
            m = jnp.mean(y, axis=(2, 3), keepdims=True)
            v = jnp.mean((y - m) ** 2, axis=(2, 3), keepdims=True)
            y = (y - m) / jnp.sqrt(v + EPS)
        if relu:
            y = jnp.where(y > 0, y, NEG_SLOPE * y)
    return y


if __name__ == "__main__":
    num_filters, n_layers = 16, 3
    key = jax.random.PRNGKey(0)
    kx, kp, kx2 = jax.random.split(key, 3)

    specs = make_layer_specs(num_filters, 3, n_layers)
    params = init_params(kp, specs)
    prepped = prepare_params(params)

    # ---- primary check: small input, whole-sample fused path ---------------
    batch, in_ch, H, W = 2, 3, 32, 32      # 32 is the smallest non-degenerate spatial
    x = jax.random.normal(kx, (batch, in_ch, H, W), dtype=jnp.float32)
    fwd = jax.jit(functools.partial(discriminator_forward, specs=specs))
    out, aux = fwd(x, prepped)
    out = jax.block_until_ready(out)
    assert aux is None
    assert out.shape == (batch, 1, 2, 2), out.shape
    ref = jax.block_until_ready(reference_forward(x, params, specs))
    # bf16 matmul inputs vs f32 reference -> loose-but-bug-catching tolerance
    assert jnp.allclose(out, ref, atol=5e-2, rtol=5e-2), float(jnp.max(jnp.abs(out - ref)))

    # ---- secondary check: force small spatial tiles so the streamed
    #      (tiled conv+stats -> normalize) path is exercised too -------------
    x2 = jax.random.normal(kx2, (1, in_ch, 64, 64), dtype=jnp.float32)
    fwd_tiled = jax.jit(functools.partial(discriminator_forward, specs=specs, max_tp=128))
    out2, _ = fwd_tiled(x2, prepped)
    out2 = jax.block_until_ready(out2)
    ref2 = jax.block_until_ready(reference_forward(x2, params, specs))
    assert out2.shape == ref2.shape, (out2.shape, ref2.shape)
    assert jnp.allclose(out2, ref2, atol=5e-2, rtol=5e-2), float(jnp.max(jnp.abs(out2 - ref2)))

    print("KERNEL_OK")
</pallas_src>

<mosaic_0001>
module attributes {stable_mosaic.version = 11 : i64} {
  func.func @_fused_kernel(%arg0: i32, %arg1: memref<2x48x256xbf16, #tpu.memory_space<vmem>>, %arg2: memref<16x48xbf16, #tpu.memory_space<vmem>>, %arg3: memref<16x1xf32, #tpu.memory_space<vmem>>, %arg4: memref<2x16x256xf32, #tpu.memory_space<vmem>>) attributes {dimension_semantics = [#tpu.dimension_semantics<parallel>], iteration_bounds = array<i64: 1>, scalar_prefetch = 0 : i64, scratch_operands = 0 : i64, tpu.core_type = #tpu.core_type<tc>, window_params = [{transform_indices = @transform_0, window_bounds = array<i64: 2, 48, 256>}, {pipeline_mode = #tpu.pipeline_mode<synchronous>, transform_indices = @transform_1, window_bounds = array<i64: 16, 48>}, {pipeline_mode = #tpu.pipeline_mode<synchronous>, transform_indices = @transform_2, window_bounds = array<i64: 16, 1>}, {transform_indices = @transform_3, window_bounds = array<i64: 2, 16, 256>}]} {
    %c0 = arith.constant 0 : index
    %c0_0 = arith.constant 0 : index
    %0 = vector.load %arg2[%c0, %c0_0] : memref<16x48xbf16, #tpu.memory_space<vmem>>, vector<16x48xbf16>
    %c0_1 = arith.constant 0 : index
    %c0_2 = arith.constant 0 : index
    %1 = vector.load %arg3[%c0_1, %c0_2] : memref<16x1xf32, #tpu.memory_space<vmem>>, vector<16x1xf32>
    %c0_3 = arith.constant 0 : index
    %c0_4 = arith.constant 0 : index
    %c0_5 = arith.constant 0 : index
    %2 = vector.load %arg1[%c0_3, %c0_4, %c0_5] : memref<2x48x256xbf16, #tpu.memory_space<vmem>>, vector<1x48x256xbf16>
    %3 = vector.shape_cast %2 : vector<1x48x256xbf16> to vector<48x256xbf16>
    %cst = arith.constant dense<0.000000e+00> : vector<16x256xf32>
    %4 = tpu.matmul %0, %3, %cst {dimension_numbers = #tpu.dot_dimension_numbers<[1], [0], [0], [1], [0, 0, 1, 1], [], []>} : vector<16x48xbf16>, vector<48x256xbf16>, vector<16x256xf32> -> vector<16x256xf32>
    %5 = vector.broadcast %1 : vector<16x1xf32> to vector<16x256xf32>
    %6 = arith.addf %4, %5 : vector<16x256xf32>
    %cst_6 = arith.constant 0.000000e+00 : f32
    %7 = vector.broadcast %cst_6 : f32 to vector<16x256xf32>
    %8 = arith.cmpf ogt, %6, %7 : vector<16x256xf32>
    %cst_7 = arith.constant 2.000000e-01 : f32
    %9 = vector.broadcast %cst_7 : f32 to vector<16x256xf32>
    %10 = arith.mulf %9, %6 : vector<16x256xf32>
    %11 = arith.select %8, %6, %10 : vector<16x256xi1>, vector<16x256xf32>
    %c0_8 = arith.constant 0 : index
    %c0_9 = arith.constant 0 : index
    %c0_10 = arith.constant 0 : index
    %12 = vector.load %arg4[%c0_8, %c0_9, %c0_10] : memref<2x16x256xf32, #tpu.memory_space<vmem>>, vector<1x16x256xf32>
    %13 = vector.shape_cast %12 : vector<1x16x256xf32> to vector<16x256xf32>
    %14 = vector.shape_cast %11 : vector<16x256xf32> to vector<1x16x256xf32>
    tpu.vector_store %arg4[%c0_8, %c0_9, %c0_10], %14 {strides = array<i32>} : memref<2x16x256xf32, #tpu.memory_space<vmem>>, vector<1x16x256xf32>,
    %c1 = arith.constant 1 : index
    %c0_11 = arith.constant 0 : index
    %c0_12 = arith.constant 0 : index
    %15 = vector.load %arg1[%c1, %c0_11, %c0_12] : memref<2x48x256xbf16, #tpu.memory_space<vmem>>, vector<1x48x256xbf16>
    %16 = vector.shape_cast %15 : vector<1x48x256xbf16> to vector<48x256xbf16>
    %cst_13 = arith.constant dense<0.000000e+00> : vector<16x256xf32>
    %17 = tpu.matmul %0, %16, %cst_13 {dimension_numbers = #tpu.dot_dimension_numbers<[1], [0], [0], [1], [0, 0, 1, 1], [], []>} : vector<16x48xbf16>, vector<48x256xbf16>, vector<16x256xf32> -> vector<16x256xf32>
    %18 = vector.broadcast %1 : vector<16x1xf32> to vector<16x256xf32>
    %19 = arith.addf %17, %18 : vector<16x256xf32>
    %cst_14 = arith.constant 0.000000e+00 : f32
    %20 = vector.broadcast %cst_14 : f32 to vector<16x256xf32>
    %21 = arith.cmpf ogt, %19, %20 : vector<16x256xf32>
    %cst_15 = arith.constant 2.000000e-01 : f32
    %22 = vector.broadcast %cst_15 : f32 to vector<16x256xf32>
    %23 = arith.mulf %22, %19 : vector<16x256xf32>
    %24 = arith.select %21, %19, %23 : vector<16x256xi1>, vector<16x256xf32>
    %c1_16 = arith.constant 1 : index
    %c0_17 = arith.constant 0 : index
    %c0_18 = arith.constant 0 : index
    %25 = vector.load %arg4[%c1_16, %c0_17, %c0_18] : memref<2x16x256xf32, #tpu.memory_space<vmem>>, vector<1x16x256xf32>
    %26 = vector.shape_cast %25 : vector<1x16x256xf32> to vector<16x256xf32>
    %27 = vector.shape_cast %24 : vector<16x256xf32> to vector<1x16x256xf32>
    tpu.vector_store %arg4[%c1_16, %c0_17, %c0_18], %27 {strides = array<i32>} : memref<2x16x256xf32, #tpu.memory_space<vmem>>, vector<1x16x256xf32>,
    return
  }
  func.func @transform_0(%arg0: i32) -> (i32, i32, i32) {
    %c0_i32 = arith.constant 0 : i32
    %c0_i32_0 = arith.constant 0 : i32
    %c0_i32_1 = arith.constant 0 : i32
    return %arg0, %c0_i32, %c0_i32_0 : i32, i32, i32
  }
  func.func @transform_1(%arg0: i32) -> (i32, i32) {
    %c0_i32 = arith.constant 0 : i32
    %c0_i32_0 = arith.constant 0 : i32
    %c0_i32_1 = arith.constant 0 : i32
    return %c0_i32, %c0_i32_0 : i32, i32
  }
  func.func @transform_2(%arg0: i32) -> (i32, i32) {
    %c0_i32 = arith.constant 0 : i32
    %c0_i32_0 = arith.constant 0 : i32
    %c0_i32_1 = arith.constant 0 : i32
    return %c0_i32, %c0_i32_0 : i32, i32
  }
  func.func @transform_3(%arg0: i32) -> (i32, i32, i32) {
    %c0_i32 = arith.constant 0 : i32
    %c0_i32_0 = arith.constant 0 : i32
    %c0_i32_1 = arith.constant 0 : i32
    return %arg0, %c0_i32, %c0_i32_0 : i32, i32, i32
  }
}

module attributes {stable_mosaic.version = 11 : i64} {
  func.func @_fused_kernel(%arg0: i32, %arg1: memref<2x256x64xbf16, #tpu.memory_space<vmem>>, %arg2: memref<32x256xbf16, #tpu.memory_space<vmem>>, %arg3: memref<32x1xf32, #tpu.memory_space<vmem>>, %arg4: memref<2x32x64xf32, #tpu.memory_space<vmem>>) attributes {dimension_semantics = [#tpu.dimension_semantics<parallel>], iteration_bounds = array<i64: 1>, scalar_prefetch = 0 : i64, scratch_operands = 0 : i64, tpu.core_type = #tpu.core_type<tc>, window_params = [{transform_indices = @transform_0, window_bounds = array<i64: 2, 256, 64>}, {pipeline_mode = #tpu.pipeline_mode<synchronous>, transform_indices = @transform_1, window_bounds = array<i64: 32, 256>}, {pipeline_mode = #tpu.pipeline_mode<synchronous>, transform_indices = @transform_2, window_bounds = array<i64: 32, 1>}, {transform_indices = @transform_3, window_bounds = array<i64: 2, 32, 64>}]} {
    %c0 = arith.constant 0 : index
    %c0_0 = arith.constant 0 : index
    %0 = vector.load %arg2[%c0, %c0_0] : memref<32x256xbf16, #tpu.memory_space<vmem>>, vector<32x256xbf16>
    %c0_1 = arith.constant 0 : index
    %c0_2 = arith.constant 0 : index
    %1 = vector.load %arg3[%c0_1, %c0_2] : memref<32x1xf32, #tpu.memory_space<vmem>>, vector<32x1xf32>
    %c0_3 = arith.constant 0 : index
    %c0_4 = arith.constant 0 : index
    %c0_5 = arith.constant 0 : index
    %2 = vector.load %arg1[%c0_3, %c0_4, %c0_5] : memref<2x256x64xbf16, #tpu.memory_space<vmem>>, vector<1x256x64xbf16>
    %3 = vector.shape_cast %2 : vector<1x256x64xbf16> to vector<256x64xbf16>
    %cst = arith.constant dense<0.000000e+00> : vector<32x64xf32>
    %4 = tpu.matmul %0, %3, %cst {dimension_numbers = #tpu.dot_dimension_numbers<[1], [0], [0], [1], [0, 0, 1, 1], [], []>} : vector<32x256xbf16>, vector<256x64xbf16>, vector<32x64xf32> -> vector<32x64xf32>
    %5 = vector.broadcast %1 : vector<32x1xf32> to vector<32x64xf32>
    %6 = arith.addf %4, %5 : vector<32x64xf32>
    %cst_6 = arith.constant dense<0.000000e+00> : vector<32xf32>
    %7 = vector.multi_reduction <add>, %6, %cst_6 [1] : vector<32x64xf32> to vector<32xf32>
    %8 = vector.shape_cast %7 : vector<32xf32> to vector<32x1xf32>
    %cst_7 = arith.constant 1.562500e-02 : f32
    %9 = vector.broadcast %cst_7 : f32 to vector<32x1xf32>
    %10 = arith.mulf %8, %9 : vector<32x1xf32>
    %11 = arith.mulf %6, %6 : vector<32x64xf32>
    %cst_8 = arith.constant dense<0.000000e+00> : vector<32xf32>
    %12 = vector.multi_reduction <add>, %11, %cst_8 [1] : vector<32x64xf32> to vector<32xf32>
    %13 = vector.shape_cast %12 : vector<32xf32> to vector<32x1xf32>
    %cst_9 = arith.constant 1.562500e-02 : f32
    %14 = vector.broadcast %cst_9 : f32 to vector<32x1xf32>
    %15 = arith.mulf %13, %14 : vector<32x1xf32>
    %16 = arith.mulf %10, %10 : vector<32x1xf32>
    %17 = arith.subf %15, %16 : vector<32x1xf32>
    %18 = vector.broadcast %10 : vector<32x1xf32> to vector<32x64xf32>
    %19 = arith.subf %6, %18 : vector<32x64xf32>
    %cst_10 = arith.constant 9.99999974E-6 : f32
    %20 = vector.broadcast %cst_10 : f32 to vector<32x1xf32>
    %21 = arith.addf %17, %20 : vector<32x1xf32>
    %22 = math.rsqrt %21 : vector<32x1xf32>
    %23 = vector.broadcast %22 : vector<32x1xf32> to vector<32x64xf32>
    %24 = arith.mulf %19, %23 : vector<32x64xf32>
    %cst_11 = arith.constant 0.000000e+00 : f32
    %25 = vector.broadcast %cst_11 : f32 to vector<32x64xf32>
    %26 = arith.cmpf ogt, %24, %25 : vector<32x64xf32>
    %cst_12 = arith.constant 2.000000e-01 : f32
    %27 = vector.broadcast %cst_12 : f32 to vector<32x64xf32>
    %28 = arith.mulf %27, %24 : vector<32x64xf32>
    %29 = arith.select %26, %24, %28 : vector<32x64xi1>, vector<32x64xf32>
    %c0_13 = arith.constant 0 : index
    %c0_14 = arith.constant 0 : index
    %c0_15 = arith.constant 0 : index
    %30 = vector.load %arg4[%c0_13, %c0_14, %c0_15] : memref<2x32x64xf32, #tpu.memory_space<vmem>>, vector<1x32x64xf32>
    %31 = vector.shape_cast %30 : vector<1x32x64xf32> to vector<32x64xf32>
    %32 = vector.shape_cast %29 : vector<32x64xf32> to vector<1x32x64xf32>
    tpu.vector_store %arg4[%c0_13, %c0_14, %c0_15], %32 {strides = array<i32>} : memref<2x32x64xf32, #tpu.memory_space<vmem>>, vector<1x32x64xf32>,
    %c1 = arith.constant 1 : index
    %c0_16 = arith.constant 0 : index
    %c0_17 = arith.constant 0 : index
    %33 = vector.load %arg1[%c1, %c0_16, %c0_17] : memref<2x256x64xbf16, #tpu.memory_space<vmem>>, vector<1x256x64xbf16>
    %34 = vector.shape_cast %33 : vector<1x256x64xbf16> to vector<256x64xbf16>
    %cst_18 = arith.constant dense<0.000000e+00> : vector<32x64xf32>
    %35 = tpu.matmul %0, %34, %cst_18 {dimension_numbers = #tpu.dot_dimension_numbers<[1], [0], [0], [1], [0, 0, 1, 1], [], []>} : vector<32x256xbf16>, vector<256x64xbf16>, vector<32x64xf32> -> vector<32x64xf32>
    %36 = vector.broadcast %1 : vector<32x1xf32> to vector<32x64xf32>
    %37 = arith.addf %35, %36 : vector<32x64xf32>
    %cst_19 = arith.constant dense<0.000000e+00> : vector<32xf32>
    %38 = vector.multi_reduction <add>, %37, %cst_19 [1] : vector<32x64xf32> to vector<32xf32>
    %39 = vector.shape_cast %38 : vector<32xf32> to vector<32x1xf32>
    %cst_20 = arith.constant 1.562500e-02 : f32
    %40 = vector.broadcast %cst_20 : f32 to vector<32x1xf32>
    %41 = arith.mulf %39, %40 : vector<32x1xf32>
    %42 = arith.mulf %37, %37 : vector<32x64xf32>
    %cst_21 = arith.constant dense<0.000000e+00> : vector<32xf32>
    %43 = vector.multi_reduction <add>, %42, %cst_21 [1] : vector<32x64xf32> to vector<32xf32>
    %44 = vector.shape_cast %43 : vector<32xf32> to vector<32x1xf32>
    %cst_22 = arith.constant 1.562500e-02 : f32
    %45 = vector.broadcast %cst_22 : f32 to vector<32x1xf32>
    %46 = arith.mulf %44, %45 : vector<32x1xf32>
    %47 = arith.mulf %41, %41 : vector<32x1xf32>
    %48 = arith.subf %46, %47 : vector<32x1xf32>
    %49 = vector.broadcast %41 : vector<32x1xf32> to vector<32x64xf32>
    %50 = arith.subf %37, %49 : vector<32x64xf32>
    %cst_23 = arith.constant 9.99999974E-6 : f32
    %51 = vector.broadcast %cst_23 : f32 to vector<32x1xf32>
    %52 = arith.addf %48, %51 : vector<32x1xf32>
    %53 = math.rsqrt %52 : vector<32x1xf32>
    %54 = vector.broadcast %53 : vector<32x1xf32> to vector<32x64xf32>
    %55 = arith.mulf %50, %54 : vector<32x64xf32>
    %cst_24 = arith.constant 0.000000e+00 : f32
    %56 = vector.broadcast %cst_24 : f32 to vector<32x64xf32>
    %57 = arith.cmpf ogt, %55, %56 : vector<32x64xf32>
    %cst_25 = arith.constant 2.000000e-01 : f32
    %58 = vector.broadcast %cst_25 : f32 to vector<32x64xf32>
    %59 = arith.mulf %58, %55 : vector<32x64xf32>
    %60 = arith.select %57, %55, %59 : vector<32x64xi1>, vector<32x64xf32>
    %c1_26 = arith.constant 1 : index
    %c0_27 = arith.constant 0 : index
    %c0_28 = arith.constant 0 : index
    %61 = vector.load %arg4[%c1_26, %c0_27, %c0_28] : memref<2x32x64xf32, #tpu.memory_space<vmem>>, vector<1x32x64xf32>
    %62 = vector.shape_cast %61 : vector<1x32x64xf32> to vector<32x64xf32>
    %63 = vector.shape_cast %60 : vector<32x64xf32> to vector<1x32x64xf32>
    tpu.vector_store %arg4[%c1_26, %c0_27, %c0_28], %63 {strides = array<i32>} : memref<2x32x64xf32, #tpu.memory_space<vmem>>, vector<1x32x64xf32>,
    return
  }
  func.func @transform_0(%arg0: i32) -> (i32, i32, i32) {
    %c0_i32 = arith.constant 0 : i32
    %c0_i32_0 = arith.constant 0 : i32
    %c0_i32_1 = arith.constant 0 : i32
    return %arg0, %c0_i32, %c0_i32_0 : i32, i32, i32
  }
  func.func @transform_1(%arg0: i32) -> (i32, i32) {
    %c0_i32 = arith.constant 0 : i32
    %c0_i32_0 = arith.constant 0 : i32
    %c0_i32_1 = arith.constant 0 : i32
    return %c0_i32, %c0_i32_0 : i32, i32
  }
  func.func @transform_2(%arg0: i32) -> (i32, i32) {
    %c0_i32 = arith.constant 0 : i32
    %c0_i32_0 = arith.constant 0 : i32
    %c0_i32_1 = arith.constant 0 : i32
    return %c0_i32, %c0_i32_0 : i32, i32
  }
  func.func @transform_3(%arg0: i32) -> (i32, i32, i32) {
    %c0_i32 = arith.constant 0 : i32
    %c0_i32_0 = arith.constant 0 : i32
    %c0_i32_1 = arith.constant 0 : i32
    return %arg0, %c0_i32, %c0_i32_0 : i32, i32, i32
  }
}

module attributes {stable_mosaic.version = 11 : i64} {
  func.func @_fused_kernel(%arg0: i32, %arg1: memref<2x512x16xbf16, #tpu.memory_space<vmem>>, %arg2: memref<64x512xbf16, #tpu.memory_space<vmem>>, %arg3: memref<64x1xf32, #tpu.memory_space<vmem>>, %arg4: memref<2x64x16xf32, #tpu.memory_space<vmem>>) attributes {dimension_semantics = [#tpu.dimension_semantics<parallel>], iteration_bounds = array<i64: 1>, scalar_prefetch = 0 : i64, scratch_operands = 0 : i64, tpu.core_type = #tpu.core_type<tc>, window_params = [{transform_indices = @transform_0, window_bounds = array<i64: 2, 512, 16>}, {pipeline_mode = #tpu.pipeline_mode<synchronous>, transform_indices = @transform_1, window_bounds = array<i64: 64, 512>}, {pipeline_mode = #tpu.pipeline_mode<synchronous>, transform_indices = @transform_2, window_bounds = array<i64: 64, 1>}, {transform_indices = @transform_3, window_bounds = array<i64: 2, 64, 16>}]} {
    %c0 = arith.constant 0 : index
    %c0_0 = arith.constant 0 : index
    %0 = vector.load %arg2[%c0, %c0_0] : memref<64x512xbf16, #tpu.memory_space<vmem>>, vector<64x512xbf16>
    %c0_1 = arith.constant 0 : index
    %c0_2 = arith.constant 0 : index
    %1 = vector.load %arg3[%c0_1, %c0_2] : memref<64x1xf32, #tpu.memory_space<vmem>>, vector<64x1xf32>
    %c0_3 = arith.constant 0 : index
    %c0_4 = arith.constant 0 : index
    %c0_5 = arith.constant 0 : index
    %2 = vector.load %arg1[%c0_3, %c0_4, %c0_5] : memref<2x512x16xbf16, #tpu.memory_space<vmem>>, vector<1x512x16xbf16>
    %3 = vector.shape_cast %2 : vector<1x512x16xbf16> to vector<512x16xbf16>
    %cst = arith.constant dense<0.000000e+00> : vector<64x16xf32>
    %4 = tpu.matmul %0, %3, %cst {dimension_numbers = #tpu.dot_dimension_numbers<[1], [0], [0], [1], [0, 0, 1, 1], [], []>} : vector<64x512xbf16>, vector<512x16xbf16>, vector<64x16xf32> -> vector<64x16xf32>
    %5 = vector.broadcast %1 : vector<64x1xf32> to vector<64x16xf32>
    %6 = arith.addf %4, %5 : vector<64x16xf32>
    %cst_6 = arith.constant dense<0.000000e+00> : vector<64xf32>
    %7 = vector.multi_reduction <add>, %6, %cst_6 [1] : vector<64x16xf32> to vector<64xf32>
    %8 = vector.shape_cast %7 : vector<64xf32> to vector<64x1xf32>
    %cst_7 = arith.constant 6.250000e-02 : f32
    %9 = vector.broadcast %cst_7 : f32 to vector<64x1xf32>
    %10 = arith.mulf %8, %9 : vector<64x1xf32>
    %11 = arith.mulf %6, %6 : vector<64x16xf32>
    %cst_8 = arith.constant dense<0.000000e+00> : vector<64xf32>
    %12 = vector.multi_reduction <add>, %11, %cst_8 [1] : vector<64x16xf32> to vector<64xf32>
    %13 = vector.shape_cast %12 : vector<64xf32> to vector<64x1xf32>
    %cst_9 = arith.constant 6.250000e-02 : f32
    %14 = vector.broadcast %cst_9 : f32 to vector<64x1xf32>
    %15 = arith.mulf %13, %14 : vector<64x1xf32>
    %16 = arith.mulf %10, %10 : vector<64x1xf32>
    %17 = arith.subf %15, %16 : vector<64x1xf32>
    %18 = vector.broadcast %10 : vector<64x1xf32> to vector<64x16xf32>
    %19 = arith.subf %6, %18 : vector<64x16xf32>
    %cst_10 = arith.constant 9.99999974E-6 : f32
    %20 = vector.broadcast %cst_10 : f32 to vector<64x1xf32>
    %21 = arith.addf %17, %20 : vector<64x1xf32>
    %22 = math.rsqrt %21 : vector<64x1xf32>
    %23 = vector.broadcast %22 : vector<64x1xf32> to vector<64x16xf32>
    %24 = arith.mulf %19, %23 : vector<64x16xf32>
    %cst_11 = arith.constant 0.000000e+00 : f32
    %25 = vector.broadcast %cst_11 : f32 to vector<64x16xf32>
    %26 = arith.cmpf ogt, %24, %25 : vector<64x16xf32>
    %cst_12 = arith.constant 2.000000e-01 : f32
    %27 = vector.broadcast %cst_12 : f32 to vector<64x16xf32>
    %28 = arith.mulf %27, %24 : vector<64x16xf32>
    %29 = arith.select %26, %24, %28 : vector<64x16xi1>, vector<64x16xf32>
    %c0_13 = arith.constant 0 : index
    %c0_14 = arith.constant 0 : index
    %c0_15 = arith.constant 0 : index
    %30 = vector.load %arg4[%c0_13, %c0_14, %c0_15] : memref<2x64x16xf32, #tpu.memory_space<vmem>>, vector<1x64x16xf32>
    %31 = vector.shape_cast %30 : vector<1x64x16xf32> to vector<64x16xf32>
    %32 = vector.shape_cast %29 : vector<64x16xf32> to vector<1x64x16xf32>
    tpu.vector_store %arg4[%c0_13, %c0_14, %c0_15], %32 {strides = array<i32>} : memref<2x64x16xf32, #tpu.memory_space<vmem>>, vector<1x64x16xf32>,
    %c1 = arith.constant 1 : index
    %c0_16 = arith.constant 0 : index
    %c0_17 = arith.constant 0 : index
    %33 = vector.load %arg1[%c1, %c0_16, %c0_17] : memref<2x512x16xbf16, #tpu.memory_space<vmem>>, vector<1x512x16xbf16>
    %34 = vector.shape_cast %33 : vector<1x512x16xbf16> to vector<512x16xbf16>
    %cst_18 = arith.constant dense<0.000000e+00> : vector<64x16xf32>
    %35 = tpu.matmul %0, %34, %cst_18 {dimension_numbers = #tpu.dot_dimension_numbers<[1], [0], [0], [1], [0, 0, 1, 1], [], []>} : vector<64x512xbf16>, vector<512x16xbf16>, vector<64x16xf32> -> vector<64x16xf32>
    %36 = vector.broadcast %1 : vector<64x1xf32> to vector<64x16xf32>
    %37 = arith.addf %35, %36 : vector<64x16xf32>
    %cst_19 = arith.constant dense<0.000000e+00> : vector<64xf32>
    %38 = vector.multi_reduction <add>, %37, %cst_19 [1] : vector<64x16xf32> to vector<64xf32>
    %39 = vector.shape_cast %38 : vector<64xf32> to vector<64x1xf32>
    %cst_20 = arith.constant 6.250000e-02 : f32
    %40 = vector.broadcast %cst_20 : f32 to vector<64x1xf32>
    %41 = arith.mulf %39, %40 : vector<64x1xf32>
    %42 = arith.mulf %37, %37 : vector<64x16xf32>
    %cst_21 = arith.constant dense<0.000000e+00> : vector<64xf32>
    %43 = vector.multi_reduction <add>, %42, %cst_21 [1] : vector<64x16xf32> to vector<64xf32>
    %44 = vector.shape_cast %43 : vector<64xf32> to vector<64x1xf32>
    %cst_22 = arith.constant 6.250000e-02 : f32
    %45 = vector.broadcast %cst_22 : f32 to vector<64x1xf32>
    %46 = arith.mulf %44, %45 : vector<64x1xf32>
    %47 = arith.mulf %41, %41 : vector<64x1xf32>
    %48 = arith.subf %46, %47 : vector<64x1xf32>
    %49 = vector.broadcast %41 : vector<64x1xf32> to vector<64x16xf32>
    %50 = arith.subf %37, %49 : vector<64x16xf32>
    %cst_23 = arith.constant 9.99999974E-6 : f32
    %51 = vector.broadcast %cst_23 : f32 to vector<64x1xf32>
    %52 = arith.addf %48, %51 : vector<64x1xf32>
    %53 = math.rsqrt %52 : vector<64x1xf32>
    %54 = vector.broadcast %53 : vector<64x1xf32> to vector<64x16xf32>
    %55 = arith.mulf %50, %54 : vector<64x16xf32>
    %cst_24 = arith.constant 0.000000e+00 : f32
    %56 = vector.broadcast %cst_24 : f32 to vector<64x16xf32>
    %57 = arith.cmpf ogt, %55, %56 : vector<64x16xf32>
    %cst_25 = arith.constant 2.000000e-01 : f32
    %58 = vector.broadcast %cst_25 : f32 to vector<64x16xf32>
    %59 = arith.mulf %58, %55 : vector<64x16xf32>
    %60 = arith.select %57, %55, %59 : vector<64x16xi1>, vector<64x16xf32>
    %c1_26 = arith.constant 1 : index
    %c0_27 = arith.constant 0 : index
    %c0_28 = arith.constant 0 : index
    %61 = vector.load %arg4[%c1_26, %c0_27, %c0_28] : memref<2x64x16xf32, #tpu.memory_space<vmem>>, vector<1x64x16xf32>
    %62 = vector.shape_cast %61 : vector<1x64x16xf32> to vector<64x16xf32>
    %63 = vector.shape_cast %60 : vector<64x16xf32> to vector<1x64x16xf32>
    tpu.vector_store %arg4[%c1_26, %c0_27, %c0_28], %63 {strides = array<i32>} : memref<2x64x16xf32, #tpu.memory_space<vmem>>, vector<1x64x16xf32>,
    return
  }
  func.func @transform_0(%arg0: i32) -> (i32, i32, i32) {
    %c0_i32 = arith.constant 0 : i32
    %c0_i32_0 = arith.constant 0 : i32
    %c0_i32_1 = arith.constant 0 : i32
    return %arg0, %c0_i32, %c0_i32_0 : i32, i32, i32
  }
  func.func @transform_1(%arg0: i32) -> (i32, i32) {
    %c0_i32 = arith.constant 0 : i32
    %c0_i32_0 = arith.constant 0 : i32
    %c0_i32_1 = arith.constant 0 : i32
    return %c0_i32, %c0_i32_0 : i32, i32
  }
  func.func @transform_2(%arg0: i32) -> (i32, i32) {
    %c0_i32 = arith.constant 0 : i32
    %c0_i32_0 = arith.constant 0 : i32
    %c0_i32_1 = arith.constant 0 : i32
    return %c0_i32, %c0_i32_0 : i32, i32
  }
  func.func @transform_3(%arg0: i32) -> (i32, i32, i32) {
    %c0_i32 = arith.constant 0 : i32
    %c0_i32_0 = arith.constant 0 : i32
    %c0_i32_1 = arith.constant 0 : i32
    return %arg0, %c0_i32, %c0_i32_0 : i32, i32, i32
  }
}

module attributes {stable_mosaic.version = 11 : i64} {
  func.func @_fused_kernel(%arg0: i32, %arg1: memref<2x1024x9xbf16, #tpu.memory_space<vmem>>, %arg2: memref<128x1024xbf16, #tpu.memory_space<vmem>>, %arg3: memref<128x1xf32, #tpu.memory_space<vmem>>, %arg4: memref<2x128x9xf32, #tpu.memory_space<vmem>>) attributes {dimension_semantics = [#tpu.dimension_semantics<parallel>], iteration_bounds = array<i64: 1>, scalar_prefetch = 0 : i64, scratch_operands = 0 : i64, tpu.core_type = #tpu.core_type<tc>, window_params = [{transform_indices = @transform_0, window_bounds = array<i64: 2, 1024, 9>}, {pipeline_mode = #tpu.pipeline_mode<synchronous>, transform_indices = @transform_1, window_bounds = array<i64: 128, 1024>}, {pipeline_mode = #tpu.pipeline_mode<synchronous>, transform_indices = @transform_2, window_bounds = array<i64: 128, 1>}, {transform_indices = @transform_3, window_bounds = array<i64: 2, 128, 9>}]} {
    %c0 = arith.constant 0 : index
    %c0_0 = arith.constant 0 : index
    %0 = vector.load %arg2[%c0, %c0_0] : memref<128x1024xbf16, #tpu.memory_space<vmem>>, vector<128x1024xbf16>
    %c0_1 = arith.constant 0 : index
    %c0_2 = arith.constant 0 : index
    %1 = vector.load %arg3[%c0_1, %c0_2] : memref<128x1xf32, #tpu.memory_space<vmem>>, vector<128x1xf32>
    %c0_3 = arith.constant 0 : index
    %c0_4 = arith.constant 0 : index
    %c0_5 = arith.constant 0 : index
    %2 = vector.load %arg1[%c0_3, %c0_4, %c0_5] : memref<2x1024x9xbf16, #tpu.memory_space<vmem>>, vector<1x1024x9xbf16>
    %3 = vector.shape_cast %2 : vector<1x1024x9xbf16> to vector<1024x9xbf16>
    %cst = arith.constant dense<0.000000e+00> : vector<128x9xf32>
    %4 = tpu.matmul %0, %3, %cst {dimension_numbers = #tpu.dot_dimension_numbers<[1], [0], [0], [1], [0, 0, 1, 1], [], []>} : vector<128x1024xbf16>, vector<1024x9xbf16>, vector<128x9xf32> -> vector<128x9xf32>
    %5 = vector.broadcast %1 : vector<128x1xf32> to vector<128x9xf32>
    %6 = arith.addf %4, %5 : vector<128x9xf32>
    %cst_6 = arith.constant dense<0.000000e+00> : vector<128xf32>
    %7 = vector.multi_reduction <add>, %6, %cst_6 [1] : vector<128x9xf32> to vector<128xf32>
    %8 = vector.shape_cast %7 : vector<128xf32> to vector<128x1xf32>
    %cst_7 = arith.constant 0.111111112 : f32
    %9 = vector.broadcast %cst_7 : f32 to vector<128x1xf32>
    %10 = arith.mulf %8, %9 : vector<128x1xf32>
    %11 = arith.mulf %6, %6 : vector<128x9xf32>
    %cst_8 = arith.constant dense<0.000000e+00> : vector<128xf32>
    %12 = vector.multi_reduction <add>, %11, %cst_8 [1] : vector<128x9xf32> to vector<128xf32>
    %13 = vector.shape_cast %12 : vector<128xf32> to vector<128x1xf32>
    %cst_9 = arith.constant 0.111111112 : f32
    %14 = vector.broadcast %cst_9 : f32 to vector<128x1xf32>
    %15 = arith.mulf %13, %14 : vector<128x1xf32>
    %16 = arith.mulf %10, %10 : vector<128x1xf32>
    %17 = arith.subf %15, %16 : vector<128x1xf32>
    %18 = vector.broadcast %10 : vector<128x1xf32> to vector<128x9xf32>
    %19 = arith.subf %6, %18 : vector<128x9xf32>
    %cst_10 = arith.constant 9.99999974E-6 : f32
    %20 = vector.broadcast %cst_10 : f32 to vector<128x1xf32>
    %21 = arith.addf %17, %20 : vector<128x1xf32>
    %22 = math.rsqrt %21 : vector<128x1xf32>
    %23 = vector.broadcast %22 : vector<128x1xf32> to vector<128x9xf32>
    %24 = arith.mulf %19, %23 : vector<128x9xf32>
    %cst_11 = arith.constant 0.000000e+00 : f32
    %25 = vector.broadcast %cst_11 : f32 to vector<128x9xf32>
    %26 = arith.cmpf ogt, %24, %25 : vector<128x9xf32>
    %cst_12 = arith.constant 2.000000e-01 : f32
    %27 = vector.broadcast %cst_12 : f32 to vector<128x9xf32>
    %28 = arith.mulf %27, %24 : vector<128x9xf32>
    %29 = arith.select %26, %24, %28 : vector<128x9xi1>, vector<128x9xf32>
    %c0_13 = arith.constant 0 : index
    %c0_14 = arith.constant 0 : index
    %c0_15 = arith.constant 0 : index
    %30 = vector.load %arg4[%c0_13, %c0_14, %c0_15] : memref<2x128x9xf32, #tpu.memory_space<vmem>>, vector<1x128x9xf32>
    %31 = vector.shape_cast %30 : vector<1x128x9xf32> to vector<128x9xf32>
    %32 = vector.shape_cast %29 : vector<128x9xf32> to vector<1x128x9xf32>
    tpu.vector_store %arg4[%c0_13, %c0_14, %c0_15], %32 {strides = array<i32>} : memref<2x128x9xf32, #tpu.memory_space<vmem>>, vector<1x128x9xf32>,
    %c1 = arith.constant 1 : index
    %c0_16 = arith.constant 0 : index
    %c0_17 = arith.constant 0 : index
    %33 = vector.load %arg1[%c1, %c0_16, %c0_17] : memref<2x1024x9xbf16, #tpu.memory_space<vmem>>, vector<1x1024x9xbf16>
    %34 = vector.shape_cast %33 : vector<1x1024x9xbf16> to vector<1024x9xbf16>
    %cst_18 = arith.constant dense<0.000000e+00> : vector<128x9xf32>
    %35 = tpu.matmul %0, %34, %cst_18 {dimension_numbers = #tpu.dot_dimension_numbers<[1], [0], [0], [1], [0, 0, 1, 1], [], []>} : vector<128x1024xbf16>, vector<1024x9xbf16>, vector<128x9xf32> -> vector<128x9xf32>
    %36 = vector.broadcast %1 : vector<128x1xf32> to vector<128x9xf32>
    %37 = arith.addf %35, %36 : vector<128x9xf32>
    %cst_19 = arith.constant dense<0.000000e+00> : vector<128xf32>
    %38 = vector.multi_reduction <add>, %37, %cst_19 [1] : vector<128x9xf32> to vector<128xf32>
    %39 = vector.shape_cast %38 : vector<128xf32> to vector<128x1xf32>
    %cst_20 = arith.constant 0.111111112 : f32
    %40 = vector.broadcast %cst_20 : f32 to vector<128x1xf32>
    %41 = arith.mulf %39, %40 : vector<128x1xf32>
    %42 = arith.mulf %37, %37 : vector<128x9xf32>
    %cst_21 = arith.constant dense<0.000000e+00> : vector<128xf32>
    %43 = vector.multi_reduction <add>, %42, %cst_21 [1] : vector<128x9xf32> to vector<128xf32>
    %44 = vector.shape_cast %43 : vector<128xf32> to vector<128x1xf32>
    %cst_22 = arith.constant 0.111111112 : f32
    %45 = vector.broadcast %cst_22 : f32 to vector<128x1xf32>
    %46 = arith.mulf %44, %45 : vector<128x1xf32>
    %47 = arith.mulf %41, %41 : vector<128x1xf32>
    %48 = arith.subf %46, %47 : vector<128x1xf32>
    %49 = vector.broadcast %41 : vector<128x1xf32> to vector<128x9xf32>
    %50 = arith.subf %37, %49 : vector<128x9xf32>
    %cst_23 = arith.constant 9.99999974E-6 : f32
    %51 = vector.broadcast %cst_23 : f32 to vector<128x1xf32>
    %52 = arith.addf %48, %51 : vector<128x1xf32>
    %53 = math.rsqrt %52 : vector<128x1xf32>
    %54 = vector.broadcast %53 : vector<128x1xf32> to vector<128x9xf32>
    %55 = arith.mulf %50, %54 : vector<128x9xf32>
    %cst_24 = arith.constant 0.000000e+00 : f32
    %56 = vector.broadcast %cst_24 : f32 to vector<128x9xf32>
    %57 = arith.cmpf ogt, %55, %56 : vector<128x9xf32>
    %cst_25 = arith.constant 2.000000e-01 : f32
    %58 = vector.broadcast %cst_25 : f32 to vector<128x9xf32>
    %59 = arith.mulf %58, %55 : vector<128x9xf32>
    %60 = arith.select %57, %55, %59 : vector<128x9xi1>, vector<128x9xf32>
    %c1_26 = arith.constant 1 : index
    %c0_27 = arith.constant 0 : index
    %c0_28 = arith.constant 0 : index
    %61 = vector.load %arg4[%c1_26, %c0_27, %c0_28] : memref<2x128x9xf32, #tpu.memory_space<vmem>>, vector<1x128x9xf32>
    %62 = vector.shape_cast %61 : vector<1x128x9xf32> to vector<128x9xf32>
    %63 = vector.shape_cast %60 : vector<128x9xf32> to vector<1x128x9xf32>
    tpu.vector_store %arg4[%c1_26, %c0_27, %c0_28], %63 {strides = array<i32>} : memref<2x128x9xf32, #tpu.memory_space<vmem>>, vector<1x128x9xf32>,
    return
  }
  func.func @transform_0(%arg0: i32) -> (i32, i32, i32) {
    %c0_i32 = arith.constant 0 : i32
    %c0_i32_0 = arith.constant 0 : i32
    %c0_i32_1 = arith.constant 0 : i32
    return %arg0, %c0_i32, %c0_i32_0 : i32, i32, i32
  }
  func.func @transform_1(%arg0: i32) -> (i32, i32) {
    %c0_i32 = arith.constant 0 : i32
    %c0_i32_0 = arith.constant 0 : i32
    %c0_i32_1 = arith.constant 0 : i32
    return %c0_i32, %c0_i32_0 : i32, i32
  }
  func.func @transform_2(%arg0: i32) -> (i32, i32) {
    %c0_i32 = arith.constant 0 : i32
    %c0_i32_0 = arith.constant 0 : i32
    %c0_i32_1 = arith.constant 0 : i32
    return %c0_i32, %c0_i32_0 : i32, i32
  }
  func.func @transform_3(%arg0: i32) -> (i32, i32, i32) {
    %c0_i32 = arith.constant 0 : i32
    %c0_i32_0 = arith.constant 0 : i32
    %c0_i32_1 = arith.constant 0 : i32
    return %arg0, %c0_i32, %c0_i32_0 : i32, i32, i32
  }
}

module attributes {stable_mosaic.version = 11 : i64} {
  func.func @_fused_kernel(%arg0: i32, %arg1: memref<2x2048x4xbf16, #tpu.memory_space<vmem>>, %arg2: memref<1x2048xbf16, #tpu.memory_space<vmem>>, %arg3: memref<1x1xf32, #tpu.memory_space<vmem>>, %arg4: memref<2x1x4xf32, #tpu.memory_space<vmem>>) attributes {dimension_semantics = [#tpu.dimension_semantics<parallel>], iteration_bounds = array<i64: 1>, scalar_prefetch = 0 : i64, scratch_operands = 0 : i64, tpu.core_type = #tpu.core_type<tc>, window_params = [{transform_indices = @transform_0, window_bounds = array<i64: 2, 2048, 4>}, {pipeline_mode = #tpu.pipeline_mode<synchronous>, transform_indices = @transform_1, window_bounds = array<i64: 1, 2048>}, {pipeline_mode = #tpu.pipeline_mode<synchronous>, transform_indices = @transform_2, window_bounds = array<i64: 1, 1>}, {transform_indices = @transform_3, window_bounds = array<i64: 2, 1, 4>}]} {
    %c0 = arith.constant 0 : index
    %c0_0 = arith.constant 0 : index
    %0 = vector.load %arg2[%c0, %c0_0] : memref<1x2048xbf16, #tpu.memory_space<vmem>>, vector<1x2048xbf16>
    %c0_1 = arith.constant 0 : index
    %c0_2 = arith.constant 0 : index
    %1 = vector.load %arg3[%c0_1, %c0_2] : memref<1x1xf32, #tpu.memory_space<vmem>>, vector<1x1xf32>
    %c0_3 = arith.constant 0 : index
    %c0_4 = arith.constant 0 : index
    %c0_5 = arith.constant 0 : index
    %2 = vector.load %arg1[%c0_3, %c0_4, %c0_5] : memref<2x2048x4xbf16, #tpu.memory_space<vmem>>, vector<1x2048x4xbf16>
    %3 = vector.shape_cast %2 : vector<1x2048x4xbf16> to vector<2048x4xbf16>
    %cst = arith.constant dense<0.000000e+00> : vector<1x4xf32>
    %4 = tpu.matmul %0, %3, %cst {dimension_numbers = #tpu.dot_dimension_numbers<[1], [0], [0], [1], [0, 0, 1, 1], [], []>} : vector<1x2048xbf16>, vector<2048x4xbf16>, vector<1x4xf32> -> vector<1x4xf32>
    %5 = vector.broadcast %1 : vector<1x1xf32> to vector<1x4xf32>
    %6 = arith.addf %4, %5 : vector<1x4xf32>
    %c0_6 = arith.constant 0 : index
    %c0_7 = arith.constant 0 : index
    %c0_8 = arith.constant 0 : index
    %7 = vector.load %arg4[%c0_6, %c0_7, %c0_8] : memref<2x1x4xf32, #tpu.memory_space<vmem>>, vector<1x1x4xf32>
    %8 = vector.shape_cast %7 : vector<1x1x4xf32> to vector<1x4xf32>
    %9 = vector.shape_cast %6 : vector<1x4xf32> to vector<1x1x4xf32>
    tpu.vector_store %arg4[%c0_6, %c0_7, %c0_8], %9 {strides = array<i32>} : memref<2x1x4xf32, #tpu.memory_space<vmem>>, vector<1x1x4xf32>,
    %c1 = arith.constant 1 : index
    %c0_9 = arith.constant 0 : index
    %c0_10 = arith.constant 0 : index
    %10 = vector.load %arg1[%c1, %c0_9, %c0_10] : memref<2x2048x4xbf16, #tpu.memory_space<vmem>>, vector<1x2048x4xbf16>
    %11 = vector.shape_cast %10 : vector<1x2048x4xbf16> to vector<2048x4xbf16>
    %cst_11 = arith.constant dense<0.000000e+00> : vector<1x4xf32>
    %12 = tpu.matmul %0, %11, %cst_11 {dimension_numbers = #tpu.dot_dimension_numbers<[1], [0], [0], [1], [0, 0, 1, 1], [], []>} : vector<1x2048xbf16>, vector<2048x4xbf16>, vector<1x4xf32> -> vector<1x4xf32>
    %13 = vector.broadcast %1 : vector<1x1xf32> to vector<1x4xf32>
    %14 = arith.addf %12, %13 : vector<1x4xf32>
    %c1_12 = arith.constant 1 : index
    %c0_13 = arith.constant 0 : index
    %c0_14 = arith.constant 0 : index
    %15 = vector.load %arg4[%c1_12, %c0_13, %c0_14] : memref<2x1x4xf32, #tpu.memory_space<vmem>>, vector<1x1x4xf32>
    %16 = vector.shape_cast %15 : vector<1x1x4xf32> to vector<1x4xf32>
    %17 = vector.shape_cast %14 : vector<1x4xf32> to vector<1x1x4xf32>
    tpu.vector_store %arg4[%c1_12, %c0_13, %c0_14], %17 {strides = array<i32>} : memref<2x1x4xf32, #tpu.memory_space<vmem>>, vector<1x1x4xf32>,
    return
  }
  func.func @transform_0(%arg0: i32) -> (i32, i32, i32) {
    %c0_i32 = arith.constant 0 : i32
    %c0_i32_0 = arith.constant 0 : i32
    %c0_i32_1 = arith.constant 0 : i32
    return %arg0, %c0_i32, %c0_i32_0 : i32, i32, i32
  }
  func.func @transform_1(%arg0: i32) -> (i32, i32) {
    %c0_i32 = arith.constant 0 : i32
    %c0_i32_0 = arith.constant 0 : i32
    %c0_i32_1 = arith.constant 0 : i32
    return %c0_i32, %c0_i32_0 : i32, i32
  }
  func.func @transform_2(%arg0: i32) -> (i32, i32) {
    %c0_i32 = arith.constant 0 : i32
    %c0_i32_0 = arith.constant 0 : i32
    %c0_i32_1 = arith.constant 0 : i32
    return %c0_i32, %c0_i32_0 : i32, i32
  }
  func.func @transform_3(%arg0: i32) -> (i32, i32, i32) {
    %c0_i32 = arith.constant 0 : i32
    %c0_i32_0 = arith.constant 0 : i32
    %c0_i32_1 = arith.constant 0 : i32
    return %arg0, %c0_i32, %c0_i32_0 : i32, i32, i32
  }
}

</mosaic_0001>

<bundles_post_ra>
// kernel: discriminator_forward.5
= control target key start
LH: loop header
LB: loop body
LE: loop exit
PB: predicated region body
PF: predicated region fallthrough
CT: control target
= control target key end

     0   :  { %v285_v3 = vmov 0   ;;  %vm70_vm0 = vcmask 392192   ;;  %s411_s0 = inlined_call_operand.vmem [shape: bf16[2,48,256], index: 0, kind: input, shape index: {}]   ;;  %s412_s2 = inlined_call_operand.vmem [shape: f32[16,1], index: 2, kind: input, shape index: {}]   ;;  %s413_s1 = inlined_call_operand.vmem [shape: bf16[16,48], index: 1, kind: input, shape index: {}]   ;;  %s414_s3 = inlined_call_operand.vmem [shape: f32[2,16,256], index: 3, kind: output, shape index: {}]  }
   0x1   :  { %v226_v0 = vld [vmem:[%s411_s0 + $0x20] sm:$0xf]  ;;  %v276_v1 = vld [vmem:[%s411_s0 + $0x24] sm:$0xf0]  ;;  %v275_v2 = vld [vmem:[%s411_s0 + $0x24] sm:$0xf]  ;;  %284 = vset.pattern.permute.xlu0 %v285_v3 }
   0x2   :  { %v227_v4 = vor.u32 %v276_v1, %v226_v0  ;;  %v228_v5 = vld [vmem:[%s411_s0 + $0x28] sm:$0xf0]  ;;  %v258_v6 = vld [vmem:[%s411_s0 + $0x50] sm:$0xf]  ;;  %v282_v7 = vld [vmem:[%s411_s0 + $0x54] sm:$0xf0] }
   0x3   :  { %v231_v8 = vor.u32 %v275_v2, %v228_v5  ;;  %v259_v9 = vor.u32 %v282_v7, %v258_v6  ;;  %v281_v10 = vld [vmem:[%s411_s0 + $0x54] sm:$0xf]  ;;  %v260_v11 = vld [vmem:[%s411_s0 + $0x58] sm:$0xf0]  ;;  %v218_v12 = vld [vmem:[%s411_s0 + $0x10] sm:$0xf] }
   0x4   :  { %79 = vmatpush.bf16.msra.mxu0 %v227_v4  ;;  %v263_v13 = vor.u32 %v281_v10, %v260_v11  ;;  %v274_v14 = vld [vmem:[%s411_s0 + $0x14] sm:$0xf0]  ;;  %v273_v15 = vld [vmem:[%s411_s0 + $0x14] sm:$0xf]  ;;  %v220_v16 = vld [vmem:[%s411_s0 + $0x18] sm:$0xf0] }
   0x5   :  { %93 = vmatpush.bf16.msra.mxu1 %v231_v8  ;;  %160 = vmatpush.bf16.msra.mxu2 %v259_v9  ;;  %v219_v17 = vor.u32 %v274_v14, %v218_v12  ;;  %v223_v18 = vor.u32 %v273_v15, %v220_v16  ;;  %v250_v19 = vld [vmem:[%s411_s0 + $0x40] sm:$0xf]  ;;  %v280_v20 = vld [vmem:[%s411_s0 + $0x44] sm:$0xf0]  ;;  %v279_v21 = vld [vmem:[%s411_s0 + $0x44] sm:$0xf] }
   0x6   :  { %174 = vmatpush.bf16.msra.mxu3 %v263_v13  ;;  %v251_v22 = vor.u32 %v280_v20, %v250_v19  ;;  %v252_v23 = vld [vmem:[%s411_s0 + $0x48] sm:$0xf0]  ;;  %v210_v24 = vld [vmem:[%s411_s0] sm:$0xf]  ;;  %v272_v25 = vld [vmem:[%s411_s0 + $0x4] sm:$0xf0] }
   0x7   :  { %v255_v26 = vor.u32 %v279_v21, %v252_v23  ;;  %v271_v27 = vld [vmem:[%s411_s0 + $0x4] sm:$0xf]  ;;  %v212_v28 = vld [vmem:[%s411_s0 + $0x8] sm:$0xf0]  ;;  %v242_v29 = vld [vmem:[%s411_s0 + $0x30] sm:$0xf]  ;;  %v211_v30 = vor.u32 %v272_v25, %v210_v24 }
   0x8   :  { %80 = vmatpush.bf16.msra.mxu0 %v219_v17  ;;  %v278_v31 = vld [vmem:[%s411_s0 + $0x34] sm:$0xf0]  ;;  %v277_v32 = vld [vmem:[%s411_s0 + $0x34] sm:$0xf]  ;;  %v244_v33 = vld [vmem:[%s411_s0 + $0x38] sm:$0xf0]  ;;  %v215_v34 = vor.u32 %v271_v27, %v212_v28 }
   0x9   :  { %94 = vmatpush.bf16.msra.mxu1 %v223_v18  ;;  %161 = vmatpush.bf16.msra.mxu2 %v251_v22  ;;  %v243_v35 = vor.u32 %v278_v31, %v242_v29  ;;  %v17_v36 = vld [vmem:[%s412_s2] sm:$0xff]  ;;  %v247_v37 = vor.u32 %v277_v32, %v244_v33  ;;  %v18_v39 = vld [vmem:[%s412_s2 + $0x8] sm:$0xff] }
   0xa   :  { %175 = vmatpush.bf16.msra.mxu3 %v255_v26  ;;  %27 = vperm.xlu0 %284, %v17_v36   ;;  %v270_v38 = vld [vmem:[%s413_s1] sm:$0xff] }
   0xc   :  { %81 = vmatpush.bf16.msra.mxu0 %v211_v30 }
   0xd   :  { %95 = vmatpush.bf16.msra.mxu1 %v215_v34  ;;  %162 = vmatpush.bf16.msra.mxu2 %v243_v35 }
   0xe   :  { %176 = vmatpush.bf16.msra.mxu3 %v247_v37 }
   0xf   :  { %232 = vmatmul.msk.bf16.vlgmr.msra.gmra.mxu0 %vm70_vm0, %v270_v38 }
  0x10   :  { %233 = vmatmul.msk.bf16.vlgmr.msra.gmra.mxu1 %vm70_vm0, %v270_v38  ;;  %264 = vmatmul.msk.bf16.vlgmr.msra.gmra.mxu2 %vm70_vm0, %v270_v38 }
  0x11   :  { %265 = vmatmul.msk.bf16.vlgmr.msra.gmra.mxu3 %vm70_vm0, %v270_v38 }
  0x12   :  { %32 = vperm.xlu0 %284, %v18_v39  }
  0x7c   :  { %v28_v40 = vpop.permute.xlu0 %27 }
  0x84   :  { %v33_v49 = vpop.permute.xlu0 %32 }
  0x8c   :  { %v83_v41 = vpop.f32.mrf.mxu0 }
  0x8d   :  { %v84_v42 = vadd.f32 %v83_v41, %v28_v40  ;;  %v97_v43 = vpop.f32.mrf.mxu1 }
  0x8e   :  { %v98_v44 = vadd.f32 %v97_v43, %v28_v40 }
  0x8f   :  { %vm102_vm1 = vcmp.gt.f32.partialorder %v84_v42, 0.0  ;;  %v106_v45 = vmul.f32 0.2, %v84_v42 }
  0x90   :  { %vm103_vm2 = vcmp.gt.f32.partialorder %v98_v44, 0.0  ;;  %v107_v46 = vmul.f32 0.2, %v98_v44 }
  0x91   :  { %v110_v47 = vsel %vm102_vm1, %v84_v42, %v106_v45 }
  0x92   :  { %114 = vst [vmem:[%s414_s3] sm:$0xff] %v110_v47  ;;  %v111_v48 = vsel %vm103_vm2, %v98_v44, %v107_v46 }
  0x93   :  { %115 = vst [vmem:[%s414_s3 + $0x8] sm:$0xff] %v111_v48  ;;  %v164_v50 = vpop.f32.mrf.mxu2 }
  0x94   :  { %v165_v51 = vadd.f32 %v164_v50, %v28_v40  ;;  %v178_v52 = vpop.f32.mrf.mxu3  ;;  %v85_v53 = vpop.f32.mrf.mxu0 }
  0x95   :  { %v179_v54 = vadd.f32 %v178_v52, %v28_v40  ;;  %v86_v55 = vadd.f32 %v85_v53, %v33_v49  ;;  %v99_v56 = vpop.f32.mrf.mxu1 }
  0x96   :  { %vm183_vm3 = vcmp.gt.f32.partialorder %v165_v51, 0.0  ;;  %v187_v57 = vmul.f32 0.2, %v165_v51  ;;  %v100_v58 = vadd.f32 %v99_v56, %v33_v49 }
  0x97   :  { %vm184_vm4 = vcmp.gt.f32.partialorder %v179_v54, 0.0  ;;  %v188_v59 = vmul.f32 0.2, %v179_v54  ;;  %vm104_vm5 = vcmp.gt.f32.partialorder %v86_v55, 0.0  ;;  %v108_v60 = vmul.f32 0.2, %v86_v55 }
  0x98   :  { %v191_v61 = vsel %vm183_vm3, %v165_v51, %v187_v57  ;;  %vm105_vm6 = vcmp.gt.f32.partialorder %v100_v58, 0.0  ;;  %v109_v62 = vmul.f32 0.2, %v100_v58 }
  0x99   :  { %266 = vst [vmem:[%s414_s3 + $0x20] sm:$0xff] %v191_v61  ;;  %v192_v63 = vsel %vm184_vm4, %v179_v54, %v188_v59  ;;  %v112_v0 = vsel %vm104_vm5, %v86_v55, %v108_v60 }
  0x9a   :  { %267 = vst [vmem:[%s414_s3 + $0x28] sm:$0xff] %v192_v63  ;;  %v113_v1 = vsel %vm105_vm6, %v100_v58, %v109_v62 }
  0x9b   :  { %116 = vst [vmem:[%s414_s3 + $0x10] sm:$0xff] %v112_v0  ;;  %v166_v2 = vpop.f32.mrf.mxu2 }
  0x9c   :  { %117 = vst [vmem:[%s414_s3 + $0x18] sm:$0xff] %v113_v1  ;;  %v167_v3 = vadd.f32 %v166_v2, %v33_v49  ;;  %v180_v4 = vpop.f32.mrf.mxu3 }
  0x9d   :  { %v181_v5 = vadd.f32 %v180_v4, %v33_v49 }
  0x9e   :  { %vm185_vm7 = vcmp.gt.f32.partialorder %v167_v3, 0.0  ;;  %v189_v6 = vmul.f32 0.2, %v167_v3 }
  0x9f   :  { %vm186_vm8 = vcmp.gt.f32.partialorder %v181_v5, 0.0  ;;  %v190_v7 = vmul.f32 0.2, %v181_v5 }
  0xa0   :  { %v193_v8 = vsel %vm185_vm7, %v167_v3, %v189_v6 }
  0xa1   :  { %268 = vst [vmem:[%s414_s3 + $0x30] sm:$0xff] %v193_v8  ;;  %v194_v9 = vsel %vm186_vm8, %v181_v5, %v190_v7 }
  0xa2   :  { %269 = vst [vmem:[%s414_s3 + $0x38] sm:$0xff] %v194_v9 }

// kernel: discriminator_forward.6
= control target key start
LH: loop header
LB: loop body
LE: loop exit
PB: predicated region body
PF: predicated region fallthrough
CT: control target
= control target key end

     0   :  { %v860_v8 = vmov 0   ;;  %vm228_vm0 = vcmask 523264   ;;  %s1139_s0 = inlined_call_operand.vmem [shape: bf16[2,256,64], index: 0, kind: input, shape index: {}]   ;;  %s1140_s2 = inlined_call_operand.vmem [shape: f32[32,1], index: 2, kind: input, shape index: {}]   ;;  %s1141_s1 = inlined_call_operand.vmem [shape: bf16[32,256], index: 1, kind: input, shape index: {}]   ;;  %s1142_s3 = inlined_call_operand.vmem [shape: f32[2,32,64], index: 3, kind: output, shape index: {}]  }
   0x1   :  { %v816_v0 = vld [vmem:[%s1139_s0 + $0x38] sm:$0xff]  ;;  %v815_v4 = vld [vmem:[%s1139_s0 + $0x30] sm:$0xff]  ;;  %842 = vset.pattern.permute.xlu0 %v860_v8  ;;  %843 = vset.pattern.permute.xlu1 %v860_v8  ;;  %v814_v9 = vld [vmem:[%s1139_s0 + $0x28] sm:$0xff] }
   0x2   :  { %v824_v1 = vld [vmem:[%s1139_s0 + $0x78] sm:$0xff]  ;;  %190 = vmatpush.bf16.msra.mxu0 %v816_v0  ;;  %v823_v5 = vld [vmem:[%s1139_s0 + $0x70] sm:$0xff]  ;;  %v822_v10 = vld [vmem:[%s1139_s0 + $0x68] sm:$0xff] }
   0x3   :  { %v832_v2 = vld [vmem:[%s1139_s0 + $0xb8] sm:$0xff]  ;;  %209 = vmatpush.bf16.msra.mxu1 %v824_v1  ;;  %v831_v6 = vld [vmem:[%s1139_s0 + $0xb0] sm:$0xff]  ;;  %v830_v11 = vld [vmem:[%s1139_s0 + $0xa8] sm:$0xff] }
   0x4   :  { %v840_v3 = vld [vmem:[%s1139_s0 + $0xf8] sm:$0xff]  ;;  %470 = vmatpush.bf16.msra.mxu2 %v832_v2  ;;  %v839_v7 = vld [vmem:[%s1139_s0 + $0xf0] sm:$0xff]  ;;  %v838_v12 = vld [vmem:[%s1139_s0 + $0xe8] sm:$0xff] }
   0x5   :  { %489 = vmatpush.bf16.msra.mxu3 %v840_v3  ;;  %v813_v13 = vld [vmem:[%s1139_s0 + $0x20] sm:$0xff]  ;;  %v812_v18 = vld [vmem:[%s1139_s0 + $0x18] sm:$0xff]  ;;  %v20_v22 = vld [vmem:[%s1140_s2 + $0x10] sm:$0xff] }
   0x6   :  { %191 = vmatpush.bf16.msra.mxu0 %v815_v4  ;;  %v821_v14 = vld [vmem:[%s1139_s0 + $0x60] sm:$0xff]  ;;  %v820_v19 = vld [vmem:[%s1139_s0 + $0x58] sm:$0xff]  ;;  %v811_v23 = vld [vmem:[%s1139_s0 + $0x10] sm:$0xff]  ;;  %66 = vperm.xlu1 %843, %v20_v22  }
   0x7   :  { %210 = vmatpush.bf16.msra.mxu1 %v823_v5  ;;  %v829_v15 = vld [vmem:[%s1139_s0 + $0xa0] sm:$0xff]  ;;  %v828_v20 = vld [vmem:[%s1139_s0 + $0x98] sm:$0xff]  ;;  %v819_v24 = vld [vmem:[%s1139_s0 + $0x50] sm:$0xff] }
   0x8   :  { %471 = vmatpush.bf16.msra.mxu2 %v831_v6  ;;  %v837_v16 = vld [vmem:[%s1139_s0 + $0xe0] sm:$0xff]  ;;  %v836_v21 = vld [vmem:[%s1139_s0 + $0xd8] sm:$0xff]  ;;  %v19_v25 = vld [vmem:[%s1140_s2 + $0x8] sm:$0xff] }
   0x9   :  { %490 = vmatpush.bf16.msra.mxu3 %v839_v7  ;;  %v18_v17 = vld [vmem:[%s1140_s2] sm:$0xff]  ;;  %v827_v26 = vld [vmem:[%s1139_s0 + $0x90] sm:$0xff]  ;;  %v810_v28 = vld [vmem:[%s1139_s0 + $0x8] sm:$0xff] }
   0xa   :  { %192 = vmatpush.bf16.msra.mxu0 %v814_v9  ;;  %56 = vperm.xlu0 %842, %v18_v17   ;;  %v835_v27 = vld [vmem:[%s1139_s0 + $0xd0] sm:$0xff]  ;;  %v818_v29 = vld [vmem:[%s1139_s0 + $0x48] sm:$0xff]  ;;  %v809_v32 = vld [vmem:[%s1139_s0] sm:$0xff] }
   0xb   :  { %211 = vmatpush.bf16.msra.mxu1 %v822_v10  ;;  %v826_v30 = vld [vmem:[%s1139_s0 + $0x88] sm:$0xff]  ;;  %v817_v33 = vld [vmem:[%s1139_s0 + $0x40] sm:$0xff]  ;;  %v21_v35 = vld [vmem:[%s1140_s2 + $0x18] sm:$0xff] }
   0xc   :  { %472 = vmatpush.bf16.msra.mxu2 %v830_v11  ;;  %v834_v31 = vld [vmem:[%s1139_s0 + $0xc8] sm:$0xff]  ;;  %v627_v34 = vld [vmem:[%s1141_s1] sm:$0xf]  ;;  %v805_v37 = vld [vmem:[%s1141_s1 + $0x4] sm:$0xf] }
   0xd   :  { %491 = vmatpush.bf16.msra.mxu3 %v838_v12  ;;  %v806_v36 = vld [vmem:[%s1141_s1 + $0x4] sm:$0xf0]  ;;  %v629_v38 = vld [vmem:[%s1141_s1 + $0x8] sm:$0xf0]  ;;  %v825_v39 = vld [vmem:[%s1139_s0 + $0x80] sm:$0xff] }
   0xe   :  { %193 = vmatpush.bf16.msra.mxu0 %v813_v13  ;;  %v833_v40 = vld [vmem:[%s1139_s0 + $0xc0] sm:$0xff]  ;;  %71 = vperm.xlu1 %843, %v21_v35   ;;  %v628_v41 = vor.u32 %v806_v36, %v627_v34  ;;  %v632_v42 = vor.u32 %v805_v37, %v629_v38  ;;  %v635_v43 = vld [vmem:[%s1141_s1 + $0x10] sm:$0xf]  ;;  %v808_v44 = vld [vmem:[%s1141_s1 + $0x14] sm:$0xf0] }
   0xf   :  { %212 = vmatpush.bf16.msra.mxu1 %v821_v14  ;;  %v807_v45 = vld [vmem:[%s1141_s1 + $0x14] sm:$0xf]  ;;  %v637_v46 = vld [vmem:[%s1141_s1 + $0x18] sm:$0xf0]  ;;  %v636_v47 = vor.u32 %v808_v44, %v635_v43 }
  0x10   :  { %473 = vmatpush.bf16.msra.mxu2 %v829_v15  ;;  %v640_v48 = vor.u32 %v807_v45, %v637_v46 }
  0x11   :  { %492 = vmatpush.bf16.msra.mxu3 %v837_v16 }
  0x12   :  { %194 = vmatpush.bf16.msra.mxu0 %v812_v18  ;;  %61 = vperm.xlu0 %842, %v19_v25  }
  0x13   :  { %213 = vmatpush.bf16.msra.mxu1 %v820_v19 }
  0x14   :  { %474 = vmatpush.bf16.msra.mxu2 %v828_v20 }
  0x15   :  { %493 = vmatpush.bf16.msra.mxu3 %v836_v21 }
  0x16   :  { %195 = vmatpush.bf16.msra.mxu0 %v811_v23 }
  0x17   :  { %214 = vmatpush.bf16.msra.mxu1 %v819_v24 }
  0x18   :  { %475 = vmatpush.bf16.msra.mxu2 %v827_v26 }
  0x19   :  { %494 = vmatpush.bf16.msra.mxu3 %v835_v27 }
  0x1a   :  { %196 = vmatpush.bf16.msra.mxu0 %v810_v28 }
  0x1b   :  { %215 = vmatpush.bf16.msra.mxu1 %v818_v29 }
  0x1c   :  { %476 = vmatpush.bf16.msra.mxu2 %v826_v30 }
  0x1d   :  { %495 = vmatpush.bf16.msra.mxu3 %v834_v31 }
  0x1e   :  { %197 = vmatpush.bf16.msra.mxu0 %v809_v32 }
  0x1f   :  { %216 = vmatpush.bf16.msra.mxu1 %v817_v33 }
  0x20   :  { %477 = vmatpush.bf16.msra.mxu2 %v825_v39 }
  0x21   :  { %496 = vmatpush.bf16.msra.mxu3 %v833_v40  ;;  %198 = vmatmul.bf16.vlgmr.msra.gmra.mxu0 %v628_v41 }
  0x22   :  { %217 = vmatmul.bf16.vlgmr.msra.gmra.mxu1 %v632_v42 }
  0x23   :  { %478 = vmatmul.bf16.vlgmr.msra.gmra.mxu2 %v628_v41 }
  0x24   :  { %497 = vmatmul.bf16.vlgmr.msra.gmra.mxu3 %v632_v42 }
  0x31   :  { %203 = vmatmul.bf16.gmra.mxu0 %v636_v47 }
  0x32   :  { %222 = vmatmul.bf16.gmra.mxu1 %v640_v48 }
  0x33   :  { %483 = vmatmul.bf16.gmra.mxu2 %v636_v47 }
  0x34   :  { %502 = vmatmul.bf16.gmra.mxu3 %v640_v48 }
  0x78   :  { %v67_v59 = vpop.permute.xlu1 %66 }
  0x7c   :  { %v57_v49 = vpop.permute.xlu0 %56 }
  0x80   :  { %v72_v9 = vpop.permute.xlu1 %71 }
  0x84   :  { %v62_v4 = vpop.permute.xlu0 %61 }
  0x9e   :  { %v199_v50 = vpop.f32.mrf.mxu0 }
  0x9f   :  { %v218_v51 = vpop.f32.mrf.mxu1  ;;  %v200_v52 = vadd.f32 %v199_v50, %v57_v49 }
  0xa1   :  { %v1013_v53 = vadd.f32 %v218_v51, %v200_v52 }
  0xa3   :  { %v229_v54 = vsel %vm228_vm0, %v1013_v53, 0.0  ;;  %v245_v57 = vmul.f32 %v1013_v53, %v1013_v53 }
  0xa4   :  { %230 = vadd.xlane.f32.xlu2 %v229_v54 }
  0xa5   :  { %v249_v61 = vsel %vm228_vm0, %v245_v57, 0.0 }
  0xa6   :  { %v201_v55 = vpop.f32.mrf.mxu0  ;;  %v479_v58 = vpop.f32.mrf.mxu2 }
  0xa7   :  { %v220_v56 = vpop.f32.mrf.mxu1  ;;  %v480_v60 = vadd.f32 %v479_v58, %v57_v49  ;;  %v498_v62 = vpop.f32.mrf.mxu3  ;;  %v202_v7 = vadd.f32 %v201_v55, %v62_v4 }
  0xa9   :  { %v1020_v1 = vadd.f32 %v498_v62, %v480_v60  ;;  %v1030_v15 = vadd.f32 %v220_v56, %v202_v7 }
  0xab   :  { %v508_v6 = vsel %vm228_vm0, %v1020_v1, 0.0  ;;  %v232_v21 = vsel %vm228_vm0, %v1030_v15, 0.0  ;;  %v524_v26 = vmul.f32 %v1020_v1, %v1020_v1  ;;  %v246_v33 = vmul.f32 %v1030_v15, %v1030_v15 }
  0xac   :  { %250 = vadd.xlane.f32.xlu2 %v249_v61 }
  0xad   :  { %v528_v31 = vsel %vm228_vm0, %v524_v26, 0.0  ;;  %v252_v35 = vsel %vm228_vm0, %v246_v33, 0.0 }
  0xae   :  { %v204_v63 = vpop.f32.mrf.mxu0  ;;  %v481_v8 = vpop.f32.mrf.mxu2 }
  0xaf   :  { %v223_v0 = vpop.f32.mrf.mxu1  ;;  %v205_v2 = vadd.f32 %v204_v63, %v67_v59  ;;  %v482_v13 = vadd.f32 %v481_v8, %v62_v4  ;;  %v500_v16 = vpop.f32.mrf.mxu3 }
  0xb1   :  { %v1022_v3 = vadd.f32 %v223_v0, %v205_v2  ;;  %v1035_v19 = vadd.f32 %v500_v16, %v482_v13 }
  0xb3   :  { %v235_v5 = vsel %vm228_vm0, %v1022_v3, 0.0  ;;  %v247_v10 = vmul.f32 %v1022_v3, %v1022_v3  ;;  %v525_v25 = vmul.f32 %v1035_v19, %v1035_v19  ;;  %v511_v36 = vsel %vm228_vm0, %v1035_v19, 0.0 }
  0xb4   :  { %236 = vadd.xlane.f32.xlu0 %v235_v5  ;;  %509 = vadd.xlane.f32.xlu2 %v508_v6 }
  0xb5   :  { %v255_v18 = vsel %vm228_vm0, %v247_v10, 0.0  ;;  %v531_v30 = vsel %vm228_vm0, %v525_v25, 0.0 }
  0xb6   :  { %v206_v11 = vpop.f32.mrf.mxu0  ;;  %v484_v22 = vpop.f32.mrf.mxu2 }
  0xb7   :  { %v225_v12 = vpop.f32.mrf.mxu1  ;;  %v207_v14 = vadd.f32 %v206_v11, %v72_v9  ;;  %v485_v24 = vadd.f32 %v484_v22, %v67_v59  ;;  %v503_v27 = vpop.f32.mrf.mxu3 }
  0xb9   :  { %v1032_v17 = vadd.f32 %v225_v12, %v207_v14  ;;  %v1048_v29 = vadd.f32 %v503_v27, %v485_v24 }
  0xbb   :  { %v238_v20 = vsel %vm228_vm0, %v1032_v17, 0.0  ;;  %v248_v23 = vmul.f32 %v1032_v17, %v1032_v17  ;;  %v526_v32 = vmul.f32 %v1048_v29, %v1048_v29  ;;  %v514_v39 = vsel %vm228_vm0, %v1048_v29, 0.0 }
  0xbc   :  { %239 = vadd.xlane.f32.xlu1 %v238_v20  ;;  %256 = vadd.xlane.f32.xlu0 %v255_v18 }
  0xbd   :  { %233 = vadd.xlane.f32.xlu2 %v232_v21  ;;  %v258_v28 = vsel %vm228_vm0, %v248_v23, 0.0  ;;  %v534_v34 = vsel %vm228_vm0, %v526_v32, 0.0 }
  0xbe   :  { %v486_v37 = vpop.f32.mrf.mxu2 }
  0xbf   :  { %v487_v38 = vadd.f32 %v486_v37, %v72_v9  ;;  %v505_v40 = vpop.f32.mrf.mxu3 }
  0xc1   :  { %v1062_v41 = vadd.f32 %v505_v40, %v487_v38 }
  0xc3   :  { %v517_v42 = vsel %vm228_vm0, %v1062_v41, 0.0  ;;  %v527_v43 = vmul.f32 %v1062_v41, %v1062_v41 }
  0xc4   :  { %259 = vadd.xlane.f32.xlu1 %v258_v28  ;;  %532 = vadd.xlane.f32.xlu0 %v531_v30 }
  0xc5   :  { %529 = vadd.xlane.f32.xlu2 %v528_v31  ;;  %v537_v44 = vsel %vm228_vm0, %v527_v43, 0.0 }
  0xcc   :  { %535 = vadd.xlane.f32.xlu1 %v534_v34 }
  0xcd   :  { %253 = vadd.xlane.f32.xlu2 %v252_v35 }
  0xd5   :  { %512 = vadd.xlane.f32.xlu2 %v511_v36 }
  0xdd   :  { %515 = vadd.xlane.f32.xlu2 %v514_v39 }
  0xe5   :  { %518 = vadd.xlane.f32.xlu2 %v517_v42 }
  0xed   :  { %538 = vadd.xlane.f32.xlu2 %v537_v44 }
 0x117   :  { %v231_v45 = vpop.xlane.xlu2 %230 }
 0x118   :  { %v241_v46 = vmul.f32 0.015625, %v231_v45 }
 0x11a   :  { %v265_v48 = vmul.f32 %v241_v46, %v241_v46  ;;  %v273_v9 = vsub.f32 %v1013_v53, %v241_v46 }
 0x11f   :  { %v251_v47 = vpop.xlane.xlu2 %250 }
 0x120   :  { %v261_v49 = vmul.f32 0.015625, %v251_v47 }
 0x122   :  { %v269_v50 = vsub.f32 %v261_v49, %v265_v48 }
 0x124   :  { %v277_v51 = vadd.f32 1e-05, %v269_v50 }
 0x126   :  { %844 = vrsqrt.f32 %v277_v51  ;;  %vm287_vm2 = vweird.f32 %v277_v51 }
 0x127   :  { %v237_v52 = vpop.xlane.xlu0 %236  ;;  %v510_v54 = vpop.xlane.xlu2 %509 }
 0x128   :  { %v1069_v56 = vmul.f32 0.015625, %v237_v52  ;;  %v1075_v8 = vmul.f32 0.015625, %v510_v54 }
 0x12a   :  { %v267_v58 = vmul.f32 %v1069_v56, %v1069_v56  ;;  %v544_v18 = vmul.f32 %v1075_v8, %v1075_v8  ;;  %v275_v43 = vsub.f32 %v1022_v3, %v1069_v56 }
 0x12c   :  { %v845_v55 = vpop.eup %844 }
 0x12d   :  { %v282_v57 = vmul.f32 %v845_v55, %v277_v51  ;;  %vm288_vm1 = vweird.f32 %v845_v55 }
 0x12e   :  { %vm289_vm3 = vmor %vm287_vm2, %vm288_vm1 }
 0x12f   :  { %v283_v59 = vmul.f32 %v845_v55, %v282_v57  ;;  %v240_v60 = vpop.xlane.xlu1 %239  ;;  %v257_v61 = vpop.xlane.xlu0 %256 }
 0x130   :  { %v263_v62 = vmul.f32 0.015625, %v257_v61  ;;  %v234_v63 = vpop.xlane.xlu2 %233  ;;  %v1073_v5 = vmul.f32 0.015625, %v240_v60 }
 0x131   :  { %v284_v0 = vmul.f32 0.5, %v283_v59  ;;  %v1082_v25 = vmul.f32 0.015625, %v234_v63 }
 0x132   :  { %v271_v2 = vsub.f32 %v263_v62, %v267_v58  ;;  %v268_v10 = vmul.f32 %v1073_v5, %v1073_v5  ;;  %v276_v63 = vsub.f32 %v1032_v17, %v1073_v5 }
 0x133   :  { %v285_v4 = vsub.f32 1.5, %v284_v0  ;;  %v266_v31 = vmul.f32 %v1082_v25, %v1082_v25 }
 0x134   :  { %v279_v6 = vadd.f32 1e-05, %v271_v2 }
 0x135   :  { %v286_v7 = vmul.f32 %v845_v55, %v285_v4  ;;  %v552_v4 = vsub.f32 %v1020_v1, %v1075_v8 }
 0x136   :  { %846 = vrsqrt.f32 %v279_v6  ;;  %vm307_vm5 = vweird.f32 %v279_v6 }
 0x137   :  { %v290_v11 = vsel %vm289_vm3, %v845_v55, %v286_v7  ;;  %v260_v12 = vpop.xlane.xlu1 %259  ;;  %v533_v48 = vpop.xlane.xlu0 %532 }
 0x138   :  { %v321_v13 = vmul.f32 %v290_v11, %v273_v9  ;;  %v264_v14 = vmul.f32 0.015625, %v260_v12  ;;  %v530_v16 = vpop.xlane.xlu2 %529  ;;  %v541_v58 = vmul.f32 0.015625, %v533_v48 }
 0x139   :  { %v540_v20 = vmul.f32 0.015625, %v530_v16 }
 0x13a   :  { %vm325_vm4 = vcmp.gt.f32.partialorder %v321_v13, 0.0  ;;  %v329_v21 = vmul.f32 0.2, %v321_v13  ;;  %v272_v22 = vsub.f32 %v264_v14, %v268_v10 }
 0x13b   :  { %v548_v23 = vsub.f32 %v540_v20, %v544_v18 }
 0x13c   :  { %v847_v24 = vpop.eup %846  ;;  %v333_v53 = vsel %vm325_vm4, %v321_v13, %v329_v21  ;;  %v280_v26 = vadd.f32 1e-05, %v272_v22 }
 0x13d   :  { %337 = vst.msk [vmem:[%s1142_s3] sm:$0xff] %vm228_vm0, %v333_v53  ;;  %v302_v27 = vmul.f32 %v847_v24, %v279_v6  ;;  %v556_v28 = vadd.f32 1e-05, %v548_v23  ;;  %vm308_vm6 = vweird.f32 %v847_v24 }
 0x13e   :  { %848 = vrsqrt.f32 %v280_v26  ;;  %vm309_vm7 = vmor %vm307_vm5, %vm308_vm6  ;;  %vm317_vm8 = vweird.f32 %v280_v26 }
 0x13f   :  { %v303_v30 = vmul.f32 %v847_v24, %v302_v27  ;;  %850 = vrsqrt.f32 %v556_v28  ;;  %vm566_vm13 = vweird.f32 %v556_v28  ;;  %v536_v12 = vpop.xlane.xlu1 %535 }
 0x140   :  { %v254_v32 = vpop.xlane.xlu2 %253  ;;  %v542_v20 = vmul.f32 0.015625, %v536_v12 }
 0x141   :  { %v304_v33 = vmul.f32 0.5, %v303_v30  ;;  %v262_v34 = vmul.f32 0.015625, %v254_v32 }
 0x143   :  { %v305_v35 = vsub.f32 1.5, %v304_v33  ;;  %v270_v36 = vsub.f32 %v262_v34, %v266_v31 }
 0x144   :  { %v849_v37 = vpop.eup %848 }
 0x145   :  { %v851_v38 = vpop.eup %850  ;;  %v306_v39 = vmul.f32 %v847_v24, %v305_v35  ;;  %v312_v40 = vmul.f32 %v849_v37, %v280_v26  ;;  %v278_v42 = vadd.f32 1e-05, %v270_v36  ;;  %vm318_vm9 = vweird.f32 %v849_v37 }
 0x146   :  { %v561_v44 = vmul.f32 %v851_v38, %v556_v28  ;;  %vm319_vm11 = vmor %vm317_vm8, %vm318_vm9  ;;  %vm567_vm12 = vweird.f32 %v851_v38  ;;  %v274_v26 = vsub.f32 %v1030_v15, %v1082_v25 }
 0x147   :  { %v310_v45 = vsel %vm309_vm7, %v847_v24, %v306_v39  ;;  %v313_v46 = vmul.f32 %v849_v37, %v312_v40  ;;  %852 = vrsqrt.f32 %v278_v42  ;;  %vm568_vm14 = vmor %vm566_vm13, %vm567_vm12  ;;  %vm297_vm3 = vweird.f32 %v278_v42 }
 0x148   :  { %v323_v47 = vmul.f32 %v310_v45, %v275_v43  ;;  %v562_v49 = vmul.f32 %v851_v38, %v561_v44  ;;  %v513_v50 = vpop.xlane.xlu2 %512 }
 0x149   :  { %v314_v51 = vmul.f32 0.5, %v313_v46  ;;  %v1092_v52 = vmul.f32 0.015625, %v513_v50 }
 0x14a   :  { %vm327_vm10 = vcmp.gt.f32.partialorder %v323_v47, 0.0  ;;  %v331_v54 = vmul.f32 0.2, %v323_v47  ;;  %v563_v55 = vmul.f32 0.5, %v562_v49 }
 0x14b   :  { %v315_v57 = vsub.f32 1.5, %v314_v51  ;;  %v545_v3 = vmul.f32 %v1092_v52, %v1092_v52 }
 0x14c   :  { %v335_v56 = vsel %vm327_vm10, %v323_v47, %v331_v54  ;;  %v564_v59 = vsub.f32 1.5, %v563_v55 }
 0x14d   :  { %v853_v60 = vpop.eup %852  ;;  %339 = vst.msk [vmem:[%s1142_s3 + $0x10] sm:$0xff] %vm228_vm0, %v335_v56  ;;  %v316_v61 = vmul.f32 %v849_v37, %v315_v57  ;;  %v549_v62 = vsub.f32 %v541_v58, %v545_v3 }
 0x14e   :  { %v565_v0 = vmul.f32 %v851_v38, %v564_v59  ;;  %v292_v2 = vmul.f32 %v853_v60, %v278_v42  ;;  %vm298_vm2 = vweird.f32 %v853_v60  ;;  %v553_v42 = vsub.f32 %v1035_v19, %v1092_v52 }
 0x14f   :  { %v320_v6 = vsel %vm319_vm11, %v849_v37, %v316_v61  ;;  %v557_v7 = vadd.f32 1e-05, %v549_v62  ;;  %vm299_vm4 = vmor %vm297_vm3, %vm298_vm2 }
 0x150   :  { %v324_v9 = vmul.f32 %v320_v6, %v276_v63  ;;  %v569_v10 = vsel %vm568_vm14, %v851_v38, %v565_v0  ;;  %v293_v11 = vmul.f32 %v853_v60, %v292_v2  ;;  %v516_v13 = vpop.xlane.xlu2 %515 }
 0x151   :  { %v600_v14 = vmul.f32 %v569_v10, %v552_v4  ;;  %854 = vrsqrt.f32 %v557_v7  ;;  %v1104_v16 = vmul.f32 0.015625, %v516_v13  ;;  %vm576_vm7 = vweird.f32 %v557_v7 }
 0x152   :  { %vm328_vm15 = vcmp.gt.f32.partialorder %v324_v9, 0.0  ;;  %v332_v17 = vmul.f32 0.2, %v324_v9  ;;  %v294_v5 = vmul.f32 0.5, %v293_v11 }
 0x153   :  { %vm604_vm1 = vcmp.gt.f32.partialorder %v600_v14, 0.0  ;;  %v608_v18 = vmul.f32 0.2, %v600_v14  ;;  %v546_v1 = vmul.f32 %v1104_v16, %v1104_v16  ;;  %v554_v52 = vsub.f32 %v1048_v29, %v1104_v16 }
 0x154   :  { %v336_v8 = vsel %vm328_vm15, %v324_v9, %v332_v17  ;;  %v295_v21 = vsub.f32 1.5, %v294_v5 }
 0x155   :  { %340 = vst.msk [vmem:[%s1142_s3 + $0x18] sm:$0xff] %vm228_vm0, %v336_v8  ;;  %v612_v22 = vsel %vm604_vm1, %v600_v14, %v608_v18  ;;  %v550_v23 = vsub.f32 %v542_v20, %v546_v1 }
 0x156   :  { %801 = vst.msk [vmem:[%s1142_s3 + $0x20] sm:$0xff] %vm228_vm0, %v612_v22  ;;  %v296_v24 = vmul.f32 %v853_v60, %v295_v21 }
 0x157   :  { %v855_v53 = vpop.eup %854  ;;  %v558_v27 = vadd.f32 1e-05, %v550_v23 }
 0x158   :  { %v300_v28 = vsel %vm299_vm4, %v853_v60, %v296_v24  ;;  %v571_v30 = vmul.f32 %v855_v53, %v557_v7  ;;  %v519_v31 = vpop.xlane.xlu2 %518  ;;  %vm577_vm6 = vweird.f32 %v855_v53 }
 0x159   :  { %v322_v32 = vmul.f32 %v300_v28, %v274_v26  ;;  %856 = vrsqrt.f32 %v558_v27  ;;  %v523_v37 = vmul.f32 0.015625, %v519_v31  ;;  %vm578_vm8 = vmor %vm576_vm7, %vm577_vm6  ;;  %vm586_vm11 = vweird.f32 %v558_v27 }
 0x15a   :  { %v572_v33 = vmul.f32 %v855_v53, %v571_v30 }
 0x15b   :  { %vm326_vm5 = vcmp.gt.f32.partialorder %v322_v32, 0.0  ;;  %v330_v34 = vmul.f32 0.2, %v322_v32  ;;  %v547_v43 = vmul.f32 %v523_v37, %v523_v37  ;;  %v555_v29 = vsub.f32 %v1062_v41, %v523_v37 }
 0x15c   :  { %v573_v35 = vmul.f32 0.5, %v572_v33 }
 0x15d   :  { %v334_v36 = vsel %vm326_vm5, %v322_v32, %v330_v34 }
 0x15e   :  { %338 = vst.msk [vmem:[%s1142_s3 + $0x8] sm:$0xff] %vm228_vm0, %v334_v36  ;;  %v574_v38 = vsub.f32 1.5, %v573_v35 }
 0x15f   :  { %v857_v15 = vpop.eup %856 }
 0x160   :  { %v575_v25 = vmul.f32 %v855_v53, %v574_v38  ;;  %v581_v39 = vmul.f32 %v857_v15, %v558_v27  ;;  %v539_v40 = vpop.xlane.xlu2 %538  ;;  %vm587_vm10 = vweird.f32 %v857_v15 }
 0x161   :  { %v543_v44 = vmul.f32 0.015625, %v539_v40  ;;  %vm588_vm12 = vmor %vm586_vm11, %vm587_vm10 }
 0x162   :  { %v579_v45 = vsel %vm578_vm8, %v855_v53, %v575_v25  ;;  %v582_v46 = vmul.f32 %v857_v15, %v581_v39 }
 0x163   :  { %v601_v47 = vmul.f32 %v579_v45, %v553_v42  ;;  %v551_v48 = vsub.f32 %v543_v44, %v547_v43 }
 0x164   :  { %v583_v49 = vmul.f32 0.5, %v582_v46 }
 0x165   :  { %vm605_vm9 = vcmp.gt.f32.partialorder %v601_v47, 0.0  ;;  %v609_v50 = vmul.f32 0.2, %v601_v47  ;;  %v559_v51 = vadd.f32 1e-05, %v551_v48 }
 0x166   :  { %v584_v54 = vsub.f32 1.5, %v583_v49 }
 0x167   :  { %v613_v55 = vsel %vm605_vm9, %v601_v47, %v609_v50  ;;  %858 = vrsqrt.f32 %v559_v51  ;;  %vm596_vm15 = vweird.f32 %v559_v51 }
 0x168   :  { %802 = vst.msk [vmem:[%s1142_s3 + $0x28] sm:$0xff] %vm228_vm0, %v613_v55  ;;  %v585_v19 = vmul.f32 %v857_v15, %v584_v54 }
 0x16a   :  { %v589_v57 = vsel %vm588_vm12, %v857_v15, %v585_v19 }
 0x16b   :  { %v602_v58 = vmul.f32 %v589_v57, %v554_v52 }
 0x16d   :  { %v859_v3 = vpop.eup %858  ;;  %vm606_vm13 = vcmp.gt.f32.partialorder %v602_v58, 0.0  ;;  %v610_v56 = vmul.f32 0.2, %v602_v58 }
 0x16e   :  { %v591_v59 = vmul.f32 %v859_v3, %v559_v51  ;;  %vm597_vm14 = vweird.f32 %v859_v3 }
 0x16f   :  { %v614_v60 = vsel %vm606_vm13, %v602_v58, %v610_v56  ;;  %vm598_vm1 = vmor %vm596_vm15, %vm597_vm14 }
 0x170   :  { %803 = vst.msk [vmem:[%s1142_s3 + $0x30] sm:$0xff] %vm228_vm0, %v614_v60  ;;  %v592_v61 = vmul.f32 %v859_v3, %v591_v59 }
 0x172   :  { %v593_v62 = vmul.f32 0.5, %v592_v61 }
 0x174   :  { %v594_v63 = vsub.f32 1.5, %v593_v62 }
 0x176   :  { %v595_v0 = vmul.f32 %v859_v3, %v594_v63 }
 0x178   :  { %v599_v2 = vsel %vm598_vm1, %v859_v3, %v595_v0 }
 0x179   :  { %v603_v4 = vmul.f32 %v599_v2, %v555_v29 }
 0x17b   :  { %vm607_vm2 = vcmp.gt.f32.partialorder %v603_v4, 0.0  ;;  %v611_v6 = vmul.f32 0.2, %v603_v4 }
 0x17d   :  { %v615_v7 = vsel %vm607_vm2, %v603_v4, %v611_v6 }
 0x17e   :  { %804 = vst.msk [vmem:[%s1142_s3 + $0x38] sm:$0xff] %vm228_vm0, %v615_v7 }

// kernel: discriminator_forward.7
= control target key start
LH: loop header
LB: loop body
LE: loop exit
PB: predicated region body
PF: predicated region fallthrough
CT: control target
= control target key end

     0   :  { %v1865_v8 = vmov 0   ;;  %vm530_vm0 = vcmask 130048   ;;  %s2524_s0 = inlined_call_operand.vmem [shape: bf16[2,512,16], index: 0, kind: input, shape index: {}]   ;;  %s2525_s2 = inlined_call_operand.vmem [shape: f32[64,1], index: 2, kind: input, shape index: {}]   ;;  %s2526_s1 = inlined_call_operand.vmem [shape: bf16[64,512], index: 1, kind: input, shape index: {}]   ;;  %s2527_s3 = inlined_call_operand.vmem [shape: f32[2,64,16], index: 3, kind: output, shape index: {}]  }
   0x1   :  { %v1772_v0 = vld [vmem:[%s2524_s0 + $0x38] sm:$0xff]  ;;  %v1771_v4 = vld [vmem:[%s2524_s0 + $0x30] sm:$0xff]  ;;  %1830 = vset.pattern.permute.xlu0 %v1865_v8  ;;  %1831 = vset.pattern.permute.xlu1 %v1865_v8  ;;  %v1770_v9 = vld [vmem:[%s2524_s0 + $0x28] sm:$0xff] }
   0x2   :  { %v1780_v1 = vld [vmem:[%s2524_s0 + $0x78] sm:$0xff]  ;;  %414 = vmatpush.bf16.msra.mxu0 %v1772_v0  ;;  %v1779_v5 = vld [vmem:[%s2524_s0 + $0x70] sm:$0xff]  ;;  %v1778_v10 = vld [vmem:[%s2524_s0 + $0x68] sm:$0xff]  ;;  %1832 = vset.pattern.permute.xlu2 %v1865_v8 }
   0x3   :  { %v1788_v2 = vld [vmem:[%s2524_s0 + $0xb8] sm:$0xff]  ;;  %443 = vmatpush.bf16.msra.mxu1 %v1780_v1  ;;  %v1787_v6 = vld [vmem:[%s2524_s0 + $0xb0] sm:$0xff]  ;;  %v1786_v11 = vld [vmem:[%s2524_s0 + $0xa8] sm:$0xff] }
   0x4   :  { %v1796_v3 = vld [vmem:[%s2524_s0 + $0xf8] sm:$0xff]  ;;  %472 = vmatpush.bf16.msra.mxu2 %v1788_v2  ;;  %v1795_v7 = vld [vmem:[%s2524_s0 + $0xf0] sm:$0xff]  ;;  %v1794_v12 = vld [vmem:[%s2524_s0 + $0xe8] sm:$0xff] }
   0x5   :  { %501 = vmatpush.bf16.msra.mxu3 %v1796_v3  ;;  %v1769_v13 = vld [vmem:[%s2524_s0 + $0x20] sm:$0xff]  ;;  %v1768_v17 = vld [vmem:[%s2524_s0 + $0x18] sm:$0xff]  ;;  %v1767_v22 = vld [vmem:[%s2524_s0 + $0x10] sm:$0xff] }
   0x6   :  { %415 = vmatpush.bf16.msra.mxu0 %v1771_v4  ;;  %v1777_v14 = vld [vmem:[%s2524_s0 + $0x60] sm:$0xff]  ;;  %v1776_v18 = vld [vmem:[%s2524_s0 + $0x58] sm:$0xff]  ;;  %v1775_v23 = vld [vmem:[%s2524_s0 + $0x50] sm:$0xff] }
   0x7   :  { %444 = vmatpush.bf16.msra.mxu1 %v1779_v5  ;;  %v1785_v15 = vld [vmem:[%s2524_s0 + $0xa0] sm:$0xff]  ;;  %v1784_v19 = vld [vmem:[%s2524_s0 + $0x98] sm:$0xff]  ;;  %v1783_v24 = vld [vmem:[%s2524_s0 + $0x90] sm:$0xff] }
   0x8   :  { %473 = vmatpush.bf16.msra.mxu2 %v1787_v6  ;;  %v1793_v16 = vld [vmem:[%s2524_s0 + $0xe0] sm:$0xff]  ;;  %v1792_v20 = vld [vmem:[%s2524_s0 + $0xd8] sm:$0xff]  ;;  %v1791_v25 = vld [vmem:[%s2524_s0 + $0xd0] sm:$0xff] }
   0x9   :  { %502 = vmatpush.bf16.msra.mxu3 %v1795_v7  ;;  %v30_v21 = vld [vmem:[%s2525_s2] sm:$0xff]  ;;  %v31_v26 = vld [vmem:[%s2525_s2 + $0x8] sm:$0xff]  ;;  %v32_v27 = vld [vmem:[%s2525_s2 + $0x10] sm:$0xff] }
   0xa   :  { %416 = vmatpush.bf16.msra.mxu0 %v1770_v9  ;;  %104 = vperm.xlu0 %1830, %v30_v21   ;;  %v1766_v28 = vld [vmem:[%s2524_s0 + $0x8] sm:$0xff]  ;;  %v1765_v32 = vld [vmem:[%s2524_s0] sm:$0xff]  ;;  %v1751_v37 = vld [vmem:[%s2526_s1 + $0xc] sm:$0xf0] }
   0xb   :  { %445 = vmatpush.bf16.msra.mxu1 %v1778_v10  ;;  %v1774_v29 = vld [vmem:[%s2524_s0 + $0x48] sm:$0xff]  ;;  %v1773_v33 = vld [vmem:[%s2524_s0 + $0x40] sm:$0xff]  ;;  %114 = vperm.xlu1 %1831, %v32_v27   ;;  %v1361_v39 = vld [vmem:[%s2526_s1 + $0x10] sm:$0xf0] }
   0xc   :  { %474 = vmatpush.bf16.msra.mxu2 %v1786_v11  ;;  %v1782_v30 = vld [vmem:[%s2524_s0 + $0x88] sm:$0xff]  ;;  %v1781_v34 = vld [vmem:[%s2524_s0 + $0x80] sm:$0xff]  ;;  %v1752_v41 = vld [vmem:[%s2526_s1 + $0x14] sm:$0xf0] }
   0xd   :  { %503 = vmatpush.bf16.msra.mxu3 %v1794_v12  ;;  %v1790_v31 = vld [vmem:[%s2524_s0 + $0xc8] sm:$0xff]  ;;  %v1789_v35 = vld [vmem:[%s2524_s0 + $0xc0] sm:$0xff]  ;;  %v1369_v43 = vld [vmem:[%s2526_s1 + $0x18] sm:$0xf0] }
   0xe   :  { %417 = vmatpush.bf16.msra.mxu0 %v1769_v13  ;;  %v1359_v36 = vld [vmem:[%s2526_s1] sm:$0xf]  ;;  %v1749_v38 = vld [vmem:[%s2526_s1 + $0x4] sm:$0xf]  ;;  %v1367_v40 = vld [vmem:[%s2526_s1 + $0x8] sm:$0xf] }
   0xf   :  { %446 = vmatpush.bf16.msra.mxu1 %v1777_v14  ;;  %v1750_v42 = vld [vmem:[%s2526_s1 + $0xc] sm:$0xf]  ;;  %v1820_v44 = vld [vmem:[%s2524_s0 + $0x1b8] sm:$0xff]  ;;  %v2021_v46 = vor.u32 %v1751_v37, %v1359_v36  ;;  %v2023_v47 = vor.u32 %v1749_v38, %v1361_v39  ;;  %v2025_v48 = vor.u32 %v1752_v41, %v1367_v40  ;;  %v1819_v52 = vld [vmem:[%s2524_s0 + $0x1b0] sm:$0xff] }
  0x10   :  { %475 = vmatpush.bf16.msra.mxu2 %v1785_v15  ;;  %v1804_v45 = vld [vmem:[%s2524_s0 + $0x138] sm:$0xff]  ;;  %v2027_v49 = vor.u32 %v1750_v42, %v1369_v43  ;;  %v1803_v53 = vld [vmem:[%s2524_s0 + $0x130] sm:$0xff]  ;;  %v1818_v57 = vld [vmem:[%s2524_s0 + $0x1a8] sm:$0xff] }
  0x11   :  { %504 = vmatpush.bf16.msra.mxu3 %v1793_v16  ;;  %v1828_v50 = vld [vmem:[%s2524_s0 + $0x1f8] sm:$0xff]  ;;  %v1827_v54 = vld [vmem:[%s2524_s0 + $0x1f0] sm:$0xff]  ;;  %v1802_v58 = vld [vmem:[%s2524_s0 + $0x128] sm:$0xff] }
  0x12   :  { %418 = vmatpush.bf16.msra.mxu0 %v1768_v17  ;;  %109 = vperm.xlu0 %1830, %v31_v26   ;;  %v1812_v51 = vld [vmem:[%s2524_s0 + $0x178] sm:$0xff]  ;;  %v1811_v55 = vld [vmem:[%s2524_s0 + $0x170] sm:$0xff]  ;;  %v1826_v59 = vld [vmem:[%s2524_s0 + $0x1e8] sm:$0xff] }
  0x13   :  { %447 = vmatpush.bf16.msra.mxu1 %v1776_v18  ;;  %v33_v56 = vld [vmem:[%s2525_s2 + $0x18] sm:$0xff]  ;;  %v1810_v60 = vld [vmem:[%s2524_s0 + $0x168] sm:$0xff]  ;;  %v1375_v61 = vld [vmem:[%s2526_s1 + $0x20] sm:$0xf] }
  0x14   :  { %476 = vmatpush.bf16.msra.mxu2 %v1784_v19  ;;  %119 = vperm.xlu1 %1831, %v33_v56   ;;  %v1817_v62 = vld [vmem:[%s2524_s0 + $0x1a0] sm:$0xff]  ;;  %v1755_v0 = vld [vmem:[%s2526_s1 + $0x2c] sm:$0xf0]  ;;  %v1377_v2 = vld [vmem:[%s2526_s1 + $0x30] sm:$0xf0] }
  0x15   :  { %505 = vmatpush.bf16.msra.mxu3 %v1792_v20  ;;  %v1801_v63 = vld [vmem:[%s2524_s0 + $0x120] sm:$0xff]  ;;  %v1383_v3 = vld [vmem:[%s2526_s1 + $0x28] sm:$0xf]  ;;  %v1756_v4 = vld [vmem:[%s2526_s1 + $0x34] sm:$0xf0]  ;;  %v2108_v11 = vor.u32 %v1755_v0, %v1375_v61 }
  0x16   :  { %419 = vmatpush.bf16.msra.mxu0 %v1767_v22  ;;  %v1753_v1 = vld [vmem:[%s2526_s1 + $0x24] sm:$0xf]  ;;  %v1754_v5 = vld [vmem:[%s2526_s1 + $0x2c] sm:$0xf]  ;;  %v1385_v6 = vld [vmem:[%s2526_s1 + $0x38] sm:$0xf0]  ;;  %v2112_v13 = vor.u32 %v1756_v4, %v1383_v3 }
  0x17   :  { %448 = vmatpush.bf16.msra.mxu1 %v1775_v23  ;;  %v1825_v7 = vld [vmem:[%s2524_s0 + $0x1e0] sm:$0xff]  ;;  %v1816_v9 = vld [vmem:[%s2524_s0 + $0x198] sm:$0xff]  ;;  %v2110_v12 = vor.u32 %v1753_v1, %v1377_v2  ;;  %v2114_v14 = vor.u32 %v1754_v5, %v1385_v6  ;;  %v1815_v17 = vld [vmem:[%s2524_s0 + $0x190] sm:$0xff] }
  0x18   :  { %477 = vmatpush.bf16.msra.mxu2 %v1783_v24  ;;  %v1809_v8 = vld [vmem:[%s2524_s0 + $0x160] sm:$0xff]  ;;  %v1800_v10 = vld [vmem:[%s2524_s0 + $0x118] sm:$0xff]  ;;  %v1799_v18 = vld [vmem:[%s2524_s0 + $0x110] sm:$0xff] }
  0x19   :  { %506 = vmatpush.bf16.msra.mxu3 %v1791_v25  ;;  %v1824_v15 = vld [vmem:[%s2524_s0 + $0x1d8] sm:$0xff]  ;;  %v1823_v19 = vld [vmem:[%s2524_s0 + $0x1d0] sm:$0xff]  ;;  %v1814_v23 = vld [vmem:[%s2524_s0 + $0x188] sm:$0xff] }
  0x1a   :  { %420 = vmatpush.bf16.msra.mxu0 %v1766_v28  ;;  %v1808_v16 = vld [vmem:[%s2524_s0 + $0x158] sm:$0xff]  ;;  %v1807_v20 = vld [vmem:[%s2524_s0 + $0x150] sm:$0xff]  ;;  %v1798_v24 = vld [vmem:[%s2524_s0 + $0x108] sm:$0xff] }
  0x1b   :  { %449 = vmatpush.bf16.msra.mxu1 %v1774_v29  ;;  %v37_v21 = vld [vmem:[%s2525_s2 + $0x38] sm:$0xff]  ;;  %v36_v22 = vld [vmem:[%s2525_s2 + $0x30] sm:$0xff]  ;;  %v1822_v25 = vld [vmem:[%s2524_s0 + $0x1c8] sm:$0xff] }
  0x1c   :  { %478 = vmatpush.bf16.msra.mxu2 %v1782_v30  ;;  %139 = vperm.xlu1 %1831, %v37_v21   ;;  %v1806_v26 = vld [vmem:[%s2524_s0 + $0x148] sm:$0xff]  ;;  %v1391_v27 = vld [vmem:[%s2526_s1 + $0x40] sm:$0xf]  ;;  %v1759_v30 = vld [vmem:[%s2526_s1 + $0x4c] sm:$0xf0] }
  0x1d   :  { %507 = vmatpush.bf16.msra.mxu3 %v1790_v31  ;;  %134 = vperm.xlu0 %1830, %v36_v22   ;;  %v1813_v28 = vld [vmem:[%s2524_s0 + $0x180] sm:$0xff]  ;;  %v1401_v36 = vld [vmem:[%s2526_s1 + $0x58] sm:$0xf0]  ;;  %v1392_v39 = vor.u32 %v1759_v30, %v1391_v27 }
  0x1e   :  { %421 = vmatpush.bf16.msra.mxu0 %v1765_v32  ;;  %v1797_v29 = vld [vmem:[%s2524_s0 + $0x100] sm:$0xff]  ;;  %v1393_v32 = vld [vmem:[%s2526_s1 + $0x50] sm:$0xf0]  ;;  %v1417_v56 = vld [vmem:[%s2526_s1 + $0x78] sm:$0xf0] }
  0x1f   :  { %450 = vmatpush.bf16.msra.mxu1 %v1773_v33  ;;  %v1757_v31 = vld [vmem:[%s2526_s1 + $0x44] sm:$0xf]  ;;  %v1399_v33 = vld [vmem:[%s2526_s1 + $0x48] sm:$0xf] }
  0x20   :  { %479 = vmatpush.bf16.msra.mxu2 %v1781_v34  ;;  %v1760_v34 = vld [vmem:[%s2526_s1 + $0x54] sm:$0xf0]  ;;  %v1821_v37 = vld [vmem:[%s2524_s0 + $0x1c0] sm:$0xff]  ;;  %v1396_v40 = vor.u32 %v1757_v31, %v1393_v32 }
  0x21   :  { %508 = vmatpush.bf16.msra.mxu3 %v1789_v35  ;;  %422 = vmatmul.bf16.vlgmr.msra.gmra.mxu0 %v2021_v46  ;;  %v1758_v35 = vld [vmem:[%s2526_s1 + $0x4c] sm:$0xf]  ;;  %v1805_v38 = vld [vmem:[%s2524_s0 + $0x140] sm:$0xff]  ;;  %v1400_v41 = vor.u32 %v1760_v34, %v1399_v33 }
  0x22   :  { %1012 = vmatpush.bf16.msrb.mxu0 %v1804_v45  ;;  %451 = vmatmul.bf16.vlgmr.msra.gmra.mxu1 %v2023_v47  ;;  %v1404_v42 = vor.u32 %v1758_v35, %v1401_v36  ;;  %v34_v43 = vld [vmem:[%s2525_s2 + $0x20] sm:$0xff] }
  0x23   :  { %480 = vmatmul.bf16.vlgmr.msra.gmra.mxu2 %v2025_v48  ;;  %1041 = vmatpush.bf16.msrb.mxu1 %v1812_v51  ;;  %v1407_v45 = vld [vmem:[%s2526_s1 + $0x60] sm:$0xf]  ;;  %v1761_v51 = vld [vmem:[%s2526_s1 + $0x64] sm:$0xf] }
  0x24   :  { %1070 = vmatpush.bf16.msrb.mxu2 %v1820_v44  ;;  %509 = vmatmul.bf16.vlgmr.msra.gmra.mxu3 %v2027_v49  ;;  %v35_v44 = vld [vmem:[%s2525_s2 + $0x28] sm:$0xff] }
  0x25   :  { %1099 = vmatpush.bf16.msrb.mxu3 %v1828_v50  ;;  %124 = vperm.xlu2 %1832, %v34_v43   ;;  %v1763_v50 = vld [vmem:[%s2526_s1 + $0x6c] sm:$0xf0] }
  0x26   :  { %1013 = vmatpush.bf16.msrb.mxu0 %v1803_v53  ;;  %v1415_v53 = vld [vmem:[%s2526_s1 + $0x68] sm:$0xf] }
  0x27   :  { %1042 = vmatpush.bf16.msrb.mxu1 %v1811_v55  ;;  %v1762_v55 = vld [vmem:[%s2526_s1 + $0x6c] sm:$0xf] }
  0x28   :  { %1071 = vmatpush.bf16.msrb.mxu2 %v1819_v52  ;;  %v1409_v52 = vld [vmem:[%s2526_s1 + $0x70] sm:$0xf0] }
  0x29   :  { %1100 = vmatpush.bf16.msrb.mxu3 %v1827_v54  ;;  %v1764_v54 = vld [vmem:[%s2526_s1 + $0x74] sm:$0xf0] }
  0x2a   :  { %1014 = vmatpush.bf16.msrb.mxu0 %v1802_v58  ;;  %v1412_v58 = vor.u32 %v1761_v51, %v1409_v52 }
  0x2b   :  { %1043 = vmatpush.bf16.msrb.mxu1 %v1810_v60  ;;  %v1420_v60 = vor.u32 %v1762_v55, %v1417_v56 }
  0x2c   :  { %1072 = vmatpush.bf16.msrb.mxu2 %v1818_v57  ;;  %v1408_v57 = vor.u32 %v1763_v50, %v1407_v45 }
  0x2d   :  { %1101 = vmatpush.bf16.msrb.mxu3 %v1826_v59  ;;  %129 = vperm.xlu2 %1832, %v35_v44   ;;  %v1416_v59 = vor.u32 %v1764_v54, %v1415_v53 }
  0x2e   :  { %1015 = vmatpush.bf16.msrb.mxu0 %v1801_v63 }
  0x2f   :  { %1044 = vmatpush.bf16.msrb.mxu1 %v1809_v8 }
  0x30   :  { %1073 = vmatpush.bf16.msrb.mxu2 %v1817_v62 }
  0x31   :  { %1102 = vmatpush.bf16.msrb.mxu3 %v1825_v7  ;;  %427 = vmatmul.bf16.gmra.mxu0 %v2108_v11 }
  0x32   :  { %1016 = vmatpush.bf16.msrb.mxu0 %v1800_v10  ;;  %456 = vmatmul.bf16.gmra.mxu1 %v2110_v12 }
  0x33   :  { %485 = vmatmul.bf16.gmra.mxu2 %v2112_v13  ;;  %1045 = vmatpush.bf16.msrb.mxu1 %v1808_v16 }
  0x34   :  { %1074 = vmatpush.bf16.msrb.mxu2 %v1816_v9  ;;  %514 = vmatmul.bf16.gmra.mxu3 %v2114_v14 }
  0x35   :  { %1103 = vmatpush.bf16.msrb.mxu3 %v1824_v15 }
  0x36   :  { %1017 = vmatpush.bf16.msrb.mxu0 %v1799_v18 }
  0x37   :  { %1046 = vmatpush.bf16.msrb.mxu1 %v1807_v20 }
  0x38   :  { %1075 = vmatpush.bf16.msrb.mxu2 %v1815_v17 }
  0x39   :  { %1104 = vmatpush.bf16.msrb.mxu3 %v1823_v19 }
  0x3a   :  { %1018 = vmatpush.bf16.msrb.mxu0 %v1798_v24 }
  0x3b   :  { %1047 = vmatpush.bf16.msrb.mxu1 %v1806_v26 }
  0x3c   :  { %1076 = vmatpush.bf16.msrb.mxu2 %v1814_v23 }
  0x3d   :  { %1105 = vmatpush.bf16.msrb.mxu3 %v1822_v25 }
  0x3e   :  { %1019 = vmatpush.bf16.msrb.mxu0 %v1797_v29 }
  0x3f   :  { %1048 = vmatpush.bf16.msrb.mxu1 %v1805_v38 }
  0x40   :  { %1077 = vmatpush.bf16.msrb.mxu2 %v1813_v28 }
  0x41   :  { %1106 = vmatpush.bf16.msrb.mxu3 %v1821_v37  ;;  %432 = vmatmul.bf16.gmra.mxu0 %v1392_v39 }
  0x42   :  { %461 = vmatmul.bf16.gmra.mxu1 %v1396_v40 }
  0x43   :  { %490 = vmatmul.bf16.gmra.mxu2 %v1400_v41 }
  0x44   :  { %519 = vmatmul.bf16.gmra.mxu3 %v1404_v42 }
  0x51   :  { %437 = vmatmul.bf16.gmra.mxu0 %v1408_v57 }
  0x52   :  { %466 = vmatmul.bf16.gmra.mxu1 %v1412_v58 }
  0x53   :  { %495 = vmatmul.bf16.gmra.mxu2 %v1416_v59 }
  0x54   :  { %524 = vmatmul.bf16.gmra.mxu3 %v1420_v60 }
  0x61   :  { %1020 = vmatmul.bf16.vlgmr.msrb.gmra.mxu0 %v2021_v46 }
  0x62   :  { %1049 = vmatmul.bf16.vlgmr.msrb.gmra.mxu1 %v2023_v47 }
  0x63   :  { %1078 = vmatmul.bf16.vlgmr.msrb.gmra.mxu2 %v2025_v48 }
  0x64   :  { %1107 = vmatmul.bf16.vlgmr.msrb.gmra.mxu3 %v2027_v49 }
  0x71   :  { %1025 = vmatmul.bf16.gmra.mxu0 %v2108_v11 }
  0x72   :  { %1054 = vmatmul.bf16.gmra.mxu1 %v2110_v12 }
  0x73   :  { %1083 = vmatmul.bf16.gmra.mxu2 %v2112_v13 }
  0x74   :  { %1112 = vmatmul.bf16.gmra.mxu3 %v2114_v14 }
  0x7c   :  { %v2230_v46 = vpop.permute.xlu0 %104 }
  0x7d   :  { %v2242_v8 = vpop.permute.xlu1 %114 }
  0x7f   :  { %v2259_v30 = vpop.permute.xlu2 %124 }
  0x81   :  { %1030 = vmatmul.bf16.gmra.mxu0 %v1392_v39 }
  0x82   :  { %1059 = vmatmul.bf16.gmra.mxu1 %v1396_v40 }
  0x83   :  { %1088 = vmatmul.bf16.gmra.mxu2 %v1400_v41 }
  0x84   :  { %1117 = vmatmul.bf16.gmra.mxu3 %v1404_v42  ;;  %v2233_v62 = vpop.permute.xlu0 %109 }
  0x86   :  { %v2250_v20 = vpop.permute.xlu1 %119 }
  0x87   :  { %v2270_v44 = vpop.permute.xlu2 %129 }
  0x91   :  { %1035 = vmatmul.bf16.gmra.mxu0 %v1408_v57 }
  0x92   :  { %1064 = vmatmul.bf16.gmra.mxu1 %v1412_v58 }
  0x93   :  { %1093 = vmatmul.bf16.gmra.mxu2 %v1416_v59 }
  0x94   :  { %1122 = vmatmul.bf16.gmra.mxu3 %v1420_v60 }
  0x9e   :  { %v423_v47 = vpop.f32.mrf.mxu0 }
  0x9f   :  { %v452_v48 = vpop.f32.mrf.mxu1  ;;  %v424_v49 = vadd.f32 %v423_v47, %v2230_v46 }
  0xa1   :  { %v453_v61 = vadd.f32 %v452_v48, %v424_v49 }
  0xa6   :  { %v481_v63 = vpop.f32.mrf.mxu2  ;;  %v425_v2 = vpop.f32.mrf.mxu0 }
  0xa7   :  { %v510_v0 = vpop.f32.mrf.mxu3  ;;  %v482_v1 = vadd.f32 %v481_v63, %v453_v61  ;;  %v454_v3 = vpop.f32.mrf.mxu1  ;;  %v426_v5 = vadd.f32 %v425_v2, %v2233_v62 }
  0xa9   :  { %v2235_v4 = vadd.f32 %v510_v0, %v482_v1  ;;  %v455_v9 = vadd.f32 %v454_v3, %v426_v5  ;;  %v2281_v0 = vpop.permute.xlu0 %134 }
  0xab   :  { %v531_v6 = vsel %vm530_vm0, %v2235_v4, 0.0  ;;  %v563_v7 = vmul.f32 %v2235_v4, %v2235_v4 }
  0xac   :  { %532 = vadd.xlane.f32.xlu2 %v531_v6 }
  0xad   :  { %v571_v10 = vsel %vm530_vm0, %v563_v7, 0.0 }
  0xae   :  { %v483_v11 = vpop.f32.mrf.mxu2  ;;  %572 = vadd.xlane.f32.xlu0 %v571_v10  ;;  %v428_v14 = vpop.f32.mrf.mxu0 }
  0xaf   :  { %v512_v12 = vpop.f32.mrf.mxu3  ;;  %v484_v13 = vadd.f32 %v483_v11, %v455_v9  ;;  %v457_v15 = vpop.f32.mrf.mxu1  ;;  %v429_v16 = vadd.f32 %v428_v14, %v2242_v8 }
  0xb1   :  { %v2246_v17 = vadd.f32 %v512_v12, %v484_v13  ;;  %v458_v18 = vadd.f32 %v457_v15, %v429_v16  ;;  %v2293_v15 = vpop.permute.xlu1 %139 }
  0xb3   :  { %v534_v19 = vsel %vm530_vm0, %v2246_v17, 0.0  ;;  %v564_v28 = vmul.f32 %v2246_v17, %v2246_v17 }
  0xb5   :  { %v574_v32 = vsel %vm530_vm0, %v564_v28, 0.0 }
  0xb6   :  { %v486_v21 = vpop.f32.mrf.mxu2  ;;  %535 = vadd.xlane.f32.xlu0 %v534_v19  ;;  %v430_v24 = vpop.f32.mrf.mxu0 }
  0xb7   :  { %v515_v22 = vpop.f32.mrf.mxu3  ;;  %v487_v23 = vadd.f32 %v486_v21, %v458_v18  ;;  %v459_v25 = vpop.f32.mrf.mxu1  ;;  %v431_v27 = vadd.f32 %v430_v24, %v2250_v20 }
  0xb9   :  { %v2252_v26 = vadd.f32 %v515_v22, %v487_v23  ;;  %v460_v31 = vadd.f32 %v459_v25, %v431_v27 }
  0xbb   :  { %v537_v29 = vsel %vm530_vm0, %v2252_v26, 0.0  ;;  %v565_v38 = vmul.f32 %v2252_v26, %v2252_v26 }
  0xbc   :  { %538 = vadd.xlane.f32.xlu1 %v537_v29 }
  0xbd   :  { %v577_v42 = vsel %vm530_vm0, %v565_v38, 0.0 }
  0xbe   :  { %v488_v33 = vpop.f32.mrf.mxu2  ;;  %575 = vadd.xlane.f32.xlu0 %v574_v32  ;;  %v433_v36 = vpop.f32.mrf.mxu0 }
  0xbf   :  { %v517_v34 = vpop.f32.mrf.mxu3  ;;  %v489_v35 = vadd.f32 %v488_v33, %v460_v31  ;;  %v462_v37 = vpop.f32.mrf.mxu1  ;;  %v434_v39 = vadd.f32 %v433_v36, %v2259_v30 }
  0xc1   :  { %v2265_v40 = vadd.f32 %v517_v34, %v489_v35  ;;  %v463_v41 = vadd.f32 %v462_v37, %v434_v39 }
  0xc3   :  { %v540_v43 = vsel %vm530_vm0, %v2265_v40, 0.0  ;;  %v566_v54 = vmul.f32 %v2265_v40, %v2265_v40 }
  0xc4   :  { %578 = vadd.xlane.f32.xlu1 %v577_v42  ;;  %541 = vadd.xlane.f32.xlu2 %v540_v43 }
  0xc5   :  { %v580_v57 = vsel %vm530_vm0, %v566_v54, 0.0 }
  0xc6   :  { %v491_v45 = vpop.f32.mrf.mxu2  ;;  %v435_v52 = vpop.f32.mrf.mxu0 }
  0xc7   :  { %v520_v50 = vpop.f32.mrf.mxu3  ;;  %v492_v51 = vadd.f32 %v491_v45, %v463_v41  ;;  %v464_v53 = vpop.f32.mrf.mxu1  ;;  %v436_v56 = vadd.f32 %v435_v52, %v2270_v44 }
  0xc9   :  { %v2274_v55 = vadd.f32 %v520_v50, %v492_v51  ;;  %v465_v59 = vadd.f32 %v464_v53, %v436_v56 }
  0xcb   :  { %v567_v58 = vmul.f32 %v2274_v55, %v2274_v55  ;;  %v543_v3 = vsel %vm530_vm0, %v2274_v55, 0.0 }
  0xcc   :  { %581 = vadd.xlane.f32.xlu2 %v580_v57 }
  0xcd   :  { %v583_v60 = vsel %vm530_vm0, %v567_v58, 0.0 }
  0xce   :  { %v493_v47 = vpop.f32.mrf.mxu2  ;;  %584 = vadd.xlane.f32.xlu0 %v583_v60  ;;  %v438_v61 = vpop.f32.mrf.mxu0 }
  0xcf   :  { %v522_v48 = vpop.f32.mrf.mxu3  ;;  %v494_v49 = vadd.f32 %v493_v47, %v465_v59  ;;  %v467_v63 = vpop.f32.mrf.mxu1  ;;  %v439_v2 = vadd.f32 %v438_v61, %v2281_v0 }
  0xd1   :  { %v2283_v1 = vadd.f32 %v522_v48, %v494_v49  ;;  %v468_v6 = vadd.f32 %v467_v63, %v439_v2 }
  0xd3   :  { %v568_v5 = vmul.f32 %v2283_v1, %v2283_v1  ;;  %v546_v9 = vsel %vm530_vm0, %v2283_v1, 0.0 }
  0xd4   :  { %544 = vadd.xlane.f32.xlu2 %v543_v3 }
  0xd5   :  { %v586_v7 = vsel %vm530_vm0, %v568_v5, 0.0 }
  0xd6   :  { %v496_v10 = vpop.f32.mrf.mxu2  ;;  %587 = vadd.xlane.f32.xlu1 %v586_v7  ;;  %547 = vadd.xlane.f32.xlu0 %v546_v9  ;;  %v440_v13 = vpop.f32.mrf.mxu0 }
  0xd7   :  { %v525_v11 = vpop.f32.mrf.mxu3  ;;  %v497_v12 = vadd.f32 %v496_v10, %v468_v6  ;;  %v469_v14 = vpop.f32.mrf.mxu1  ;;  %v441_v18 = vadd.f32 %v440_v13, %v2293_v15 }
  0xd9   :  { %v2295_v16 = vadd.f32 %v525_v11, %v497_v12  ;;  %v470_v21 = vadd.f32 %v469_v14, %v441_v18 }
  0xdb   :  { %v569_v19 = vmul.f32 %v2295_v16, %v2295_v16  ;;  %v549_v22 = vsel %vm530_vm0, %v2295_v16, 0.0 }
  0xdd   :  { %v589_v23 = vsel %vm530_vm0, %v569_v19, 0.0 }
  0xde   :  { %v498_v24 = vpop.f32.mrf.mxu2  ;;  %550 = vadd.xlane.f32.xlu1 %v549_v22  ;;  %590 = vadd.xlane.f32.xlu2 %v589_v23  ;;  %v1021_v28 = vpop.f32.mrf.mxu0 }
  0xdf   :  { %v527_v25 = vpop.f32.mrf.mxu3  ;;  %v499_v27 = vadd.f32 %v498_v24, %v470_v21  ;;  %v1050_v29 = vpop.f32.mrf.mxu1  ;;  %v1022_v32 = vadd.f32 %v1021_v28, %v2230_v46 }
  0xe1   :  { %v2303_v31 = vadd.f32 %v527_v25, %v499_v27  ;;  %v1051_v34 = vadd.f32 %v1050_v29, %v1022_v32 }
  0xe3   :  { %v570_v33 = vmul.f32 %v2303_v31, %v2303_v31  ;;  %v552_v36 = vsel %vm530_vm0, %v2303_v31, 0.0 }
  0xe5   :  { %v592_v35 = vsel %vm530_vm0, %v570_v33, 0.0 }
  0xe6   :  { %v1079_v37 = vpop.f32.mrf.mxu2  ;;  %593 = vadd.xlane.f32.xlu0 %v592_v35  ;;  %553 = vadd.xlane.f32.xlu2 %v552_v36  ;;  %v1023_v41 = vpop.f32.mrf.mxu0 }
  0xe7   :  { %v1108_v38 = vpop.f32.mrf.mxu3  ;;  %v1080_v39 = vadd.f32 %v1079_v37, %v1051_v34  ;;  %v1052_v42 = vpop.f32.mrf.mxu1  ;;  %v1024_v46 = vadd.f32 %v1023_v41, %v2233_v62 }
  0xe9   :  { %v2311_v43 = vadd.f32 %v1108_v38, %v1080_v39  ;;  %v1053_v50 = vadd.f32 %v1052_v42, %v1024_v46 }
  0xeb   :  { %v1128_v45 = vsel %vm530_vm0, %v2311_v43, 0.0  ;;  %v1160_v57 = vmul.f32 %v2311_v43, %v2311_v43 }
  0xec   :  { %1129 = vadd.xlane.f32.xlu1 %v1128_v45 }
  0xed   :  { %v1168_v60 = vsel %vm530_vm0, %v1160_v57, 0.0 }
  0xee   :  { %v1081_v51 = vpop.f32.mrf.mxu2  ;;  %v1026_v54 = vpop.f32.mrf.mxu0 }
  0xef   :  { %v1110_v52 = vpop.f32.mrf.mxu3  ;;  %v1082_v53 = vadd.f32 %v1081_v51, %v1053_v50  ;;  %v1055_v56 = vpop.f32.mrf.mxu1  ;;  %v1027_v59 = vadd.f32 %v1026_v54, %v2242_v8 }
  0xf1   :  { %v2318_v58 = vadd.f32 %v1110_v52, %v1082_v53  ;;  %v1056_v47 = vadd.f32 %v1055_v56, %v1027_v59 }
  0xf3   :  { %v1131_v62 = vsel %vm530_vm0, %v2318_v58, 0.0  ;;  %v1161_v3 = vmul.f32 %v2318_v58, %v2318_v58 }
  0xf4   :  { %1169 = vadd.xlane.f32.xlu1 %v1168_v60  ;;  %1132 = vadd.xlane.f32.xlu2 %v1131_v62 }
  0xf5   :  { %v1171_v7 = vsel %vm530_vm0, %v1161_v3, 0.0 }
  0xf6   :  { %v1084_v48 = vpop.f32.mrf.mxu2  ;;  %v1028_v63 = vpop.f32.mrf.mxu0 }
  0xf7   :  { %v1113_v49 = vpop.f32.mrf.mxu3  ;;  %v1085_v61 = vadd.f32 %v1084_v48, %v1056_v47  ;;  %v1057_v2 = vpop.f32.mrf.mxu1  ;;  %v1029_v8 = vadd.f32 %v1028_v63, %v2250_v20 }
  0xf9   :  { %v2326_v5 = vadd.f32 %v1113_v49, %v1085_v61  ;;  %v1058_v9 = vadd.f32 %v1057_v2, %v1029_v8 }
  0xfb   :  { %v1134_v6 = vsel %vm530_vm0, %v2326_v5, 0.0  ;;  %v1162_v18 = vmul.f32 %v2326_v5, %v2326_v5 }
  0xfc   :  { %1135 = vadd.xlane.f32.xlu0 %v1134_v6  ;;  %1172 = vadd.xlane.f32.xlu2 %v1171_v7 }
  0xfd   :  { %v1174_v22 = vsel %vm530_vm0, %v1162_v18, 0.0 }
  0xfe   :  { %v1086_v10 = vpop.f32.mrf.mxu2  ;;  %v1031_v13 = vpop.f32.mrf.mxu0 }
  0xff   :  { %v1115_v11 = vpop.f32.mrf.mxu3  ;;  %v1087_v12 = vadd.f32 %v1086_v10, %v1058_v9  ;;  %v1060_v14 = vpop.f32.mrf.mxu1  ;;  %v1032_v20 = vadd.f32 %v1031_v13, %v2259_v30 }
 0x101   :  { %v2334_v19 = vadd.f32 %v1115_v11, %v1087_v12  ;;  %v1061_v23 = vadd.f32 %v1060_v14, %v1032_v20 }
 0x103   :  { %v1137_v21 = vsel %vm530_vm0, %v2334_v19, 0.0  ;;  %v1163_v29 = vmul.f32 %v2334_v19, %v2334_v19 }
 0x104   :  { %1138 = vadd.xlane.f32.xlu1 %v1137_v21  ;;  %1175 = vadd.xlane.f32.xlu0 %v1174_v22 }
 0x105   :  { %v1177_v34 = vsel %vm530_vm0, %v1163_v29, 0.0 }
 0x106   :  { %v1089_v24 = vpop.f32.mrf.mxu2  ;;  %v1033_v28 = vpop.f32.mrf.mxu0 }
 0x107   :  { %v1118_v25 = vpop.f32.mrf.mxu3  ;;  %v1090_v27 = vadd.f32 %v1089_v24, %v1061_v23  ;;  %v1062_v32 = vpop.f32.mrf.mxu1  ;;  %v1034_v30 = vadd.f32 %v1033_v28, %v2270_v44 }
 0x109   :  { %v2342_v33 = vadd.f32 %v1118_v25, %v1090_v27  ;;  %v1063_v36 = vadd.f32 %v1062_v32, %v1034_v30 }
 0x10b   :  { %v1140_v35 = vsel %vm530_vm0, %v2342_v33, 0.0  ;;  %v1164_v42 = vmul.f32 %v2342_v33, %v2342_v33 }
 0x10c   :  { %1178 = vadd.xlane.f32.xlu1 %v1177_v34  ;;  %1141 = vadd.xlane.f32.xlu2 %v1140_v35 }
 0x10d   :  { %v1180_v51 = vsel %vm530_vm0, %v1164_v42, 0.0 }
 0x10e   :  { %v1091_v37 = vpop.f32.mrf.mxu2  ;;  %v1036_v41 = vpop.f32.mrf.mxu0 }
 0x10f   :  { %v1120_v38 = vpop.f32.mrf.mxu3  ;;  %v1092_v39 = vadd.f32 %v1091_v37, %v1063_v36  ;;  %v1037_v45 = vadd.f32 %v1036_v41, %v2281_v0  ;;  %v1065_v44 = vpop.f32.mrf.mxu1 }
 0x111   :  { %v2350_v46 = vadd.f32 %v1120_v38, %v1092_v39  ;;  %v1066_v52 = vadd.f32 %v1065_v44, %v1037_v45 }
 0x113   :  { %v1143_v50 = vsel %vm530_vm0, %v2350_v46, 0.0  ;;  %v1165_v59 = vmul.f32 %v2350_v46, %v2350_v46 }
 0x114   :  { %1144 = vadd.xlane.f32.xlu0 %v1143_v50  ;;  %1181 = vadd.xlane.f32.xlu2 %v1180_v51 }
 0x115   :  { %v1183_v47 = vsel %vm530_vm0, %v1165_v59, 0.0 }
 0x116   :  { %v1094_v53 = vpop.f32.mrf.mxu2  ;;  %v1038_v57 = vpop.f32.mrf.mxu0 }
 0x117   :  { %v1123_v54 = vpop.f32.mrf.mxu3  ;;  %v1095_v56 = vadd.f32 %v1094_v53, %v1066_v52  ;;  %v1039_v0 = vadd.f32 %v1038_v57, %v2293_v15  ;;  %v1067_v48 = vpop.f32.mrf.mxu1 }
 0x119   :  { %v2358_v60 = vadd.f32 %v1123_v54, %v1095_v56  ;;  %v1068_v49 = vadd.f32 %v1067_v48, %v1039_v0 }
 0x11b   :  { %v1146_v62 = vsel %vm530_vm0, %v2358_v60, 0.0  ;;  %v1166_v3 = vmul.f32 %v2358_v60, %v2358_v60 }
 0x11c   :  { %1147 = vadd.xlane.f32.xlu1 %v1146_v62  ;;  %1184 = vadd.xlane.f32.xlu0 %v1183_v47 }
 0x11d   :  { %v1186_v11 = vsel %vm530_vm0, %v1166_v3, 0.0 }
 0x11e   :  { %v1096_v61 = vpop.f32.mrf.mxu2 }
 0x11f   :  { %v1097_v63 = vadd.f32 %v1096_v61, %v1068_v49  ;;  %v533_v2 = vpop.xlane.xlu2 %532  ;;  %v1125_v8 = vpop.f32.mrf.mxu3 }
 0x120   :  { %v555_v6 = vmul.f32 0.0625, %v533_v2 }
 0x121   :  { %v2366_v7 = vadd.f32 %v1125_v8, %v1097_v63  ;;  %v573_v15 = vpop.xlane.xlu0 %572 }
 0x122   :  { %v603_v9 = vmul.f32 %v555_v6, %v555_v6  ;;  %v595_v10 = vmul.f32 0.0625, %v573_v15  ;;  %v619_v42 = vsub.f32 %v2235_v4, %v555_v6 }
 0x123   :  { %v1149_v12 = vsel %vm530_vm0, %v2366_v7, 0.0  ;;  %v1167_v18 = vmul.f32 %v2366_v7, %v2366_v7 }
 0x124   :  { %v611_v13 = vsub.f32 %v595_v10, %v603_v9  ;;  %1187 = vadd.xlane.f32.xlu1 %v1186_v11  ;;  %1150 = vadd.xlane.f32.xlu2 %v1149_v12 }
 0x125   :  { %v1189_v21 = vsel %vm530_vm0, %v1167_v18, 0.0 }
 0x126   :  { %v627_v14 = vadd.f32 1e-05, %v611_v13 }
 0x128   :  { %1833 = vrsqrt.f32 %v627_v14  ;;  %vm641_vm2 = vweird.f32 %v627_v14 }
 0x129   :  { %v536_v20 = vpop.xlane.xlu0 %535 }
 0x12a   :  { %v556_v23 = vmul.f32 0.0625, %v536_v20 }
 0x12c   :  { %1190 = vadd.xlane.f32.xlu2 %v1189_v21  ;;  %v604_v29 = vmul.f32 %v556_v23, %v556_v23  ;;  %v620_v11 = vsub.f32 %v2246_v17, %v556_v23 }
 0x12e   :  { %v1834_v22 = vpop.eup %1833 }
 0x12f   :  { %v636_v24 = vmul.f32 %v1834_v22, %v627_v14  ;;  %v539_v25 = vpop.xlane.xlu1 %538  ;;  %vm642_vm1 = vweird.f32 %v1834_v22 }
 0x130   :  { %v2374_v34 = vmul.f32 0.0625, %v539_v25  ;;  %vm643_vm3 = vmor %vm641_vm2, %vm642_vm1 }
 0x131   :  { %v637_v27 = vmul.f32 %v1834_v22, %v636_v24  ;;  %v576_v28 = vpop.xlane.xlu0 %575 }
 0x132   :  { %v596_v32 = vmul.f32 0.0625, %v576_v28  ;;  %v605_v45 = vmul.f32 %v2374_v34, %v2374_v34 }
 0x133   :  { %v638_v30 = vmul.f32 0.5, %v637_v27 }
 0x134   :  { %v612_v35 = vsub.f32 %v596_v32, %v604_v29 }
 0x135   :  { %v639_v36 = vsub.f32 1.5, %v638_v30 }
 0x136   :  { %v628_v37 = vadd.f32 1e-05, %v612_v35 }
 0x137   :  { %v640_v38 = vmul.f32 %v1834_v22, %v639_v36  ;;  %v579_v39 = vpop.xlane.xlu1 %578  ;;  %v542_v41 = vpop.xlane.xlu2 %541  ;;  %v621_v36 = vsub.f32 %v2252_v26, %v2374_v34 }
 0x138   :  { %1835 = vrsqrt.f32 %v628_v37  ;;  %v597_v44 = vmul.f32 0.0625, %v579_v39  ;;  %v2379_v56 = vmul.f32 0.0625, %v542_v41  ;;  %vm651_vm6 = vweird.f32 %v628_v37 }
 0x139   :  { %v644_v50 = vsel %vm643_vm3, %v1834_v22, %v640_v38 }
 0x13a   :  { %v715_v51 = vmul.f32 %v644_v50, %v619_v42  ;;  %v613_v52 = vsub.f32 %v597_v44, %v605_v45  ;;  %v606_v62 = vmul.f32 %v2379_v56, %v2379_v56 }
 0x13c   :  { %vm723_vm4 = vcmp.gt.f32.partialorder %v715_v51, 0.0  ;;  %v731_v53 = vmul.f32 0.2, %v715_v51  ;;  %v629_v54 = vadd.f32 1e-05, %v613_v52 }
 0x13e   :  { %v1836_v57 = vpop.eup %1835  ;;  %v739_v59 = vsel %vm723_vm4, %v715_v51, %v731_v53  ;;  %1837 = vrsqrt.f32 %v629_v54  ;;  %vm661_vm10 = vweird.f32 %v629_v54 }
 0x13f   :  { %747 = vst.msk [vmem:[%s2527_s3] sm:$0xff] %vm530_vm0, %v739_v59  ;;  %v646_v4 = vmul.f32 %v1836_v57, %v628_v37  ;;  %v582_v0 = vpop.xlane.xlu2 %581  ;;  %vm652_vm5 = vweird.f32 %v1836_v57 }
 0x140   :  { %v598_v47 = vmul.f32 0.0625, %v582_v0  ;;  %vm653_vm7 = vmor %vm651_vm6, %vm652_vm5 }
 0x141   :  { %v647_v48 = vmul.f32 %v1836_v57, %v646_v4  ;;  %v585_v49 = vpop.xlane.xlu0 %584 }
 0x142   :  { %v614_v61 = vsub.f32 %v598_v47, %v606_v62  ;;  %v599_v22 = vmul.f32 0.0625, %v585_v49  ;;  %v622_v62 = vsub.f32 %v2265_v40, %v2379_v56 }
 0x143   :  { %v648_v63 = vmul.f32 0.5, %v647_v48 }
 0x144   :  { %v1838_v2 = vpop.eup %1837  ;;  %v630_v3 = vadd.f32 1e-05, %v614_v61 }
 0x145   :  { %v649_v8 = vsub.f32 1.5, %v648_v63  ;;  %v656_v6 = vmul.f32 %v1838_v2, %v629_v54  ;;  %vm662_vm8 = vweird.f32 %v1838_v2 }
 0x146   :  { %1839 = vrsqrt.f32 %v630_v3  ;;  %vm663_vm11 = vmor %vm661_vm10, %vm662_vm8  ;;  %vm671_vm14 = vweird.f32 %v630_v3 }
 0x147   :  { %v650_v15 = vmul.f32 %v1836_v57, %v649_v8  ;;  %v657_v9 = vmul.f32 %v1838_v2, %v656_v6  ;;  %v545_v10 = vpop.xlane.xlu2 %544 }
 0x148   :  { %v2388_v12 = vmul.f32 0.0625, %v545_v10 }
 0x149   :  { %v654_v13 = vsel %vm653_vm7, %v1836_v57, %v650_v15  ;;  %v658_v14 = vmul.f32 0.5, %v657_v9  ;;  %v588_v18 = vpop.xlane.xlu1 %587  ;;  %v548_v20 = vpop.xlane.xlu0 %547 }
 0x14a   :  { %v716_v21 = vmul.f32 %v654_v13, %v620_v11  ;;  %v607_v24 = vmul.f32 %v2388_v12, %v2388_v12  ;;  %v2392_v27 = vmul.f32 0.0625, %v548_v20  ;;  %v600_v30 = vmul.f32 0.0625, %v588_v18 }
 0x14b   :  { %v659_v25 = vsub.f32 1.5, %v658_v14 }
 0x14c   :  { %v1840_v28 = vpop.eup %1839  ;;  %vm724_vm9 = vcmp.gt.f32.partialorder %v716_v21, 0.0  ;;  %v732_v29 = vmul.f32 0.2, %v716_v21  ;;  %v615_v17 = vsub.f32 %v599_v22, %v607_v24  ;;  %v608_v35 = vmul.f32 %v2392_v27, %v2392_v27 }
 0x14d   :  { %v660_v23 = vmul.f32 %v1838_v2, %v659_v25  ;;  %v666_v32 = vmul.f32 %v1840_v28, %v630_v3  ;;  %vm672_vm13 = vweird.f32 %v1840_v28  ;;  %v623_v24 = vsub.f32 %v2274_v55, %v2388_v12 }
 0x14e   :  { %v740_v37 = vsel %vm724_vm9, %v716_v21, %v732_v29  ;;  %v631_v38 = vadd.f32 1e-05, %v615_v17  ;;  %v616_v42 = vsub.f32 %v600_v30, %v608_v35  ;;  %vm673_vm15 = vmor %vm671_vm14, %vm672_vm13  ;;  %v624_v35 = vsub.f32 %v2283_v1, %v2392_v27 }
 0x14f   :  { %748 = vst.msk [vmem:[%s2527_s3 + $0x8] sm:$0xff] %vm530_vm0, %v740_v37  ;;  %v664_v39 = vsel %vm663_vm11, %v1838_v2, %v660_v23  ;;  %v667_v41 = vmul.f32 %v1840_v28, %v666_v32 }
 0x150   :  { %v717_v45 = vmul.f32 %v664_v39, %v621_v36  ;;  %1841 = vrsqrt.f32 %v631_v38  ;;  %v632_v50 = vadd.f32 1e-05, %v616_v42  ;;  %vm681_vm3 = vweird.f32 %v631_v38 }
 0x151   :  { %v668_v44 = vmul.f32 0.5, %v667_v41  ;;  %v551_v51 = vpop.xlane.xlu1 %550  ;;  %v591_v52 = vpop.xlane.xlu2 %590 }
 0x152   :  { %vm725_vm12 = vcmp.gt.f32.partialorder %v717_v45, 0.0  ;;  %v733_v53 = vmul.f32 0.2, %v717_v45  ;;  %v2402_v26 = vmul.f32 0.0625, %v551_v51  ;;  %1843 = vrsqrt.f32 %v632_v50 }
 0x153   :  { %v669_v34 = vsub.f32 1.5, %v668_v44  ;;  %v601_v59 = vmul.f32 0.0625, %v591_v52  ;;  %vm691_vm6 = vweird.f32 %v632_v50 }
 0x154   :  { %v741_v54 = vsel %vm725_vm12, %v717_v45, %v733_v53  ;;  %v609_v57 = vmul.f32 %v2402_v26, %v2402_v26 }
 0x155   :  { %749 = vst.msk [vmem:[%s2527_s3 + $0x10] sm:$0xff] %vm530_vm0, %v741_v54  ;;  %v670_v4 = vmul.f32 %v1840_v28, %v669_v34 }
 0x156   :  { %v1842_v0 = vpop.eup %1841  ;;  %v617_v47 = vsub.f32 %v601_v59, %v609_v57  ;;  %v625_v57 = vsub.f32 %v2295_v16, %v2402_v26 }
 0x157   :  { %v674_v48 = vsel %vm673_vm15, %v1840_v28, %v670_v4  ;;  %v676_v49 = vmul.f32 %v1842_v0, %v631_v38  ;;  %vm682_vm2 = vweird.f32 %v1842_v0 }
 0x158   :  { %v718_v61 = vmul.f32 %v674_v48, %v622_v62  ;;  %v633_v63 = vadd.f32 1e-05, %v617_v47  ;;  %v1844_v2 = vpop.eup %1843  ;;  %vm683_vm4 = vmor %vm681_vm3, %vm682_vm2 }
 0x159   :  { %v677_v8 = vmul.f32 %v1842_v0, %v676_v49  ;;  %v554_v6 = vpop.xlane.xlu2 %553  ;;  %v686_v9 = vmul.f32 %v1844_v2, %v632_v50  ;;  %v594_v11 = vpop.xlane.xlu0 %593  ;;  %vm692_vm5 = vweird.f32 %v1844_v2 }
 0x15a   :  { %vm726_vm1 = vcmp.gt.f32.partialorder %v718_v61, 0.0  ;;  %v734_v15 = vmul.f32 0.2, %v718_v61  ;;  %1845 = vrsqrt.f32 %v633_v63  ;;  %v2412_v14 = vmul.f32 0.0625, %v554_v6  ;;  %vm693_vm7 = vmor %vm691_vm6, %vm692_vm5 }
 0x15b   :  { %v678_v10 = vmul.f32 0.5, %v677_v8  ;;  %v687_v13 = vmul.f32 %v1844_v2, %v686_v9  ;;  %v602_v18 = vmul.f32 0.0625, %v594_v11  ;;  %vm701_vm11 = vweird.f32 %v633_v63 }
 0x15c   :  { %v742_v3 = vsel %vm726_vm1, %v718_v61, %v734_v15  ;;  %v610_v20 = vmul.f32 %v2412_v14, %v2412_v14 }
 0x15d   :  { %750 = vst.msk [vmem:[%s2527_s3 + $0x18] sm:$0xff] %vm530_vm0, %v742_v3  ;;  %v679_v40 = vsub.f32 1.5, %v678_v10  ;;  %v688_v56 = vmul.f32 0.5, %v687_v13  ;;  %v626_v13 = vsub.f32 %v2303_v31, %v2412_v14 }
 0x15e   :  { %v618_v28 = vsub.f32 %v602_v18, %v610_v20 }
 0x15f   :  { %v680_v21 = vmul.f32 %v1842_v0, %v679_v40  ;;  %v1130_v22 = vpop.xlane.xlu1 %1129  ;;  %v689_v25 = vsub.f32 1.5, %v688_v56 }
 0x160   :  { %v1846_v29 = vpop.eup %1845  ;;  %v634_v36 = vadd.f32 1e-05, %v618_v28  ;;  %v2424_v37 = vmul.f32 0.0625, %v1130_v22 }
 0x161   :  { %v684_v17 = vsel %vm683_vm4, %v1842_v0, %v680_v21  ;;  %v690_v32 = vmul.f32 %v1844_v2, %v689_v25  ;;  %v696_v30 = vmul.f32 %v1846_v29, %v633_v63  ;;  %vm702_vm10 = vweird.f32 %v1846_v29 }
 0x162   :  { %v719_v23 = vmul.f32 %v684_v17, %v623_v24  ;;  %1847 = vrsqrt.f32 %v634_v36  ;;  %v1200_v50 = vmul.f32 %v2424_v37, %v2424_v37  ;;  %vm703_vm12 = vmor %vm701_vm11, %vm702_vm10  ;;  %vm711_vm15 = vweird.f32 %v634_v36 }
 0x163   :  { %v694_v55 = vsel %vm693_vm7, %v1844_v2, %v690_v32  ;;  %v697_v12 = vmul.f32 %v1846_v29, %v696_v30 }
 0x164   :  { %vm727_vm8 = vcmp.gt.f32.partialorder %v719_v23, 0.0  ;;  %v735_v38 = vmul.f32 0.2, %v719_v23  ;;  %v720_v39 = vmul.f32 %v694_v55, %v624_v35 }
 0x165   :  { %v698_v42 = vmul.f32 0.5, %v697_v12 }
 0x166   :  { %v743_v41 = vsel %vm727_vm8, %v719_v23, %v735_v38  ;;  %vm728_vm9 = vcmp.gt.f32.partialorder %v720_v39, 0.0  ;;  %v736_v45 = vmul.f32 0.2, %v720_v39  ;;  %v1216_v38 = vsub.f32 %v2311_v43, %v2424_v37 }
 0x167   :  { %751 = vst.msk [vmem:[%s2527_s3 + $0x20] sm:$0xff] %vm530_vm0, %v743_v41  ;;  %v1170_v1 = vpop.xlane.xlu1 %1169  ;;  %v1133_v27 = vpop.xlane.xlu2 %1132  ;;  %v699_v44 = vsub.f32 1.5, %v698_v42 }
 0x168   :  { %v1192_v51 = vmul.f32 0.0625, %v1170_v1  ;;  %v744_v52 = vsel %vm728_vm9, %v720_v39, %v736_v45  ;;  %v1848_v54 = vpop.eup %1847  ;;  %v2438_v62 = vmul.f32 0.0625, %v1133_v27 }
 0x169   :  { %752 = vst.msk [vmem:[%s2527_s3 + $0x28] sm:$0xff] %vm530_vm0, %v744_v52  ;;  %v700_v53 = vmul.f32 %v1846_v29, %v699_v44  ;;  %v706_v4 = vmul.f32 %v1848_v54, %v634_v36  ;;  %vm712_vm14 = vweird.f32 %v1848_v54 }
 0x16a   :  { %v1208_v34 = vsub.f32 %v1192_v51, %v1200_v50  ;;  %v1201_v63 = vmul.f32 %v2438_v62, %v2438_v62  ;;  %vm713_vm1 = vmor %vm711_vm15, %vm712_vm14 }
 0x16b   :  { %v704_v59 = vsel %vm703_vm12, %v1846_v29, %v700_v53  ;;  %v707_v48 = vmul.f32 %v1848_v54, %v706_v4 }
 0x16c   :  { %v1224_v0 = vadd.f32 1e-05, %v1208_v34  ;;  %v721_v47 = vmul.f32 %v704_v59, %v625_v57  ;;  %v1217_v57 = vsub.f32 %v2318_v58, %v2438_v62 }
 0x16d   :  { %v708_v8 = vmul.f32 0.5, %v707_v48 }
 0x16e   :  { %1849 = vrsqrt.f32 %v1224_v0  ;;  %vm729_vm13 = vcmp.gt.f32.partialorder %v721_v47, 0.0  ;;  %v737_v49 = vmul.f32 0.2, %v721_v47  ;;  %vm1238_vm4 = vweird.f32 %v1224_v0 }
 0x16f   :  { %v1136_v61 = vpop.xlane.xlu0 %1135  ;;  %v1173_v2 = vpop.xlane.xlu2 %1172  ;;  %v709_v16 = vsub.f32 1.5, %v708_v8 }
 0x170   :  { %v1193_v6 = vmul.f32 0.0625, %v1173_v2  ;;  %v745_v15 = vsel %vm729_vm13, %v721_v47, %v737_v49  ;;  %v2446_v11 = vmul.f32 0.0625, %v1136_v61 }
 0x171   :  { %753 = vst.msk [vmem:[%s2527_s3 + $0x30] sm:$0xff] %vm530_vm0, %v745_v15  ;;  %v710_v10 = vmul.f32 %v1848_v54, %v709_v16 }
 0x172   :  { %v1209_v26 = vsub.f32 %v1193_v6, %v1201_v63  ;;  %v1202_v24 = vmul.f32 %v2446_v11, %v2446_v11 }
 0x173   :  { %v714_v56 = vsel %vm713_vm1, %v1848_v54, %v710_v10  ;;  %v1218_v10 = vsub.f32 %v2326_v5, %v2446_v11 }
 0x174   :  { %v1850_v9 = vpop.eup %1849  ;;  %v1225_v3 = vadd.f32 1e-05, %v1209_v26  ;;  %v722_v18 = vmul.f32 %v714_v56, %v626_v13 }
 0x175   :  { %v1233_v40 = vmul.f32 %v1850_v9, %v1224_v0  ;;  %vm1239_vm3 = vweird.f32 %v1850_v9 }
 0x176   :  { %1851 = vrsqrt.f32 %v1225_v3  ;;  %vm730_vm2 = vcmp.gt.f32.partialorder %v722_v18, 0.0  ;;  %v738_v28 = vmul.f32 0.2, %v722_v18  ;;  %vm1240_vm5 = vmor %vm1238_vm4, %vm1239_vm3  ;;  %vm1248_vm8 = vweird.f32 %v1225_v3 }
 0x177   :  { %v1234_v20 = vmul.f32 %v1850_v9, %v1233_v40  ;;  %v1139_v21 = vpop.xlane.xlu1 %1138  ;;  %v1176_v22 = vpop.xlane.xlu0 %1175 }
 0x178   :  { %v1194_v25 = vmul.f32 0.0625, %v1176_v22  ;;  %v746_v23 = vsel %vm730_vm2, %v722_v18, %v738_v28  ;;  %v2456_v14 = vmul.f32 0.0625, %v1139_v21 }
 0x179   :  { %v1235_v29 = vmul.f32 0.5, %v1234_v20  ;;  %754 = vst.msk [vmem:[%s2527_s3 + $0x38] sm:$0xff] %vm530_vm0, %v746_v23 }
 0x17a   :  { %v1210_v17 = vsub.f32 %v1194_v25, %v1202_v24  ;;  %v1203_v45 = vmul.f32 %v2456_v14, %v2456_v14 }
 0x17b   :  { %v1236_v32 = vsub.f32 1.5, %v1235_v29 }
 0x17c   :  { %v1852_v31 = vpop.eup %1851  ;;  %v1226_v30 = vadd.f32 1e-05, %v1210_v17 }
 0x17d   :  { %v1237_v35 = vmul.f32 %v1850_v9, %v1236_v32  ;;  %v1243_v36 = vmul.f32 %v1852_v31, %v1225_v3  ;;  %vm1249_vm7 = vweird.f32 %v1852_v31  ;;  %v1219_v32 = vsub.f32 %v2334_v19, %v2456_v14 }
 0x17e   :  { %1853 = vrsqrt.f32 %v1226_v30  ;;  %vm1250_vm9 = vmor %vm1248_vm8, %vm1249_vm7  ;;  %vm1258_vm12 = vweird.f32 %v1226_v30 }
 0x17f   :  { %v1241_v55 = vsel %vm1240_vm5, %v1850_v9, %v1237_v35  ;;  %v1244_v12 = vmul.f32 %v1852_v31, %v1243_v36  ;;  %v1179_v39 = vpop.xlane.xlu1 %1178  ;;  %v1142_v41 = vpop.xlane.xlu2 %1141 }
 0x180   :  { %v1312_v42 = vmul.f32 %v1241_v55, %v1216_v38  ;;  %v1195_v1 = vmul.f32 0.0625, %v1179_v39  ;;  %v2466_v54 = vmul.f32 0.0625, %v1142_v41 }
 0x181   :  { %v1245_v27 = vmul.f32 0.5, %v1244_v12 }
 0x182   :  { %vm1320_vm6 = vcmp.gt.f32.partialorder %v1312_v42, 0.0  ;;  %v1328_v44 = vmul.f32 0.2, %v1312_v42  ;;  %v1211_v50 = vsub.f32 %v1195_v1, %v1203_v45  ;;  %v1204_v2 = vmul.f32 %v2466_v54, %v2466_v54 }
 0x183   :  { %v1246_v51 = vsub.f32 1.5, %v1245_v27 }
 0x184   :  { %v1854_v52 = vpop.eup %1853  ;;  %v1336_v53 = vsel %vm1320_vm6, %v1312_v42, %v1328_v44  ;;  %v1227_v43 = vadd.f32 1e-05, %v1211_v50 }
 0x185   :  { %1741 = vst.msk [vmem:[%s2527_s3 + $0x40] sm:$0xff] %vm530_vm0, %v1336_v53  ;;  %v1247_v37 = vmul.f32 %v1852_v31, %v1246_v51  ;;  %v1253_v34 = vmul.f32 %v1854_v52, %v1226_v30  ;;  %vm1259_vm11 = vweird.f32 %v1854_v52 }
 0x186   :  { %1855 = vrsqrt.f32 %v1227_v43  ;;  %vm1260_vm13 = vmor %vm1258_vm12, %vm1259_vm11  ;;  %vm1268_vm1 = vweird.f32 %v1227_v43 }
 0x187   :  { %v1251_v59 = vsel %vm1250_vm9, %v1852_v31, %v1247_v37  ;;  %v1254_v4 = vmul.f32 %v1854_v52, %v1253_v34  ;;  %v1145_v0 = vpop.xlane.xlu0 %1144  ;;  %v1182_v47 = vpop.xlane.xlu2 %1181 }
 0x188   :  { %v1313_v48 = vmul.f32 %v1251_v59, %v1217_v57  ;;  %v1196_v49 = vmul.f32 0.0625, %v1182_v47  ;;  %v2476_v26 = vmul.f32 0.0625, %v1145_v0 }
 0x189   :  { %v1255_v61 = vmul.f32 0.5, %v1254_v4 }
 0x18a   :  { %vm1321_vm10 = vcmp.gt.f32.partialorder %v1313_v48, 0.0  ;;  %v1329_v8 = vmul.f32 0.2, %v1313_v48  ;;  %v1212_v6 = vsub.f32 %v1196_v49, %v1204_v2  ;;  %v1205_v22 = vmul.f32 %v2476_v26, %v2476_v26 }
 0x18b   :  { %v1256_v63 = vsub.f32 1.5, %v1255_v61 }
 0x18c   :  { %v1856_v15 = vpop.eup %1855  ;;  %v1337_v16 = vsel %vm1321_vm10, %v1313_v48, %v1329_v8  ;;  %v1228_v9 = vadd.f32 1e-05, %v1212_v6 }
 0x18d   :  { %1742 = vst.msk [vmem:[%s2527_s3 + $0x48] sm:$0xff] %vm530_vm0, %v1337_v16  ;;  %v1257_v58 = vmul.f32 %v1854_v52, %v1256_v63  ;;  %v1263_v62 = vmul.f32 %v1856_v15, %v1227_v43  ;;  %vm1269_vm15 = vweird.f32 %v1856_v15 }
 0x18e   :  { %1857 = vrsqrt.f32 %v1228_v9  ;;  %vm1270_vm2 = vmor %vm1268_vm1, %vm1269_vm15  ;;  %vm1278_vm5 = vweird.f32 %v1228_v9 }
 0x18f   :  { %v1261_v3 = vsel %vm1260_vm13, %v1854_v52, %v1257_v58  ;;  %v1264_v13 = vmul.f32 %v1856_v15, %v1263_v62  ;;  %v1148_v40 = vpop.xlane.xlu1 %1147  ;;  %v1185_v56 = vpop.xlane.xlu0 %1184  ;;  %v1220_v52 = vsub.f32 %v2342_v33, %v2466_v54  ;;  %v1221_v54 = vsub.f32 %v2350_v46, %v2476_v26 }
 0x190   :  { %v1314_v18 = vmul.f32 %v1261_v3, %v1218_v10  ;;  %v1197_v20 = vmul.f32 0.0625, %v1185_v56  ;;  %v2482_v17 = vmul.f32 0.0625, %v1148_v40 }
 0x191   :  { %v1265_v21 = vmul.f32 0.5, %v1264_v13 }
 0x192   :  { %vm1322_vm14 = vcmp.gt.f32.partialorder %v1314_v18, 0.0  ;;  %v1330_v24 = vmul.f32 0.2, %v1314_v18  ;;  %v1213_v28 = vsub.f32 %v1197_v20, %v1205_v22  ;;  %v1206_v12 = vmul.f32 %v2482_v17, %v2482_v17 }
 0x193   :  { %v1266_v25 = vsub.f32 1.5, %v1265_v21  ;;  %v1222_v40 = vsub.f32 %v2358_v60, %v2482_v17 }
 0x194   :  { %v1338_v29 = vsel %vm1322_vm14, %v1314_v18, %v1330_v24  ;;  %v1858_v5 = vpop.eup %1857  ;;  %v1229_v23 = vadd.f32 1e-05, %v1213_v28 }
 0x195   :  { %1743 = vst.msk [vmem:[%s2527_s3 + $0x50] sm:$0xff] %vm530_vm0, %v1338_v29  ;;  %v1267_v11 = vmul.f32 %v1856_v15, %v1266_v25  ;;  %v1273_v31 = vmul.f32 %v1858_v5, %v1228_v9  ;;  %vm1279_vm4 = vweird.f32 %v1858_v5 }
 0x196   :  { %1859 = vrsqrt.f32 %v1229_v23  ;;  %vm1280_vm6 = vmor %vm1278_vm5, %vm1279_vm4  ;;  %vm1288_vm9 = vweird.f32 %v1229_v23 }
 0x197   :  { %v1271_v30 = vsel %vm1270_vm2, %v1856_v15, %v1267_v11  ;;  %v1188_v35 = vpop.xlane.xlu1 %1187  ;;  %v1151_v36 = vpop.xlane.xlu2 %1150  ;;  %v1274_v55 = vmul.f32 %v1858_v5, %v1273_v31 }
 0x198   :  { %v1315_v38 = vmul.f32 %v1271_v30, %v1219_v32  ;;  %v1198_v39 = vmul.f32 0.0625, %v1188_v35  ;;  %v2492_v14 = vmul.f32 0.0625, %v1151_v36 }
 0x199   :  { %v1275_v42 = vmul.f32 0.5, %v1274_v55 }
 0x19a   :  { %vm1323_vm3 = vcmp.gt.f32.partialorder %v1315_v38, 0.0  ;;  %v1331_v41 = vmul.f32 0.2, %v1315_v38  ;;  %v1214_v45 = vsub.f32 %v1198_v39, %v1206_v12  ;;  %v1207_v34 = vmul.f32 %v2492_v14, %v2492_v14 }
 0x19b   :  { %v1276_v27 = vsub.f32 1.5, %v1275_v42  ;;  %v1223_v24 = vsub.f32 %v2366_v7, %v2492_v14 }
 0x19c   :  { %v1339_v1 = vsel %vm1323_vm3, %v1315_v38, %v1331_v41  ;;  %v1230_v19 = vadd.f32 1e-05, %v1214_v45  ;;  %v1860_v44 = vpop.eup %1859 }
 0x19d   :  { %1744 = vst.msk [vmem:[%s2527_s3 + $0x58] sm:$0xff] %vm530_vm0, %v1339_v1  ;;  %v1277_v50 = vmul.f32 %v1858_v5, %v1276_v27  ;;  %v1283_v51 = vmul.f32 %v1860_v44, %v1229_v23  ;;  %vm1289_vm8 = vweird.f32 %v1860_v44 }
 0x19e   :  { %1861 = vrsqrt.f32 %v1230_v19  ;;  %vm1290_vm10 = vmor %vm1288_vm9, %vm1289_vm8  ;;  %vm1298_vm13 = vweird.f32 %v1230_v19 }
 0x19f   :  { %v1191_v53 = vpop.xlane.xlu2 %1190  ;;  %v1281_v43 = vsel %vm1280_vm6, %v1858_v5, %v1277_v50  ;;  %v1284_v37 = vmul.f32 %v1860_v44, %v1283_v51 }
 0x1a0   :  { %v1199_v57 = vmul.f32 0.0625, %v1191_v53  ;;  %v1316_v59 = vmul.f32 %v1281_v43, %v1220_v52 }
 0x1a1   :  { %v1285_v4 = vmul.f32 0.5, %v1284_v37 }
 0x1a2   :  { %v1215_v0 = vsub.f32 %v1199_v57, %v1207_v34  ;;  %vm1324_vm7 = vcmp.gt.f32.partialorder %v1316_v59, 0.0  ;;  %v1332_v47 = vmul.f32 0.2, %v1316_v59 }
 0x1a3   :  { %v1286_v49 = vsub.f32 1.5, %v1285_v4 }
 0x1a4   :  { %v1862_v48 = vpop.eup %1861  ;;  %v1231_v61 = vadd.f32 1e-05, %v1215_v0  ;;  %v1340_v2 = vsel %vm1324_vm7, %v1316_v59, %v1332_v47 }
 0x1a5   :  { %v1293_v8 = vmul.f32 %v1862_v48, %v1230_v19  ;;  %1745 = vst.msk [vmem:[%s2527_s3 + $0x60] sm:$0xff] %vm530_vm0, %v1340_v2  ;;  %v1287_v33 = vmul.f32 %v1860_v44, %v1286_v49  ;;  %vm1299_vm12 = vweird.f32 %v1862_v48 }
 0x1a6   :  { %1863 = vrsqrt.f32 %v1231_v61  ;;  %vm1300_vm14 = vmor %vm1298_vm13, %vm1299_vm12  ;;  %vm1308_vm2 = vweird.f32 %v1231_v61 }
 0x1a7   :  { %v1294_v63 = vmul.f32 %v1862_v48, %v1293_v8  ;;  %v1291_v6 = vsel %vm1290_vm10, %v1860_v44, %v1287_v33 }
 0x1a8   :  { %v1317_v15 = vmul.f32 %v1291_v6, %v1221_v54 }
 0x1a9   :  { %v1295_v16 = vmul.f32 0.5, %v1294_v63 }
 0x1aa   :  { %vm1325_vm11 = vcmp.gt.f32.partialorder %v1317_v15, 0.0  ;;  %v1333_v58 = vmul.f32 0.2, %v1317_v15 }
 0x1ab   :  { %v1296_v62 = vsub.f32 1.5, %v1295_v16 }
 0x1ac   :  { %v1864_v9 = vpop.eup %1863  ;;  %v1341_v10 = vsel %vm1325_vm11, %v1317_v15, %v1333_v58 }
 0x1ad   :  { %v1297_v3 = vmul.f32 %v1862_v48, %v1296_v62  ;;  %v1303_v13 = vmul.f32 %v1864_v9, %v1231_v61  ;;  %1746 = vst.msk [vmem:[%s2527_s3 + $0x68] sm:$0xff] %vm530_vm0, %v1341_v10  ;;  %vm1309_vm1 = vweird.f32 %v1864_v9 }
 0x1ae   :  { %vm1310_vm3 = vmor %vm1308_vm2, %vm1309_vm1 }
 0x1af   :  { %v1301_v46 = vsel %vm1300_vm14, %v1862_v48, %v1297_v3  ;;  %v1304_v26 = vmul.f32 %v1864_v9, %v1303_v13 }
 0x1b0   :  { %v1318_v56 = vmul.f32 %v1301_v46, %v1222_v40 }
 0x1b1   :  { %v1305_v18 = vmul.f32 0.5, %v1304_v26 }
 0x1b2   :  { %vm1326_vm15 = vcmp.gt.f32.partialorder %v1318_v56, 0.0  ;;  %v1334_v20 = vmul.f32 0.2, %v1318_v56 }
 0x1b3   :  { %v1306_v21 = vsub.f32 1.5, %v1305_v18 }
 0x1b4   :  { %v1342_v22 = vsel %vm1326_vm15, %v1318_v56, %v1334_v20 }
 0x1b5   :  { %1747 = vst.msk [vmem:[%s2527_s3 + $0x70] sm:$0xff] %vm530_vm0, %v1342_v22  ;;  %v1307_v60 = vmul.f32 %v1864_v9, %v1306_v21 }
 0x1b7   :  { %v1311_v25 = vsel %vm1310_vm3, %v1864_v9, %v1307_v60 }
 0x1b8   :  { %v1319_v28 = vmul.f32 %v1311_v25, %v1223_v24 }
 0x1ba   :  { %vm1327_vm4 = vcmp.gt.f32.partialorder %v1319_v28, 0.0  ;;  %v1335_v29 = vmul.f32 0.2, %v1319_v28 }
 0x1bc   :  { %v1343_v17 = vsel %vm1327_vm4, %v1319_v28, %v1335_v29 }
 0x1bd   :  { %1748 = vst.msk [vmem:[%s2527_s3 + $0x78] sm:$0xff] %vm530_vm0, %v1343_v17 }

// kernel: discriminator_forward.8
= control target key start
LH: loop header
LB: loop body
LE: loop exit
PB: predicated region body
PF: predicated region fallthrough
CT: control target
= control target key end

     0   :  { %v4377_v8 = vmov 0   ;;  %vm1398_vm0 = vcmask 72704   ;;  %s6219_s0 = inlined_call_operand.vmem [shape: bf16[2,1024,9], index: 0, kind: input, shape index: {}]   ;;  %s6220_s2 = inlined_call_operand.vmem [shape: f32[128,1], index: 2, kind: input, shape index: {}]   ;;  %s6221_s1 = inlined_call_operand.vmem [shape: bf16[128,1024], index: 1, kind: input, shape index: {}]   ;;  %s6222_s3 = inlined_call_operand.vmem [shape: f32[2,128,9], index: 3, kind: output, shape index: {}]  }
   0x1   :  { %v4188_v0 = vld [vmem:[%s6219_s0 + $0x38] sm:$0xff]  ;;  %v4187_v4 = vld [vmem:[%s6219_s0 + $0x30] sm:$0xff]  ;;  %4310 = vset.pattern.permute.xlu0 %v4377_v8  ;;  %4311 = vset.pattern.permute.xlu1 %v4377_v8  ;;  %v4186_v9 = vld [vmem:[%s6219_s0 + $0x28] sm:$0xff] }
   0x2   :  { %v4196_v1 = vld [vmem:[%s6219_s0 + $0x78] sm:$0xff]  ;;  %1006 = vmatpush.bf16.msra.mxu0 %v4188_v0  ;;  %v4195_v5 = vld [vmem:[%s6219_s0 + $0x70] sm:$0xff]  ;;  %4312 = vset.pattern.permute.xlu2 %v4377_v8  ;;  %v4194_v10 = vld [vmem:[%s6219_s0 + $0x68] sm:$0xff] }
   0x3   :  { %v4204_v2 = vld [vmem:[%s6219_s0 + $0xb8] sm:$0xff]  ;;  %1055 = vmatpush.bf16.msra.mxu1 %v4196_v1  ;;  %v4203_v6 = vld [vmem:[%s6219_s0 + $0xb0] sm:$0xff]  ;;  %v4202_v11 = vld [vmem:[%s6219_s0 + $0xa8] sm:$0xff] }
   0x4   :  { %v4212_v3 = vld [vmem:[%s6219_s0 + $0xf8] sm:$0xff]  ;;  %1104 = vmatpush.bf16.msra.mxu2 %v4204_v2  ;;  %v4211_v7 = vld [vmem:[%s6219_s0 + $0xf0] sm:$0xff]  ;;  %v4210_v12 = vld [vmem:[%s6219_s0 + $0xe8] sm:$0xff] }
   0x5   :  { %1153 = vmatpush.bf16.msra.mxu3 %v4212_v3  ;;  %v4185_v13 = vld [vmem:[%s6219_s0 + $0x20] sm:$0xff]  ;;  %v4184_v17 = vld [vmem:[%s6219_s0 + $0x18] sm:$0xff]  ;;  %v4183_v22 = vld [vmem:[%s6219_s0 + $0x10] sm:$0xff] }
   0x6   :  { %1007 = vmatpush.bf16.msra.mxu0 %v4187_v4  ;;  %v4193_v14 = vld [vmem:[%s6219_s0 + $0x60] sm:$0xff]  ;;  %v4192_v18 = vld [vmem:[%s6219_s0 + $0x58] sm:$0xff]  ;;  %v4191_v23 = vld [vmem:[%s6219_s0 + $0x50] sm:$0xff] }
   0x7   :  { %1056 = vmatpush.bf16.msra.mxu1 %v4195_v5  ;;  %v4201_v15 = vld [vmem:[%s6219_s0 + $0xa0] sm:$0xff]  ;;  %v4200_v20 = vld [vmem:[%s6219_s0 + $0x98] sm:$0xff]  ;;  %v4199_v24 = vld [vmem:[%s6219_s0 + $0x90] sm:$0xff] }
   0x8   :  { %1105 = vmatpush.bf16.msra.mxu2 %v4203_v6  ;;  %v4209_v16 = vld [vmem:[%s6219_s0 + $0xe0] sm:$0xff]  ;;  %v4208_v21 = vld [vmem:[%s6219_s0 + $0xd8] sm:$0xff]  ;;  %v4207_v25 = vld [vmem:[%s6219_s0 + $0xd0] sm:$0xff] }
   0x9   :  { %1154 = vmatpush.bf16.msra.mxu3 %v4211_v7  ;;  %v78_v19 = vld [vmem:[%s6220_s2] sm:$0xff]  ;;  %v80_v26 = vld [vmem:[%s6220_s2 + $0x10] sm:$0xff]  ;;  %v79_v27 = vld [vmem:[%s6220_s2 + $0x8] sm:$0xff] }
   0xa   :  { %1008 = vmatpush.bf16.msra.mxu0 %v4186_v9  ;;  %224 = vperm.xlu0 %4310, %v78_v19   ;;  %v4182_v28 = vld [vmem:[%s6219_s0 + $0x8] sm:$0xff]  ;;  %v4181_v32 = vld [vmem:[%s6219_s0] sm:$0xff]  ;;  %v4236_v44 = vld [vmem:[%s6219_s0 + $0x1b8] sm:$0xff] }
   0xb   :  { %1057 = vmatpush.bf16.msra.mxu1 %v4194_v10  ;;  %234 = vperm.xlu1 %4311, %v80_v26   ;;  %v4190_v29 = vld [vmem:[%s6219_s0 + $0x48] sm:$0xff]  ;;  %v4189_v33 = vld [vmem:[%s6219_s0 + $0x40] sm:$0xff]  ;;  %v4220_v45 = vld [vmem:[%s6219_s0 + $0x138] sm:$0xff] }
   0xc   :  { %1106 = vmatpush.bf16.msra.mxu2 %v4202_v11  ;;  %v4198_v30 = vld [vmem:[%s6219_s0 + $0x88] sm:$0xff]  ;;  %v4197_v34 = vld [vmem:[%s6219_s0 + $0x80] sm:$0xff]  ;;  %v4244_v50 = vld [vmem:[%s6219_s0 + $0x1f8] sm:$0xff] }
   0xd   :  { %1155 = vmatpush.bf16.msra.mxu3 %v4210_v12  ;;  %v4206_v31 = vld [vmem:[%s6219_s0 + $0xc8] sm:$0xff]  ;;  %v4205_v35 = vld [vmem:[%s6219_s0 + $0xc0] sm:$0xff]  ;;  %v4228_v51 = vld [vmem:[%s6219_s0 + $0x178] sm:$0xff] }
   0xe   :  { %1009 = vmatpush.bf16.msra.mxu0 %v4185_v13  ;;  %v3207_v36 = vld [vmem:[%s6221_s1] sm:$0xf]  ;;  %v4117_v38 = vld [vmem:[%s6221_s1 + $0x4] sm:$0xf]  ;;  %v3215_v40 = vld [vmem:[%s6221_s1 + $0x8] sm:$0xf] }
   0xf   :  { %1058 = vmatpush.bf16.msra.mxu1 %v4193_v14  ;;  %v4121_v37 = vld [vmem:[%s6221_s1 + $0x1c] sm:$0xf0]  ;;  %v3209_v39 = vld [vmem:[%s6221_s1 + $0x20] sm:$0xf0]  ;;  %v4122_v41 = vld [vmem:[%s6221_s1 + $0x24] sm:$0xf0] }
  0x10   :  { %1107 = vmatpush.bf16.msra.mxu2 %v4201_v15  ;;  %v4118_v42 = vld [vmem:[%s6221_s1 + $0xc] sm:$0xf]  ;;  %v4533_v46 = vor.u32 %v4121_v37, %v3207_v36  ;;  %v4535_v47 = vor.u32 %v4117_v38, %v3209_v39  ;;  %v4537_v48 = vor.u32 %v4122_v41, %v3215_v40  ;;  %v4235_v52 = vld [vmem:[%s6219_s0 + $0x1b0] sm:$0xff]  ;;  %v81_v56 = vld [vmem:[%s6220_s2 + $0x18] sm:$0xff] }
  0x11   :  { %1156 = vmatpush.bf16.msra.mxu3 %v4209_v16  ;;  %v3217_v43 = vld [vmem:[%s6221_s1 + $0x28] sm:$0xf0]  ;;  %v4219_v53 = vld [vmem:[%s6219_s0 + $0x130] sm:$0xff]  ;;  %v3239_v61 = vld [vmem:[%s6221_s1 + $0x40] sm:$0xf] }
  0x12   :  { %1010 = vmatpush.bf16.msra.mxu0 %v4184_v17  ;;  %229 = vperm.xlu0 %4310, %v79_v27   ;;  %v4539_v49 = vor.u32 %v4118_v42, %v3217_v43  ;;  %v4243_v54 = vld [vmem:[%s6219_s0 + $0x1f0] sm:$0xff]  ;;  %v4234_v57 = vld [vmem:[%s6219_s0 + $0x1a8] sm:$0xff]  ;;  %v4129_v62 = vld [vmem:[%s6221_s1 + $0x5c] sm:$0xf0] }
  0x13   :  { %1059 = vmatpush.bf16.msra.mxu1 %v4192_v18  ;;  %v4227_v55 = vld [vmem:[%s6219_s0 + $0x170] sm:$0xff]  ;;  %v4218_v58 = vld [vmem:[%s6219_s0 + $0x128] sm:$0xff]  ;;  %239 = vperm.xlu1 %4311, %v81_v56   ;;  %v4125_v63 = vld [vmem:[%s6221_s1 + $0x44] sm:$0xf]  ;;  %v4602_v5 = vor.u32 %v4129_v62, %v3239_v61 }
  0x14   :  { %1108 = vmatpush.bf16.msra.mxu2 %v4200_v20  ;;  %v4242_v59 = vld [vmem:[%s6219_s0 + $0x1e8] sm:$0xff]  ;;  %v3241_v0 = vld [vmem:[%s6221_s1 + $0x60] sm:$0xf0]  ;;  %v84_v13 = vld [vmem:[%s6220_s2 + $0x30] sm:$0xff] }
  0x15   :  { %1157 = vmatpush.bf16.msra.mxu3 %v4208_v21  ;;  %v4226_v60 = vld [vmem:[%s6219_s0 + $0x168] sm:$0xff]  ;;  %v4604_v6 = vor.u32 %v4125_v63, %v3241_v0  ;;  %v4233_v9 = vld [vmem:[%s6219_s0 + $0x1a0] sm:$0xff]  ;;  %v4232_v26 = vld [vmem:[%s6219_s0 + $0x198] sm:$0xff] }
  0x16   :  { %1011 = vmatpush.bf16.msra.mxu0 %v4183_v22  ;;  %v3247_v1 = vld [vmem:[%s6221_s1 + $0x48] sm:$0xf]  ;;  %v4126_v3 = vld [vmem:[%s6221_s1 + $0x4c] sm:$0xf]  ;;  %v4217_v10 = vld [vmem:[%s6219_s0 + $0x120] sm:$0xff] }
  0x17   :  { %1060 = vmatpush.bf16.msra.mxu1 %v4191_v23  ;;  %v4130_v2 = vld [vmem:[%s6221_s1 + $0x64] sm:$0xf0]  ;;  %v3249_v4 = vld [vmem:[%s6221_s1 + $0x68] sm:$0xf0]  ;;  %v4241_v11 = vld [vmem:[%s6219_s0 + $0x1e0] sm:$0xff] }
  0x18   :  { %1109 = vmatpush.bf16.msra.mxu2 %v4199_v24  ;;  %v4606_v7 = vor.u32 %v4130_v2, %v3247_v1  ;;  %v4608_v8 = vor.u32 %v4126_v3, %v3249_v4  ;;  %v4225_v12 = vld [vmem:[%s6219_s0 + $0x160] sm:$0xff]  ;;  %v3279_v18 = vld [vmem:[%s6221_s1 + $0x88] sm:$0xf]  ;;  %v4134_v20 = vld [vmem:[%s6221_s1 + $0x8c] sm:$0xf] }
  0x19   :  { %1158 = vmatpush.bf16.msra.mxu3 %v4207_v25  ;;  %v3271_v14 = vld [vmem:[%s6221_s1 + $0x80] sm:$0xf]  ;;  %v4133_v16 = vld [vmem:[%s6221_s1 + $0x84] sm:$0xf]  ;;  %v4138_v19 = vld [vmem:[%s6221_s1 + $0xa4] sm:$0xf0] }
  0x1a   :  { %1012 = vmatpush.bf16.msra.mxu0 %v4182_v28  ;;  %254 = vperm.xlu0 %4310, %v84_v13   ;;  %v4137_v15 = vld [vmem:[%s6221_s1 + $0x9c] sm:$0xf0]  ;;  %v3273_v17 = vld [vmem:[%s6221_s1 + $0xa0] sm:$0xf0]  ;;  %v3281_v21 = vld [vmem:[%s6221_s1 + $0xa8] sm:$0xf0]  ;;  %v4657_v24 = vor.u32 %v4138_v19, %v3279_v18 }
  0x1b   :  { %1061 = vmatpush.bf16.msra.mxu1 %v4190_v29  ;;  %v4653_v22 = vor.u32 %v4137_v15, %v3271_v14  ;;  %v4655_v23 = vor.u32 %v4133_v16, %v3273_v17  ;;  %v4659_v25 = vor.u32 %v4134_v20, %v3281_v21  ;;  %v4216_v27 = vld [vmem:[%s6219_s0 + $0x118] sm:$0xff]  ;;  %v82_v29 = vld [vmem:[%s6220_s2 + $0x20] sm:$0xff]  ;;  %v3311_v36 = vld [vmem:[%s6221_s1 + $0xc8] sm:$0xf] }
  0x1c   :  { %1110 = vmatpush.bf16.msra.mxu2 %v4198_v30  ;;  %v4240_v28 = vld [vmem:[%s6219_s0 + $0x1d8] sm:$0xff]  ;;  %244 = vperm.xlu2 %4312, %v82_v29   ;;  %v83_v37 = vld [vmem:[%s6220_s2 + $0x28] sm:$0xff]  ;;  %v4153_v56 = vld [vmem:[%s6221_s1 + $0x11c] sm:$0xf0] }
  0x1d   :  { %1159 = vmatpush.bf16.msra.mxu3 %v4206_v31  ;;  %v85_v30 = vld [vmem:[%s6220_s2 + $0x38] sm:$0xff]  ;;  %v4146_v38 = vld [vmem:[%s6221_s1 + $0xe4] sm:$0xf0]  ;;  %v4142_v39 = vld [vmem:[%s6221_s1 + $0xcc] sm:$0xf] }
  0x1e   :  { %1013 = vmatpush.bf16.msra.mxu0 %v4181_v32  ;;  %v4224_v31 = vld [vmem:[%s6219_s0 + $0x158] sm:$0xff]  ;;  %259 = vperm.xlu1 %4311, %v85_v30   ;;  %v3303_v32 = vld [vmem:[%s6221_s1 + $0xc0] sm:$0xf]  ;;  %v3313_v40 = vld [vmem:[%s6221_s1 + $0xe8] sm:$0xf0]  ;;  %v4714_v43 = vor.u32 %v4146_v38, %v3311_v36 }
  0x1f   :  { %1062 = vmatpush.bf16.msra.mxu1 %v4189_v33  ;;  %v4145_v33 = vld [vmem:[%s6221_s1 + $0xdc] sm:$0xf0]  ;;  %v4150_v61 = vld [vmem:[%s6221_s1 + $0x10c] sm:$0xf]  ;;  %v4157_v15 = vld [vmem:[%s6221_s1 + $0x144] sm:$0xf] }
  0x20   :  { %1111 = vmatpush.bf16.msra.mxu2 %v4197_v34  ;;  %v4141_v34 = vld [vmem:[%s6221_s1 + $0xc4] sm:$0xf]  ;;  %v4710_v41 = vor.u32 %v4145_v33, %v3303_v32  ;;  %v3345_v62 = vld [vmem:[%s6221_s1 + $0x128] sm:$0xf0]  ;;  %v3367_v13 = vld [vmem:[%s6221_s1 + $0x140] sm:$0xf] }
  0x21   :  { %1160 = vmatpush.bf16.msra.mxu3 %v4205_v35  ;;  %1014 = vmatmul.bf16.vlgmr.msra.gmra.mxu0 %v4533_v46  ;;  %v3305_v35 = vld [vmem:[%s6221_s1 + $0xe0] sm:$0xf0]  ;;  %v4770_v2 = vor.u32 %v4150_v61, %v3345_v62  ;;  %v4230_v3 = vld [vmem:[%s6219_s0 + $0x188] sm:$0xff]  ;;  %v4161_v14 = vld [vmem:[%s6221_s1 + $0x15c] sm:$0xf0] }
  0x22   :  { %1202 = vmatpush.bf16.msrb.mxu0 %v4220_v45  ;;  %1063 = vmatmul.bf16.vlgmr.msra.gmra.mxu1 %v4535_v47  ;;  %v4712_v42 = vor.u32 %v4141_v34, %v3305_v35  ;;  %v4231_v45 = vld [vmem:[%s6219_s0 + $0x190] sm:$0xff]  ;;  %v4214_v4 = vld [vmem:[%s6219_s0 + $0x108] sm:$0xff]  ;;  %v3369_v16 = vld [vmem:[%s6221_s1 + $0x160] sm:$0xf0]  ;;  %v4818_v21 = vor.u32 %v4161_v14, %v3367_v13 }
  0x23   :  { %1112 = vmatmul.bf16.vlgmr.msra.gmra.mxu2 %v4537_v48  ;;  %1251 = vmatpush.bf16.msrb.mxu1 %v4228_v51  ;;  %v4239_v51 = vld [vmem:[%s6219_s0 + $0x1d0] sm:$0xff]  ;;  %v3375_v17 = vld [vmem:[%s6221_s1 + $0x148] sm:$0xf]  ;;  %v4158_v19 = vld [vmem:[%s6221_s1 + $0x14c] sm:$0xf] }
  0x24   :  { %1300 = vmatpush.bf16.msrb.mxu2 %v4236_v44  ;;  %1161 = vmatmul.bf16.vlgmr.msra.gmra.mxu3 %v4539_v49  ;;  %v4716_v44 = vor.u32 %v4142_v39, %v3313_v40  ;;  %v4162_v18 = vld [vmem:[%s6221_s1 + $0x164] sm:$0xf0]  ;;  %v3377_v20 = vld [vmem:[%s6221_s1 + $0x168] sm:$0xf0]  ;;  %v4229_v29 = vld [vmem:[%s6219_s0 + $0x180] sm:$0xff] }
  0x25   :  { %1349 = vmatpush.bf16.msrb.mxu3 %v4244_v50  ;;  %249 = vperm.xlu2 %4312, %v83_v37   ;;  %v4215_v50 = vld [vmem:[%s6219_s0 + $0x110] sm:$0xff]  ;;  %v4213_v30 = vld [vmem:[%s6219_s0 + $0x100] sm:$0xff]  ;;  %v91_v32 = vld [vmem:[%s6220_s2 + $0x68] sm:$0xff] }
  0x26   :  { %1203 = vmatpush.bf16.msrb.mxu0 %v4219_v53  ;;  %v4223_v53 = vld [vmem:[%s6219_s0 + $0x150] sm:$0xff]  ;;  %v4221_v33 = vld [vmem:[%s6219_s0 + $0x140] sm:$0xff]  ;;  %v89_v34 = vld [vmem:[%s6220_s2 + $0x58] sm:$0xff] }
  0x27   :  { %1252 = vmatpush.bf16.msrb.mxu1 %v4227_v55  ;;  %v3335_v55 = vld [vmem:[%s6221_s1 + $0x100] sm:$0xf]  ;;  %v4165_v37 = vld [vmem:[%s6221_s1 + $0x184] sm:$0xf]  ;;  %v3407_v39 = vld [vmem:[%s6221_s1 + $0x188] sm:$0xf] }
  0x28   :  { %1301 = vmatpush.bf16.msrb.mxu2 %v4235_v52  ;;  %v87_v52 = vld [vmem:[%s6220_s2 + $0x48] sm:$0xff]  ;;  %v4764_v63 = vor.u32 %v4153_v56, %v3335_v55  ;;  %v3399_v35 = vld [vmem:[%s6221_s1 + $0x180] sm:$0xf]  ;;  %v3401_v38 = vld [vmem:[%s6221_s1 + $0x1a0] sm:$0xf0] }
  0x29   :  { %1350 = vmatpush.bf16.msrb.mxu3 %v4243_v54  ;;  %v88_v54 = vld [vmem:[%s6220_s2 + $0x50] sm:$0xff]  ;;  %269 = vperm.xlu0 %4310, %v87_v52   ;;  %v4169_v36 = vld [vmem:[%s6221_s1 + $0x19c] sm:$0xf0]  ;;  %v4170_v40 = vld [vmem:[%s6221_s1 + $0x1a4] sm:$0xf0]  ;;  %v4874_v52 = vor.u32 %v4165_v37, %v3401_v38 }
  0x2a   :  { %1204 = vmatpush.bf16.msrb.mxu0 %v4218_v58  ;;  %274 = vperm.xlu1 %4311, %v88_v54   ;;  %v3337_v58 = vld [vmem:[%s6221_s1 + $0x120] sm:$0xf0]  ;;  %v4268_v55 = vld [vmem:[%s6219_s0 + $0x2b8] sm:$0xff]  ;;  %v4177_v61 = vld [vmem:[%s6221_s1 + $0x1dc] sm:$0xf0] }
  0x2b   :  { %1253 = vmatpush.bf16.msrb.mxu1 %v4226_v60  ;;  %v4154_v60 = vld [vmem:[%s6221_s1 + $0x124] sm:$0xf0]  ;;  %v4252_v56 = vld [vmem:[%s6219_s0 + $0x238] sm:$0xff]  ;;  %v4173_v62 = vld [vmem:[%s6221_s1 + $0x1c4] sm:$0xf] }
  0x2c   :  { %1302 = vmatpush.bf16.msrb.mxu2 %v4234_v57  ;;  %v4149_v57 = vld [vmem:[%s6221_s1 + $0x104] sm:$0xf]  ;;  %v3233_v37 = vld [vmem:[%s6221_s1 + $0x38] sm:$0xf0] }
  0x2d   :  { %1351 = vmatpush.bf16.msrb.mxu3 %v4242_v59  ;;  %v3343_v59 = vld [vmem:[%s6221_s1 + $0x108] sm:$0xf]  ;;  %v4766_v0 = vor.u32 %v4149_v57, %v3337_v58  ;;  %v4276_v57 = vld [vmem:[%s6219_s0 + $0x2f8] sm:$0xff] }
  0x2e   :  { %1205 = vmatpush.bf16.msrb.mxu0 %v4217_v10  ;;  %v4768_v1 = vor.u32 %v4154_v60, %v3343_v59  ;;  %v4222_v10 = vld [vmem:[%s6219_s0 + $0x148] sm:$0xff]  ;;  %v93_v58 = vld [vmem:[%s6220_s2 + $0x78] sm:$0xff]  ;;  %v3431_v60 = vld [vmem:[%s6221_s1 + $0x1c0] sm:$0xf] }
  0x2f   :  { %1254 = vmatpush.bf16.msrb.mxu1 %v4225_v12  ;;  %v90_v12 = vld [vmem:[%s6220_s2 + $0x60] sm:$0xff]  ;;  %v4260_v59 = vld [vmem:[%s6219_s0 + $0x278] sm:$0xff] }
  0x30   :  { %1303 = vmatpush.bf16.msrb.mxu2 %v4233_v9  ;;  %v4238_v9 = vld [vmem:[%s6219_s0 + $0x1c8] sm:$0xff] }
  0x31   :  { %1019 = vmatmul.bf16.gmra.mxu0 %v4602_v5  ;;  %1352 = vmatpush.bf16.msrb.mxu3 %v4241_v11  ;;  %v86_v11 = vld [vmem:[%s6220_s2 + $0x40] sm:$0xff] }
  0x32   :  { %1068 = vmatmul.bf16.gmra.mxu1 %v4604_v6  ;;  %1206 = vmatpush.bf16.msrb.mxu0 %v4216_v27  ;;  %v4822_v27 = vor.u32 %v4162_v18, %v3375_v17  ;;  %v4251_v17 = vld [vmem:[%s6219_s0 + $0x230] sm:$0xff] }
  0x33   :  { %1117 = vmatmul.bf16.gmra.mxu2 %v4606_v7  ;;  %1255 = vmatpush.bf16.msrb.mxu1 %v4224_v31  ;;  %v4237_v31 = vld [vmem:[%s6219_s0 + $0x1c0] sm:$0xff]  ;;  %v4275_v18 = vld [vmem:[%s6219_s0 + $0x2f0] sm:$0xff] }
  0x34   :  { %1166 = vmatmul.bf16.gmra.mxu3 %v4608_v8  ;;  %1304 = vmatpush.bf16.msrb.mxu2 %v4232_v26  ;;  %v4820_v26 = vor.u32 %v4157_v15, %v3369_v16  ;;  %v4267_v16 = vld [vmem:[%s6219_s0 + $0x2b0] sm:$0xff] }
  0x35   :  { %1353 = vmatpush.bf16.msrb.mxu3 %v4240_v28  ;;  %264 = vperm.xlu2 %4312, %v86_v11   ;;  %v4824_v28 = vor.u32 %v4158_v19, %v3377_v20  ;;  %v3441_v11 = vld [vmem:[%s6221_s1 + $0x1e8] sm:$0xf0]  ;;  %v92_v19 = vld [vmem:[%s6220_s2 + $0x70] sm:$0xff] }
  0x36   :  { %1207 = vmatpush.bf16.msrb.mxu0 %v4215_v50  ;;  %284 = vperm.xlu0 %4310, %v90_v12   ;;  %v3409_v50 = vld [vmem:[%s6221_s1 + $0x1a8] sm:$0xf0]  ;;  %v4923_v12 = vor.u32 %v4177_v61, %v3431_v60  ;;  %v4259_v20 = vld [vmem:[%s6219_s0 + $0x270] sm:$0xff] }
  0x37   :  { %1256 = vmatpush.bf16.msrb.mxu1 %v4223_v53  ;;  %289 = vperm.xlu1 %4311, %v91_v32   ;;  %v4876_v53 = vor.u32 %v4170_v40, %v3407_v39  ;;  %v4119_v32 = vld [vmem:[%s6221_s1 + $0x14] sm:$0xf]  ;;  %v4274_v60 = vld [vmem:[%s6219_s0 + $0x2e8] sm:$0xff] }
  0x38   :  { %1305 = vmatpush.bf16.msrb.mxu2 %v4231_v45  ;;  %v4166_v45 = vld [vmem:[%s6221_s1 + $0x18c] sm:$0xf] }
  0x39   :  { %1354 = vmatpush.bf16.msrb.mxu3 %v4239_v51  ;;  %v4872_v51 = vor.u32 %v4169_v36, %v3399_v35  ;;  %v4878_v54 = vor.u32 %v4166_v45, %v3409_v50  ;;  %v4124_v35 = vld [vmem:[%s6221_s1 + $0x34] sm:$0xf0]  ;;  %v4120_v36 = vld [vmem:[%s6221_s1 + $0x1c] sm:$0xf] }
  0x3a   :  { %1208 = vmatpush.bf16.msrb.mxu0 %v4214_v4  ;;  %v3439_v4 = vld [vmem:[%s6221_s1 + $0x1c8] sm:$0xf] }
  0x3b   :  { %1257 = vmatpush.bf16.msrb.mxu1 %v4222_v10  ;;  %v4174_v10 = vld [vmem:[%s6221_s1 + $0x1cc] sm:$0xf] }
  0x3c   :  { %1306 = vmatpush.bf16.msrb.mxu2 %v4230_v3  ;;  %v3433_v3 = vld [vmem:[%s6221_s1 + $0x1e0] sm:$0xf0]  ;;  %v4929_v15 = vor.u32 %v4174_v10, %v3441_v11 }
  0x3d   :  { %1355 = vmatpush.bf16.msrb.mxu3 %v4238_v9  ;;  %279 = vperm.xlu2 %4312, %v89_v34   ;;  %v4178_v9 = vld [vmem:[%s6221_s1 + $0x1e4] sm:$0xf0]  ;;  %v4925_v13 = vor.u32 %v4173_v62, %v3433_v3  ;;  %v3231_v34 = vld [vmem:[%s6221_s1 + $0x18] sm:$0xf] }
  0x3e   :  { %1209 = vmatpush.bf16.msrb.mxu0 %v4213_v30  ;;  %299 = vperm.xlu0 %4310, %v93_v58   ;;  %v4927_v14 = vor.u32 %v4178_v9, %v3439_v4  ;;  %6272 = vst [vmem:[#allocation4_spill] sm:$0xff] %v4929_v15  ;;  %v4123_v30 = vld [vmem:[%s6221_s1 + $0x2c] sm:$0xf0]  ;;  %v4980_v50 = vor.u32 %v4124_v35, %v3231_v34  ;;  %v4266_v58 = vld [vmem:[%s6219_s0 + $0x2a8] sm:$0xff]  ;;  %v4132_v34 = vld [vmem:[%s6221_s1 + $0x74] sm:$0xf0] }
  0x3f   :  { %1258 = vmatpush.bf16.msrb.mxu1 %v4221_v33  ;;  %6270 = vst [vmem:[#allocation2_spill] sm:$0xff] %v4925_v13  ;;  %v3225_v33 = vld [vmem:[%s6221_s1 + $0x30] sm:$0xf0]  ;;  %v4128_v35 = vld [vmem:[%s6221_s1 + $0x5c] sm:$0xf] }
  0x40   :  { %1307 = vmatpush.bf16.msrb.mxu2 %v4229_v29  ;;  %6271 = vst [vmem:[#allocation3_spill] sm:$0xff] %v4927_v14  ;;  %v3223_v29 = vld [vmem:[%s6221_s1 + $0x10] sm:$0xf]  ;;  %v4978_v39 = vor.u32 %v4119_v32, %v3225_v33  ;;  %v3257_v32 = vld [vmem:[%s6221_s1 + $0x70] sm:$0xf0] }
  0x41   :  { %1024 = vmatmul.bf16.gmra.mxu0 %v4653_v22  ;;  %1356 = vmatpush.bf16.msrb.mxu3 %v4237_v31  ;;  %v4976_v38 = vor.u32 %v4123_v30, %v3223_v29  ;;  %6276 = vst [vmem:[#allocation8_spill] sm:$0xff] %v4980_v50  ;;  %v4127_v30 = vld [vmem:[%s6221_s1 + $0x54] sm:$0xf]  ;;  %v3263_v33 = vld [vmem:[%s6221_s1 + $0x58] sm:$0xf] }
  0x42   :  { %1073 = vmatmul.bf16.gmra.mxu1 %v4655_v23  ;;  %2360 = vmatpush.bf16.msra.mxu0 %v4252_v56  ;;  %6275 = vst [vmem:[#allocation7_spill] sm:$0xff] %v4978_v39 }
  0x43   :  { %1122 = vmatmul.bf16.gmra.mxu2 %v4657_v24  ;;  %2409 = vmatpush.bf16.msra.mxu1 %v4260_v59  ;;  %6274 = vst [vmem:[#allocation6_spill] sm:$0xff] %v4976_v38  ;;  %v4250_v59 = vld [vmem:[%s6219_s0 + $0x228] sm:$0xff] }
  0x44   :  { %1171 = vmatmul.bf16.gmra.mxu3 %v4659_v25  ;;  %2458 = vmatpush.bf16.msra.mxu2 %v4268_v55  ;;  %v4982_v55 = vor.u32 %v4120_v36, %v3233_v37  ;;  %v3265_v36 = vld [vmem:[%s6221_s1 + $0x78] sm:$0xf0] }
  0x45   :  { %2507 = vmatpush.bf16.msra.mxu3 %v4276_v57  ;;  %294 = vperm.xlu2 %4312, %v92_v19   ;;  %v3255_v19 = vld [vmem:[%s6221_s1 + $0x50] sm:$0xf] }
  0x46   :  { %2361 = vmatpush.bf16.msra.mxu0 %v4251_v17  ;;  %6277 = vst [vmem:[#allocation9_spill] sm:$0xff] %v4982_v55  ;;  %v4258_v17 = vld [vmem:[%s6219_s0 + $0x268] sm:$0xff] }
  0x47   :  { %2410 = vmatpush.bf16.msra.mxu1 %v4259_v20  ;;  %v4131_v20 = vld [vmem:[%s6221_s1 + $0x6c] sm:$0xf0] }
  0x48   :  { %2459 = vmatpush.bf16.msra.mxu2 %v4267_v16 }
  0x49   :  { %2508 = vmatpush.bf16.msra.mxu3 %v4275_v18 }
  0x4a   :  { %2362 = vmatpush.bf16.msra.mxu0 %v4250_v59 }
  0x4b   :  { %2411 = vmatpush.bf16.msra.mxu1 %v4258_v17  ;;  %v4273_v17 = vld [vmem:[%s6219_s0 + $0x2e0] sm:$0xff] }
  0x4c   :  { %2460 = vmatpush.bf16.msra.mxu2 %v4266_v58 }
  0x4d   :  { %2509 = vmatpush.bf16.msra.mxu3 %v4274_v60  ;;  %v5036_v60 = vor.u32 %v4132_v34, %v3263_v33 }
  0x4f   :  { %6282 = vst [vmem:[#allocation14_spill] sm:$0xff] %v5036_v60 }
  0x51   :  { %1029 = vmatmul.bf16.gmra.mxu0 %v4710_v41  ;;  %2510 = vmatpush.bf16.msra.mxu3 %v4273_v17  ;;  %v3297_v17 = vld [vmem:[%s6221_s1 + $0xb8] sm:$0xf0] }
  0x52   :  { %1078 = vmatmul.bf16.gmra.mxu1 %v4712_v42 }
  0x53   :  { %1127 = vmatmul.bf16.gmra.mxu2 %v4714_v43 }
  0x54   :  { %1176 = vmatmul.bf16.gmra.mxu3 %v4716_v44 }
  0x61   :  { %1034 = vmatmul.bf16.gmra.mxu0 %v4764_v63 }
  0x62   :  { %1083 = vmatmul.bf16.gmra.mxu1 %v4766_v0 }
  0x63   :  { %1132 = vmatmul.bf16.gmra.mxu2 %v4768_v1 }
  0x64   :  { %1181 = vmatmul.bf16.gmra.mxu3 %v4770_v2 }
  0x71   :  { %1039 = vmatmul.bf16.gmra.mxu0 %v4818_v21 }
  0x72   :  { %1088 = vmatmul.bf16.gmra.mxu1 %v4820_v26 }
  0x73   :  { %1137 = vmatmul.bf16.gmra.mxu2 %v4822_v27 }
  0x74   :  { %1186 = vmatmul.bf16.gmra.mxu3 %v4824_v28 }
  0x7c   :  { %v4956_v31 = vpop.permute.xlu0 %224 }
  0x7d   :  { %6273 = vst [vmem:[#allocation5_spill] sm:$0xff] %v4956_v31  ;;  %v5012_v29 = vpop.permute.xlu1 %234 }
  0x7e   :  { %6279 = vst [vmem:[#allocation11_spill] sm:$0xff] %v5012_v29 }
  0x81   :  { %1044 = vmatmul.bf16.gmra.mxu0 %v4872_v51 }
  0x82   :  { %1093 = vmatmul.bf16.gmra.mxu1 %v4874_v52 }
  0x83   :  { %1142 = vmatmul.bf16.gmra.mxu2 %v4876_v53 }
  0x84   :  { %1191 = vmatmul.bf16.gmra.mxu3 %v4878_v54  ;;  %v4998_v61 = vpop.permute.xlu0 %229 }
  0x85   :  { %6278 = vst [vmem:[#allocation10_spill] sm:$0xff] %v4998_v61 }
  0x91   :  { %1049 = vmatmul.bf16.gmra.mxu0 %v4923_v12 }
  0x92   :  { %1098 = vmatmul.bf16.gmra.mxu1 %v4925_v13 }
  0x93   :  { %1147 = vmatmul.bf16.gmra.mxu2 %v4927_v14 }
  0x94   :  { %1196 = vmatmul.bf16.gmra.mxu3 %v4929_v15 }
  0x9e   :  { %v1015_v40 = vpop.f32.mrf.mxu0 }
  0x9f   :  { %v1064_v45 = vpop.f32.mrf.mxu1  ;;  %v1016_v56 = vadd.f32 %v1015_v40, %v4956_v31 }
  0xa1   :  { %v1065_v57 = vadd.f32 %v1064_v45, %v1016_v56  ;;  %1210 = vmatmul.bf16.vlgmr.msrb.gmra.mxu0 %v4976_v38  ;;  %v5032_v45 = vor.u32 %v4131_v20, %v3255_v19  ;;  %v5034_v56 = vor.u32 %v4127_v30, %v3257_v32 }
  0xa2   :  { %1259 = vmatmul.bf16.vlgmr.msrb.gmra.mxu1 %v4978_v39 }
  0xa3   :  { %1308 = vmatmul.bf16.vlgmr.msrb.gmra.mxu2 %v4980_v50  ;;  %6280 = vst [vmem:[#allocation12_spill] sm:$0xff] %v5032_v45 }
  0xa4   :  { %1357 = vmatmul.bf16.vlgmr.msrb.gmra.mxu3 %v4982_v55  ;;  %6281 = vst [vmem:[#allocation13_spill] sm:$0xff] %v5034_v56 }
  0xa6   :  { %v1113_v62 = vpop.f32.mrf.mxu2  ;;  %v1017_v9 = vpop.f32.mrf.mxu0 }
  0xa7   :  { %v1162_v3 = vpop.f32.mrf.mxu3  ;;  %v1114_v4 = vadd.f32 %v1113_v62, %v1065_v57  ;;  %v1066_v10 = vpop.f32.mrf.mxu1  ;;  %v1018_v11 = vadd.f32 %v1017_v9, %v4998_v61  ;;  %v5038_v62 = vor.u32 %v4128_v35, %v3265_v36  ;;  %v4257_v36 = vld [vmem:[%s6219_s0 + $0x260] sm:$0xff] }
  0xa8   :  { %2412 = vmatpush.bf16.msra.mxu1 %v4257_v36 }
  0xa9   :  { %v5001_v16 = vadd.f32 %v1162_v3, %v1114_v4  ;;  %v1067_v18 = vadd.f32 %v1066_v10, %v1018_v11  ;;  %6283 = vst [vmem:[#allocation15_spill] sm:$0xff] %v5038_v62  ;;  %v4265_v10 = vld [vmem:[%s6219_s0 + $0x2a0] sm:$0xff] }
  0xaa   :  { %v4249_v11 = vld [vmem:[%s6219_s0 + $0x220] sm:$0xff]  ;;  %2461 = vmatpush.bf16.msra.mxu2 %v4265_v10  ;;  %v4140_v10 = vld [vmem:[%s6221_s1 + $0xb4] sm:$0xf0] }
  0xab   :  { %2363 = vmatpush.bf16.msra.mxu0 %v4249_v11  ;;  %v4136_v11 = vld [vmem:[%s6221_s1 + $0x9c] sm:$0xf] }
  0xae   :  { %v1115_v37 = vpop.f32.mrf.mxu2  ;;  %v1020_v58 = vpop.f32.mrf.mxu0 }
  0xaf   :  { %v1164_v40 = vpop.f32.mrf.mxu3  ;;  %v1116_v57 = vadd.f32 %v1115_v37, %v1067_v18  ;;  %v1069_v59 = vpop.f32.mrf.mxu1  ;;  %v1021_v3 = vadd.f32 %v1020_v58, %v5012_v29 }
  0xb0   :  { %v5056_v18 = vpop.permute.xlu1 %239  ;;  %v5070_v58 = vpop.permute.xlu2 %244 }
  0xb1   :  { %v5041_v4 = vadd.f32 %v1164_v40, %v1116_v57  ;;  %v1070_v9 = vadd.f32 %v1069_v59, %v1021_v3  ;;  %1215 = vmatmul.bf16.gmra.mxu0 %v5032_v45  ;;  %6284 = vst [vmem:[#allocation16_spill] sm:$0xff] %v5056_v18  ;;  %v3287_v40 = vld [vmem:[%s6221_s1 + $0x90] sm:$0xf]  ;;  %v4135_v59 = vld [vmem:[%s6221_s1 + $0x94] sm:$0xf] }
  0xb2   :  { %1264 = vmatmul.bf16.gmra.mxu1 %v5034_v56  ;;  %v4139_v57 = vld [vmem:[%s6221_s1 + $0xac] sm:$0xf0]  ;;  %6285 = vst [vmem:[#allocation17_spill] sm:$0xff] %v5070_v58  ;;  %v3289_v3 = vld [vmem:[%s6221_s1 + $0xb0] sm:$0xf0] }
  0xb3   :  { %1313 = vmatmul.bf16.gmra.mxu2 %v5036_v60 }
  0xb4   :  { %1362 = vmatmul.bf16.gmra.mxu3 %v5038_v62  ;;  %v5096_v62 = vor.u32 %v4136_v11, %v3297_v17 }
  0xb6   :  { %v1118_v19 = vpop.f32.mrf.mxu2  ;;  %v1022_v32 = vpop.f32.mrf.mxu0  ;;  %6289 = vst [vmem:[#allocation21_spill] sm:$0xff] %v5096_v62 }
  0xb7   :  { %v1167_v20 = vpop.f32.mrf.mxu3  ;;  %v1119_v30 = vadd.f32 %v1118_v19, %v1070_v9  ;;  %v1071_v33 = vpop.f32.mrf.mxu1  ;;  %v1023_v34 = vadd.f32 %v1022_v32, %v5056_v18  ;;  %v3295_v9 = vld [vmem:[%s6221_s1 + $0x98] sm:$0xf]  ;;  %v5092_v32 = vor.u32 %v4135_v59, %v3289_v3 }
  0xb8   :  { %v5094_v18 = vor.u32 %v4140_v10, %v3295_v9 }
  0xb9   :  { %v5059_v35 = vadd.f32 %v1167_v20, %v1119_v30  ;;  %v1072_v37 = vadd.f32 %v1071_v33, %v1023_v34  ;;  %v5090_v30 = vor.u32 %v4139_v57, %v3287_v40  ;;  %6287 = vst [vmem:[#allocation19_spill] sm:$0xff] %v5092_v32  ;;  %v4248_v40 = vld [vmem:[%s6219_s0 + $0x218] sm:$0xff]  ;;  %v5114_v57 = vpop.permute.xlu2 %249 }
  0xba   :  { %6288 = vst [vmem:[#allocation20_spill] sm:$0xff] %v5094_v18  ;;  %2364 = vmatpush.bf16.msra.mxu0 %v4248_v40  ;;  %v3327_v40 = vld [vmem:[%s6221_s1 + $0xd8] sm:$0xf] }
  0xbb   :  { %6286 = vst [vmem:[#allocation18_spill] sm:$0xff] %v5090_v30 }
  0xbc   :  { %6290 = vst [vmem:[#allocation22_spill] sm:$0xff] %v5114_v57 }
  0xbe   :  { %v1120_v19 = vpop.f32.mrf.mxu2  ;;  %v1025_v34 = vpop.f32.mrf.mxu0 }
  0xbf   :  { %v1169_v20 = vpop.f32.mrf.mxu3  ;;  %v1121_v33 = vadd.f32 %v1120_v19, %v1072_v37  ;;  %v1074_v36 = vpop.f32.mrf.mxu1  ;;  %v1026_v60 = vadd.f32 %v1025_v34, %v5070_v58  ;;  %v4264_v37 = vld [vmem:[%s6219_s0 + $0x298] sm:$0xff]  ;;  %v3319_v34 = vld [vmem:[%s6221_s1 + $0xd0] sm:$0xf] }
  0xc0   :  { %2462 = vmatpush.bf16.msra.mxu2 %v4264_v37  ;;  %v3321_v37 = vld [vmem:[%s6221_s1 + $0xf0] sm:$0xf0] }
  0xc1   :  { %v5099_v56 = vadd.f32 %v1169_v20, %v1121_v33  ;;  %v1075_v45 = vadd.f32 %v1074_v36, %v1026_v60  ;;  %1220 = vmatmul.bf16.gmra.mxu0 %v5090_v30  ;;  %v4272_v60 = vld [vmem:[%s6219_s0 + $0x2d8] sm:$0xff]  ;;  %v4147_v36 = vld [vmem:[%s6221_s1 + $0xec] sm:$0xf0] }
  0xc2   :  { %1269 = vmatmul.bf16.gmra.mxu1 %v5092_v32  ;;  %2511 = vmatpush.bf16.msra.mxu3 %v4272_v60  ;;  %v4256_v20 = vld [vmem:[%s6219_s0 + $0x258] sm:$0xff] }
  0xc3   :  { %1318 = vmatmul.bf16.gmra.mxu2 %v5094_v18  ;;  %2413 = vmatpush.bf16.msra.mxu1 %v4256_v20  ;;  %v4148_v60 = vld [vmem:[%s6221_s1 + $0xf4] sm:$0xf0] }
  0xc4   :  { %1367 = vmatmul.bf16.gmra.mxu3 %v5096_v62  ;;  %v5152_v32 = vor.u32 %v4148_v60, %v3327_v40 }
  0xc6   :  { %v1123_v59 = vpop.f32.mrf.mxu2  ;;  %v1027_v10 = vpop.f32.mrf.mxu0  ;;  %6294 = vst [vmem:[#allocation26_spill] sm:$0xff] %v5152_v32 }
  0xc7   :  { %v1172_v3 = vpop.f32.mrf.mxu3  ;;  %v1124_v9 = vadd.f32 %v1123_v59, %v1075_v45  ;;  %v1076_v11 = vpop.f32.mrf.mxu1  ;;  %v1028_v17 = vadd.f32 %v1027_v10, %v5114_v57  ;;  %v4143_v45 = vld [vmem:[%s6221_s1 + $0xd4] sm:$0xf]  ;;  %v4144_v59 = vld [vmem:[%s6221_s1 + $0xdc] sm:$0xf] }
  0xc8   :  { %v5150_v57 = vor.u32 %v4143_v45, %v3321_v37 }
  0xc9   :  { %v5117_v19 = vadd.f32 %v1172_v3, %v1124_v9  ;;  %v1077_v33 = vadd.f32 %v1076_v11, %v1028_v17  ;;  %v3329_v3 = vld [vmem:[%s6221_s1 + $0xf8] sm:$0xf0]  ;;  %v5146_v9 = vpop.permute.xlu0 %254  ;;  %v5148_v17 = vor.u32 %v4147_v36, %v3319_v34  ;;  %v4247_v34 = vld [vmem:[%s6219_s0 + $0x210] sm:$0xff]  ;;  %v5172_v36 = vpop.permute.xlu1 %259 }
  0xca   :  { %6291 = vst [vmem:[#allocation23_spill] sm:$0xff] %v5146_v9  ;;  %v5154_v30 = vor.u32 %v4144_v59, %v3329_v3  ;;  %2365 = vmatpush.bf16.msra.mxu0 %v4247_v34  ;;  %v4255_v3 = vld [vmem:[%s6219_s0 + $0x250] sm:$0xff]  ;;  %v3359_v34 = vld [vmem:[%s6221_s1 + $0x118] sm:$0xf] }
  0xcb   :  { %6292 = vst [vmem:[#allocation24_spill] sm:$0xff] %v5148_v17  ;;  %2414 = vmatpush.bf16.msra.mxu1 %v4255_v3 }
  0xcc   :  { %6293 = vst [vmem:[#allocation25_spill] sm:$0xff] %v5150_v57 }
  0xcd   :  { %6295 = vst [vmem:[#allocation27_spill] sm:$0xff] %v5154_v30 }
  0xce   :  { %v1125_v10 = vpop.f32.mrf.mxu2  ;;  %v1030_v62 = vpop.f32.mrf.mxu0  ;;  %6296 = vst [vmem:[#allocation28_spill] sm:$0xff] %v5172_v36 }
  0xcf   :  { %v1174_v11 = vpop.f32.mrf.mxu3  ;;  %v1126_v20 = vadd.f32 %v1125_v10, %v1077_v33  ;;  %v1079_v18 = vpop.f32.mrf.mxu1  ;;  %v1031_v58 = vadd.f32 %v1030_v62, %v5146_v9  ;;  %v4263_v33 = vld [vmem:[%s6219_s0 + $0x290] sm:$0xff] }
  0xd0   :  { %v4271_v62 = vld [vmem:[%s6219_s0 + $0x2d0] sm:$0xff]  ;;  %2463 = vmatpush.bf16.msra.mxu2 %v4263_v33 }
  0xd1   :  { %v5157_v29 = vadd.f32 %v1174_v11, %v1126_v20  ;;  %1225 = vmatmul.bf16.gmra.mxu0 %v5148_v17  ;;  %v1080_v61 = vadd.f32 %v1079_v18, %v1031_v58  ;;  %2512 = vmatpush.bf16.msra.mxu3 %v4271_v62  ;;  %v3351_v11 = vld [vmem:[%s6221_s1 + $0x110] sm:$0xf]  ;;  %v3353_v33 = vld [vmem:[%s6221_s1 + $0x130] sm:$0xf0]  ;;  %v4156_v62 = vld [vmem:[%s6221_s1 + $0x134] sm:$0xf0] }
  0xd2   :  { %1274 = vmatmul.bf16.gmra.mxu1 %v5150_v57  ;;  %v4155_v20 = vld [vmem:[%s6221_s1 + $0x12c] sm:$0xf0]  ;;  %v5210_v57 = vor.u32 %v4156_v62, %v3359_v34 }
  0xd3   :  { %1323 = vmatmul.bf16.gmra.mxu2 %v5152_v32 }
  0xd4   :  { %1372 = vmatmul.bf16.gmra.mxu3 %v5154_v30  ;;  %6300 = vst [vmem:[#allocation32_spill] sm:$0xff] %v5210_v57 }
  0xd6   :  { %v1128_v18 = vpop.f32.mrf.mxu2  ;;  %v1032_v37 = vpop.f32.mrf.mxu0 }
  0xd7   :  { %v1177_v58 = vpop.f32.mrf.mxu3  ;;  %v1129_v45 = vadd.f32 %v1128_v18, %v1080_v61  ;;  %v1081_v40 = vpop.f32.mrf.mxu1  ;;  %v1033_v60 = vadd.f32 %v1032_v37, %v5172_v36  ;;  %v4151_v61 = vld [vmem:[%s6221_s1 + $0x114] sm:$0xf]  ;;  %v4152_v18 = vld [vmem:[%s6221_s1 + $0x11c] sm:$0xf] }
  0xd8   :  { %v5208_v36 = vor.u32 %v4151_v61, %v3353_v33 }
  0xd9   :  { %v5175_v59 = vadd.f32 %v1177_v58, %v1129_v45  ;;  %v1082_v10 = vadd.f32 %v1081_v40, %v1033_v60  ;;  %v3361_v58 = vld [vmem:[%s6221_s1 + $0x138] sm:$0xf0]  ;;  %v5204_v45 = vpop.permute.xlu2 %264  ;;  %v5206_v60 = vor.u32 %v4155_v20, %v3351_v11  ;;  %v4246_v11 = vld [vmem:[%s6219_s0 + $0x208] sm:$0xff]  ;;  %v5230_v20 = vpop.permute.xlu0 %269 }
  0xda   :  { %6297 = vst [vmem:[#allocation29_spill] sm:$0xff] %v5204_v45  ;;  %v5212_v17 = vor.u32 %v4152_v18, %v3361_v58  ;;  %2366 = vmatpush.bf16.msra.mxu0 %v4246_v11  ;;  %v4254_v58 = vld [vmem:[%s6219_s0 + $0x248] sm:$0xff]  ;;  %v3391_v11 = vld [vmem:[%s6221_s1 + $0x158] sm:$0xf] }
  0xdb   :  { %6298 = vst [vmem:[#allocation30_spill] sm:$0xff] %v5206_v60  ;;  %2415 = vmatpush.bf16.msra.mxu1 %v4254_v58 }
  0xdc   :  { %6299 = vst [vmem:[#allocation31_spill] sm:$0xff] %v5208_v36 }
  0xdd   :  { %6301 = vst [vmem:[#allocation33_spill] sm:$0xff] %v5212_v17 }
  0xde   :  { %v1130_v37 = vpop.f32.mrf.mxu2  ;;  %v1035_v30 = vpop.f32.mrf.mxu0  ;;  %6302 = vst [vmem:[#allocation34_spill] sm:$0xff] %v5230_v20 }
  0xdf   :  { %v1179_v40 = vpop.f32.mrf.mxu3  ;;  %v1131_v3 = vadd.f32 %v1130_v37, %v1082_v10  ;;  %v1084_v32 = vpop.f32.mrf.mxu1  ;;  %v1036_v9 = vadd.f32 %v1035_v30, %v5204_v45  ;;  %v4262_v10 = vld [vmem:[%s6219_s0 + $0x288] sm:$0xff] }
  0xe0   :  { %v4270_v30 = vld [vmem:[%s6219_s0 + $0x2c8] sm:$0xff]  ;;  %2464 = vmatpush.bf16.msra.mxu2 %v4262_v10  ;;  %v3385_v10 = vld [vmem:[%s6221_s1 + $0x170] sm:$0xf0] }
  0xe1   :  { %v5215_v55 = vadd.f32 %v1179_v40, %v1131_v3  ;;  %1230 = vmatmul.bf16.gmra.mxu0 %v5206_v60  ;;  %v1085_v50 = vadd.f32 %v1084_v32, %v1036_v9  ;;  %2513 = vmatpush.bf16.msra.mxu3 %v4270_v30  ;;  %v3383_v40 = vld [vmem:[%s6221_s1 + $0x150] sm:$0xf]  ;;  %v4164_v30 = vld [vmem:[%s6221_s1 + $0x174] sm:$0xf0] }
  0xe2   :  { %1279 = vmatmul.bf16.gmra.mxu1 %v5208_v36  ;;  %v4163_v3 = vld [vmem:[%s6221_s1 + $0x16c] sm:$0xf0]  ;;  %v5268_v36 = vor.u32 %v4164_v30, %v3391_v11 }
  0xe3   :  { %1328 = vmatmul.bf16.gmra.mxu2 %v5210_v57 }
  0xe4   :  { %1377 = vmatmul.bf16.gmra.mxu3 %v5212_v17  ;;  %6306 = vst [vmem:[#allocation38_spill] sm:$0xff] %v5268_v36 }
  0xe6   :  { %v1133_v32 = vpop.f32.mrf.mxu2  ;;  %v1037_v33 = vpop.f32.mrf.mxu0 }
  0xe7   :  { %v1182_v9 = vpop.f32.mrf.mxu3  ;;  %v1134_v61 = vadd.f32 %v1133_v32, %v1085_v50  ;;  %v1086_v34 = vpop.f32.mrf.mxu1  ;;  %v1038_v62 = vadd.f32 %v1037_v33, %v5230_v20  ;;  %v4159_v50 = vld [vmem:[%s6221_s1 + $0x154] sm:$0xf]  ;;  %v4160_v32 = vld [vmem:[%s6221_s1 + $0x15c] sm:$0xf] }
  0xe8   :  { %v5266_v20 = vor.u32 %v4159_v50, %v3385_v10 }
  0xe9   :  { %v5233_v18 = vadd.f32 %v1182_v9, %v1134_v61  ;;  %v1087_v37 = vadd.f32 %v1086_v34, %v1038_v62  ;;  %v3393_v9 = vld [vmem:[%s6221_s1 + $0x178] sm:$0xf0]  ;;  %v5262_v61 = vpop.permute.xlu1 %274  ;;  %v5264_v62 = vor.u32 %v4163_v3, %v3383_v40  ;;  %v4245_v40 = vld [vmem:[%s6219_s0 + $0x200] sm:$0xff]  ;;  %v5288_v3 = vpop.permute.xlu2 %279 }
  0xea   :  { %6303 = vst [vmem:[#allocation35_spill] sm:$0xff] %v5262_v61  ;;  %v5270_v60 = vor.u32 %v4160_v32, %v3393_v9  ;;  %2367 = vmatpush.bf16.msra.mxu0 %v4245_v40  ;;  %v4253_v9 = vld [vmem:[%s6219_s0 + $0x240] sm:$0xff]  ;;  %v3423_v40 = vld [vmem:[%s6221_s1 + $0x198] sm:$0xf] }
  0xeb   :  { %6304 = vst [vmem:[#allocation36_spill] sm:$0xff] %v5264_v62  ;;  %2416 = vmatpush.bf16.msra.mxu1 %v4253_v9 }
  0xec   :  { %6305 = vst [vmem:[#allocation37_spill] sm:$0xff] %v5266_v20 }
  0xed   :  { %6307 = vst [vmem:[#allocation39_spill] sm:$0xff] %v5270_v60 }
  0xee   :  { %v1135_v33 = vpop.f32.mrf.mxu2  ;;  %v1040_v17 = vpop.f32.mrf.mxu0  ;;  %6308 = vst [vmem:[#allocation40_spill] sm:$0xff] %v5288_v3 }
  0xef   :  { %v1184_v34 = vpop.f32.mrf.mxu3  ;;  %v1136_v58 = vadd.f32 %v1135_v33, %v1087_v37  ;;  %v1089_v57 = vpop.f32.mrf.mxu1  ;;  %v1041_v45 = vadd.f32 %v1040_v17, %v5262_v61  ;;  %v4261_v37 = vld [vmem:[%s6219_s0 + $0x280] sm:$0xff] }
  0xf0   :  { %v4269_v17 = vld [vmem:[%s6219_s0 + $0x2c0] sm:$0xff]  ;;  %2465 = vmatpush.bf16.msra.mxu2 %v4261_v37  ;;  %v3417_v37 = vld [vmem:[%s6221_s1 + $0x1b0] sm:$0xf0] }
  0xf1   :  { %v5273_v39 = vadd.f32 %v1184_v34, %v1136_v58  ;;  %1235 = vmatmul.bf16.gmra.mxu0 %v5264_v62  ;;  %v1090_v38 = vadd.f32 %v1089_v57, %v1041_v45  ;;  %2514 = vmatpush.bf16.msra.mxu3 %v4269_v17  ;;  %v3415_v34 = vld [vmem:[%s6221_s1 + $0x190] sm:$0xf]  ;;  %v4172_v17 = vld [vmem:[%s6221_s1 + $0x1b4] sm:$0xf0] }
  0xf2   :  { %1284 = vmatmul.bf16.gmra.mxu1 %v5266_v20  ;;  %v4171_v58 = vld [vmem:[%s6221_s1 + $0x1ac] sm:$0xf0]  ;;  %v5326_v20 = vor.u32 %v4172_v17, %v3423_v40 }
  0xf3   :  { %1333 = vmatmul.bf16.gmra.mxu2 %v5268_v36 }
  0xf4   :  { %1382 = vmatmul.bf16.gmra.mxu3 %v5270_v60  ;;  %6312 = vst [vmem:[#allocation44_spill] sm:$0xff] %v5326_v20 }
  0xf6   :  { %v1138_v57 = vpop.f32.mrf.mxu2  ;;  %v1042_v10 = vpop.f32.mrf.mxu0 }
  0xf7   :  { %v1187_v45 = vpop.f32.mrf.mxu3  ;;  %v1139_v50 = vadd.f32 %v1138_v57, %v1090_v38  ;;  %v1091_v11 = vpop.f32.mrf.mxu1  ;;  %v1043_v30 = vadd.f32 %v1042_v10, %v5288_v3  ;;  %v4167_v38 = vld [vmem:[%s6221_s1 + $0x194] sm:$0xf]  ;;  %v4168_v57 = vld [vmem:[%s6221_s1 + $0x19c] sm:$0xf] }
  0xf8   :  { %v5324_v3 = vor.u32 %v4167_v38, %v3417_v37 }
  0xf9   :  { %v5291_v32 = vadd.f32 %v1187_v45, %v1139_v50  ;;  %v1092_v33 = vadd.f32 %v1091_v11, %v1043_v30  ;;  %v3425_v45 = vld [vmem:[%s6221_s1 + $0x1b8] sm:$0xf0]  ;;  %v5320_v50 = vpop.permute.xlu0 %284  ;;  %v5322_v30 = vor.u32 %v4171_v58, %v3415_v34  ;;  %v5346_v58 = vpop.permute.xlu1 %289 }
  0xfa   :  { %6309 = vst [vmem:[#allocation41_spill] sm:$0xff] %v5320_v50  ;;  %v5328_v62 = vor.u32 %v4168_v57, %v3425_v45  ;;  %v4284_v34 = vld [vmem:[%s6219_s0 + $0x338] sm:$0xff] }
  0xfb   :  { %6310 = vst [vmem:[#allocation42_spill] sm:$0xff] %v5322_v30  ;;  %2556 = vmatpush.bf16.msrb.mxu0 %v4284_v34  ;;  %v4292_v45 = vld [vmem:[%s6219_s0 + $0x378] sm:$0xff] }
  0xfc   :  { %6311 = vst [vmem:[#allocation43_spill] sm:$0xff] %v5324_v3  ;;  %v3455_v34 = vld [vmem:[%s6221_s1 + $0x1d8] sm:$0xf]  ;;  %2605 = vmatpush.bf16.msrb.mxu1 %v4292_v45 }
  0xfd   :  { %6313 = vst [vmem:[#allocation45_spill] sm:$0xff] %v5328_v62 }
  0xfe   :  { %v1140_v10 = vpop.f32.mrf.mxu2  ;;  %v1045_v60 = vpop.f32.mrf.mxu0  ;;  %6314 = vst [vmem:[#allocation46_spill] sm:$0xff] %v5346_v58 }
  0xff   :  { %v1189_v11 = vpop.f32.mrf.mxu3  ;;  %v1141_v9 = vadd.f32 %v1140_v10, %v1092_v33  ;;  %v1094_v36 = vpop.f32.mrf.mxu1  ;;  %v1046_v61 = vadd.f32 %v1045_v60, %v5320_v50  ;;  %v4300_v33 = vld [vmem:[%s6219_s0 + $0x3b8] sm:$0xff] }
 0x100   :  { %v4308_v60 = vld [vmem:[%s6219_s0 + $0x3f8] sm:$0xff]  ;;  %2654 = vmatpush.bf16.msrb.mxu2 %v4300_v33  ;;  %v3449_v33 = vld [vmem:[%s6221_s1 + $0x1f0] sm:$0xf0] }
 0x101   :  { %v5331_v31 = vadd.f32 %v1189_v11, %v1141_v9  ;;  %1240 = vmatmul.bf16.gmra.mxu0 %v5322_v30  ;;  %v1095_v15 = vadd.f32 %v1094_v36, %v1046_v61  ;;  %2703 = vmatpush.bf16.msrb.mxu3 %v4308_v60  ;;  %v3447_v11 = vld [vmem:[%s6221_s1 + $0x1d0] sm:$0xf]  ;;  %v4180_v60 = vld [vmem:[%s6221_s1 + $0x1f4] sm:$0xf0] }
 0x102   :  { %1289 = vmatmul.bf16.gmra.mxu1 %v5324_v3  ;;  %v4179_v9 = vld [vmem:[%s6221_s1 + $0x1ec] sm:$0xf0]  ;;  %v5384_v3 = vor.u32 %v4180_v60, %v3455_v34 }
 0x103   :  { %1338 = vmatmul.bf16.gmra.mxu2 %v5326_v20 }
 0x104   :  { %1387 = vmatmul.bf16.gmra.mxu3 %v5328_v62  ;;  %6315 = vst [vmem:[#allocation47_spill] sm:$0xff] %v5384_v3 }
 0x106   :  { %v1143_v36 = vpop.f32.mrf.mxu2  ;;  %v1047_v37 = vpop.f32.mrf.mxu0 }
 0x107   :  { %v1192_v61 = vpop.f32.mrf.mxu3  ;;  %v1144_v38 = vadd.f32 %v1143_v36, %v1095_v15  ;;  %v1096_v40 = vpop.f32.mrf.mxu1  ;;  %v1048_v17 = vadd.f32 %v1047_v37, %v5346_v58  ;;  %v4175_v15 = vld [vmem:[%s6221_s1 + $0x1d4] sm:$0xf]  ;;  %v4176_v36 = vld [vmem:[%s6221_s1 + $0x1dc] sm:$0xf] }
 0x108   :  { %v5382_v58 = vor.u32 %v4175_v15, %v3449_v33 }
 0x109   :  { %v5349_v57 = vadd.f32 %v1192_v61, %v1144_v38  ;;  %v1097_v10 = vadd.f32 %v1096_v40, %v1048_v17  ;;  %v3457_v61 = vld [vmem:[%s6221_s1 + $0x1f8] sm:$0xf0]  ;;  %v5378_v38 = vpop.permute.xlu2 %294  ;;  %v5380_v17 = vor.u32 %v4179_v9, %v3447_v11  ;;  %v4283_v11 = vld [vmem:[%s6219_s0 + $0x330] sm:$0xff]  ;;  %v5404_v9 = vpop.permute.xlu0 %299 }
 0x10a   :  { %v5386_v30 = vor.u32 %v4176_v36, %v3457_v61  ;;  %2557 = vmatpush.bf16.msrb.mxu0 %v4283_v11  ;;  %v4291_v61 = vld [vmem:[%s6219_s0 + $0x370] sm:$0xff] }
 0x10b   :  { %2606 = vmatpush.bf16.msrb.mxu1 %v4291_v61 }
 0x10c   :  { %6316 = vst [vmem:[#allocation48_spill] sm:$0xff] %v5386_v30 }
 0x10e   :  { %v1145_v37 = vpop.f32.mrf.mxu2  ;;  %v1050_v62 = vpop.f32.mrf.mxu0 }
 0x10f   :  { %v1194_v40 = vpop.f32.mrf.mxu3  ;;  %v1146_v45 = vadd.f32 %v1145_v37, %v1097_v10  ;;  %v1099_v20 = vpop.f32.mrf.mxu1  ;;  %v1051_v50 = vadd.f32 %v1050_v62, %v5378_v38  ;;  %v4299_v10 = vld [vmem:[%s6219_s0 + $0x3b0] sm:$0xff] }
 0x110   :  { %v4307_v62 = vld [vmem:[%s6219_s0 + $0x3f0] sm:$0xff]  ;;  %2655 = vmatpush.bf16.msrb.mxu2 %v4299_v10 }
 0x111   :  { %v5389_v14 = vadd.f32 %v1194_v40, %v1146_v45  ;;  %1245 = vmatmul.bf16.gmra.mxu0 %v5380_v17  ;;  %v1100_v13 = vadd.f32 %v1099_v20, %v1051_v50  ;;  %2704 = vmatpush.bf16.msrb.mxu3 %v4307_v62  ;;  %v4298_v62 = vld [vmem:[%s6219_s0 + $0x3a8] sm:$0xff] }
 0x112   :  { %1294 = vmatmul.bf16.gmra.mxu1 %v5382_v58 }
 0x113   :  { %1343 = vmatmul.bf16.gmra.mxu2 %v5384_v3 }
 0x114   :  { %1392 = vmatmul.bf16.gmra.mxu3 %v5386_v30  ;;  %2656 = vmatpush.bf16.msrb.mxu2 %v4298_v62 }
 0x116   :  { %v1148_v20 = vpop.f32.mrf.mxu2  ;;  %v1052_v33 = vpop.f32.mrf.mxu0 }
 0x117   :  { %v1197_v50 = vpop.f32.mrf.mxu3  ;;  %v1149_v15 = vadd.f32 %v1148_v20, %v1100_v13  ;;  %v1101_v34 = vpop.f32.mrf.mxu1  ;;  %v1053_v60 = vadd.f32 %v1052_v33, %v5404_v9  ;;  %v4282_v20 = vld [vmem:[%s6219_s0 + $0x328] sm:$0xff] }
 0x118   :  { %2558 = vmatpush.bf16.msrb.mxu0 %v4282_v20 }
 0x119   :  { %v5407_v36 = vadd.f32 %v1197_v50, %v1149_v15  ;;  %v1102_v37 = vadd.f32 %v1101_v34, %v1053_v60  ;;  %v4290_v34 = vld [vmem:[%s6219_s0 + $0x368] sm:$0xff] }
 0x11a   :  { %2607 = vmatpush.bf16.msrb.mxu1 %v4290_v34  ;;  %v4289_v34 = vld [vmem:[%s6219_s0 + $0x360] sm:$0xff] }
 0x11e   :  { %v1150_v40 = vpop.f32.mrf.mxu2  ;;  %v1211_v30 = vpop.f32.mrf.mxu0  ;;  %2608 = vmatpush.bf16.msrb.mxu1 %v4289_v34 }
 0x11f   :  { %v1199_v45 = vpop.f32.mrf.mxu3  ;;  %v1151_v10 = vadd.f32 %v1150_v40, %v1102_v37  ;;  %v1260_v3 = vpop.f32.mrf.mxu1  ;;  %v1212_v13 = vadd.f32 %v1211_v30, %v5001_v16  ;;  %v4306_v16 = vld [vmem:[%s6219_s0 + $0x3e8] sm:$0xff] }
 0x120   :  { %2705 = vmatpush.bf16.msrb.mxu3 %v4306_v16 }
 0x121   :  { %v5412_v11 = vadd.f32 %v1199_v45, %v1151_v10  ;;  %2368 = vmatmul.bf16.vlgmr.msra.gmra.mxu0 %v4533_v46  ;;  %v1261_v30 = vadd.f32 %v1260_v3, %v1212_v13 }
 0x122   :  { %2417 = vmatmul.bf16.vlgmr.msra.gmra.mxu1 %v4535_v47 }
 0x123   :  { %2466 = vmatmul.bf16.vlgmr.msra.gmra.mxu2 %v4537_v48 }
 0x124   :  { %2515 = vmatmul.bf16.vlgmr.msra.gmra.mxu3 %v4539_v49 }
 0x126   :  { %v1309_v46 = vpop.f32.mrf.mxu2  ;;  %v1213_v49 = vpop.f32.mrf.mxu0 }
 0x127   :  { %v1358_v47 = vpop.f32.mrf.mxu3  ;;  %v1310_v48 = vadd.f32 %v1309_v46, %v1261_v30  ;;  %v1262_v50 = vpop.f32.mrf.mxu1  ;;  %v1214_v33 = vadd.f32 %v1213_v49, %v5041_v4  ;;  %v4297_v30 = vld [vmem:[%s6219_s0 + $0x3a0] sm:$0xff] }
 0x128   :  { %2657 = vmatpush.bf16.msrb.mxu2 %v4297_v30 }
 0x129   :  { %v5428_v15 = vadd.f32 %v1358_v47, %v1310_v48  ;;  %v1263_v60 = vadd.f32 %v1262_v50, %v1214_v33 }
 0x12b   :  { %v1399_v3 = vsel %vm1398_vm0, %v5428_v15, 0.0  ;;  %v1463_v13 = vmul.f32 %v5428_v15, %v5428_v15 }
 0x12c   :  { %1400 = vadd.xlane.f32.xlu1 %v1399_v3 }
 0x12d   :  { %v1479_v16 = vsel %vm1398_vm0, %v1463_v13, 0.0 }
 0x12e   :  { %v1311_v61 = vpop.f32.mrf.mxu2  ;;  %v1216_v45 = vpop.f32.mrf.mxu0 }
 0x12f   :  { %v1360_v37 = vpop.f32.mrf.mxu3  ;;  %v1312_v40 = vadd.f32 %v1311_v61, %v1263_v60  ;;  %v1265_v10 = vpop.f32.mrf.mxu1  ;;  %v1217_v4 = vadd.f32 %v1216_v45, %v5059_v35  ;;  %v4281_v35 = vld [vmem:[%s6219_s0 + $0x320] sm:$0xff] }
 0x130   :  { %2559 = vmatpush.bf16.msrb.mxu0 %v4281_v35 }
 0x131   :  { %v5438_v62 = vadd.f32 %v1360_v37, %v1312_v40  ;;  %2373 = vmatmul.bf16.gmra.mxu0 %v4602_v5  ;;  %v4305_v5 = vld [vmem:[%s6219_s0 + $0x3e0] sm:$0xff] }
 0x132   :  { %2422 = vmatmul.bf16.gmra.mxu1 %v4604_v6  ;;  %v1266_v6 = vadd.f32 %v1265_v10, %v1217_v4  ;;  %2706 = vmatpush.bf16.msrb.mxu3 %v4305_v5 }
 0x133   :  { %2471 = vmatmul.bf16.gmra.mxu2 %v4606_v7  ;;  %v1402_v20 = vsel %vm1398_vm0, %v5438_v62, 0.0  ;;  %v1464_v49 = vmul.f32 %v5438_v62, %v5438_v62 }
 0x134   :  { %2520 = vmatmul.bf16.gmra.mxu3 %v4608_v8  ;;  %1403 = vadd.xlane.f32.xlu2 %v1402_v20 }
 0x135   :  { %1480 = vadd.xlane.f32.xlu1 %v1479_v16  ;;  %v1482_v60 = vsel %vm1398_vm0, %v1464_v49, 0.0  ;;  %v4288_v49 = vld [vmem:[%s6219_s0 + $0x358] sm:$0xff] }
 0x136   :  { %v1314_v7 = vpop.f32.mrf.mxu2  ;;  %v1218_v47 = vpop.f32.mrf.mxu0  ;;  %2609 = vmatpush.bf16.msrb.mxu1 %v4288_v49 }
 0x137   :  { %v1363_v8 = vpop.f32.mrf.mxu3  ;;  %v1315_v46 = vadd.f32 %v1314_v7, %v1266_v6  ;;  %v1267_v48 = vpop.f32.mrf.mxu1  ;;  %v1219_v33 = vadd.f32 %v1218_v47, %v5099_v56 }
 0x139   :  { %v5459_v50 = vadd.f32 %v1363_v8, %v1315_v46  ;;  %v1268_v61 = vadd.f32 %v1267_v48, %v1219_v33 }
 0x13b   :  { %v1405_v3 = vsel %vm1398_vm0, %v5459_v50, 0.0  ;;  %v1465_v56 = vmul.f32 %v5459_v50, %v5459_v50 }
 0x13c   :  { %1406 = vadd.xlane.f32.xlu0 %v1405_v3  ;;  %1483 = vadd.xlane.f32.xlu2 %v1482_v60 }
 0x13d   :  { %v1485_v16 = vsel %vm1398_vm0, %v1465_v56, 0.0 }
 0x13e   :  { %v1316_v37 = vpop.f32.mrf.mxu2  ;;  %v1221_v10 = vpop.f32.mrf.mxu0 }
 0x13f   :  { %v1365_v40 = vpop.f32.mrf.mxu3  ;;  %v1317_v45 = vadd.f32 %v1316_v37, %v1268_v61  ;;  %v1270_v13 = vpop.f32.mrf.mxu1  ;;  %v1222_v20 = vadd.f32 %v1221_v10, %v5117_v19  ;;  %v4296_v19 = vld [vmem:[%s6219_s0 + $0x398] sm:$0xff] }
 0x140   :  { %2658 = vmatpush.bf16.msrb.mxu2 %v4296_v19 }
 0x141   :  { %v5470_v4 = vadd.f32 %v1365_v40, %v1317_v45  ;;  %2378 = vmatmul.bf16.gmra.mxu0 %v4653_v22  ;;  %v4280_v22 = vld [vmem:[%s6219_s0 + $0x318] sm:$0xff] }
 0x142   :  { %2427 = vmatmul.bf16.gmra.mxu1 %v4655_v23  ;;  %v4304_v23 = vld [vmem:[%s6219_s0 + $0x3d8] sm:$0xff]  ;;  %2560 = vmatpush.bf16.msrb.mxu0 %v4280_v22 }
 0x143   :  { %2476 = vmatmul.bf16.gmra.mxu2 %v4657_v24  ;;  %v1408_v30 = vsel %vm1398_vm0, %v5470_v4, 0.0  ;;  %v1466_v35 = vmul.f32 %v5470_v4, %v5470_v4  ;;  %v1271_v24 = vadd.f32 %v1270_v13, %v1222_v20  ;;  %2707 = vmatpush.bf16.msrb.mxu3 %v4304_v23  ;;  %v4295_v20 = vld [vmem:[%s6219_s0 + $0x390] sm:$0xff] }
 0x144   :  { %2525 = vmatmul.bf16.gmra.mxu3 %v4659_v25  ;;  %1486 = vadd.xlane.f32.xlu0 %v1485_v16  ;;  %v4279_v16 = vld [vmem:[%s6219_s0 + $0x310] sm:$0xff] }
 0x145   :  { %1409 = vadd.xlane.f32.xlu2 %v1408_v30  ;;  %v1488_v25 = vsel %vm1398_vm0, %v1466_v35, 0.0  ;;  %2659 = vmatpush.bf16.msrb.mxu2 %v4295_v20 }
 0x146   :  { %v1319_v5 = vpop.f32.mrf.mxu2  ;;  %1489 = vadd.xlane.f32.xlu1 %v1488_v25  ;;  %v1223_v8 = vpop.f32.mrf.mxu0  ;;  %2561 = vmatpush.bf16.msrb.mxu0 %v4279_v16  ;;  %v4287_v25 = vld [vmem:[%s6219_s0 + $0x350] sm:$0xff]  ;;  %v4286_v16 = vld [vmem:[%s6219_s0 + $0x348] sm:$0xff] }
 0x147   :  { %v1368_v6 = vpop.f32.mrf.mxu3  ;;  %v1320_v7 = vadd.f32 %v1319_v5, %v1271_v24  ;;  %v1272_v46 = vpop.f32.mrf.mxu1  ;;  %v1224_v48 = vadd.f32 %v1223_v8, %v5157_v29  ;;  %2610 = vmatpush.bf16.msrb.mxu1 %v4287_v25 }
 0x149   :  { %v5492_v47 = vadd.f32 %v1368_v6, %v1320_v7  ;;  %v1273_v34 = vadd.f32 %v1272_v46, %v1224_v48 }
 0x14b   :  { %v1467_v33 = vmul.f32 %v5492_v47, %v5492_v47  ;;  %v1411_v60 = vsel %vm1398_vm0, %v5492_v47, 0.0  ;;  %2611 = vmatpush.bf16.msrb.mxu1 %v4286_v16 }
 0x14d   :  { %v1491_v3 = vsel %vm1398_vm0, %v1467_v33, 0.0 }
 0x14e   :  { %v1321_v61 = vpop.f32.mrf.mxu2  ;;  %1492 = vadd.xlane.f32.xlu2 %v1491_v3  ;;  %1412 = vadd.xlane.f32.xlu1 %v1411_v60  ;;  %v1226_v29 = vpop.f32.mrf.mxu0 }
 0x14f   :  { %v1370_v37 = vpop.f32.mrf.mxu3  ;;  %v1322_v40 = vadd.f32 %v1321_v61, %v1273_v34  ;;  %v1275_v45 = vpop.f32.mrf.mxu1  ;;  %v1227_v13 = vadd.f32 %v1226_v29, %v5175_v59  ;;  %v4294_v61 = vld [vmem:[%s6219_s0 + $0x388] sm:$0xff] }
 0x150   :  { %2660 = vmatpush.bf16.msrb.mxu2 %v4294_v61 }
 0x151   :  { %v5503_v10 = vadd.f32 %v1370_v37, %v1322_v40  ;;  %2383 = vmatmul.bf16.gmra.mxu0 %v4710_v41  ;;  %v4303_v41 = vld [vmem:[%s6219_s0 + $0x3d0] sm:$0xff]  ;;  %v4278_v37 = vld [vmem:[%s6219_s0 + $0x308] sm:$0xff] }
 0x152   :  { %2432 = vmatmul.bf16.gmra.mxu1 %v4712_v42  ;;  %v1276_v42 = vadd.f32 %v1275_v45, %v1227_v13  ;;  %2708 = vmatpush.bf16.msrb.mxu3 %v4303_v41 }
 0x153   :  { %2481 = vmatmul.bf16.gmra.mxu2 %v4714_v43  ;;  %v1468_v56 = vmul.f32 %v5503_v10, %v5503_v10  ;;  %2562 = vmatpush.bf16.msrb.mxu0 %v4278_v37 }
 0x154   :  { %2530 = vmatmul.bf16.gmra.mxu3 %v4716_v44  ;;  %v1414_v44 = vsel %vm1398_vm0, %v5503_v10, 0.0 }
 0x155   :  { %v1494_v43 = vsel %vm1398_vm0, %v1468_v56, 0.0 }
 0x156   :  { %v1324_v59 = vpop.f32.mrf.mxu2  ;;  %1495 = vadd.xlane.f32.xlu0 %v1494_v43  ;;  %1415 = vadd.xlane.f32.xlu2 %v1414_v44  ;;  %v1228_v19 = vpop.f32.mrf.mxu0 }
 0x157   :  { %v1373_v30 = vpop.f32.mrf.mxu3  ;;  %v1325_v35 = vadd.f32 %v1324_v59, %v1276_v42  ;;  %v1277_v22 = vpop.f32.mrf.mxu1  ;;  %v1229_v24 = vadd.f32 %v1228_v19, %v5215_v55 }
 0x159   :  { %v5524_v23 = vadd.f32 %v1373_v30, %v1325_v35  ;;  %v1278_v6 = vadd.f32 %v1277_v22, %v1229_v24 }
 0x15b   :  { %v1469_v5 = vmul.f32 %v5524_v23, %v5524_v23  ;;  %v1417_v7 = vsel %vm1398_vm0, %v5524_v23, 0.0 }
 0x15d   :  { %v1497_v8 = vsel %vm1398_vm0, %v1469_v5, 0.0  ;;  %v4293_v5 = vld [vmem:[%s6219_s0 + $0x380] sm:$0xff] }
 0x15e   :  { %v1326_v46 = vpop.f32.mrf.mxu2  ;;  %1418 = vadd.xlane.f32.xlu0 %v1417_v7  ;;  %1498 = vadd.xlane.f32.xlu1 %v1497_v8  ;;  %v1231_v55 = vpop.f32.mrf.mxu0 }
 0x15f   :  { %v1375_v48 = vpop.f32.mrf.mxu3  ;;  %v1327_v49 = vadd.f32 %v1326_v46, %v1278_v6  ;;  %v1280_v33 = vpop.f32.mrf.mxu1  ;;  %v1232_v3 = vadd.f32 %v1231_v55, %v5233_v18  ;;  %v4277_v6 = vld [vmem:[%s6219_s0 + $0x300] sm:$0xff]  ;;  %2661 = vmatpush.bf16.msrb.mxu2 %v4293_v5 }
 0x160   :  { %2563 = vmatpush.bf16.msrb.mxu0 %v4277_v6  ;;  %v6317_v5 = vld [vmem:[#allocation2_spill] sm:$0xff]  ;;  %v6318_v6 = vld [vmem:[#allocation3_spill] sm:$0xff] }
 0x161   :  { %v5535_v34 = vadd.f32 %v1375_v48, %v1327_v49  ;;  %2388 = vmatmul.bf16.gmra.mxu0 %v4764_v63  ;;  %v4302_v63 = vld [vmem:[%s6219_s0 + $0x3c8] sm:$0xff] }
 0x162   :  { %2437 = vmatmul.bf16.gmra.mxu1 %v4766_v0  ;;  %v1281_v0 = vadd.f32 %v1280_v33, %v1232_v3  ;;  %2709 = vmatpush.bf16.msrb.mxu3 %v4302_v63  ;;  %v4285_v33 = vld [vmem:[%s6219_s0 + $0x340] sm:$0xff] }
 0x163   :  { %2486 = vmatmul.bf16.gmra.mxu2 %v4768_v1  ;;  %v1470_v60 = vmul.f32 %v5535_v34, %v5535_v34  ;;  %2612 = vmatpush.bf16.msrb.mxu1 %v4285_v33 }
 0x164   :  { %2535 = vmatmul.bf16.gmra.mxu3 %v4770_v2  ;;  %v1420_v2 = vsel %vm1398_vm0, %v5535_v34, 0.0 }
 0x165   :  { %v1500_v1 = vsel %vm1398_vm0, %v1470_v60, 0.0 }
 0x166   :  { %v1329_v18 = vpop.f32.mrf.mxu2  ;;  %1501 = vadd.xlane.f32.xlu2 %v1500_v1  ;;  %1421 = vadd.xlane.f32.xlu1 %v1420_v2  ;;  %v1233_v45 = vpop.f32.mrf.mxu0 }
 0x167   :  { %v1378_v40 = vpop.f32.mrf.mxu3  ;;  %v1330_v29 = vadd.f32 %v1329_v18, %v1281_v0  ;;  %v1282_v13 = vpop.f32.mrf.mxu1  ;;  %v1234_v20 = vadd.f32 %v1233_v45, %v5273_v39 }
 0x169   :  { %v5556_v56 = vadd.f32 %v1378_v40, %v1330_v29  ;;  %v1283_v42 = vadd.f32 %v1282_v13, %v1234_v20 }
 0x16b   :  { %v1471_v41 = vmul.f32 %v5556_v56, %v5556_v56  ;;  %v1423_v44 = vsel %vm1398_vm0, %v5556_v56, 0.0 }
 0x16d   :  { %v1503_v43 = vsel %vm1398_vm0, %v1471_v41, 0.0 }
 0x16e   :  { %v1331_v59 = vpop.f32.mrf.mxu2  ;;  %1504 = vadd.xlane.f32.xlu0 %v1503_v43  ;;  %1424 = vadd.xlane.f32.xlu2 %v1423_v44  ;;  %v1236_v39 = vpop.f32.mrf.mxu0 }
 0x16f   :  { %v1380_v30 = vpop.f32.mrf.mxu3  ;;  %v1332_v35 = vadd.f32 %v1331_v59, %v1283_v42  ;;  %v1285_v19 = vpop.f32.mrf.mxu1  ;;  %v1237_v24 = vadd.f32 %v1236_v39, %v5291_v32 }
 0x171   :  { %v5567_v22 = vadd.f32 %v1380_v30, %v1332_v35  ;;  %2393 = vmatmul.bf16.gmra.mxu0 %v4818_v21  ;;  %v4301_v21 = vld [vmem:[%s6219_s0 + $0x3c0] sm:$0xff] }
 0x172   :  { %2442 = vmatmul.bf16.gmra.mxu1 %v4820_v26  ;;  %v1286_v26 = vadd.f32 %v1285_v19, %v1237_v24  ;;  %2710 = vmatpush.bf16.msrb.mxu3 %v4301_v21  ;;  %v6319_v21 = vld [vmem:[#allocation4_spill] sm:$0xff] }
 0x173   :  { %2491 = vmatmul.bf16.gmra.mxu2 %v4822_v27  ;;  %v1472_v25 = vmul.f32 %v5567_v22, %v5567_v22  ;;  %v1426_v27 = vsel %vm1398_vm0, %v5567_v22, 0.0 }
 0x174   :  { %2540 = vmatmul.bf16.gmra.mxu3 %v4824_v28 }
 0x175   :  { %v1506_v28 = vsel %vm1398_vm0, %v1472_v25, 0.0 }
 0x176   :  { %v1334_v32 = vpop.f32.mrf.mxu2  ;;  %1427 = vadd.xlane.f32.xlu0 %v1426_v27  ;;  %1507 = vadd.xlane.f32.xlu1 %v1506_v28  ;;  %v1238_v46 = vpop.f32.mrf.mxu0 }
 0x177   :  { %v1383_v7 = vpop.f32.mrf.mxu3  ;;  %v1335_v8 = vadd.f32 %v1334_v32, %v1286_v26  ;;  %v1287_v48 = vpop.f32.mrf.mxu1  ;;  %v1239_v55 = vadd.f32 %v1238_v46, %v5331_v31 }
 0x179   :  { %v5588_v49 = vadd.f32 %v1383_v7, %v1335_v8  ;;  %v1288_v60 = vadd.f32 %v1287_v48, %v1239_v55 }
 0x17b   :  { %v1473_v3 = vmul.f32 %v5588_v49, %v5588_v49  ;;  %v1429_v37 = vsel %vm1398_vm0, %v5588_v49, 0.0 }
 0x17d   :  { %v1509_v61 = vsel %vm1398_vm0, %v1473_v3, 0.0 }
 0x17e   :  { %v1336_v63 = vpop.f32.mrf.mxu2  ;;  %1510 = vadd.xlane.f32.xlu2 %v1509_v61  ;;  %1430 = vadd.xlane.f32.xlu1 %v1429_v37  ;;  %v1241_v31 = vpop.f32.mrf.mxu0 }
 0x17f   :  { %v1385_v0 = vpop.f32.mrf.mxu3  ;;  %v1337_v1 = vadd.f32 %v1336_v63, %v1288_v60  ;;  %v1290_v2 = vpop.f32.mrf.mxu1  ;;  %v1242_v40 = vadd.f32 %v1241_v31, %v5349_v57 }
 0x181   :  { %v5599_v18 = vadd.f32 %v1385_v0, %v1337_v1  ;;  %2398 = vmatmul.bf16.gmra.mxu0 %v4872_v51  ;;  %v1291_v45 = vadd.f32 %v1290_v2, %v1242_v40  ;;  %v6320_v2 = vld [vmem:[#allocation5_spill] sm:$0xff] }
 0x182   :  { %2447 = vmatmul.bf16.gmra.mxu1 %v4874_v52 }
 0x183   :  { %2496 = vmatmul.bf16.gmra.mxu2 %v4876_v53  ;;  %v1474_v29 = vmul.f32 %v5599_v18, %v5599_v18  ;;  %v1432_v20 = vsel %vm1398_vm0, %v5599_v18, 0.0 }
 0x184   :  { %2545 = vmatmul.bf16.gmra.mxu3 %v4878_v54 }
 0x185   :  { %v1512_v13 = vsel %vm1398_vm0, %v1474_v29, 0.0 }
 0x186   :  { %v1339_v16 = vpop.f32.mrf.mxu2  ;;  %1513 = vadd.xlane.f32.xlu0 %v1512_v13  ;;  %1433 = vadd.xlane.f32.xlu2 %v1432_v20  ;;  %v1243_v57 = vpop.f32.mrf.mxu0  ;;  %v6321_v13 = vld [vmem:[#allocation6_spill] sm:$0xff]  ;;  %v6322_v20 = vld [vmem:[#allocation7_spill] sm:$0xff] }
 0x187   :  { %v1388_v41 = vpop.f32.mrf.mxu3  ;;  %v1340_v51 = vadd.f32 %v1339_v16, %v1291_v45  ;;  %v1292_v52 = vpop.f32.mrf.mxu1  ;;  %v1244_v53 = vadd.f32 %v1243_v57, %v5389_v14  ;;  %v6323_v16 = vld [vmem:[#allocation8_spill] sm:$0xff] }
 0x189   :  { %v5611_v42 = vadd.f32 %v1388_v41, %v1340_v51  ;;  %v1293_v43 = vadd.f32 %v1292_v52, %v1244_v53  ;;  %v6324_v41 = vld [vmem:[#allocation9_spill] sm:$0xff] }
 0x18b   :  { %v1475_v54 = vmul.f32 %v5611_v42, %v5611_v42  ;;  %v1435_v44 = vsel %vm1398_vm0, %v5611_v42, 0.0 }
 0x18d   :  { %v1515_v59 = vsel %vm1398_vm0, %v1475_v54, 0.0 }
 0x18e   :  { %v1341_v30 = vpop.f32.mrf.mxu2  ;;  %1436 = vadd.xlane.f32.xlu0 %v1435_v44  ;;  %1516 = vadd.xlane.f32.xlu1 %v1515_v59  ;;  %v1246_v19 = vpop.f32.mrf.mxu0 }
 0x18f   :  { %v1390_v35 = vpop.f32.mrf.mxu3  ;;  %v1342_v39 = vadd.f32 %v1341_v30, %v1293_v43  ;;  %v1295_v24 = vpop.f32.mrf.mxu1  ;;  %v1247_v14 = vadd.f32 %v1246_v19, %v5407_v36 }
 0x191   :  { %v5619_v25 = vadd.f32 %v1390_v35, %v1342_v39  ;;  %2403 = vmatmul.bf16.gmra.mxu0 %v4923_v12  ;;  %v1296_v27 = vadd.f32 %v1295_v24, %v1247_v14 }
 0x192   :  { %2452 = vmatmul.bf16.gmra.mxu1 %v6317_v5  ;;  %v6325_v5 = vld [vmem:[#allocation10_spill] sm:$0xff] }
 0x193   :  { %2501 = vmatmul.bf16.gmra.mxu2 %v6318_v6  ;;  %v1476_v26 = vmul.f32 %v5619_v25, %v5619_v25  ;;  %v1438_v32 = vsel %vm1398_vm0, %v5619_v25, 0.0 }
 0x194   :  { %2550 = vmatmul.bf16.gmra.mxu3 %v6319_v21 }
 0x195   :  { %v1518_v28 = vsel %vm1398_vm0, %v1476_v26, 0.0 }
 0x196   :  { %v1344_v7 = vpop.f32.mrf.mxu2  ;;  %1519 = vadd.xlane.f32.xlu2 %v1518_v28  ;;  %1439 = vadd.xlane.f32.xlu1 %v1438_v32  ;;  %v1248_v36 = vpop.f32.mrf.mxu0 }
 0x197   :  { %v1393_v8 = vpop.f32.mrf.mxu3  ;;  %v1345_v12 = vadd.f32 %v1344_v7, %v1296_v27  ;;  %v1297_v46 = vpop.f32.mrf.mxu1  ;;  %v1249_v55 = vadd.f32 %v1248_v36, %v5412_v11 }
 0x199   :  { %v5631_v48 = vadd.f32 %v1393_v8, %v1345_v12  ;;  %v1298_v3 = vadd.f32 %v1297_v46, %v1249_v55 }
 0x19b   :  { %v1477_v33 = vmul.f32 %v5631_v48, %v5631_v48  ;;  %v1441_v61 = vsel %vm1398_vm0, %v5631_v48, 0.0 }
 0x19d   :  { %v1521_v60 = vsel %vm1398_vm0, %v1477_v33, 0.0 }
 0x19e   :  { %v1346_v37 = vpop.f32.mrf.mxu2  ;;  %1522 = vadd.xlane.f32.xlu0 %v1521_v60  ;;  %1442 = vadd.xlane.f32.xlu2 %v1441_v61  ;;  %v2369_v31 = vpop.f32.mrf.mxu0  ;;  %v6326_v61 = vld [vmem:[#allocation11_spill] sm:$0xff] }
 0x19f   :  { %v1395_v63 = vpop.f32.mrf.mxu3  ;;  %v1347_v0 = vadd.f32 %v1346_v37, %v1298_v3  ;;  %v1401_v1 = vpop.xlane.xlu1 %1400  ;;  %v2370_v40 = vadd.f32 %v2369_v31, %v6320_v2  ;;  %v6329_v2 = vld [vmem:[#allocation14_spill] sm:$0xff] }
 0x1a0   :  { %v2418_v29 = vpop.f32.mrf.mxu1  ;;  %v5648_v57 = vmul.f32 0.11111111, %v1401_v1  ;;  %v6328_v1 = vld [vmem:[#allocation13_spill] sm:$0xff] }
 0x1a1   :  { %v5640_v11 = vadd.f32 %v1395_v63, %v1347_v0  ;;  %v2419_v45 = vadd.f32 %v2418_v29, %v2370_v40  ;;  %2564 = vmatmul.bf16.vlgmr.msrb.gmra.mxu0 %v6321_v13  ;;  %v6327_v0 = vld [vmem:[#allocation12_spill] sm:$0xff]  ;;  %v6330_v40 = vld [vmem:[#allocation15_spill] sm:$0xff] }
 0x1a2   :  { %2613 = vmatmul.bf16.vlgmr.msrb.gmra.mxu1 %v6322_v20  ;;  %v1543_v35 = vmul.f32 %v5648_v57, %v5648_v57 }
 0x1a3   :  { %2662 = vmatmul.bf16.vlgmr.msrb.gmra.mxu2 %v6323_v16  ;;  %v1478_v51 = vmul.f32 %v5640_v11, %v5640_v11  ;;  %v1444_v52 = vsel %vm1398_vm0, %v5640_v11, 0.0 }
 0x1a4   :  { %2711 = vmatmul.bf16.vlgmr.msrb.gmra.mxu3 %v6324_v41 }
 0x1a5   :  { %v1524_v53 = vsel %vm1398_vm0, %v1478_v51, 0.0 }
 0x1a6   :  { %v2467_v54 = vpop.f32.mrf.mxu2  ;;  %1445 = vadd.xlane.f32.xlu0 %v1444_v52  ;;  %1525 = vadd.xlane.f32.xlu1 %v1524_v53  ;;  %v2371_v19 = vpop.f32.mrf.mxu0 }
 0x1a7   :  { %v2516_v43 = vpop.f32.mrf.mxu3  ;;  %v2468_v44 = vadd.f32 %v2467_v54, %v2419_v45  ;;  %v1404_v59 = vpop.xlane.xlu2 %1403  ;;  %v2372_v6 = vadd.f32 %v2371_v19, %v6325_v5 }
 0x1a8   :  { %v1481_v30 = vpop.xlane.xlu1 %1480  ;;  %v2420_v24 = vpop.f32.mrf.mxu1  ;;  %v5658_v27 = vmul.f32 0.11111111, %v1404_v59 }
 0x1a9   :  { %v1527_v39 = vmul.f32 0.11111111, %v1481_v30  ;;  %v5655_v14 = vadd.f32 %v2516_v43, %v2468_v44  ;;  %v2421_v26 = vadd.f32 %v2420_v24, %v2372_v6  ;;  %v6331_v24 = vld [vmem:[#allocation16_spill] sm:$0xff] }
 0x1aa   :  { %v1544_v46 = vmul.f32 %v5658_v27, %v5658_v27 }
 0x1ab   :  { %v1559_v21 = vsub.f32 %v1527_v39, %v1543_v35 }
 0x1ad   :  { %v1591_v28 = vadd.f32 1e-05, %v1559_v21 }
 0x1ae   :  { %v2469_v32 = vpop.f32.mrf.mxu2  ;;  %v2374_v33 = vpop.f32.mrf.mxu0 }
 0x1af   :  { %4313 = vrsqrt.f32 %v1591_v28  ;;  %v2518_v7 = vpop.f32.mrf.mxu3  ;;  %v2470_v8 = vadd.f32 %v2469_v32, %v2421_v26  ;;  %v1407_v12 = vpop.xlane.xlu0 %1406  ;;  %v2375_v37 = vadd.f32 %v2374_v33, %v6326_v61  ;;  %vm1613_vm2 = vweird.f32 %v1591_v28 }
 0x1b0   :  { %v1484_v36 = vpop.xlane.xlu2 %1483  ;;  %v2423_v3 = vpop.f32.mrf.mxu1  ;;  %v5669_v45 = vmul.f32 0.11111111, %v1407_v12 }
 0x1b1   :  { %v1528_v55 = vmul.f32 0.11111111, %v1484_v36  ;;  %v5662_v60 = vadd.f32 %v2518_v7, %v2470_v8  ;;  %2569 = vmatmul.bf16.gmra.mxu0 %v6327_v0  ;;  %v2424_v31 = vadd.f32 %v2423_v3, %v2375_v37  ;;  %v1575_v3 = vsub.f32 %v5428_v15, %v5648_v57 }
 0x1b2   :  { %2618 = vmatmul.bf16.gmra.mxu1 %v6328_v1  ;;  %v1545_v43 = vmul.f32 %v5669_v45, %v5669_v45 }
 0x1b3   :  { %v1560_v63 = vsub.f32 %v1528_v55, %v1544_v46  ;;  %2667 = vmatmul.bf16.gmra.mxu2 %v6329_v2 }
 0x1b4   :  { %2716 = vmatmul.bf16.gmra.mxu3 %v6330_v40 }
 0x1b5   :  { %v4314_v29 = vpop.eup %4313  ;;  %v5671_v13 = vadd.f32 1e-05, %v1560_v63 }
 0x1b6   :  { %v1608_v20 = vmul.f32 %v4314_v29, %v1591_v28  ;;  %v2472_v16 = vpop.f32.mrf.mxu2  ;;  %v2376_v30 = vpop.f32.mrf.mxu0  ;;  %vm1614_vm1 = vweird.f32 %v4314_v29 }
 0x1b7   :  { %4315 = vrsqrt.f32 %v5671_v13  ;;  %v2521_v41 = vpop.f32.mrf.mxu3  ;;  %v2473_v52 = vadd.f32 %v2472_v16, %v2424_v31  ;;  %v1487_v53 = vpop.xlane.xlu0 %1486  ;;  %v2377_v5 = vadd.f32 %v2376_v30, %v6331_v24  ;;  %vm1615_vm3 = vmor %vm1613_vm2, %vm1614_vm1  ;;  %v6335_v30 = vld [vmem:[#allocation20_spill] sm:$0xff]  ;;  %vm1623_vm6 = vweird.f32 %v5671_v13 }
 0x1b8   :  { %v1609_v51 = vmul.f32 %v4314_v29, %v1608_v20  ;;  %v1410_v54 = vpop.xlane.xlu2 %1409  ;;  %v1529_v44 = vmul.f32 0.11111111, %v1487_v53  ;;  %v2425_v35 = vpop.f32.mrf.mxu1  ;;  %v6333_v53 = vld [vmem:[#allocation18_spill] sm:$0xff] }
 0x1b9   :  { %v5676_v59 = vmul.f32 0.11111111, %v1410_v54  ;;  %v5678_v19 = vadd.f32 %v2521_v41, %v2473_v52  ;;  %v1490_v6 = vpop.xlane.xlu1 %1489  ;;  %v2426_v8 = vadd.f32 %v2425_v35, %v2377_v5  ;;  %v6332_v41 = vld [vmem:[#allocation17_spill] sm:$0xff]  ;;  %v6334_v54 = vld [vmem:[#allocation19_spill] sm:$0xff] }
 0x1ba   :  { %v1610_v39 = vmul.f32 0.5, %v1609_v51  ;;  %v1561_v21 = vsub.f32 %v1529_v44, %v1545_v43  ;;  %v1530_v32 = vmul.f32 0.11111111, %v1490_v6  ;;  %v6336_v35 = vld [vmem:[#allocation21_spill] sm:$0xff] }
 0x1bb   :  { %v1546_v26 = vmul.f32 %v5676_v59, %v5676_v59 }
 0x1bc   :  { %v1611_v7 = vsub.f32 1.5, %v1610_v39  ;;  %v5683_v36 = vadd.f32 1e-05, %v1561_v21 }
 0x1bd   :  { %v4316_v12 = vpop.eup %4315  ;;  %v1562_v46 = vsub.f32 %v1530_v32, %v1546_v26  ;;  %v1576_v32 = vsub.f32 %v5438_v62, %v5658_v27 }
 0x1be   :  { %v1612_v55 = vmul.f32 %v4314_v29, %v1611_v7  ;;  %v1618_v33 = vmul.f32 %v4316_v12, %v5671_v13  ;;  %4317 = vrsqrt.f32 %v5683_v36  ;;  %v2474_v37 = vpop.f32.mrf.mxu2  ;;  %v2379_v40 = vpop.f32.mrf.mxu0  ;;  %vm1624_vm5 = vweird.f32 %v4316_v12 }
 0x1bf   :  { %v5689_v61 = vadd.f32 1e-05, %v1562_v46  ;;  %v2523_v63 = vpop.f32.mrf.mxu3  ;;  %v2475_v31 = vadd.f32 %v2474_v37, %v2426_v8  ;;  %v2380_v15 = vadd.f32 %v2379_v40, %v6332_v41  ;;  %vm1625_vm7 = vmor %vm1623_vm6, %vm1624_vm5  ;;  %v6337_v40 = vld [vmem:[#allocation22_spill] sm:$0xff]  ;;  %vm1633_vm10 = vweird.f32 %v5683_v36 }
 0x1c0   :  { %v1616_v0 = vsel %vm1615_vm3, %v4314_v29, %v1612_v55  ;;  %v1619_v1 = vmul.f32 %v4316_v12, %v1618_v33  ;;  %v2428_v28 = vpop.f32.mrf.mxu1 }
 0x1c1   :  { %v1767_v2 = vmul.f32 %v1616_v0, %v1575_v3  ;;  %4319 = vrsqrt.f32 %v5689_v61  ;;  %v5692_v16 = vadd.f32 %v2523_v63, %v2475_v31  ;;  %v1493_v57 = vpop.xlane.xlu2 %1492  ;;  %v1413_v51 = vpop.xlane.xlu1 %1412  ;;  %2574 = vmatmul.bf16.gmra.mxu0 %v6333_v53  ;;  %v2429_v43 = vadd.f32 %v2428_v28, %v2380_v15 }
 0x1c2   :  { %v1620_v20 = vmul.f32 0.5, %v1619_v1  ;;  %2623 = vmatmul.bf16.gmra.mxu1 %v6334_v54  ;;  %v5697_v44 = vmul.f32 0.11111111, %v1413_v51  ;;  %v1531_v7 = vmul.f32 0.11111111, %v1493_v57  ;;  %vm1643_vm13 = vweird.f32 %v5689_v61 }
 0x1c3   :  { %vm1783_vm4 = vcmp.gt.f32.partialorder %v1767_v2, 0.0  ;;  %v1799_v52 = vmul.f32 0.2, %v1767_v2  ;;  %2672 = vmatmul.bf16.gmra.mxu2 %v6335_v30 }
 0x1c4   :  { %v1621_v29 = vsub.f32 1.5, %v1620_v20  ;;  %2721 = vmatmul.bf16.gmra.mxu3 %v6336_v35  ;;  %v4318_v39 = vpop.eup %4317  ;;  %v1547_v21 = vmul.f32 %v5697_v44, %v5697_v44 }
 0x1c5   :  { %v1815_v24 = vsel %vm1783_vm4, %v1767_v2, %v1799_v52  ;;  %v1628_v6 = vmul.f32 %v4318_v39, %v5683_v36  ;;  %vm1634_vm9 = vweird.f32 %v4318_v39  ;;  %v1578_v36 = vsub.f32 %v5470_v4, %v5676_v59  ;;  %v6340_v4 = vld [vmem:[#allocation25_spill] sm:$0xff] }
 0x1c6   :  { %1831 = vst.msk [vmem:[%s6222_s3] sm:$0xff] %vm1398_vm0, %v1815_v24  ;;  %v1622_v5 = vmul.f32 %v4316_v12, %v1621_v29  ;;  %v2477_v8 = vpop.f32.mrf.mxu2  ;;  %v1563_v63 = vsub.f32 %v1531_v7, %v1547_v21  ;;  %v2381_v0 = vpop.f32.mrf.mxu0  ;;  %vm1635_vm12 = vmor %vm1633_vm10, %vm1634_vm9 }
 0x1c7   :  { %v4320_v26 = vpop.eup %4319  ;;  %v2526_v46 = vpop.f32.mrf.mxu3  ;;  %v1629_v33 = vmul.f32 %v4318_v39, %v1628_v6  ;;  %v2478_v13 = vadd.f32 %v2477_v8, %v2429_v43  ;;  %v2382_v28 = vadd.f32 %v2381_v0, %v6337_v40  ;;  %v1577_v43 = vsub.f32 %v5459_v50, %v5669_v45  ;;  %v6342_v40 = vld [vmem:[#allocation27_spill] sm:$0xff] }
 0x1c8   :  { %v1626_v55 = vsel %vm1625_vm7, %v4316_v12, %v1622_v5  ;;  %v1638_v3 = vmul.f32 %v4320_v26, %v5689_v61  ;;  %v2430_v1 = vpop.f32.mrf.mxu1  ;;  %v5713_v27 = vadd.f32 1e-05, %v1563_v63  ;;  %vm1644_vm11 = vweird.f32 %v4320_v26 }
 0x1c9   :  { %v1768_v37 = vmul.f32 %v1626_v55, %v1576_v32  ;;  %v1630_v31 = vmul.f32 0.5, %v1629_v33  ;;  %v1496_v20 = vpop.xlane.xlu0 %1495  ;;  %v1416_v41 = vpop.xlane.xlu2 %1415  ;;  %v5715_v15 = vadd.f32 %v2526_v46, %v2478_v13  ;;  %v2431_v51 = vadd.f32 %v2430_v1, %v2382_v28  ;;  %vm1645_vm14 = vmor %vm1643_vm13, %vm1644_vm11  ;;  %v6338_v33 = vld [vmem:[#allocation23_spill] sm:$0xff]  ;;  %v6339_v1 = vld [vmem:[#allocation24_spill] sm:$0xff] }
 0x1ca   :  { %v1639_v2 = vmul.f32 %v4320_v26, %v1638_v3  ;;  %4321 = vrsqrt.f32 %v5713_v27  ;;  %v5718_v53 = vmul.f32 0.11111111, %v1416_v41  ;;  %v1532_v30 = vmul.f32 0.11111111, %v1496_v20 }
 0x1cb   :  { %vm1784_vm8 = vcmp.gt.f32.partialorder %v1768_v37, 0.0  ;;  %v1800_v62 = vmul.f32 0.2, %v1768_v37  ;;  %v1631_v12 = vsub.f32 1.5, %v1630_v31  ;;  %vm1653_vm3 = vweird.f32 %v5713_v27 }
 0x1cc   :  { %v1640_v57 = vmul.f32 0.5, %v1639_v2  ;;  %v1548_v35 = vmul.f32 %v5718_v53, %v5718_v53  ;;  %v6341_v2 = vld [vmem:[#allocation26_spill] sm:$0xff] }
 0x1cd   :  { %v1816_v52 = vsel %vm1784_vm8, %v1768_v37, %v1800_v62  ;;  %v1632_v54 = vmul.f32 %v4318_v39, %v1631_v12 }
 0x1ce   :  { %1832 = vst.msk [vmem:[%s6222_s3 + $0x8] sm:$0xff] %vm1398_vm0, %v1816_v52  ;;  %v1641_v29 = vsub.f32 1.5, %v1640_v57  ;;  %v2479_v24 = vpop.f32.mrf.mxu2  ;;  %v1564_v8 = vsub.f32 %v1532_v30, %v1548_v35  ;;  %v2384_v46 = vpop.f32.mrf.mxu0 }
 0x1cf   :  { %v2528_v5 = vpop.f32.mrf.mxu3  ;;  %v1636_v6 = vsel %vm1635_vm12, %v4318_v39, %v1632_v54  ;;  %v2480_v32 = vadd.f32 %v2479_v24, %v2431_v51  ;;  %v2385_v3 = vadd.f32 %v2384_v46, %v6338_v33 }
 0x1d0   :  { %v1642_v21 = vmul.f32 %v4320_v26, %v1641_v29  ;;  %v1769_v7 = vmul.f32 %v1636_v6, %v1577_v43  ;;  %v2433_v50 = vpop.f32.mrf.mxu1  ;;  %v4322_v39 = vpop.eup %4321  ;;  %v5735_v0 = vadd.f32 1e-05, %v1564_v8  ;;  %v6343_v6 = vld [vmem:[#allocation28_spill] sm:$0xff] }
 0x1d1   :  { %v5732_v55 = vadd.f32 %v2528_v5, %v2480_v32  ;;  %v1419_v37 = vpop.xlane.xlu0 %1418  ;;  %v1499_v63 = vpop.xlane.xlu1 %1498  ;;  %2579 = vmatmul.bf16.gmra.mxu0 %v6339_v1  ;;  %v1648_v59 = vmul.f32 %v4322_v39, %v5713_v27  ;;  %v2434_v31 = vadd.f32 %v2433_v50, %v2385_v3  ;;  %vm1654_vm2 = vweird.f32 %v4322_v39 }
 0x1d2   :  { %v1646_v45 = vsel %vm1645_vm14, %v4320_v26, %v1642_v21  ;;  %vm1785_vm15 = vcmp.gt.f32.partialorder %v1769_v7, 0.0  ;;  %v1801_v13 = vmul.f32 0.2, %v1769_v7  ;;  %2628 = vmatmul.bf16.gmra.mxu1 %v6340_v4  ;;  %v5740_v26 = vmul.f32 0.11111111, %v1419_v37  ;;  %vm1655_vm4 = vmor %vm1653_vm3, %vm1654_vm2 }
 0x1d3   :  { %v1770_v61 = vmul.f32 %v1646_v45, %v1578_v36  ;;  %2677 = vmatmul.bf16.gmra.mxu2 %v6341_v2  ;;  %4323 = vrsqrt.f32 %v5735_v0  ;;  %v1649_v41 = vmul.f32 %v4322_v39, %v1648_v59  ;;  %v1533_v57 = vmul.f32 0.11111111, %v1499_v63 }
 0x1d4   :  { %2726 = vmatmul.bf16.gmra.mxu3 %v6342_v40  ;;  %v1817_v28 = vsel %vm1785_vm15, %v1769_v7, %v1801_v13  ;;  %v1549_v62 = vmul.f32 %v5740_v26, %v5740_v26  ;;  %v1579_v3 = vsub.f32 %v5492_v47, %v5697_v44  ;;  %vm1663_vm7 = vweird.f32 %v5735_v0 }
 0x1d5   :  { %vm1786_vm1 = vcmp.gt.f32.partialorder %v1770_v61, 0.0  ;;  %v1802_v20 = vmul.f32 0.2, %v1770_v61  ;;  %1833 = vst.msk [vmem:[%s6222_s3 + $0x10] sm:$0xff] %vm1398_vm0, %v1817_v28  ;;  %v1650_v54 = vmul.f32 0.5, %v1649_v41 }
 0x1d6   :  { %v2482_v51 = vpop.f32.mrf.mxu2  ;;  %v1565_v43 = vsub.f32 %v1533_v57, %v1549_v62  ;;  %v2386_v30 = vpop.f32.mrf.mxu0  ;;  %v6344_v62 = vld [vmem:[#allocation29_spill] sm:$0xff] }
 0x1d7   :  { %v1818_v12 = vsel %vm1786_vm1, %v1770_v61, %v1802_v20  ;;  %v2531_v52 = vpop.f32.mrf.mxu3  ;;  %v2483_v29 = vadd.f32 %v2482_v51, %v2434_v31  ;;  %v1651_v24 = vsub.f32 1.5, %v1650_v54  ;;  %v2387_v21 = vadd.f32 %v2386_v30, %v6343_v6  ;;  %v6345_v54 = vld [vmem:[#allocation30_spill] sm:$0xff] }
 0x1d8   :  { %1834 = vst.msk [vmem:[%s6222_s3 + $0x18] sm:$0xff] %vm1398_vm0, %v1818_v12  ;;  %v2435_v35 = vpop.f32.mrf.mxu1  ;;  %v5758_v8 = vadd.f32 1e-05, %v1565_v43  ;;  %v1580_v6 = vsub.f32 %v5503_v10, %v5718_v53 }
 0x1d9   :  { %v5755_v5 = vadd.f32 %v2531_v52, %v2483_v29  ;;  %v1502_v32 = vpop.xlane.xlu2 %1501  ;;  %v1422_v7 = vpop.xlane.xlu1 %1421  ;;  %v1652_v50 = vmul.f32 %v4322_v39, %v1651_v24  ;;  %v2436_v33 = vadd.f32 %v2435_v35, %v2387_v21  ;;  %v6346_v29 = vld [vmem:[#allocation31_spill] sm:$0xff]  ;;  %v6347_v24 = vld [vmem:[#allocation32_spill] sm:$0xff] }
 0x1da   :  { %v4324_v36 = vpop.eup %4323  ;;  %v5760_v46 = vmul.f32 0.11111111, %v1422_v7  ;;  %4325 = vrsqrt.f32 %v5758_v8  ;;  %v1534_v37 = vmul.f32 0.11111111, %v1502_v32  ;;  %v6348_v32 = vld [vmem:[#allocation33_spill] sm:$0xff]  ;;  %vm1673_vm11 = vweird.f32 %v5758_v8 }
 0x1db   :  { %v1658_v45 = vmul.f32 %v4324_v36, %v5735_v0  ;;  %v1656_v13 = vsel %vm1655_vm4, %v4322_v39, %v1652_v50  ;;  %vm1664_vm6 = vweird.f32 %v4324_v36 }
 0x1dc   :  { %v1550_v63 = vmul.f32 %v5760_v46, %v5760_v46  ;;  %v1771_v1 = vmul.f32 %v1656_v13, %v1579_v3  ;;  %vm1665_vm8 = vmor %vm1663_vm7, %vm1664_vm6 }
 0x1dd   :  { %v1659_v61 = vmul.f32 %v4324_v36, %v1658_v45 }
 0x1de   :  { %v1566_v4 = vsub.f32 %v1534_v37, %v1550_v63  ;;  %v2484_v59 = vpop.f32.mrf.mxu2  ;;  %vm1787_vm5 = vcmp.gt.f32.partialorder %v1771_v1, 0.0  ;;  %v1803_v40 = vmul.f32 0.2, %v1771_v1  ;;  %v2389_v47 = vpop.f32.mrf.mxu0 }
 0x1df   :  { %v2533_v31 = vpop.f32.mrf.mxu3  ;;  %v1660_v27 = vmul.f32 0.5, %v1659_v61  ;;  %v2485_v2 = vadd.f32 %v2484_v59, %v2436_v33  ;;  %v2390_v12 = vadd.f32 %v2389_v47, %v6344_v62 }
 0x1e0   :  { %v5769_v28 = vadd.f32 1e-05, %v1566_v4  ;;  %v2438_v44 = vpop.f32.mrf.mxu1  ;;  %v4326_v51 = vpop.eup %4325  ;;  %v1819_v52 = vsel %vm1787_vm5, %v1771_v1, %v1803_v40 }
 0x1e1   :  { %v1661_v20 = vsub.f32 1.5, %v1660_v27  ;;  %v5771_v41 = vadd.f32 %v2533_v31, %v2485_v2  ;;  %v1505_v39 = vpop.xlane.xlu0 %1504  ;;  %v1425_v57 = vpop.xlane.xlu2 %1424  ;;  %2584 = vmatmul.bf16.gmra.mxu0 %v6345_v54  ;;  %1835 = vst.msk [vmem:[%s6222_s3 + $0x20] sm:$0xff] %vm1398_vm0, %v1819_v52  ;;  %v1668_v30 = vmul.f32 %v4326_v51, %v5758_v8  ;;  %v2439_v35 = vadd.f32 %v2438_v44, %v2390_v12  ;;  %v6349_v44 = vld [vmem:[#allocation34_spill] sm:$0xff] }
 0x1e2   :  { %4327 = vrsqrt.f32 %v5769_v28  ;;  %2633 = vmatmul.bf16.gmra.mxu1 %v6346_v29  ;;  %v5787_v21 = vmul.f32 0.11111111, %v1425_v57  ;;  %v1535_v33 = vmul.f32 0.11111111, %v1505_v39  ;;  %vm1674_vm10 = vweird.f32 %v4326_v51 }
 0x1e3   :  { %v1662_v43 = vmul.f32 %v4324_v36, %v1661_v20  ;;  %2682 = vmatmul.bf16.gmra.mxu2 %v6347_v24  ;;  %v1669_v50 = vmul.f32 %v4326_v51, %v1668_v30  ;;  %v1581_v12 = vsub.f32 %v5524_v23, %v5740_v26  ;;  %vm1675_vm12 = vmor %vm1673_vm11, %vm1674_vm10  ;;  %vm1683_vm15 = vweird.f32 %v5769_v28 }
 0x1e4   :  { %2731 = vmatmul.bf16.gmra.mxu3 %v6348_v32  ;;  %v1551_v0 = vmul.f32 %v5787_v21, %v5787_v21 }
 0x1e5   :  { %v1666_v7 = vsel %vm1665_vm8, %v4324_v36, %v1662_v43  ;;  %v1670_v63 = vmul.f32 0.5, %v1669_v50 }
 0x1e6   :  { %v1772_v45 = vmul.f32 %v1666_v7, %v1580_v6  ;;  %v2487_v3 = vpop.f32.mrf.mxu2  ;;  %v1567_v53 = vsub.f32 %v1535_v33, %v1551_v0  ;;  %v2391_v1 = vpop.f32.mrf.mxu0 }
 0x1e7   :  { %v2536_v37 = vpop.f32.mrf.mxu3  ;;  %v2488_v13 = vadd.f32 %v2487_v3, %v2439_v35  ;;  %v1671_v59 = vsub.f32 1.5, %v1670_v63  ;;  %v2392_v20 = vadd.f32 %v2391_v1, %v6349_v44  ;;  %v6351_v1 = vld [vmem:[#allocation36_spill] sm:$0xff] }
 0x1e8   :  { %v4328_v61 = vpop.eup %4327  ;;  %vm1788_vm9 = vcmp.gt.f32.partialorder %v1772_v45, 0.0  ;;  %v1804_v10 = vmul.f32 0.2, %v1772_v45  ;;  %v2440_v4 = vpop.f32.mrf.mxu1  ;;  %v5795_v47 = vadd.f32 1e-05, %v1567_v53  ;;  %v1582_v53 = vsub.f32 %v5535_v34, %v5760_v46 }
 0x1e9   :  { %v1678_v36 = vmul.f32 %v4328_v61, %v5769_v28  ;;  %v5793_v31 = vadd.f32 %v2536_v37, %v2488_v13  ;;  %v1428_v27 = vpop.xlane.xlu0 %1427  ;;  %v1508_v2 = vpop.xlane.xlu1 %1507  ;;  %v1672_v39 = vmul.f32 %v4326_v51, %v1671_v59  ;;  %v2441_v52 = vadd.f32 %v2440_v4, %v2392_v20  ;;  %v6352_v4 = vld [vmem:[#allocation37_spill] sm:$0xff] }
 0x1ea   :  { %v1820_v40 = vsel %vm1788_vm9, %v1772_v45, %v1804_v10  ;;  %v5798_v62 = vmul.f32 0.11111111, %v1428_v27  ;;  %4329 = vrsqrt.f32 %v5795_v47  ;;  %v1536_v29 = vmul.f32 0.11111111, %v1508_v2  ;;  %v6353_v27 = vld [vmem:[#allocation38_spill] sm:$0xff]  ;;  %v6354_v2 = vld [vmem:[#allocation39_spill] sm:$0xff] }
 0x1eb   :  { %1836 = vst.msk [vmem:[%s6222_s3 + $0x28] sm:$0xff] %vm1398_vm0, %v1820_v40  ;;  %v1679_v57 = vmul.f32 %v4328_v61, %v1678_v36  ;;  %v1676_v43 = vsel %vm1675_vm12, %v4326_v51, %v1672_v39  ;;  %vm1684_vm13 = vweird.f32 %v4328_v61  ;;  %v6350_v51 = vld [vmem:[#allocation35_spill] sm:$0xff]  ;;  %vm1693_vm4 = vweird.f32 %v5795_v47 }
 0x1ec   :  { %v1552_v54 = vmul.f32 %v5798_v62, %v5798_v62  ;;  %v1773_v35 = vmul.f32 %v1676_v43, %v1581_v12  ;;  %vm1685_vm1 = vmor %vm1683_vm15, %vm1684_vm13 }
 0x1ed   :  { %v1680_v30 = vmul.f32 0.5, %v1679_v57 }
 0x1ee   :  { %v1568_v24 = vsub.f32 %v1536_v29, %v1552_v54  ;;  %v2489_v6 = vpop.f32.mrf.mxu2  ;;  %vm1789_vm14 = vcmp.gt.f32.partialorder %v1773_v35, 0.0  ;;  %v1805_v26 = vmul.f32 0.2, %v1773_v35  ;;  %v2394_v50 = vpop.f32.mrf.mxu0 }
 0x1ef   :  { %v2538_v32 = vpop.f32.mrf.mxu3  ;;  %v1681_v7 = vsub.f32 1.5, %v1680_v30  ;;  %v2490_v23 = vadd.f32 %v2489_v6, %v2441_v52  ;;  %v2395_v3 = vadd.f32 %v2394_v50, %v6350_v51  ;;  %v6355_v50 = vld [vmem:[#allocation40_spill] sm:$0xff]  ;;  %v1583_v51 = vsub.f32 %v5556_v56, %v5787_v21 }
 0x1f0   :  { %v5810_v8 = vadd.f32 1e-05, %v1568_v24  ;;  %v2443_v45 = vpop.f32.mrf.mxu1  ;;  %v4330_v13 = vpop.eup %4329  ;;  %v1821_v10 = vsel %vm1789_vm14, %v1773_v35, %v1805_v26 }
 0x1f1   :  { %v1682_v33 = vmul.f32 %v4328_v61, %v1681_v7  ;;  %v5813_v0 = vadd.f32 %v2538_v32, %v2490_v23  ;;  %v1511_v37 = vpop.xlane.xlu2 %1510  ;;  %v1431_v63 = vpop.xlane.xlu1 %1430  ;;  %2589 = vmatmul.bf16.gmra.mxu0 %v6351_v1  ;;  %1837 = vst.msk [vmem:[%s6222_s3 + $0x30] sm:$0xff] %vm1398_vm0, %v1821_v10  ;;  %v1688_v59 = vmul.f32 %v4330_v13, %v5795_v47  ;;  %vm1694_vm3 = vweird.f32 %v4330_v13 }
 0x1f2   :  { %4331 = vrsqrt.f32 %v5810_v8  ;;  %2638 = vmatmul.bf16.gmra.mxu1 %v6352_v4  ;;  %v2444_v36 = vadd.f32 %v2443_v45, %v2395_v3  ;;  %v5828_v46 = vmul.f32 0.11111111, %v1431_v63  ;;  %v1537_v20 = vmul.f32 0.11111111, %v1511_v37  ;;  %vm1695_vm5 = vmor %vm1693_vm4, %vm1694_vm3 }
 0x1f3   :  { %v1686_v28 = vsel %vm1685_vm1, %v4328_v61, %v1682_v33  ;;  %2687 = vmatmul.bf16.gmra.mxu2 %v6353_v27  ;;  %v1689_v40 = vmul.f32 %v4330_v13, %v1688_v59  ;;  %vm1703_vm8 = vweird.f32 %v5810_v8 }
 0x1f4   :  { %v1774_v34 = vmul.f32 %v1686_v28, %v1582_v53  ;;  %2736 = vmatmul.bf16.gmra.mxu3 %v6354_v2  ;;  %v1553_v12 = vmul.f32 %v5828_v46, %v5828_v46 }
 0x1f5   :  { %v1690_v61 = vmul.f32 0.5, %v1689_v40 }
 0x1f6   :  { %vm1790_vm2 = vcmp.gt.f32.partialorder %v1774_v34, 0.0  ;;  %v1806_v44 = vmul.f32 0.2, %v1774_v34  ;;  %v2492_v39 = vpop.f32.mrf.mxu2  ;;  %v1569_v43 = vsub.f32 %v1537_v20, %v1553_v12  ;;  %v2396_v30 = vpop.f32.mrf.mxu0 }
 0x1f7   :  { %v2541_v57 = vpop.f32.mrf.mxu3  ;;  %v2493_v52 = vadd.f32 %v2492_v39, %v2444_v36  ;;  %v1691_v24 = vsub.f32 1.5, %v1690_v61  ;;  %v2397_v45 = vadd.f32 %v2396_v30, %v6355_v50  ;;  %v6357_v30 = vld [vmem:[#allocation42_spill] sm:$0xff]  ;;  %v6360_v50 = vld [vmem:[#allocation45_spill] sm:$0xff] }
 0x1f8   :  { %v4332_v54 = vpop.eup %4331  ;;  %v1822_v29 = vsel %vm1790_vm2, %v1774_v34, %v1806_v44  ;;  %v2445_v35 = vpop.f32.mrf.mxu1  ;;  %v5840_v26 = vadd.f32 1e-05, %v1569_v43 }
 0x1f9   :  { %1838 = vst.msk [vmem:[%s6222_s3 + $0x38] sm:$0xff] %vm1398_vm0, %v1822_v29  ;;  %v1698_v6 = vmul.f32 %v4332_v54, %v5810_v8  ;;  %v5838_v32 = vadd.f32 %v2541_v57, %v2493_v52  ;;  %v1514_v7 = vpop.xlane.xlu0 %1513  ;;  %v1434_v23 = vpop.xlane.xlu2 %1433  ;;  %v1692_v3 = vmul.f32 %v4330_v13, %v1691_v24  ;;  %v2446_v63 = vadd.f32 %v2445_v35, %v2397_v45  ;;  %v6358_v8 = vld [vmem:[#allocation43_spill] sm:$0xff] }
 0x1fa   :  { %v5843_v33 = vmul.f32 0.11111111, %v1434_v23  ;;  %4333 = vrsqrt.f32 %v5840_v26  ;;  %v1538_v10 = vmul.f32 0.11111111, %v1514_v7  ;;  %vm1704_vm6 = vweird.f32 %v4332_v54 }
 0x1fb   :  { %v1699_v37 = vmul.f32 %v4332_v54, %v1698_v6  ;;  %v1696_v1 = vsel %vm1695_vm5, %v4330_v13, %v1692_v3  ;;  %v6356_v13 = vld [vmem:[#allocation41_spill] sm:$0xff]  ;;  %v1584_v29 = vsub.f32 %v5567_v22, %v5798_v62  ;;  %vm1705_vm9 = vmor %vm1703_vm8, %vm1704_vm6  ;;  %v6359_v22 = vld [vmem:[#allocation44_spill] sm:$0xff]  ;;  %vm1713_vm12 = vweird.f32 %v5840_v26 }
 0x1fc   :  { %v1554_v53 = vmul.f32 %v5843_v33, %v5843_v33  ;;  %v1775_v28 = vmul.f32 %v1696_v1, %v1583_v51 }
 0x1fd   :  { %v1700_v4 = vmul.f32 0.5, %v1699_v37 }
 0x1fe   :  { %v1570_v59 = vsub.f32 %v1538_v10, %v1554_v53  ;;  %v2494_v36 = vpop.f32.mrf.mxu2  ;;  %vm1791_vm7 = vcmp.gt.f32.partialorder %v1775_v28, 0.0  ;;  %v1807_v21 = vmul.f32 0.2, %v1775_v28  ;;  %v2399_v2 = vpop.f32.mrf.mxu0 }
 0x1ff   :  { %v2543_v27 = vpop.f32.mrf.mxu3  ;;  %v1701_v34 = vsub.f32 1.5, %v1700_v4  ;;  %v2495_v56 = vadd.f32 %v2494_v36, %v2446_v63  ;;  %v2400_v12 = vadd.f32 %v2399_v2, %v6356_v13  ;;  %v6361_v2 = vld [vmem:[#allocation46_spill] sm:$0xff] }
 0x200   :  { %v5851_v47 = vadd.f32 1e-05, %v1570_v59  ;;  %v2448_v40 = vpop.f32.mrf.mxu1  ;;  %v4334_v61 = vpop.eup %4333  ;;  %v1823_v52 = vsel %vm1791_vm7, %v1775_v28, %v1807_v21 }
 0x201   :  { %v1702_v44 = vmul.f32 %v4332_v54, %v1701_v34  ;;  %v5854_v20 = vadd.f32 %v2543_v27, %v2495_v56  ;;  %v1437_v39 = vpop.xlane.xlu0 %1436  ;;  %v1517_v57 = vpop.xlane.xlu1 %1516  ;;  %2594 = vmatmul.bf16.gmra.mxu0 %v6357_v30  ;;  %1839 = vst.msk [vmem:[%s6222_s3 + $0x40] sm:$0xff] %vm1398_vm0, %v1823_v52  ;;  %v1708_v24 = vmul.f32 %v4334_v61, %v5840_v26  ;;  %vm1714_vm11 = vweird.f32 %v4334_v61 }
 0x202   :  { %4335 = vrsqrt.f32 %v5851_v47  ;;  %v5861_v43 = vmul.f32 0.11111111, %v1437_v39  ;;  %2643 = vmatmul.bf16.gmra.mxu1 %v6358_v8  ;;  %v2449_v6 = vadd.f32 %v2448_v40, %v2400_v12  ;;  %v1539_v23 = vmul.f32 0.11111111, %v1517_v57  ;;  %vm1715_vm13 = vmor %vm1713_vm12, %vm1714_vm11 }
 0x203   :  { %v1706_v35 = vsel %vm1705_vm9, %v4332_v54, %v1702_v44  ;;  %2692 = vmatmul.bf16.gmra.mxu2 %v6359_v22  ;;  %v1709_v45 = vmul.f32 %v4334_v61, %v1708_v24  ;;  %v1585_v39 = vsub.f32 %v5588_v49, %v5828_v46  ;;  %v1586_v49 = vsub.f32 %v5599_v18, %v5843_v33 }
 0x204   :  { %v1776_v62 = vmul.f32 %v1706_v35, %v1584_v29  ;;  %v1555_v7 = vmul.f32 %v5861_v43, %v5861_v43  ;;  %2741 = vmatmul.bf16.gmra.mxu3 %v6360_v50  ;;  %vm1723_vm1 = vweird.f32 %v5851_v47 }
 0x205   :  { %v1710_v10 = vmul.f32 0.5, %v1709_v45 }
 0x206   :  { %vm1792_vm10 = vcmp.gt.f32.partialorder %v1776_v62, 0.0  ;;  %v1808_v51 = vmul.f32 0.2, %v1776_v62  ;;  %v1571_v3 = vsub.f32 %v1539_v23, %v1555_v7  ;;  %v2497_v37 = vpop.f32.mrf.mxu2  ;;  %v2401_v28 = vpop.f32.mrf.mxu0 }
 0x207   :  { %v2546_v63 = vpop.f32.mrf.mxu3  ;;  %v2498_v54 = vadd.f32 %v2497_v37, %v2449_v6  ;;  %v1711_v36 = vsub.f32 1.5, %v1710_v10  ;;  %v2402_v40 = vadd.f32 %v2401_v28, %v6361_v2 }
 0x208   :  { %v4336_v53 = vpop.eup %4335  ;;  %v1824_v1 = vsel %vm1792_vm10, %v1776_v62, %v1808_v51  ;;  %v5874_v4 = vadd.f32 1e-05, %v1571_v3  ;;  %v2450_v59 = vpop.f32.mrf.mxu1 }
 0x209   :  { %1840 = vst.msk [vmem:[%s6222_s3 + $0x48] sm:$0xff] %vm1398_vm0, %v1824_v1  ;;  %v1718_v27 = vmul.f32 %v4336_v53, %v5851_v47  ;;  %v5881_v34 = vadd.f32 %v2546_v63, %v2498_v54  ;;  %v1520_v56 = vpop.xlane.xlu2 %1519  ;;  %v1440_v21 = vpop.xlane.xlu1 %1439  ;;  %v1712_v44 = vmul.f32 %v4334_v61, %v1711_v36  ;;  %v2451_v57 = vadd.f32 %v2450_v59, %v2402_v40  ;;  %v6362_v47 = vld [vmem:[#allocation47_spill] sm:$0xff] }
 0x20a   :  { %4337 = vrsqrt.f32 %v5874_v4  ;;  %v5886_v12 = vmul.f32 0.11111111, %v1440_v21  ;;  %v1540_v30 = vmul.f32 0.11111111, %v1520_v56  ;;  %vm1724_vm14 = vweird.f32 %v4336_v53 }
 0x20b   :  { %v1719_v13 = vmul.f32 %v4336_v53, %v1718_v27  ;;  %v1716_v52 = vsel %vm1715_vm13, %v4334_v61, %v1712_v44  ;;  %vm1725_vm2 = vmor %vm1723_vm1, %vm1724_vm14  ;;  %vm1733_vm5 = vweird.f32 %v5874_v4 }
 0x20c   :  { %v1556_v8 = vmul.f32 %v5886_v12, %v5886_v12  ;;  %v1777_v35 = vmul.f32 %v1716_v52, %v1585_v39 }
 0x20d   :  { %v1720_v29 = vmul.f32 0.5, %v1719_v13 }
 0x20e   :  { %v2499_v24 = vpop.f32.mrf.mxu2  ;;  %v1572_v26 = vsub.f32 %v1540_v30, %v1556_v8  ;;  %vm1793_vm15 = vcmp.gt.f32.partialorder %v1777_v35, 0.0  ;;  %v1809_v23 = vmul.f32 0.2, %v1777_v35  ;;  %v2404_v46 = vpop.f32.mrf.mxu0 }
 0x20f   :  { %v2548_v6 = vpop.f32.mrf.mxu3  ;;  %v1721_v22 = vsub.f32 1.5, %v1720_v29  ;;  %v2500_v62 = vadd.f32 %v2499_v24, %v2451_v57  ;;  %v2405_v54 = vadd.f32 %v2404_v46, %v5378_v38  ;;  %v6363_v38 = vld [vmem:[#allocation48_spill] sm:$0xff] }
 0x210   :  { %v4338_v7 = vpop.eup %4337  ;;  %v2453_v61 = vpop.f32.mrf.mxu1  ;;  %v5896_v51 = vadd.f32 1e-05, %v1572_v26  ;;  %v1825_v63 = vsel %vm1793_vm15, %v1777_v35, %v1809_v23  ;;  %v1587_v35 = vsub.f32 %v5611_v42, %v5861_v43 }
 0x211   :  { %v1722_v50 = vmul.f32 %v4336_v53, %v1721_v22  ;;  %v1728_v45 = vmul.f32 %v4338_v7, %v5874_v4  ;;  %v1523_v3 = vpop.xlane.xlu0 %1522  ;;  %v1443_v37 = vpop.xlane.xlu2 %1442  ;;  %v5899_v10 = vadd.f32 %v2548_v6, %v2500_v62  ;;  %2599 = vmatmul.bf16.gmra.mxu0 %v5380_v17  ;;  %1841 = vst.msk [vmem:[%s6222_s3 + $0x50] sm:$0xff] %vm1398_vm0, %v1825_v63  ;;  %vm1734_vm4 = vweird.f32 %v4338_v7 }
 0x212   :  { %2648 = vmatmul.bf16.gmra.mxu1 %v5382_v58  ;;  %4339 = vrsqrt.f32 %v5896_v51  ;;  %v2454_v28 = vadd.f32 %v2453_v61, %v2405_v54  ;;  %v5910_v59 = vmul.f32 0.11111111, %v1443_v37  ;;  %v1541_v36 = vmul.f32 0.11111111, %v1523_v3  ;;  %vm1735_vm6 = vmor %vm1733_vm5, %vm1734_vm4 }
 0x213   :  { %v1726_v18 = vsel %vm1725_vm2, %v4336_v53, %v1722_v50  ;;  %v1729_v33 = vmul.f32 %v4338_v7, %v1728_v45  ;;  %2697 = vmatmul.bf16.gmra.mxu2 %v6362_v47  ;;  %vm1743_vm9 = vweird.f32 %v5896_v51 }
 0x214   :  { %v1778_v1 = vmul.f32 %v1726_v18, %v1586_v49  ;;  %2746 = vmatmul.bf16.gmra.mxu3 %v6363_v38  ;;  %v1557_v27 = vmul.f32 %v5910_v59, %v5910_v59  ;;  %v1588_v38 = vsub.f32 %v5619_v25, %v5886_v12 }
 0x215   :  { %v1730_v17 = vmul.f32 0.5, %v1729_v33 }
 0x216   :  { %vm1794_vm3 = vcmp.gt.f32.partialorder %v1778_v1, 0.0  ;;  %v1810_v58 = vmul.f32 0.2, %v1778_v1  ;;  %v2502_v56 = vpop.f32.mrf.mxu2  ;;  %v1573_v44 = vsub.f32 %v1541_v36, %v1557_v27  ;;  %v2406_v13 = vpop.f32.mrf.mxu0 }
 0x217   :  { %v2551_v53 = vpop.f32.mrf.mxu3  ;;  %v1731_v21 = vsub.f32 1.5, %v1730_v17  ;;  %v2503_v2 = vadd.f32 %v2502_v56, %v2454_v28  ;;  %v2407_v30 = vadd.f32 %v2406_v13, %v5404_v9 }
 0x218   :  { %v1826_v40 = vsel %vm1794_vm3, %v1778_v1, %v1810_v58  ;;  %v2455_v39 = vpop.f32.mrf.mxu1  ;;  %v4340_v57 = vpop.eup %4339  ;;  %v1605_v6 = vadd.f32 1e-05, %v1573_v44 }
 0x219   :  { %1842 = vst.msk [vmem:[%s6222_s3 + $0x58] sm:$0xff] %vm1398_vm0, %v1826_v40  ;;  %v1732_v52 = vmul.f32 %v4338_v7, %v1731_v21  ;;  %v5920_v29 = vadd.f32 %v2551_v53, %v2503_v2  ;;  %v1446_v8 = vpop.xlane.xlu0 %1445  ;;  %v1738_v24 = vmul.f32 %v4340_v57, %v5896_v51  ;;  %v1526_v26 = vpop.xlane.xlu1 %1525  ;;  %v2456_v23 = vadd.f32 %v2455_v39, %v2407_v30 }
 0x21a   :  { %v5926_v22 = vmul.f32 0.11111111, %v1446_v8  ;;  %4341 = vrsqrt.f32 %v1605_v6  ;;  %v1542_v9 = vmul.f32 0.11111111, %v1526_v26  ;;  %vm1744_vm8 = vweird.f32 %v4340_v57 }
 0x21b   :  { %v1736_v62 = vsel %vm1735_vm6, %v4338_v7, %v1732_v52  ;;  %v1739_v46 = vmul.f32 %v4340_v57, %v1738_v24  ;;  %vm1745_vm10 = vmor %vm1743_vm9, %vm1744_vm8  ;;  %vm1753_vm13 = vweird.f32 %v1605_v6  ;;  %v1589_v24 = vsub.f32 %v5631_v48, %v5910_v59 }
 0x21c   :  { %v1779_v49 = vmul.f32 %v1736_v62, %v1587_v35  ;;  %v1558_v4 = vmul.f32 %v5926_v22, %v5926_v22 }
 0x21d   :  { %v1740_v50 = vmul.f32 0.5, %v1739_v46 }
 0x21e   :  { %vm1795_vm7 = vcmp.gt.f32.partialorder %v1779_v49, 0.0  ;;  %v1811_v61 = vmul.f32 0.2, %v1779_v49  ;;  %v2504_v42 = vpop.f32.mrf.mxu2  ;;  %v1574_v45 = vsub.f32 %v1542_v9, %v1558_v4  ;;  %v2565_v54 = vpop.f32.mrf.mxu0 }
 0x21f   :  { %v2553_v43 = vpop.f32.mrf.mxu3  ;;  %v2505_v3 = vadd.f32 %v2504_v42, %v2456_v23  ;;  %v1741_v63 = vsub.f32 1.5, %v1740_v50  ;;  %v2566_v47 = vadd.f32 %v2565_v54, %v5655_v14 }
 0x220   :  { %v1827_v37 = vsel %vm1795_vm7, %v1779_v49, %v1811_v61  ;;  %v2614_v7 = vpop.f32.mrf.mxu1  ;;  %v1606_v18 = vadd.f32 1e-05, %v1574_v45  ;;  %v4342_v1 = vpop.eup %4341 }
 0x221   :  { %1843 = vst.msk [vmem:[%s6222_s3 + $0x60] sm:$0xff] %vm1398_vm0, %v1827_v37  ;;  %v5934_v33 = vadd.f32 %v2553_v43, %v2505_v3  ;;  %v1742_v28 = vmul.f32 %v4340_v57, %v1741_v63  ;;  %v1748_v17 = vmul.f32 %v4342_v1, %v1605_v6  ;;  %v2615_v56 = vadd.f32 %v2614_v7, %v2566_v47 }
 0x222   :  { %4343 = vrsqrt.f32 %v1606_v18  ;;  %vm1754_vm12 = vweird.f32 %v4342_v1  ;;  %vm1763_vm2 = vweird.f32 %v1606_v18  ;;  %v1590_v37 = vsub.f32 %v5640_v11, %v5926_v22 }
 0x223   :  { %v1746_v58 = vsel %vm1745_vm10, %v4340_v57, %v1742_v28  ;;  %v1749_v27 = vmul.f32 %v4342_v1, %v1748_v17  ;;  %vm1755_vm14 = vmor %vm1753_vm13, %vm1754_vm12 }
 0x224   :  { %v1780_v36 = vmul.f32 %v1746_v58, %v1588_v38 }
 0x225   :  { %v1750_v40 = vmul.f32 0.5, %v1749_v27 }
 0x226   :  { %v2663_v53 = vpop.f32.mrf.mxu2  ;;  %vm1796_vm11 = vcmp.gt.f32.partialorder %v1780_v36, 0.0  ;;  %v1812_v2 = vmul.f32 0.2, %v1780_v36  ;;  %v2567_v44 = vpop.f32.mrf.mxu0 }
 0x227   :  { %v2712_v21 = vpop.f32.mrf.mxu3  ;;  %v2664_v14 = vadd.f32 %v2663_v53, %v2615_v56  ;;  %v1751_v52 = vsub.f32 1.5, %v1750_v40  ;;  %v2568_v12 = vadd.f32 %v2567_v44, %v5662_v60 }
 0x228   :  { %v2616_v13 = vpop.f32.mrf.mxu1  ;;  %v4344_v51 = vpop.eup %4343  ;;  %v1828_v39 = vsel %vm1796_vm11, %v1780_v36, %v1812_v2 }
 0x229   :  { %v5940_v25 = vadd.f32 %v2712_v21, %v2664_v14  ;;  %1844 = vst.msk [vmem:[%s6222_s3 + $0x68] sm:$0xff] %vm1398_vm0, %v1828_v39  ;;  %v1758_v57 = vmul.f32 %v4344_v51, %v1606_v18  ;;  %v1752_v30 = vmul.f32 %v4342_v1, %v1751_v52  ;;  %v2617_v62 = vadd.f32 %v2616_v13, %v2568_v12 }
 0x22a   :  { %vm1764_vm1 = vweird.f32 %v4344_v51 }
 0x22b   :  { %v2752_v8 = vsel %vm1398_vm0, %v5940_v25, 0.0  ;;  %v2816_v35 = vmul.f32 %v5940_v25, %v5940_v25  ;;  %v1759_v60 = vmul.f32 %v4344_v51, %v1758_v57  ;;  %v1756_v26 = vsel %vm1755_vm14, %v4342_v1, %v1752_v30  ;;  %vm1765_vm3 = vmor %vm1763_vm2, %vm1764_vm1 }
 0x22c   :  { %2753 = vadd.xlane.f32.xlu2 %v2752_v8  ;;  %v1781_v49 = vmul.f32 %v1756_v26, %v1589_v24 }
 0x22d   :  { %v2832_v23 = vsel %vm1398_vm0, %v2816_v35, 0.0  ;;  %v1760_v46 = vmul.f32 0.5, %v1759_v60 }
 0x22e   :  { %v2665_v6 = vpop.f32.mrf.mxu2  ;;  %2833 = vadd.xlane.f32.xlu0 %v2832_v23  ;;  %vm1797_vm15 = vcmp.gt.f32.partialorder %v1781_v49, 0.0  ;;  %v1813_v61 = vmul.f32 0.2, %v1781_v49  ;;  %v2570_v42 = vpop.f32.mrf.mxu0 }
 0x22f   :  { %v2714_v4 = vpop.f32.mrf.mxu3  ;;  %v2666_v9 = vadd.f32 %v2665_v6, %v2617_v62  ;;  %v1761_v50 = vsub.f32 1.5, %v1760_v46  ;;  %v2571_v43 = vadd.f32 %v2570_v42, %v5678_v19 }
 0x230   :  { %v2619_v48 = vpop.f32.mrf.mxu1  ;;  %v1829_v45 = vsel %vm1797_vm15, %v1781_v49, %v1813_v61 }
 0x231   :  { %v5955_v59 = vadd.f32 %v2714_v4, %v2666_v9  ;;  %v1762_v3 = vmul.f32 %v4344_v51, %v1761_v50  ;;  %1845 = vst.msk [vmem:[%s6222_s3 + $0x70] sm:$0xff] %vm1398_vm0, %v1829_v45  ;;  %v2620_v47 = vadd.f32 %v2619_v48, %v2571_v43 }
 0x233   :  { %v2817_v63 = vmul.f32 %v5955_v59, %v5955_v59  ;;  %v1766_v54 = vsel %vm1765_vm3, %v4344_v51, %v1762_v3  ;;  %v2755_v19 = vsel %vm1398_vm0, %v5955_v59, 0.0 }
 0x234   :  { %v1782_v7 = vmul.f32 %v1766_v54, %v1590_v37 }
 0x235   :  { %v2835_v18 = vsel %vm1398_vm0, %v2817_v63, 0.0 }
 0x236   :  { %v2668_v1 = vpop.f32.mrf.mxu2  ;;  %2756 = vadd.xlane.f32.xlu0 %v2755_v19  ;;  %2836 = vadd.xlane.f32.xlu1 %v2835_v18  ;;  %vm1798_vm4 = vcmp.gt.f32.partialorder %v1782_v7, 0.0  ;;  %v1814_v38 = vmul.f32 0.2, %v1782_v7  ;;  %v2572_v11 = vpop.f32.mrf.mxu0 }
 0x237   :  { %v2717_v28 = vpop.f32.mrf.mxu3  ;;  %v2669_v17 = vadd.f32 %v2668_v1, %v2620_v47  ;;  %v2573_v27 = vadd.f32 %v2572_v11, %v5692_v16 }
 0x238   :  { %v2621_v22 = vpop.f32.mrf.mxu1  ;;  %v1830_v58 = vsel %vm1798_vm4, %v1782_v7, %v1814_v38 }
 0x239   :  { %v5969_v36 = vadd.f32 %v2717_v28, %v2669_v17  ;;  %1846 = vst.msk [vmem:[%s6222_s3 + $0x78] sm:$0xff] %vm1398_vm0, %v1830_v58  ;;  %v2622_v53 = vadd.f32 %v2621_v22, %v2573_v27 }
 0x23b   :  { %v2818_v56 = vmul.f32 %v5969_v36, %v5969_v36  ;;  %v2758_v2 = vsel %vm1398_vm0, %v5969_v36, 0.0 }
 0x23d   :  { %v2838_v21 = vsel %vm1398_vm0, %v2818_v56, 0.0 }
 0x23e   :  { %v2670_v40 = vpop.f32.mrf.mxu2  ;;  %2839 = vadd.xlane.f32.xlu2 %v2838_v21  ;;  %2759 = vadd.xlane.f32.xlu1 %v2758_v2  ;;  %v2575_v16 = vpop.f32.mrf.mxu0 }
 0x23f   :  { %v2719_v14 = vpop.f32.mrf.mxu3  ;;  %v2671_v44 = vadd.f32 %v2670_v40, %v2622_v53  ;;  %v2576_v39 = vadd.f32 %v2575_v16, %v5715_v15 }
 0x240   :  { %v2624_v13 = vpop.f32.mrf.mxu1 }
 0x241   :  { %v5981_v51 = vadd.f32 %v2719_v14, %v2671_v44  ;;  %v2625_v12 = vadd.f32 %v2624_v13, %v2576_v39 }
 0x243   :  { %v2819_v52 = vmul.f32 %v5981_v51, %v5981_v51  ;;  %v2761_v30 = vsel %vm1398_vm0, %v5981_v51, 0.0 }
 0x245   :  { %v2841_v57 = vsel %vm1398_vm0, %v2819_v52, 0.0 }
 0x246   :  { %v2673_v8 = vpop.f32.mrf.mxu2  ;;  %2842 = vadd.xlane.f32.xlu0 %v2841_v57  ;;  %2762 = vadd.xlane.f32.xlu2 %v2761_v30  ;;  %v2577_v60 = vpop.f32.mrf.mxu0 }
 0x247   :  { %v2722_v35 = vpop.f32.mrf.mxu3  ;;  %v2674_v24 = vadd.f32 %v2673_v8, %v2625_v12  ;;  %v2578_v15 = vadd.f32 %v2577_v60, %v5732_v55 }
 0x248   :  { %v2626_v26 = vpop.f32.mrf.mxu1 }
 0x249   :  { %v5989_v62 = vadd.f32 %v2722_v35, %v2674_v24  ;;  %v2627_v49 = vadd.f32 %v2626_v26, %v2578_v15 }
 0x24b   :  { %v2820_v23 = vmul.f32 %v5989_v62, %v5989_v62  ;;  %v2764_v46 = vsel %vm1398_vm0, %v5989_v62, 0.0 }
 0x24d   :  { %v2844_v6 = vsel %vm1398_vm0, %v2820_v23, 0.0 }
 0x24e   :  { %v2675_v4 = vpop.f32.mrf.mxu2  ;;  %2765 = vadd.xlane.f32.xlu0 %v2764_v46  ;;  %2845 = vadd.xlane.f32.xlu1 %v2844_v6  ;;  %v2580_v50 = vpop.f32.mrf.mxu0 }
 0x24f   :  { %v2724_v9 = vpop.f32.mrf.mxu3  ;;  %v2676_v61 = vadd.f32 %v2675_v4, %v2627_v49  ;;  %v2581_v55 = vadd.f32 %v2580_v50, %v5755_v5 }
 0x250   :  { %v2629_v42 = vpop.f32.mrf.mxu1 }
 0x251   :  { %v5997_v48 = vadd.f32 %v2724_v9, %v2676_v61  ;;  %v2630_v45 = vadd.f32 %v2629_v42, %v2581_v55 }
 0x253   :  { %v2821_v43 = vmul.f32 %v5997_v48, %v5997_v48  ;;  %v2767_v37 = vsel %vm1398_vm0, %v5997_v48, 0.0 }
 0x255   :  { %v2847_v3 = vsel %vm1398_vm0, %v2821_v43, 0.0 }
 0x256   :  { %v2678_v63 = vpop.f32.mrf.mxu2  ;;  %2848 = vadd.xlane.f32.xlu2 %v2847_v3  ;;  %2768 = vadd.xlane.f32.xlu1 %v2767_v37  ;;  %v2582_v47 = vpop.f32.mrf.mxu0 }
 0x257   :  { %v2727_v54 = vpop.f32.mrf.mxu3  ;;  %v2679_v7 = vadd.f32 %v2678_v63, %v2630_v45  ;;  %v2583_v5 = vadd.f32 %v2582_v47, %v5771_v41 }
 0x258   :  { %v2631_v19 = vpop.f32.mrf.mxu1 }
 0x259   :  { %v6005_v18 = vadd.f32 %v2727_v54, %v2679_v7  ;;  %v2632_v28 = vadd.f32 %v2631_v19, %v2583_v5 }
 0x25b   :  { %v2822_v1 = vmul.f32 %v6005_v18, %v6005_v18  ;;  %v2770_v17 = vsel %vm1398_vm0, %v6005_v18, 0.0 }
 0x25d   :  { %v2850_v38 = vsel %vm1398_vm0, %v2822_v1, 0.0 }
 0x25e   :  { %v2680_v11 = vpop.f32.mrf.mxu2  ;;  %2851 = vadd.xlane.f32.xlu0 %v2850_v38  ;;  %2771 = vadd.xlane.f32.xlu2 %v2770_v17  ;;  %v2585_v27 = vpop.f32.mrf.mxu0 }
 0x25f   :  { %v2729_v22 = vpop.f32.mrf.mxu3  ;;  %v2681_v58 = vadd.f32 %v2680_v11, %v2632_v28  ;;  %v2586_v41 = vadd.f32 %v2585_v27, %v5793_v31 }
 0x260   :  { %v2634_v56 = vpop.f32.mrf.mxu1 }
 0x261   :  { %v6013_v53 = vadd.f32 %v2729_v22, %v2681_v58  ;;  %v2635_v2 = vadd.f32 %v2634_v56, %v2586_v41 }
 0x263   :  { %v2823_v21 = vmul.f32 %v6013_v53, %v6013_v53  ;;  %v2773_v40 = vsel %vm1398_vm0, %v6013_v53, 0.0 }
 0x265   :  { %v2853_v14 = vsel %vm1398_vm0, %v2823_v21, 0.0 }
 0x266   :  { %v2683_v44 = vpop.f32.mrf.mxu2  ;;  %2774 = vadd.xlane.f32.xlu0 %v2773_v40  ;;  %2854 = vadd.xlane.f32.xlu1 %v2853_v14  ;;  %v2587_v39 = vpop.f32.mrf.mxu0 }
 0x267   :  { %v2684_v16 = vadd.f32 %v2683_v44, %v2635_v2  ;;  %v2732_v13 = vpop.f32.mrf.mxu3  ;;  %v2588_v31 = vadd.f32 %v2587_v39, %v5813_v0 }
 0x268   :  { %v2636_v52 = vpop.f32.mrf.mxu1 }
 0x269   :  { %v6021_v12 = vadd.f32 %v2732_v13, %v2684_v16  ;;  %v2637_v30 = vadd.f32 %v2636_v52, %v2588_v31 }
 0x26b   :  { %v2824_v57 = vmul.f32 %v6021_v12, %v6021_v12  ;;  %v2776_v35 = vsel %vm1398_vm0, %v6021_v12, 0.0 }
 0x26d   :  { %v2856_v8 = vsel %vm1398_vm0, %v2824_v57, 0.0 }
 0x26e   :  { %v2685_v24 = vpop.f32.mrf.mxu2  ;;  %2857 = vadd.xlane.f32.xlu2 %v2856_v8  ;;  %2777 = vadd.xlane.f32.xlu1 %v2776_v35  ;;  %v2590_v15 = vpop.f32.mrf.mxu0 }
 0x26f   :  { %v2686_v60 = vadd.f32 %v2685_v24, %v2637_v30  ;;  %v2734_v26 = vpop.f32.mrf.mxu3  ;;  %v2591_v0 = vadd.f32 %v2590_v15, %v5838_v32 }
 0x270   :  { %v2639_v23 = vpop.f32.mrf.mxu1 }
 0x271   :  { %v6029_v49 = vadd.f32 %v2734_v26, %v2686_v60  ;;  %v2640_v6 = vadd.f32 %v2639_v23, %v2591_v0 }
 0x273   :  { %v2825_v46 = vmul.f32 %v6029_v49, %v6029_v49  ;;  %v2779_v9 = vsel %vm1398_vm0, %v6029_v49, 0.0 }
 0x275   :  { %v2859_v4 = vsel %vm1398_vm0, %v2825_v46, 0.0 }
 0x276   :  { %v2688_v61 = vpop.f32.mrf.mxu2  ;;  %2860 = vadd.xlane.f32.xlu0 %v2859_v4  ;;  %2780 = vadd.xlane.f32.xlu2 %v2779_v9  ;;  %v2592_v55 = vpop.f32.mrf.mxu0 }
 0x277   :  { %v2689_v50 = vadd.f32 %v2688_v61, %v2640_v6  ;;  %v2737_v42 = vpop.f32.mrf.mxu3  ;;  %v2593_v32 = vadd.f32 %v2592_v55, %v5854_v20 }
 0x278   :  { %v2641_v43 = vpop.f32.mrf.mxu1 }
 0x279   :  { %v6037_v45 = vadd.f32 %v2737_v42, %v2689_v50  ;;  %v2642_v37 = vadd.f32 %v2641_v43, %v2593_v32 }
 0x27b   :  { %v2826_v3 = vmul.f32 %v6037_v45, %v6037_v45  ;;  %v2782_v63 = vsel %vm1398_vm0, %v6037_v45, 0.0 }
 0x27d   :  { %v2862_v54 = vsel %vm1398_vm0, %v2826_v3, 0.0 }
 0x27e   :  { %v2690_v7 = vpop.f32.mrf.mxu2  ;;  %2783 = vadd.xlane.f32.xlu0 %v2782_v63  ;;  %2863 = vadd.xlane.f32.xlu1 %v2862_v54  ;;  %v2595_v5 = vpop.f32.mrf.mxu0 }
 0x27f   :  { %v2691_v47 = vadd.f32 %v2690_v7, %v2642_v37  ;;  %v2739_v19 = vpop.f32.mrf.mxu3  ;;  %v2596_v20 = vadd.f32 %v2595_v5, %v5881_v34 }
 0x280   :  { %v2644_v1 = vpop.f32.mrf.mxu1 }
 0x281   :  { %v6045_v28 = vadd.f32 %v2739_v19, %v2691_v47  ;;  %v2645_v17 = vadd.f32 %v2644_v1, %v2596_v20 }
 0x283   :  { %v2827_v38 = vmul.f32 %v6045_v28, %v6045_v28  ;;  %v2785_v22 = vsel %vm1398_vm0, %v6045_v28, 0.0 }
 0x285   :  { %v2865_v11 = vsel %vm1398_vm0, %v2827_v38, 0.0 }
 0x286   :  { %v2693_v58 = vpop.f32.mrf.mxu2  ;;  %2866 = vadd.xlane.f32.xlu2 %v2865_v11  ;;  %2786 = vadd.xlane.f32.xlu1 %v2785_v22  ;;  %v2597_v41 = vpop.f32.mrf.mxu0 }
 0x287   :  { %v2694_v27 = vadd.f32 %v2693_v58, %v2645_v17  ;;  %v2742_v56 = vpop.f32.mrf.mxu3  ;;  %v2598_v34 = vadd.f32 %v2597_v41, %v5899_v10 }
 0x288   :  { %v2646_v21 = vpop.f32.mrf.mxu1 }
 0x289   :  { %v6053_v2 = vadd.f32 %v2742_v56, %v2694_v27  ;;  %v2647_v14 = vadd.f32 %v2646_v21, %v2598_v34 }
 0x28b   :  { %v2828_v40 = vmul.f32 %v6053_v2, %v6053_v2  ;;  %v2788_v16 = vsel %vm1398_vm0, %v6053_v2, 0.0 }
 0x28d   :  { %v2868_v44 = vsel %vm1398_vm0, %v2828_v40, 0.0 }
 0x28e   :  { %v2695_v13 = vpop.f32.mrf.mxu2  ;;  %2869 = vadd.xlane.f32.xlu0 %v2868_v44  ;;  %2789 = vadd.xlane.f32.xlu2 %v2788_v16  ;;  %v2600_v31 = vpop.f32.mrf.mxu0 }
 0x28f   :  { %v2696_v39 = vadd.f32 %v2695_v13, %v2647_v14  ;;  %v2744_v52 = vpop.f32.mrf.mxu3  ;;  %v2601_v30 = vadd.f32 %v2600_v31, %v5920_v29 }
 0x290   :  { %v2649_v10 = vpop.f32.mrf.mxu1 }
 0x291   :  { %v6061_v57 = vadd.f32 %v2744_v52, %v2696_v39  ;;  %v2650_v8 = vadd.f32 %v2649_v10, %v2601_v30 }
 0x293   :  { %v2791_v35 = vsel %vm1398_vm0, %v6061_v57, 0.0  ;;  %v2829_v50 = vmul.f32 %v6061_v57, %v6061_v57 }
 0x295   :  { %v2871_v63 = vsel %vm1398_vm0, %v2829_v50, 0.0 }
 0x296   :  { %v2698_v24 = vpop.f32.mrf.mxu2  ;;  %2792 = vadd.xlane.f32.xlu0 %v2791_v35  ;;  %v2602_v15 = vpop.f32.mrf.mxu0 }
 0x297   :  { %v2699_v60 = vadd.f32 %v2698_v24, %v2650_v8  ;;  %v2747_v26 = vpop.f32.mrf.mxu3  ;;  %v2603_v0 = vadd.f32 %v2602_v15, %v5934_v33 }
 0x298   :  { %v2651_v6 = vpop.f32.mrf.mxu1 }
 0x299   :  { %v6066_v23 = vadd.f32 %v2747_v26, %v2699_v60  ;;  %v2652_v29 = vadd.f32 %v2651_v6, %v2603_v0 }
 0x29b   :  { %v2794_v46 = vsel %vm1398_vm0, %v6066_v23, 0.0  ;;  %v2830_v5 = vmul.f32 %v6066_v23, %v6066_v23 }
 0x29c   :  { %2795 = vadd.xlane.f32.xlu1 %v2794_v46 }
 0x29d   :  { %v2874_v17 = vsel %vm1398_vm0, %v2830_v5, 0.0 }
 0x29e   :  { %v2700_v4 = vpop.f32.mrf.mxu2 }
 0x29f   :  { %v2701_v9 = vadd.f32 %v2700_v4, %v2652_v29  ;;  %v2754_v61 = vpop.xlane.xlu2 %2753  ;;  %v2749_v42 = vpop.f32.mrf.mxu3 }
 0x2a0   :  { %v2800_v55 = vmul.f32 0.11111111, %v2754_v61 }
 0x2a1   :  { %v6073_v43 = vadd.f32 %v2749_v42, %v2701_v9  ;;  %v2834_v32 = vpop.xlane.xlu0 %2833 }
 0x2a2   :  { %v2896_v3 = vmul.f32 %v2800_v55, %v2800_v55  ;;  %v2880_v37 = vmul.f32 0.11111111, %v2834_v32  ;;  %v2928_v10 = vsub.f32 %v5940_v25, %v2800_v55 }
 0x2a3   :  { %v2797_v33 = vsel %vm1398_vm0, %v6073_v43, 0.0  ;;  %v2831_v54 = vmul.f32 %v6073_v43, %v6073_v43 }
 0x2a4   :  { %v2912_v7 = vsub.f32 %v2880_v37, %v2896_v3  ;;  %2798 = vadd.xlane.f32.xlu2 %v2797_v33  ;;  %2872 = vadd.xlane.f32.xlu1 %v2871_v63 }
 0x2a5   :  { %v2877_v47 = vsel %vm1398_vm0, %v2831_v54, 0.0 }
 0x2a6   :  { %v2944_v19 = vadd.f32 1e-05, %v2912_v7  ;;  %2878 = vadd.xlane.f32.xlu0 %v2877_v47 }
 0x2a8   :  { %4345 = vrsqrt.f32 %v2944_v19  ;;  %vm2966_vm6 = vweird.f32 %v2944_v19 }
 0x2a9   :  { %v2757_v1 = vpop.xlane.xlu0 %2756  ;;  %v2837_v20 = vpop.xlane.xlu1 %2836 }
 0x2aa   :  { %v2801_v38 = vmul.f32 0.11111111, %v2757_v1  ;;  %v2881_v22 = vmul.f32 0.11111111, %v2837_v20 }
 0x2ac   :  { %v2897_v11 = vmul.f32 %v2801_v38, %v2801_v38  ;;  %2875 = vadd.xlane.f32.xlu2 %v2874_v17  ;;  %v2929_v63 = vsub.f32 %v5955_v59, %v2801_v38 }
 0x2ae   :  { %v4346_v58 = vpop.eup %4345  ;;  %v2913_v27 = vsub.f32 %v2881_v22, %v2897_v11 }
 0x2af   :  { %v2961_v56 = vmul.f32 %v4346_v58, %v2944_v19  ;;  %vm2967_vm5 = vweird.f32 %v4346_v58 }
 0x2b0   :  { %v2945_v41 = vadd.f32 1e-05, %v2913_v27  ;;  %vm2968_vm7 = vmor %vm2966_vm6, %vm2967_vm5 }
 0x2b1   :  { %v2962_v21 = vmul.f32 %v4346_v58, %v2961_v56  ;;  %v2840_v34 = vpop.xlane.xlu2 %2839  ;;  %v2760_v40 = vpop.xlane.xlu1 %2759 }
 0x2b2   :  { %4347 = vrsqrt.f32 %v2945_v41  ;;  %v6084_v14 = vmul.f32 0.11111111, %v2760_v40  ;;  %v2882_v16 = vmul.f32 0.11111111, %v2840_v34  ;;  %vm2976_vm10 = vweird.f32 %v2945_v41 }
 0x2b3   :  { %v2963_v44 = vmul.f32 0.5, %v2962_v21 }
 0x2b4   :  { %v2898_v13 = vmul.f32 %v6084_v14, %v6084_v14  ;;  %v2930_v21 = vsub.f32 %v5969_v36, %v6084_v14 }
 0x2b5   :  { %v2964_v39 = vsub.f32 1.5, %v2963_v44 }
 0x2b6   :  { %v2914_v52 = vsub.f32 %v2882_v16, %v2898_v13 }
 0x2b7   :  { %v2965_v31 = vmul.f32 %v4346_v58, %v2964_v39 }
 0x2b8   :  { %v4348_v30 = vpop.eup %4347  ;;  %v2946_v8 = vadd.f32 1e-05, %v2914_v52 }
 0x2b9   :  { %v2969_v35 = vsel %vm2968_vm7, %v4346_v58, %v2965_v31  ;;  %v2971_v24 = vmul.f32 %v4348_v30, %v2945_v41  ;;  %v2843_v60 = vpop.xlane.xlu0 %2842  ;;  %v2763_v26 = vpop.xlane.xlu2 %2762  ;;  %vm2977_vm9 = vweird.f32 %v4348_v30 }
 0x2ba   :  { %v3120_v15 = vmul.f32 %v2969_v35, %v2928_v10  ;;  %4349 = vrsqrt.f32 %v2946_v8  ;;  %v6089_v46 = vmul.f32 0.11111111, %v2763_v26  ;;  %v2883_v4 = vmul.f32 0.11111111, %v2843_v60  ;;  %vm2978_vm11 = vmor %vm2976_vm10, %vm2977_vm9 }
 0x2bb   :  { %v2972_v0 = vmul.f32 %v4348_v30, %v2971_v24  ;;  %vm2986_vm14 = vweird.f32 %v2946_v8 }
 0x2bc   :  { %vm3136_vm8 = vcmp.gt.f32.partialorder %v3120_v15, 0.0  ;;  %v3152_v6 = vmul.f32 0.2, %v3120_v15  ;;  %v2899_v9 = vmul.f32 %v6089_v46, %v6089_v46 }
 0x2bd   :  { %v2973_v29 = vmul.f32 0.5, %v2972_v0 }
 0x2be   :  { %v3168_v61 = vsel %vm3136_vm8, %v3120_v15, %v3152_v6  ;;  %v2915_v50 = vsub.f32 %v2883_v4, %v2899_v9  ;;  %v2931_v6 = vsub.f32 %v5981_v51, %v6089_v46 }
 0x2bf   :  { %4101 = vst.msk [vmem:[%s6222_s3 + $0x80] sm:$0xff] %vm1398_vm0, %v3168_v61  ;;  %v2974_v25 = vsub.f32 1.5, %v2973_v29 }
 0x2c0   :  { %v4350_v42 = vpop.eup %4349  ;;  %v2947_v3 = vadd.f32 1e-05, %v2915_v50 }
 0x2c1   :  { %v2975_v55 = vmul.f32 %v4348_v30, %v2974_v25  ;;  %v2981_v32 = vmul.f32 %v4350_v42, %v2946_v8  ;;  %v2766_v37 = vpop.xlane.xlu0 %2765  ;;  %v2846_v33 = vpop.xlane.xlu1 %2845  ;;  %vm2987_vm13 = vweird.f32 %v4350_v42 }
 0x2c2   :  { %v6098_v54 = vmul.f32 0.11111111, %v2766_v37  ;;  %4351 = vrsqrt.f32 %v2947_v3  ;;  %v2884_v1 = vmul.f32 0.11111111, %v2846_v33  ;;  %vm2988_vm15 = vmor %vm2986_vm14, %vm2987_vm13  ;;  %vm2996_vm3 = vweird.f32 %v2947_v3 }
 0x2c3   :  { %v2979_v7 = vsel %vm2978_vm11, %v4348_v30, %v2975_v55  ;;  %v2982_v47 = vmul.f32 %v4350_v42, %v2981_v32 }
 0x2c4   :  { %v3121_v19 = vmul.f32 %v2979_v7, %v2929_v63  ;;  %v2900_v5 = vmul.f32 %v6098_v54, %v6098_v54  ;;  %v2932_v7 = vsub.f32 %v5989_v62, %v6098_v54 }
 0x2c5   :  { %v2983_v20 = vmul.f32 0.5, %v2982_v47 }
 0x2c6   :  { %vm3137_vm12 = vcmp.gt.f32.partialorder %v3121_v19, 0.0  ;;  %v3153_v17 = vmul.f32 0.2, %v3121_v19  ;;  %v2916_v11 = vsub.f32 %v2884_v1, %v2900_v5 }
 0x2c7   :  { %v2984_v22 = vsub.f32 1.5, %v2983_v20 }
 0x2c8   :  { %v3169_v58 = vsel %vm3137_vm12, %v3121_v19, %v3153_v17  ;;  %v2948_v27 = vadd.f32 1e-05, %v2916_v11  ;;  %v4352_v59 = vpop.eup %4351 }
 0x2c9   :  { %4102 = vst.msk [vmem:[%s6222_s3 + $0x88] sm:$0xff] %vm1398_vm0, %v3169_v58  ;;  %v2985_v38 = vmul.f32 %v4350_v42, %v2984_v22  ;;  %v2849_v56 = vpop.xlane.xlu2 %2848  ;;  %v2769_v41 = vpop.xlane.xlu1 %2768  ;;  %v2991_v34 = vmul.f32 %v4352_v59, %v2947_v3  ;;  %vm2997_vm2 = vweird.f32 %v4352_v59 }
 0x2ca   :  { %4353 = vrsqrt.f32 %v2948_v27  ;;  %v6108_v44 = vmul.f32 0.11111111, %v2769_v41  ;;  %v2885_v39 = vmul.f32 0.11111111, %v2849_v56  ;;  %vm2998_vm4 = vmor %vm2996_vm3, %vm2997_vm2  ;;  %vm3006_vm7 = vweird.f32 %v2948_v27 }
 0x2cb   :  { %v2989_v40 = vsel %vm2988_vm15, %v4350_v42, %v2985_v38  ;;  %v2992_v13 = vmul.f32 %v4352_v59, %v2991_v34 }
 0x2cc   :  { %v3122_v16 = vmul.f32 %v2989_v40, %v2930_v21  ;;  %v2901_v52 = vmul.f32 %v6108_v44, %v6108_v44 }
 0x2cd   :  { %v2993_v30 = vmul.f32 0.5, %v2992_v13 }
 0x2ce   :  { %vm3138_vm1 = vcmp.gt.f32.partialorder %v3122_v16, 0.0  ;;  %v3154_v31 = vmul.f32 0.2, %v3122_v16  ;;  %v2917_v10 = vsub.f32 %v2885_v39, %v2901_v52 }
 0x2cf   :  { %v2994_v24 = vsub.f32 1.5, %v2993_v30 }
 0x2d0   :  { %v4354_v8 = vpop.eup %4353  ;;  %v3170_v35 = vsel %vm3138_vm1, %v3122_v16, %v3154_v31  ;;  %v2949_v14 = vadd.f32 1e-05, %v2917_v10  ;;  %v2933_v16 = vsub.f32 %v5997_v48, %v6108_v44 }
 0x2d1   :  { %4103 = vst.msk [vmem:[%s6222_s3 + $0x90] sm:$0xff] %vm1398_vm0, %v3170_v35  ;;  %v3001_v36 = vmul.f32 %v4354_v8, %v2948_v27  ;;  %v2852_v60 = vpop.xlane.xlu0 %2851  ;;  %v2772_v26 = vpop.xlane.xlu2 %2771  ;;  %v2995_v15 = vmul.f32 %v4352_v59, %v2994_v24  ;;  %vm3007_vm6 = vweird.f32 %v4354_v8 }
 0x2d2   :  { %v6116_v0 = vmul.f32 0.11111111, %v2772_v26  ;;  %4355 = vrsqrt.f32 %v2949_v14  ;;  %v2886_v9 = vmul.f32 0.11111111, %v2852_v60  ;;  %vm3008_vm8 = vmor %vm3006_vm7, %vm3007_vm6  ;;  %vm3016_vm11 = vweird.f32 %v2949_v14 }
 0x2d3   :  { %v3002_v29 = vmul.f32 %v4354_v8, %v3001_v36  ;;  %v2999_v4 = vsel %vm2998_vm4, %v4352_v59, %v2995_v15 }
 0x2d4   :  { %v2902_v61 = vmul.f32 %v6116_v0, %v6116_v0  ;;  %v3123_v25 = vmul.f32 %v2999_v4, %v2931_v6  ;;  %v2934_v15 = vsub.f32 %v6005_v18, %v6116_v0 }
 0x2d5   :  { %v3003_v50 = vmul.f32 0.5, %v3002_v29 }
 0x2d6   :  { %v2918_v42 = vsub.f32 %v2886_v9, %v2902_v61  ;;  %vm3139_vm5 = vcmp.gt.f32.partialorder %v3123_v25, 0.0  ;;  %v3155_v55 = vmul.f32 0.2, %v3123_v25 }
 0x2d7   :  { %v3004_v32 = vsub.f32 1.5, %v3003_v50 }
 0x2d8   :  { %v2950_v3 = vadd.f32 1e-05, %v2918_v42  ;;  %v4356_v37 = vpop.eup %4355  ;;  %v3171_v33 = vsel %vm3139_vm5, %v3123_v25, %v3155_v55 }
 0x2d9   :  { %v3005_v63 = vmul.f32 %v4354_v8, %v3004_v32  ;;  %v2775_v51 = vpop.xlane.xlu0 %2774  ;;  %v2855_v46 = vpop.xlane.xlu1 %2854  ;;  %4104 = vst.msk [vmem:[%s6222_s3 + $0x98] sm:$0xff] %vm1398_vm0, %v3171_v33  ;;  %v3011_v47 = vmul.f32 %v4356_v37, %v2949_v14  ;;  %vm3017_vm10 = vweird.f32 %v4356_v37 }
 0x2da   :  { %4357 = vrsqrt.f32 %v2950_v3  ;;  %v6128_v5 = vmul.f32 0.11111111, %v2775_v51  ;;  %v2887_v11 = vmul.f32 0.11111111, %v2855_v46  ;;  %vm3018_vm12 = vmor %vm3016_vm11, %vm3017_vm10  ;;  %vm3026_vm15 = vweird.f32 %v2950_v3 }
 0x2db   :  { %v3009_v19 = vsel %vm3008_vm8, %v4354_v8, %v3005_v63  ;;  %v3012_v20 = vmul.f32 %v4356_v37, %v3011_v47 }
 0x2dc   :  { %v3124_v1 = vmul.f32 %v3009_v19, %v2932_v7  ;;  %v2903_v17 = vmul.f32 %v6128_v5, %v6128_v5  ;;  %v2935_v47 = vsub.f32 %v6013_v53, %v6128_v5 }
 0x2dd   :  { %v3013_v58 = vmul.f32 0.5, %v3012_v20 }
 0x2de   :  { %vm3140_vm9 = vcmp.gt.f32.partialorder %v3124_v1, 0.0  ;;  %v3156_v22 = vmul.f32 0.2, %v3124_v1  ;;  %v2919_v27 = vsub.f32 %v2887_v11, %v2903_v17 }
 0x2df   :  { %v3014_v56 = vsub.f32 1.5, %v3013_v58 }
 0x2e0   :  { %v4358_v59 = vpop.eup %4357  ;;  %v3172_v38 = vsel %vm3140_vm9, %v3124_v1, %v3156_v22  ;;  %v2951_v54 = vadd.f32 1e-05, %v2919_v27 }
 0x2e1   :  { %4105 = vst.msk [vmem:[%s6222_s3 + $0xa0] sm:$0xff] %vm1398_vm0, %v3172_v38  ;;  %v3021_v62 = vmul.f32 %v4358_v59, %v2950_v3  ;;  %v2858_v41 = vpop.xlane.xlu2 %2857  ;;  %v2778_v21 = vpop.xlane.xlu1 %2777  ;;  %v3015_v34 = vmul.f32 %v4356_v37, %v3014_v56  ;;  %vm3027_vm14 = vweird.f32 %v4358_v59 }
 0x2e2   :  { %v6136_v40 = vmul.f32 0.11111111, %v2778_v21  ;;  %4359 = vrsqrt.f32 %v2951_v54  ;;  %v2888_v52 = vmul.f32 0.11111111, %v2858_v41  ;;  %vm3028_vm1 = vmor %vm3026_vm15, %vm3027_vm14  ;;  %vm3036_vm4 = vweird.f32 %v2951_v54 }
 0x2e3   :  { %v3022_v13 = vmul.f32 %v4358_v59, %v3021_v62  ;;  %v3019_v39 = vsel %vm3018_vm12, %v4356_v37, %v3015_v34 }
 0x2e4   :  { %v2904_v31 = vmul.f32 %v6136_v40, %v6136_v40  ;;  %v3125_v30 = vmul.f32 %v3019_v39, %v2933_v16  ;;  %v2936_v41 = vsub.f32 %v6021_v12, %v6136_v40 }
 0x2e5   :  { %v3023_v10 = vmul.f32 0.5, %v3022_v13 }
 0x2e6   :  { %v2920_v8 = vsub.f32 %v2888_v52, %v2904_v31  ;;  %vm3141_vm13 = vcmp.gt.f32.partialorder %v3125_v30, 0.0  ;;  %v3157_v35 = vmul.f32 0.2, %v3125_v30 }
 0x2e7   :  { %v3024_v24 = vsub.f32 1.5, %v3023_v10 }
 0x2e8   :  { %v2952_v36 = vadd.f32 1e-05, %v2920_v8  ;;  %v4360_v14 = vpop.eup %4359  ;;  %v3173_v60 = vsel %vm3141_vm13, %v3125_v30, %v3157_v35 }
 0x2e9   :  { %v3025_v26 = vmul.f32 %v4358_v59, %v3024_v24  ;;  %v2861_v48 = vpop.xlane.xlu0 %2860  ;;  %v2781_v44 = vpop.xlane.xlu2 %2780  ;;  %4106 = vst.msk [vmem:[%s6222_s3 + $0xa8] sm:$0xff] %vm1398_vm0, %v3173_v60  ;;  %v3031_v6 = vmul.f32 %v4360_v14, %v2951_v54  ;;  %vm3037_vm3 = vweird.f32 %v4360_v14 }
 0x2ea   :  { %4361 = vrsqrt.f32 %v2952_v36  ;;  %v6148_v4 = vmul.f32 0.11111111, %v2781_v44  ;;  %v2889_v25 = vmul.f32 0.11111111, %v2861_v48  ;;  %vm3038_vm5 = vmor %vm3036_vm4, %vm3037_vm3  ;;  %vm3046_vm8 = vweird.f32 %v2952_v36 }
 0x2eb   :  { %v3029_v29 = vsel %vm3028_vm1, %v4358_v59, %v3025_v26  ;;  %v3032_v61 = vmul.f32 %v4360_v14, %v3031_v6 }
 0x2ec   :  { %v3126_v9 = vmul.f32 %v3029_v29, %v2934_v15  ;;  %v2905_v50 = vmul.f32 %v6148_v4, %v6148_v4  ;;  %v2937_v44 = vsub.f32 %v6029_v49, %v6148_v4 }
 0x2ed   :  { %v3033_v55 = vmul.f32 0.5, %v3032_v61 }
 0x2ee   :  { %vm3142_vm2 = vcmp.gt.f32.partialorder %v3126_v9, 0.0  ;;  %v3158_v42 = vmul.f32 0.2, %v3126_v9  ;;  %v2921_v32 = vsub.f32 %v2889_v25, %v2905_v50 }
 0x2ef   :  { %v3034_v33 = vsub.f32 1.5, %v3033_v55 }
 0x2f0   :  { %v4362_v3 = vpop.eup %4361  ;;  %v3174_v37 = vsel %vm3142_vm2, %v3126_v9, %v3158_v42  ;;  %v2953_v0 = vadd.f32 1e-05, %v2921_v32 }
 0x2f1   :  { %4107 = vst.msk [vmem:[%s6222_s3 + $0xb0] sm:$0xff] %vm1398_vm0, %v3174_v37  ;;  %v3041_v18 = vmul.f32 %v4362_v3, %v2952_v36  ;;  %v2784_v63 = vpop.xlane.xlu0 %2783  ;;  %v2864_v51 = vpop.xlane.xlu1 %2863  ;;  %v3035_v46 = vmul.f32 %v4360_v14, %v3034_v33  ;;  %vm3047_vm7 = vweird.f32 %v4362_v3 }
 0x2f2   :  { %v6156_v7 = vmul.f32 0.11111111, %v2784_v63  ;;  %4363 = vrsqrt.f32 %v2953_v0  ;;  %v2890_v17 = vmul.f32 0.11111111, %v2864_v51  ;;  %vm3048_vm9 = vmor %vm3046_vm8, %vm3047_vm7  ;;  %vm3056_vm12 = vweird.f32 %v2953_v0 }
 0x2f3   :  { %v3042_v19 = vmul.f32 %v4362_v3, %v3041_v18  ;;  %v3039_v1 = vsel %vm3038_vm5, %v4360_v14, %v3035_v46 }
 0x2f4   :  { %v2906_v20 = vmul.f32 %v6156_v7, %v6156_v7  ;;  %v3127_v11 = vmul.f32 %v3039_v1, %v2935_v47  ;;  %v2938_v49 = vsub.f32 %v6037_v45, %v6156_v7 }
 0x2f5   :  { %v3043_v22 = vmul.f32 0.5, %v3042_v19 }
 0x2f6   :  { %v2922_v58 = vsub.f32 %v2890_v17, %v2906_v20  ;;  %vm3143_vm6 = vcmp.gt.f32.partialorder %v3127_v11, 0.0  ;;  %v3159_v27 = vmul.f32 0.2, %v3127_v11 }
 0x2f7   :  { %v3044_v59 = vsub.f32 1.5, %v3043_v22 }
 0x2f8   :  { %v2954_v38 = vadd.f32 1e-05, %v2922_v58  ;;  %v4364_v56 = vpop.eup %4363  ;;  %v3175_v62 = vsel %vm3143_vm6, %v3127_v11, %v3159_v27 }
 0x2f9   :  { %v3045_v54 = vmul.f32 %v4362_v3, %v3044_v59  ;;  %v2867_v53 = vpop.xlane.xlu2 %2866  ;;  %v2787_v5 = vpop.xlane.xlu1 %2786  ;;  %4108 = vst.msk [vmem:[%s6222_s3 + $0xb8] sm:$0xff] %vm1398_vm0, %v3175_v62  ;;  %v3051_v21 = vmul.f32 %v4364_v56, %v2953_v0  ;;  %vm3057_vm11 = vweird.f32 %v4364_v56 }
 0x2fa   :  { %4365 = vrsqrt.f32 %v2954_v38  ;;  %v6168_v16 = vmul.f32 0.11111111, %v2787_v5  ;;  %v2891_v52 = vmul.f32 0.11111111, %v2867_v53  ;;  %vm3058_vm13 = vmor %vm3056_vm12, %vm3057_vm11  ;;  %vm3066_vm1 = vweird.f32 %v2954_v38 }
 0x2fb   :  { %v3049_v34 = vsel %vm3048_vm9, %v4362_v3, %v3045_v54  ;;  %v3052_v39 = vmul.f32 %v4364_v56, %v3051_v21 }
 0x2fc   :  { %v3128_v13 = vmul.f32 %v3049_v34, %v2936_v41  ;;  %v2907_v31 = vmul.f32 %v6168_v16, %v6168_v16  ;;  %v2939_v11 = vsub.f32 %v6045_v28, %v6168_v16 }
 0x2fd   :  { %v3053_v10 = vmul.f32 0.5, %v3052_v39 }
 0x2fe   :  { %vm3144_vm10 = vcmp.gt.f32.partialorder %v3128_v13, 0.0  ;;  %v3160_v30 = vmul.f32 0.2, %v3128_v13  ;;  %v2923_v8 = vsub.f32 %v2891_v52, %v2907_v31 }
 0x2ff   :  { %v3054_v36 = vsub.f32 1.5, %v3053_v10 }
 0x300   :  { %v4366_v35 = vpop.eup %4365  ;;  %v3176_v24 = vsel %vm3144_vm10, %v3128_v13, %v3160_v30  ;;  %v2955_v40 = vadd.f32 1e-05, %v2923_v8 }
 0x301   :  { %4109 = vst.msk [vmem:[%s6222_s3 + $0xc0] sm:$0xff] %vm1398_vm0, %v3176_v24  ;;  %v3061_v12 = vmul.f32 %v4366_v35, %v2954_v38  ;;  %v2870_v14 = vpop.xlane.xlu0 %2869  ;;  %v2790_v60 = vpop.xlane.xlu2 %2789  ;;  %v3055_v26 = vmul.f32 %v4364_v56, %v3054_v36  ;;  %vm3067_vm15 = vweird.f32 %v4366_v35 }
 0x302   :  { %v6176_v48 = vmul.f32 0.11111111, %v2790_v60  ;;  %4367 = vrsqrt.f32 %v2955_v40  ;;  %v2892_v29 = vmul.f32 0.11111111, %v2870_v14  ;;  %vm3068_vm2 = vmor %vm3066_vm1, %vm3067_vm15  ;;  %vm3076_vm5 = vweird.f32 %v2955_v40 }
 0x303   :  { %v3062_v15 = vmul.f32 %v4366_v35, %v3061_v12  ;;  %v3059_v6 = vsel %vm3058_vm13, %v4364_v56, %v3055_v26 }
 0x304   :  { %v2908_v9 = vmul.f32 %v6176_v48, %v6176_v48  ;;  %v3129_v61 = vmul.f32 %v3059_v6, %v2937_v44  ;;  %v2940_v28 = vsub.f32 %v6053_v2, %v6176_v48 }
 0x305   :  { %v3063_v25 = vmul.f32 0.5, %v3062_v15 }
 0x306   :  { %v2924_v50 = vsub.f32 %v2892_v29, %v2908_v9  ;;  %vm3145_vm14 = vcmp.gt.f32.partialorder %v3129_v61, 0.0  ;;  %v3161_v42 = vmul.f32 0.2, %v3129_v61 }
 0x307   :  { %v3064_v55 = vsub.f32 1.5, %v3063_v25 }
 0x308   :  { %v2956_v32 = vadd.f32 1e-05, %v2924_v50  ;;  %v4368_v3 = vpop.eup %4367  ;;  %v3177_v37 = vsel %vm3145_vm14, %v3129_v61, %v3161_v42 }
 0x309   :  { %v3065_v33 = vmul.f32 %v4366_v35, %v3064_v55  ;;  %4110 = vst.msk [vmem:[%s6222_s3 + $0xc8] sm:$0xff] %vm1398_vm0, %v3177_v37  ;;  %v3071_v4 = vmul.f32 %v4368_v3, %v2955_v40  ;;  %vm3077_vm4 = vweird.f32 %v4368_v3  ;;  %v2793_v7 = vpop.xlane.xlu0 %2792 }
 0x30a   :  { %4369 = vrsqrt.f32 %v2956_v32  ;;  %vm3078_vm6 = vmor %vm3076_vm5, %vm3077_vm4  ;;  %v2813_v27 = vmul.f32 0.11111111, %v2793_v7  ;;  %vm3086_vm9 = vweird.f32 %v2956_v32 }
 0x30b   :  { %v3069_v18 = vsel %vm3068_vm2, %v4366_v35, %v3065_v33  ;;  %v3072_v63 = vmul.f32 %v4368_v3, %v3071_v4 }
 0x30c   :  { %v3130_v0 = vmul.f32 %v3069_v18, %v2938_v49  ;;  %v2909_v5 = vmul.f32 %v2813_v27, %v2813_v27  ;;  %v2941_v37 = vsub.f32 %v6061_v57, %v2813_v27 }
 0x30d   :  { %v3073_v46 = vmul.f32 0.5, %v3072_v63 }
 0x30e   :  { %vm3146_vm3 = vcmp.gt.f32.partialorder %v3130_v0, 0.0  ;;  %v3162_v51 = vmul.f32 0.2, %v3130_v0 }
 0x30f   :  { %v2796_v47 = vpop.xlane.xlu1 %2795  ;;  %v3074_v20 = vsub.f32 1.5, %v3073_v46 }
 0x310   :  { %v4370_v19 = vpop.eup %4369  ;;  %v3178_v1 = vsel %vm3146_vm3, %v3130_v0, %v3162_v51  ;;  %v2814_v8 = vmul.f32 0.11111111, %v2796_v47 }
 0x311   :  { %4111 = vst.msk [vmem:[%s6222_s3 + $0xd0] sm:$0xff] %vm1398_vm0, %v3178_v1  ;;  %v3081_v45 = vmul.f32 %v4370_v19, %v2956_v32  ;;  %v3075_v17 = vmul.f32 %v4368_v3, %v3074_v20  ;;  %vm3087_vm8 = vweird.f32 %v4370_v19 }
 0x312   :  { %vm3088_vm10 = vmor %vm3086_vm9, %vm3087_vm8  ;;  %v2910_v60 = vmul.f32 %v2814_v8, %v2814_v8 }
 0x313   :  { %v3082_v22 = vmul.f32 %v4370_v19, %v3081_v45  ;;  %v3079_v58 = vsel %vm3078_vm6, %v4368_v3, %v3075_v17 }
 0x314   :  { %v3131_v59 = vmul.f32 %v3079_v58, %v2939_v11 }
 0x315   :  { %v3083_v38 = vmul.f32 0.5, %v3082_v22 }
 0x316   :  { %vm3147_vm7 = vcmp.gt.f32.partialorder %v3131_v59, 0.0  ;;  %v3163_v56 = vmul.f32 0.2, %v3131_v59 }
 0x317   :  { %v3084_v62 = vsub.f32 1.5, %v3083_v38  ;;  %v2799_v54 = vpop.xlane.xlu2 %2798  ;;  %v2873_v53 = vpop.xlane.xlu1 %2872 }
 0x318   :  { %v2815_v41 = vmul.f32 0.11111111, %v2799_v54  ;;  %v2893_v21 = vmul.f32 0.11111111, %v2873_v53  ;;  %v3179_v34 = vsel %vm3147_vm7, %v3131_v59, %v3163_v56 }
 0x319   :  { %v3085_v13 = vmul.f32 %v4370_v19, %v3084_v62  ;;  %v2879_v39 = vpop.xlane.xlu0 %2878  ;;  %4112 = vst.msk [vmem:[%s6222_s3 + $0xd8] sm:$0xff] %vm1398_vm0, %v3179_v34 }
 0x31a   :  { %v2911_v16 = vmul.f32 %v2815_v41, %v2815_v41  ;;  %v2925_v52 = vsub.f32 %v2893_v21, %v2909_v5  ;;  %v2895_v31 = vmul.f32 0.11111111, %v2879_v39  ;;  %v2943_v63 = vsub.f32 %v6073_v43, %v2815_v41 }
 0x31b   :  { %v3089_v30 = vsel %vm3088_vm10, %v4370_v19, %v3085_v13  ;;  %v2942_v43 = vsub.f32 %v6066_v23, %v2814_v8 }
 0x31c   :  { %v3132_v10 = vmul.f32 %v3089_v30, %v2940_v28  ;;  %v2957_v35 = vadd.f32 1e-05, %v2925_v52  ;;  %v2927_v24 = vsub.f32 %v2895_v31, %v2911_v16 }
 0x31e   :  { %vm3148_vm11 = vcmp.gt.f32.partialorder %v3132_v10, 0.0  ;;  %v3164_v36 = vmul.f32 0.2, %v3132_v10  ;;  %4371 = vrsqrt.f32 %v2957_v35  ;;  %v2959_v12 = vadd.f32 1e-05, %v2927_v24 }
 0x31f   :  { %v2876_v40 = vpop.xlane.xlu2 %2875  ;;  %vm3096_vm13 = vweird.f32 %v2957_v35 }
 0x320   :  { %v3180_v14 = vsel %vm3148_vm11, %v3132_v10, %v3164_v36  ;;  %v2894_v26 = vmul.f32 0.11111111, %v2876_v40  ;;  %4373 = vrsqrt.f32 %v2959_v12  ;;  %vm3116_vm1 = vweird.f32 %v2959_v12 }
 0x321   :  { %4113 = vst.msk [vmem:[%s6222_s3 + $0xe0] sm:$0xff] %vm1398_vm0, %v3180_v14 }
 0x322   :  { %v2926_v2 = vsub.f32 %v2894_v26, %v2910_v60 }
 0x324   :  { %v4372_v48 = vpop.eup %4371  ;;  %v2958_v44 = vadd.f32 1e-05, %v2926_v2 }
 0x325   :  { %v3091_v15 = vmul.f32 %v4372_v48, %v2957_v35  ;;  %vm3097_vm12 = vweird.f32 %v4372_v48 }
 0x326   :  { %4375 = vrsqrt.f32 %v2958_v44  ;;  %v4374_v6 = vpop.eup %4373  ;;  %vm3098_vm14 = vmor %vm3096_vm13, %vm3097_vm12  ;;  %vm3106_vm6 = vweird.f32 %v2958_v44 }
 0x327   :  { %v3092_v29 = vmul.f32 %v4372_v48, %v3091_v15  ;;  %v3111_v9 = vmul.f32 %v4374_v6, %v2959_v12  ;;  %vm3117_vm15 = vweird.f32 %v4374_v6 }
 0x328   :  { %vm3118_vm2 = vmor %vm3116_vm1, %vm3117_vm15 }
 0x329   :  { %v3093_v61 = vmul.f32 0.5, %v3092_v29  ;;  %v3112_v25 = vmul.f32 %v4374_v6, %v3111_v9 }
 0x32b   :  { %v3094_v50 = vsub.f32 1.5, %v3093_v61  ;;  %v3113_v55 = vmul.f32 0.5, %v3112_v25 }
 0x32c   :  { %v4376_v42 = vpop.eup %4375 }
 0x32d   :  { %v3095_v32 = vmul.f32 %v4372_v48, %v3094_v50  ;;  %v3101_v3 = vmul.f32 %v4376_v42, %v2958_v44  ;;  %v3114_v33 = vsub.f32 1.5, %v3113_v55  ;;  %vm3107_vm4 = vweird.f32 %v4376_v42 }
 0x32e   :  { %vm3108_vm7 = vmor %vm3106_vm6, %vm3107_vm4 }
 0x32f   :  { %v3099_v49 = vsel %vm3098_vm14, %v4372_v48, %v3095_v32  ;;  %v3102_v4 = vmul.f32 %v4376_v42, %v3101_v3  ;;  %v3115_v0 = vmul.f32 %v4374_v6, %v3114_v33 }
 0x330   :  { %v3133_v18 = vmul.f32 %v3099_v49, %v2941_v37 }
 0x331   :  { %v3103_v51 = vmul.f32 0.5, %v3102_v4  ;;  %v3119_v47 = vsel %vm3118_vm2, %v4374_v6, %v3115_v0 }
 0x332   :  { %vm3149_vm3 = vcmp.gt.f32.partialorder %v3133_v18, 0.0  ;;  %v3165_v46 = vmul.f32 0.2, %v3133_v18  ;;  %v3135_v19 = vmul.f32 %v3119_v47, %v2943_v63 }
 0x333   :  { %v3104_v1 = vsub.f32 1.5, %v3103_v51 }
 0x334   :  { %v3181_v20 = vsel %vm3149_vm3, %v3133_v18, %v3165_v46  ;;  %vm3151_vm5 = vcmp.gt.f32.partialorder %v3135_v19, 0.0  ;;  %v3167_v57 = vmul.f32 0.2, %v3135_v19 }
 0x335   :  { %4114 = vst.msk [vmem:[%s6222_s3 + $0xe8] sm:$0xff] %vm1398_vm0, %v3181_v20  ;;  %v3105_v45 = vmul.f32 %v4376_v42, %v3104_v1 }
 0x336   :  { %v3183_v7 = vsel %vm3151_vm5, %v3135_v19, %v3167_v57 }
 0x337   :  { %v3109_v17 = vsel %vm3108_vm7, %v4376_v42, %v3105_v45  ;;  %4116 = vst.msk [vmem:[%s6222_s3 + $0xf8] sm:$0xff] %vm1398_vm0, %v3183_v7 }
 0x338   :  { %v3134_v11 = vmul.f32 %v3109_v17, %v2942_v43 }
 0x33a   :  { %vm3150_vm8 = vcmp.gt.f32.partialorder %v3134_v11, 0.0  ;;  %v3166_v22 = vmul.f32 0.2, %v3134_v11 }
 0x33c   :  { %v3182_v58 = vsel %vm3150_vm8, %v3134_v11, %v3166_v22 }
 0x33d   :  { %4115 = vst.msk [vmem:[%s6222_s3 + $0xf0] sm:$0xff] %vm1398_vm0, %v3182_v58 }

// kernel: discriminator_forward.9
= control target key start
LH: loop header
LB: loop body
LE: loop exit
PB: predicated region body
PF: predicated region fallthrough
CT: control target
= control target key end

     0   :  { %v4107_v52 = vmov 0   ;;  %vm1293_vm0 = vcmask 24576   ;;  %s4970_s0 = inlined_call_operand.vmem [shape: bf16[2,2048,4], index: 0, kind: input, shape index: {}]   ;;  %s4971_s1 = inlined_call_operand.vmem [shape: bf16[1,2048], index: 1, kind: input, shape index: {}]   ;;  %s4972_s2 = inlined_call_operand.<no memory space> [shape: f32[1,1], index: 2, kind: input, shape index: {}]   ;;  %s4973_s3 = inlined_call_operand.vmem [shape: f32[2,1,4], index: 3, kind: output, shape index: {}]  }
   0x1   :  { %v3856_v0 = vld [vmem:[%s4970_s0 + $0x38] sm:$0xff]  ;;  %v3855_v4 = vld [vmem:[%s4970_s0 + $0x30] sm:$0xff]  ;;  %v3854_v8 = vld [vmem:[%s4970_s0 + $0x28] sm:$0xff]  ;;  %v8_v40 = vstv %s4972_s2  ;;  %4106 = vset.pattern.permute.xlu0 %v4107_v52 }
   0x2   :  { %v3864_v1 = vld [vmem:[%s4970_s0 + $0x78] sm:$0xff]  ;;  %1085 = vmatpush.bf16.msra.mxu0 %v3856_v0  ;;  %v3863_v5 = vld [vmem:[%s4970_s0 + $0x70] sm:$0xff]  ;;  %v3862_v9 = vld [vmem:[%s4970_s0 + $0x68] sm:$0xff]  ;;  %9 = vst [vmem:[#allocation2] sm:$0x1] %v8_v40 }
   0x3   :  { %v3872_v2 = vld [vmem:[%s4970_s0 + $0xb8] sm:$0xff]  ;;  %1098 = vmatpush.bf16.msra.mxu1 %v3864_v1  ;;  %v3871_v6 = vld [vmem:[%s4970_s0 + $0xb0] sm:$0xff]  ;;  %v3870_v10 = vld [vmem:[%s4970_s0 + $0xa8] sm:$0xff] }
   0x4   :  { %v3880_v3 = vld [vmem:[%s4970_s0 + $0xf8] sm:$0xff]  ;;  %1111 = vmatpush.bf16.msra.mxu2 %v3872_v2  ;;  %v3879_v7 = vld [vmem:[%s4970_s0 + $0xf0] sm:$0xff]  ;;  %v3878_v11 = vld [vmem:[%s4970_s0 + $0xe8] sm:$0xff] }
   0x5   :  { %1124 = vmatpush.bf16.msra.mxu3 %v3880_v3  ;;  %v3853_v12 = vld [vmem:[%s4970_s0 + $0x20] sm:$0xff]  ;;  %v3852_v16 = vld [vmem:[%s4970_s0 + $0x18] sm:$0xff]  ;;  %v3851_v21 = vld [vmem:[%s4970_s0 + $0x10] sm:$0xff] }
   0x6   :  { %1086 = vmatpush.bf16.msra.mxu0 %v3855_v4  ;;  %v3861_v13 = vld [vmem:[%s4970_s0 + $0x60] sm:$0xff]  ;;  %v3860_v17 = vld [vmem:[%s4970_s0 + $0x58] sm:$0xff]  ;;  %v3859_v22 = vld [vmem:[%s4970_s0 + $0x50] sm:$0xff] }
   0x7   :  { %1099 = vmatpush.bf16.msra.mxu1 %v3863_v5  ;;  %v3869_v14 = vld [vmem:[%s4970_s0 + $0xa0] sm:$0xff]  ;;  %v3868_v18 = vld [vmem:[%s4970_s0 + $0x98] sm:$0xff]  ;;  %v3867_v23 = vld [vmem:[%s4970_s0 + $0x90] sm:$0xff] }
   0x8   :  { %1112 = vmatpush.bf16.msra.mxu2 %v3871_v6  ;;  %v3877_v15 = vld [vmem:[%s4970_s0 + $0xe0] sm:$0xff]  ;;  %v3876_v19 = vld [vmem:[%s4970_s0 + $0xd8] sm:$0xff]  ;;  %v3875_v24 = vld [vmem:[%s4970_s0 + $0xd0] sm:$0xff] }
   0x9   :  { %1125 = vmatpush.bf16.msra.mxu3 %v3879_v7  ;;  %v4191_v20 = vld [vmem:[%s4971_s1] sm:$0xff]  ;;  %v3850_v25 = vld [vmem:[%s4970_s0 + $0x8] sm:$0xff]  ;;  %v3888_v33 = vld [vmem:[%s4970_s0 + $0x138] sm:$0xff] }
   0xa   :  { %1087 = vmatpush.bf16.msra.mxu0 %v3854_v8  ;;  %282 = vst [vmem:[#allocation1] ss:$9 sm:$0xff] %v4191_v20  ;;  %v3858_v26 = vld [vmem:[%s4970_s0 + $0x48] sm:$0xff]  ;;  %v3849_v29 = vld [vmem:[%s4970_s0] sm:$0xff]  ;;  %v3896_v34 = vld [vmem:[%s4970_s0 + $0x178] sm:$0xff] }
   0xb   :  { %1100 = vmatpush.bf16.msra.mxu1 %v3862_v9  ;;  %v3866_v27 = vld [vmem:[%s4970_s0 + $0x88] sm:$0xff]  ;;  %v3857_v30 = vld [vmem:[%s4970_s0 + $0x40] sm:$0xff]  ;;  %v3904_v35 = vld [vmem:[%s4970_s0 + $0x1b8] sm:$0xff] }
   0xc   :  { %1113 = vmatpush.bf16.msra.mxu2 %v3870_v10  ;;  %v3874_v28 = vld [vmem:[%s4970_s0 + $0xc8] sm:$0xff]  ;;  %v3865_v31 = vld [vmem:[%s4970_s0 + $0x80] sm:$0xff]  ;;  %v3912_v36 = vld [vmem:[%s4970_s0 + $0x1f8] sm:$0xff] }
   0xd   :  { %1126 = vmatpush.bf16.msra.mxu3 %v3878_v11  ;;  %v3873_v32 = vld [vmem:[%s4970_s0 + $0xc0] sm:$0xff]  ;;  %v3887_v37 = vld [vmem:[%s4970_s0 + $0x130] sm:$0xff]  ;;  %v3886_v46 = vld [vmem:[%s4970_s0 + $0x128] sm:$0xff] }
   0xe   :  { %1088 = vmatpush.bf16.msra.mxu0 %v3853_v12  ;;  %v3895_v41 = vld [vmem:[%s4970_s0 + $0x170] sm:$0xff]  ;;  %v3894_v47 = vld [vmem:[%s4970_s0 + $0x168] sm:$0xff]  ;;  %v3885_v57 = vld [vmem:[%s4970_s0 + $0x120] sm:$0xff] }
   0xf   :  { %1101 = vmatpush.bf16.msra.mxu1 %v3861_v13  ;;  %v3903_v44 = vld [vmem:[%s4970_s0 + $0x1b0] sm:$0xff]  ;;  %v3902_v48 = vld [vmem:[%s4970_s0 + $0x1a8] sm:$0xff]  ;;  %v3893_v58 = vld [vmem:[%s4970_s0 + $0x160] sm:$0xff] }
  0x10   :  { %1114 = vmatpush.bf16.msra.mxu2 %v3869_v14  ;;  %v3911_v45 = vld [vmem:[%s4970_s0 + $0x1f0] sm:$0xff]  ;;  %v3910_v49 = vld [vmem:[%s4970_s0 + $0x1e8] sm:$0xff]  ;;  %v3901_v59 = vld [vmem:[%s4970_s0 + $0x1a0] sm:$0xff] }
  0x11   :  { %1127 = vmatpush.bf16.msra.mxu3 %v3877_v15  ;;  %v285_v38 = vld [vmem:[#allocation1 + $0x12] sm:$0xff]  ;;  %v283_v39 = vld [vmem:[#allocation1] sm:$0xff]  ;;  %v284_v43 = vld [vmem:[#allocation1 + $0x9] sm:$0xff] }
  0x12   :  { %1089 = vmatpush.bf16.msra.mxu0 %v3852_v16  ;;  %v286_v42 = vld [vmem:[#allocation1 + $0x1b] sm:$0xff]  ;;  %v4272_v50 = vld [vmem:[%s4971_s1 + $0x8] sm:$0xff]  ;;  %v3883_v1 = vld [vmem:[%s4970_s0 + $0x110] sm:$0xff] }
  0x13   :  { %1102 = vmatpush.bf16.msra.mxu1 %v3860_v17  ;;  %v4274_v51 = vld [vmem:[#allocation1 + $0x36] sm:$0xff]  ;;  %v287_v53 = vld [vmem:[#allocation1 + $0x24] sm:$0xff]  ;;  %v288_v56 = vld [vmem:[#allocation1 + $0x2d] sm:$0xff] }
  0x14   :  { %1115 = vmatpush.bf16.msra.mxu2 %v3868_v18  ;;  %v290_v54 = vld [vmem:[#allocation1 + $0x3f] sm:$0xff]  ;;  %v18_v55 = vld [vmem:[#allocation2] sm:$0x1]  ;;  %v3891_v2 = vld [vmem:[%s4970_s0 + $0x150] sm:$0xff] }
  0x15   :  { %1128 = vmatpush.bf16.msra.mxu3 %v3876_v19  ;;  %292 = vst [vmem:[#allocation1] ss:$9 sm:$0xff] %v4272_v50  ;;  %v3909_v60 = vld [vmem:[%s4970_s0 + $0x1e0] sm:$0xff]  ;;  %277 = vperm.xlu0 %4106, %v18_v55   ;;  %v3884_v61 = vld [vmem:[%s4970_s0 + $0x118] sm:$0xff]  ;;  %v3899_v3 = vld [vmem:[%s4970_s0 + $0x190] sm:$0xff] }
  0x16   :  { %1090 = vmatpush.bf16.msra.mxu0 %v3851_v21  ;;  %v3892_v62 = vld [vmem:[%s4970_s0 + $0x158] sm:$0xff]  ;;  %v3907_v4 = vld [vmem:[%s4970_s0 + $0x1d0] sm:$0xff]  ;;  %v3882_v5 = vld [vmem:[%s4970_s0 + $0x108] sm:$0xff] }
  0x17   :  { %1103 = vmatpush.bf16.msra.mxu1 %v3859_v22  ;;  %v3900_v63 = vld [vmem:[%s4970_s0 + $0x198] sm:$0xff]  ;;  %v3890_v6 = vld [vmem:[%s4970_s0 + $0x148] sm:$0xff]  ;;  %v3881_v9 = vld [vmem:[%s4970_s0 + $0x100] sm:$0xff] }
  0x18   :  { %1116 = vmatpush.bf16.msra.mxu2 %v3867_v23  ;;  %v3908_v0 = vld [vmem:[%s4970_s0 + $0x1d8] sm:$0xff]  ;;  %v3898_v7 = vld [vmem:[%s4970_s0 + $0x188] sm:$0xff]  ;;  %v3889_v10 = vld [vmem:[%s4970_s0 + $0x140] sm:$0xff] }
  0x19   :  { %1129 = vmatpush.bf16.msra.mxu3 %v3875_v24  ;;  %v3906_v8 = vld [vmem:[%s4970_s0 + $0x1c8] sm:$0xff]  ;;  %v3897_v11 = vld [vmem:[%s4970_s0 + $0x180] sm:$0xff]  ;;  %v3920_v13 = vld [vmem:[%s4970_s0 + $0x238] sm:$0xff] }
  0x1a   :  { %1091 = vmatpush.bf16.msra.mxu0 %v3850_v25  ;;  %v3905_v12 = vld [vmem:[%s4970_s0 + $0x1c0] sm:$0xff]  ;;  %v3928_v14 = vld [vmem:[%s4970_s0 + $0x278] sm:$0xff]  ;;  %v3919_v17 = vld [vmem:[%s4970_s0 + $0x230] sm:$0xff] }
  0x1b   :  { %1104 = vmatpush.bf16.msra.mxu1 %v3858_v26  ;;  %v3936_v15 = vld [vmem:[%s4970_s0 + $0x2b8] sm:$0xff]  ;;  %v3927_v18 = vld [vmem:[%s4970_s0 + $0x270] sm:$0xff]  ;;  %v3918_v22 = vld [vmem:[%s4970_s0 + $0x228] sm:$0xff] }
  0x1c   :  { %1117 = vmatpush.bf16.msra.mxu2 %v3866_v27  ;;  %v3944_v16 = vld [vmem:[%s4970_s0 + $0x2f8] sm:$0xff]  ;;  %v3935_v19 = vld [vmem:[%s4970_s0 + $0x2b0] sm:$0xff]  ;;  %v3926_v23 = vld [vmem:[%s4970_s0 + $0x268] sm:$0xff] }
  0x1d   :  { %1130 = vmatpush.bf16.msra.mxu3 %v3874_v28  ;;  %v3943_v21 = vld [vmem:[%s4970_s0 + $0x2f0] sm:$0xff]  ;;  %v3934_v24 = vld [vmem:[%s4970_s0 + $0x2a8] sm:$0xff]  ;;  %v3917_v26 = vld [vmem:[%s4970_s0 + $0x220] sm:$0xff] }
  0x1e   :  { %1092 = vmatpush.bf16.msra.mxu0 %v3849_v29  ;;  %v3942_v25 = vld [vmem:[%s4970_s0 + $0x2e8] sm:$0xff]  ;;  %v3925_v27 = vld [vmem:[%s4970_s0 + $0x260] sm:$0xff]  ;;  %v295_v52 = vld [vmem:[#allocation1 + $0x12] sm:$0xff] }
  0x1f   :  { %1105 = vmatpush.bf16.msra.mxu1 %v3857_v30  ;;  %v3933_v28 = vld [vmem:[%s4970_s0 + $0x2a0] sm:$0xff]  ;;  %v3916_v30 = vld [vmem:[%s4970_s0 + $0x218] sm:$0xff]  ;;  %v3930_v40 = vld [vmem:[%s4970_s0 + $0x288] sm:$0xff] }
  0x20   :  { %1118 = vmatpush.bf16.msra.mxu2 %v3865_v31  ;;  %v3941_v29 = vld [vmem:[%s4970_s0 + $0x2e0] sm:$0xff]  ;;  %v3924_v31 = vld [vmem:[%s4970_s0 + $0x258] sm:$0xff]  ;;  %v3951_v55 = vld [vmem:[%s4970_s0 + $0x330] sm:$0xff] }
  0x21   :  { %1131 = vmatpush.bf16.msra.mxu3 %v3873_v32  ;;  %1093 = vmatmul.bf16.vlgmr.msra.gmra.mxu0 %v283_v39  ;;  %v3932_v32 = vld [vmem:[%s4970_s0 + $0x298] sm:$0xff]  ;;  %v3922_v39 = vld [vmem:[%s4970_s0 + $0x248] sm:$0xff] }
  0x22   :  { %1137 = vmatpush.bf16.msrb.mxu0 %v3888_v33  ;;  %1106 = vmatmul.bf16.vlgmr.msra.gmra.mxu1 %v284_v43  ;;  %v3940_v33 = vld [vmem:[%s4970_s0 + $0x2d8] sm:$0xff]  ;;  %v3921_v43 = vld [vmem:[%s4970_s0 + $0x240] sm:$0xff] }
  0x23   :  { %1150 = vmatpush.bf16.msrb.mxu1 %v3896_v34  ;;  %1119 = vmatmul.bf16.vlgmr.msra.gmra.mxu2 %v285_v38  ;;  %v3915_v34 = vld [vmem:[%s4970_s0 + $0x210] sm:$0xff]  ;;  %v3914_v38 = vld [vmem:[%s4970_s0 + $0x208] sm:$0xff] }
  0x24   :  { %1163 = vmatpush.bf16.msrb.mxu2 %v3904_v35  ;;  %1132 = vmatmul.bf16.vlgmr.msra.gmra.mxu3 %v286_v42  ;;  %v3923_v35 = vld [vmem:[%s4970_s0 + $0x250] sm:$0xff]  ;;  %v3913_v42 = vld [vmem:[%s4970_s0 + $0x200] sm:$0xff] }
  0x25   :  { %1176 = vmatpush.bf16.msrb.mxu3 %v3912_v36  ;;  %v3931_v36 = vld [vmem:[%s4970_s0 + $0x290] sm:$0xff] }
  0x26   :  { %1138 = vmatpush.bf16.msrb.mxu0 %v3887_v37  ;;  %v3939_v37 = vld [vmem:[%s4970_s0 + $0x2d0] sm:$0xff] }
  0x27   :  { %1151 = vmatpush.bf16.msrb.mxu1 %v3895_v41  ;;  %v3938_v41 = vld [vmem:[%s4970_s0 + $0x2c8] sm:$0xff] }
  0x28   :  { %1164 = vmatpush.bf16.msrb.mxu2 %v3903_v44  ;;  %v3929_v44 = vld [vmem:[%s4970_s0 + $0x280] sm:$0xff] }
  0x29   :  { %1177 = vmatpush.bf16.msrb.mxu3 %v3911_v45  ;;  %v3937_v45 = vld [vmem:[%s4970_s0 + $0x2c0] sm:$0xff] }
  0x2a   :  { %1139 = vmatpush.bf16.msrb.mxu0 %v3886_v46  ;;  %v3952_v46 = vld [vmem:[%s4970_s0 + $0x338] sm:$0xff] }
  0x2b   :  { %1152 = vmatpush.bf16.msrb.mxu1 %v3894_v47  ;;  %v3960_v47 = vld [vmem:[%s4970_s0 + $0x378] sm:$0xff] }
  0x2c   :  { %1165 = vmatpush.bf16.msrb.mxu2 %v3902_v48  ;;  %v3968_v48 = vld [vmem:[%s4970_s0 + $0x3b8] sm:$0xff] }
  0x2d   :  { %1178 = vmatpush.bf16.msrb.mxu3 %v3910_v49  ;;  %v3976_v49 = vld [vmem:[%s4970_s0 + $0x3f8] sm:$0xff] }
  0x2e   :  { %1140 = vmatpush.bf16.msrb.mxu0 %v3885_v57  ;;  %v3967_v57 = vld [vmem:[%s4970_s0 + $0x3b0] sm:$0xff] }
  0x2f   :  { %1153 = vmatpush.bf16.msrb.mxu1 %v3893_v58  ;;  %v3975_v58 = vld [vmem:[%s4970_s0 + $0x3f0] sm:$0xff] }
  0x30   :  { %1166 = vmatpush.bf16.msrb.mxu2 %v3901_v59  ;;  %v4458_v59 = vld [vmem:[#allocation1 + $0x24] sm:$0xff] }
  0x31   :  { %1179 = vmatpush.bf16.msrb.mxu3 %v3909_v60  ;;  %v4460_v60 = vld [vmem:[#allocation1 + $0x36] sm:$0xff] }
  0x32   :  { %1141 = vmatpush.bf16.msrb.mxu0 %v3884_v61  ;;  %v4462_v61 = vld [vmem:[#allocation1 + $0x2d] sm:$0xff] }
  0x33   :  { %1154 = vmatpush.bf16.msrb.mxu1 %v3892_v62  ;;  %v4464_v62 = vld [vmem:[#allocation1 + $0x3f] sm:$0xff] }
  0x34   :  { %1167 = vmatpush.bf16.msrb.mxu2 %v3900_v63  ;;  %v3950_v63 = vld [vmem:[%s4970_s0 + $0x328] sm:$0xff] }
  0x35   :  { %1180 = vmatpush.bf16.msrb.mxu3 %v3908_v0  ;;  %v3958_v0 = vld [vmem:[%s4970_s0 + $0x368] sm:$0xff] }
  0x36   :  { %1142 = vmatpush.bf16.msrb.mxu0 %v3883_v1  ;;  %v3966_v1 = vld [vmem:[%s4970_s0 + $0x3a8] sm:$0xff] }
  0x37   :  { %1155 = vmatpush.bf16.msrb.mxu1 %v3891_v2  ;;  %v3949_v2 = vld [vmem:[%s4970_s0 + $0x320] sm:$0xff] }
  0x38   :  { %1168 = vmatpush.bf16.msrb.mxu2 %v3899_v3  ;;  %v3957_v3 = vld [vmem:[%s4970_s0 + $0x360] sm:$0xff] }
  0x39   :  { %1181 = vmatpush.bf16.msrb.mxu3 %v3907_v4  ;;  %v3965_v4 = vld [vmem:[%s4970_s0 + $0x3a0] sm:$0xff] }
  0x3a   :  { %1143 = vmatpush.bf16.msrb.mxu0 %v3882_v5  ;;  %v3973_v5 = vld [vmem:[%s4970_s0 + $0x3e0] sm:$0xff] }
  0x3b   :  { %1156 = vmatpush.bf16.msrb.mxu1 %v3890_v6  ;;  %v3948_v6 = vld [vmem:[%s4970_s0 + $0x318] sm:$0xff] }
  0x3c   :  { %1169 = vmatpush.bf16.msrb.mxu2 %v3898_v7  ;;  %v3956_v7 = vld [vmem:[%s4970_s0 + $0x358] sm:$0xff] }
  0x3d   :  { %1182 = vmatpush.bf16.msrb.mxu3 %v3906_v8  ;;  %v3964_v8 = vld [vmem:[%s4970_s0 + $0x398] sm:$0xff] }
  0x3e   :  { %1144 = vmatpush.bf16.msrb.mxu0 %v3881_v9  ;;  %v3972_v9 = vld [vmem:[%s4970_s0 + $0x3d8] sm:$0xff] }
  0x3f   :  { %1157 = vmatpush.bf16.msrb.mxu1 %v3889_v10  ;;  %v3947_v10 = vld [vmem:[%s4970_s0 + $0x310] sm:$0xff] }
  0x40   :  { %1170 = vmatpush.bf16.msrb.mxu2 %v3897_v11  ;;  %v3955_v11 = vld [vmem:[%s4970_s0 + $0x350] sm:$0xff] }
  0x41   :  { %1183 = vmatpush.bf16.msrb.mxu3 %v3905_v12  ;;  %1145 = vmatmul.bf16.vlgmr.msrb.gmra.mxu0 %v287_v53  ;;  %v294_v53 = vld [vmem:[#allocation1 + $0x9] sm:$0xff] }
  0x42   :  { %1189 = vmatpush.bf16.msra.mxu0 %v3920_v13  ;;  %1158 = vmatmul.bf16.vlgmr.msrb.gmra.mxu1 %v288_v56  ;;  %v3959_v56 = vld [vmem:[%s4970_s0 + $0x370] sm:$0xff] }
  0x43   :  { %1202 = vmatpush.bf16.msra.mxu1 %v3928_v14  ;;  %1171 = vmatmul.bf16.vlgmr.msrb.gmra.mxu2 %v4274_v51  ;;  %v293_v51 = vld [vmem:[#allocation1] sm:$0xff]  ;;  %v3963_v12 = vld [vmem:[%s4970_s0 + $0x390] sm:$0xff]  ;;  %v3946_v14 = vld [vmem:[%s4970_s0 + $0x308] sm:$0xff] }
  0x44   :  { %1215 = vmatpush.bf16.msra.mxu2 %v3936_v15  ;;  %1184 = vmatmul.bf16.vlgmr.msrb.gmra.mxu3 %v290_v54  ;;  %v296_v54 = vld [vmem:[#allocation1 + $0x1b] sm:$0xff]  ;;  %v3971_v13 = vld [vmem:[%s4970_s0 + $0x3d0] sm:$0xff]  ;;  %v3954_v15 = vld [vmem:[%s4970_s0 + $0x348] sm:$0xff] }
  0x45   :  { %1228 = vmatpush.bf16.msra.mxu3 %v3944_v16  ;;  %1552 = vst [vmem:[#allocation1] ss:$9 sm:$0xff] %v4191_v20  ;;  %v3974_v20 = vld [vmem:[%s4970_s0 + $0x3e8] sm:$0xff] }
  0x46   :  { %1190 = vmatpush.bf16.msra.mxu0 %v3919_v17  ;;  %v3962_v16 = vld [vmem:[%s4970_s0 + $0x388] sm:$0xff] }
  0x47   :  { %1203 = vmatpush.bf16.msra.mxu1 %v3927_v18  ;;  %v3970_v17 = vld [vmem:[%s4970_s0 + $0x3c8] sm:$0xff]  ;;  %v3945_v18 = vld [vmem:[%s4970_s0 + $0x300] sm:$0xff] }
  0x48   :  { %1216 = vmatpush.bf16.msra.mxu2 %v3935_v19  ;;  %v3953_v19 = vld [vmem:[%s4970_s0 + $0x340] sm:$0xff] }
  0x49   :  { %1229 = vmatpush.bf16.msra.mxu3 %v3943_v21  ;;  %v3961_v21 = vld [vmem:[%s4970_s0 + $0x380] sm:$0xff] }
  0x4a   :  { %1191 = vmatpush.bf16.msra.mxu0 %v3918_v22  ;;  %v3969_v22 = vld [vmem:[%s4970_s0 + $0x3c0] sm:$0xff] }
  0x4b   :  { %1204 = vmatpush.bf16.msra.mxu1 %v3926_v23  ;;  %v3984_v23 = vld [vmem:[%s4970_s0 + $0x438] sm:$0xff] }
  0x4c   :  { %1217 = vmatpush.bf16.msra.mxu2 %v3934_v24  ;;  %v3992_v24 = vld [vmem:[%s4970_s0 + $0x478] sm:$0xff] }
  0x4d   :  { %1230 = vmatpush.bf16.msra.mxu3 %v3942_v25  ;;  %v4000_v25 = vld [vmem:[%s4970_s0 + $0x4b8] sm:$0xff] }
  0x4e   :  { %1192 = vmatpush.bf16.msra.mxu0 %v3917_v26  ;;  %v4008_v26 = vld [vmem:[%s4970_s0 + $0x4f8] sm:$0xff] }
  0x4f   :  { %1205 = vmatpush.bf16.msra.mxu1 %v3925_v27  ;;  %v3983_v27 = vld [vmem:[%s4970_s0 + $0x430] sm:$0xff] }
  0x50   :  { %1218 = vmatpush.bf16.msra.mxu2 %v3933_v28  ;;  %v3991_v28 = vld [vmem:[%s4970_s0 + $0x470] sm:$0xff] }
  0x51   :  { %1231 = vmatpush.bf16.msra.mxu3 %v3941_v29  ;;  %v3999_v29 = vld [vmem:[%s4970_s0 + $0x4b0] sm:$0xff] }
  0x52   :  { %1193 = vmatpush.bf16.msra.mxu0 %v3916_v30  ;;  %v4007_v30 = vld [vmem:[%s4970_s0 + $0x4f0] sm:$0xff] }
  0x53   :  { %1206 = vmatpush.bf16.msra.mxu1 %v3924_v31  ;;  %v3982_v31 = vld [vmem:[%s4970_s0 + $0x428] sm:$0xff] }
  0x54   :  { %1219 = vmatpush.bf16.msra.mxu2 %v3932_v32  ;;  %v3990_v32 = vld [vmem:[%s4970_s0 + $0x468] sm:$0xff] }
  0x55   :  { %1232 = vmatpush.bf16.msra.mxu3 %v3940_v33  ;;  %v3998_v33 = vld [vmem:[%s4970_s0 + $0x4a8] sm:$0xff] }
  0x56   :  { %1194 = vmatpush.bf16.msra.mxu0 %v3915_v34  ;;  %v4006_v34 = vld [vmem:[%s4970_s0 + $0x4e8] sm:$0xff] }
  0x57   :  { %1207 = vmatpush.bf16.msra.mxu1 %v3923_v35  ;;  %v3981_v35 = vld [vmem:[%s4970_s0 + $0x420] sm:$0xff] }
  0x58   :  { %1220 = vmatpush.bf16.msra.mxu2 %v3931_v36  ;;  %v3989_v36 = vld [vmem:[%s4970_s0 + $0x460] sm:$0xff] }
  0x59   :  { %1233 = vmatpush.bf16.msra.mxu3 %v3939_v37  ;;  %v3997_v37 = vld [vmem:[%s4970_s0 + $0x4a0] sm:$0xff] }
  0x5a   :  { %1195 = vmatpush.bf16.msra.mxu0 %v3914_v38  ;;  %v4005_v38 = vld [vmem:[%s4970_s0 + $0x4e0] sm:$0xff] }
  0x5b   :  { %1208 = vmatpush.bf16.msra.mxu1 %v3922_v39  ;;  %v3980_v39 = vld [vmem:[%s4970_s0 + $0x418] sm:$0xff] }
  0x5c   :  { %1221 = vmatpush.bf16.msra.mxu2 %v3930_v40  ;;  %v3988_v40 = vld [vmem:[%s4970_s0 + $0x458] sm:$0xff] }
  0x5d   :  { %1234 = vmatpush.bf16.msra.mxu3 %v3938_v41  ;;  %v3996_v41 = vld [vmem:[%s4970_s0 + $0x498] sm:$0xff] }
  0x5e   :  { %1196 = vmatpush.bf16.msra.mxu0 %v3913_v42  ;;  %v4004_v42 = vld [vmem:[%s4970_s0 + $0x4d8] sm:$0xff] }
  0x5f   :  { %1209 = vmatpush.bf16.msra.mxu1 %v3921_v43  ;;  %v3979_v43 = vld [vmem:[%s4970_s0 + $0x410] sm:$0xff] }
  0x60   :  { %1222 = vmatpush.bf16.msra.mxu2 %v3929_v44  ;;  %v3987_v44 = vld [vmem:[%s4970_s0 + $0x450] sm:$0xff] }
  0x61   :  { %1235 = vmatpush.bf16.msra.mxu3 %v3937_v45  ;;  %1197 = vmatmul.bf16.vlgmr.msra.gmra.mxu0 %v293_v51  ;;  %v3995_v45 = vld [vmem:[%s4970_s0 + $0x490] sm:$0xff]  ;;  %v4002_v51 = vld [vmem:[%s4970_s0 + $0x4c8] sm:$0xff] }
  0x62   :  { %1241 = vmatpush.bf16.msrb.mxu0 %v3952_v46  ;;  %1210 = vmatmul.bf16.vlgmr.msra.gmra.mxu1 %v294_v53  ;;  %v4003_v46 = vld [vmem:[%s4970_s0 + $0x4d0] sm:$0xff]  ;;  %v3985_v53 = vld [vmem:[%s4970_s0 + $0x440] sm:$0xff] }
  0x63   :  { %1254 = vmatpush.bf16.msrb.mxu1 %v3960_v47  ;;  %1223 = vmatmul.bf16.vlgmr.msra.gmra.mxu2 %v295_v52  ;;  %v3978_v47 = vld [vmem:[%s4970_s0 + $0x408] sm:$0xff]  ;;  %v3977_v52 = vld [vmem:[%s4970_s0 + $0x400] sm:$0xff] }
  0x64   :  { %1267 = vmatpush.bf16.msrb.mxu2 %v3968_v48  ;;  %1236 = vmatmul.bf16.vlgmr.msra.gmra.mxu3 %v296_v54  ;;  %v3986_v48 = vld [vmem:[%s4970_s0 + $0x448] sm:$0xff]  ;;  %v3993_v54 = vld [vmem:[%s4970_s0 + $0x480] sm:$0xff] }
  0x65   :  { %1280 = vmatpush.bf16.msrb.mxu3 %v3976_v49  ;;  %v3994_v49 = vld [vmem:[%s4970_s0 + $0x488] sm:$0xff] }
  0x66   :  { %1242 = vmatpush.bf16.msrb.mxu0 %v3951_v55  ;;  %v4001_v55 = vld [vmem:[%s4970_s0 + $0x4c0] sm:$0xff] }
  0x67   :  { %1255 = vmatpush.bf16.msrb.mxu1 %v3959_v56  ;;  %v4016_v56 = vld [vmem:[%s4970_s0 + $0x538] sm:$0xff] }
  0x68   :  { %1268 = vmatpush.bf16.msrb.mxu2 %v3967_v57  ;;  %v4024_v57 = vld [vmem:[%s4970_s0 + $0x578] sm:$0xff] }
  0x69   :  { %1281 = vmatpush.bf16.msrb.mxu3 %v3975_v58  ;;  %v4032_v58 = vld [vmem:[%s4970_s0 + $0x5b8] sm:$0xff] }
  0x6a   :  { %1243 = vmatpush.bf16.msrb.mxu0 %v3950_v63  ;;  %v4023_v63 = vld [vmem:[%s4970_s0 + $0x570] sm:$0xff] }
  0x6b   :  { %1256 = vmatpush.bf16.msrb.mxu1 %v3958_v0  ;;  %v1556_v0 = vld [vmem:[#allocation1 + $0x1b] sm:$0xff] }
  0x6c   :  { %1269 = vmatpush.bf16.msrb.mxu2 %v3966_v1  ;;  %v1554_v1 = vld [vmem:[#allocation1 + $0x9] sm:$0xff] }
  0x6d   :  { %1282 = vmatpush.bf16.msrb.mxu3 %v3974_v20  ;;  %v4031_v20 = vld [vmem:[%s4970_s0 + $0x5b0] sm:$0xff] }
  0x6e   :  { %1244 = vmatpush.bf16.msrb.mxu0 %v3949_v2  ;;  %v4039_v2 = vld [vmem:[%s4970_s0 + $0x5f0] sm:$0xff] }
  0x6f   :  { %1257 = vmatpush.bf16.msrb.mxu1 %v3957_v3  ;;  %v4014_v3 = vld [vmem:[%s4970_s0 + $0x528] sm:$0xff] }
  0x70   :  { %1270 = vmatpush.bf16.msrb.mxu2 %v3965_v4  ;;  %v4022_v4 = vld [vmem:[%s4970_s0 + $0x568] sm:$0xff] }
  0x71   :  { %1283 = vmatpush.bf16.msrb.mxu3 %v3973_v5 }
  0x72   :  { %1245 = vmatpush.bf16.msrb.mxu0 %v3948_v6  ;;  %v4030_v6 = vld [vmem:[%s4970_s0 + $0x5a8] sm:$0xff] }
  0x73   :  { %1258 = vmatpush.bf16.msrb.mxu1 %v3956_v7  ;;  %v4038_v7 = vld [vmem:[%s4970_s0 + $0x5e8] sm:$0xff] }
  0x74   :  { %1271 = vmatpush.bf16.msrb.mxu2 %v3964_v8 }
  0x75   :  { %1284 = vmatpush.bf16.msrb.mxu3 %v3972_v9  ;;  %v4678_v9 = vld [vmem:[#allocation1 + $0x36] sm:$0xff] }
  0x76   :  { %1246 = vmatpush.bf16.msrb.mxu0 %v3947_v10 }
  0x77   :  { %1259 = vmatpush.bf16.msrb.mxu1 %v3955_v11  ;;  %v4680_v11 = vld [vmem:[#allocation1 + $0x24] sm:$0xff] }
  0x78   :  { %1272 = vmatpush.bf16.msrb.mxu2 %v3963_v12  ;;  %v4682_v12 = vld [vmem:[#allocation1 + $0x3f] sm:$0xff] }
  0x79   :  { %1285 = vmatpush.bf16.msrb.mxu3 %v3971_v13  ;;  %v4684_v13 = vld [vmem:[#allocation1 + $0x2d] sm:$0xff] }
  0x7a   :  { %1247 = vmatpush.bf16.msrb.mxu0 %v3946_v14  ;;  %v4013_v14 = vld [vmem:[%s4970_s0 + $0x520] sm:$0xff] }
  0x7b   :  { %1260 = vmatpush.bf16.msrb.mxu1 %v3954_v15  ;;  %v4021_v15 = vld [vmem:[%s4970_s0 + $0x560] sm:$0xff] }
  0x7c   :  { %1273 = vmatpush.bf16.msrb.mxu2 %v3962_v16 }
  0x7d   :  { %1286 = vmatpush.bf16.msrb.mxu3 %v3970_v17 }
  0x7e   :  { %1248 = vmatpush.bf16.msrb.mxu0 %v3945_v18  ;;  %v4029_v18 = vld [vmem:[%s4970_s0 + $0x5a0] sm:$0xff] }
  0x7f   :  { %1261 = vmatpush.bf16.msrb.mxu1 %v3953_v19  ;;  %v4037_v19 = vld [vmem:[%s4970_s0 + $0x5e0] sm:$0xff] }
  0x80   :  { %1274 = vmatpush.bf16.msrb.mxu2 %v3961_v21 }
  0x81   :  { %1287 = vmatpush.bf16.msrb.mxu3 %v3969_v22  ;;  %1249 = vmatmul.bf16.vlgmr.msrb.gmra.mxu0 %v4458_v59  ;;  %v4040_v59 = vld [vmem:[%s4970_s0 + $0x5f8] sm:$0xff] }
  0x82   :  { %2354 = vmatpush.bf16.msra.mxu0 %v3984_v23  ;;  %1262 = vmatmul.bf16.vlgmr.msrb.gmra.mxu1 %v4462_v61  ;;  %v1555_v61 = vld [vmem:[#allocation1 + $0x12] sm:$0xff] }
  0x83   :  { %2367 = vmatpush.bf16.msra.mxu1 %v3992_v24  ;;  %1275 = vmatmul.bf16.vlgmr.msrb.gmra.mxu2 %v4460_v60  ;;  %v4015_v60 = vld [vmem:[%s4970_s0 + $0x530] sm:$0xff]  ;;  %v4012_v22 = vld [vmem:[%s4970_s0 + $0x518] sm:$0xff] }
  0x84   :  { %2380 = vmatpush.bf16.msra.mxu2 %v4000_v25  ;;  %1288 = vmatmul.bf16.vlgmr.msrb.gmra.mxu3 %v4464_v62  ;;  %v1553_v62 = vld [vmem:[#allocation1] sm:$0xff]  ;;  %v4028_v23 = vld [vmem:[%s4970_s0 + $0x598] sm:$0xff] }
  0x85   :  { %2393 = vmatpush.bf16.msra.mxu3 %v4008_v26  ;;  %1561 = vst [vmem:[#allocation1] ss:$9 sm:$0xff] %v4272_v50  ;;  %v4020_v50 = vld [vmem:[%s4970_s0 + $0x558] sm:$0xff] }
  0x86   :  { %2355 = vmatpush.bf16.msra.mxu0 %v3983_v27  ;;  %v4036_v24 = vld [vmem:[%s4970_s0 + $0x5d8] sm:$0xff] }
  0x87   :  { %2368 = vmatpush.bf16.msra.mxu1 %v3991_v28  ;;  %v4669_v5 = vpop.permute.xlu0 %277 }
  0x88   :  { %2381 = vmatpush.bf16.msra.mxu2 %v3999_v29  ;;  %v280_v8 = vperm.slane %v4669_v5, 0  ;;  %v4011_v29 = vld [vmem:[%s4970_s0 + $0x510] sm:$0xff] }
  0x89   :  { %2394 = vmatpush.bf16.msra.mxu3 %v4007_v30  ;;  %v4019_v30 = vld [vmem:[%s4970_s0 + $0x550] sm:$0xff] }
  0x8a   :  { %2356 = vmatpush.bf16.msra.mxu0 %v3982_v31 }
  0x8b   :  { %2369 = vmatpush.bf16.msra.mxu1 %v3990_v32 }
  0x8c   :  { %2382 = vmatpush.bf16.msra.mxu2 %v3998_v33  ;;  %v4027_v33 = vld [vmem:[%s4970_s0 + $0x590] sm:$0xff] }
  0x8d   :  { %2395 = vmatpush.bf16.msra.mxu3 %v4006_v34  ;;  %v4035_v34 = vld [vmem:[%s4970_s0 + $0x5d0] sm:$0xff] }
  0x8e   :  { %2357 = vmatpush.bf16.msra.mxu0 %v3981_v35  ;;  %v4010_v35 = vld [vmem:[%s4970_s0 + $0x508] sm:$0xff] }
  0x8f   :  { %2370 = vmatpush.bf16.msra.mxu1 %v3989_v36  ;;  %v4018_v36 = vld [vmem:[%s4970_s0 + $0x548] sm:$0xff] }
  0x90   :  { %2383 = vmatpush.bf16.msra.mxu2 %v3997_v37  ;;  %v4026_v37 = vld [vmem:[%s4970_s0 + $0x588] sm:$0xff] }
  0x91   :  { %2396 = vmatpush.bf16.msra.mxu3 %v4005_v38  ;;  %v4034_v38 = vld [vmem:[%s4970_s0 + $0x5c8] sm:$0xff] }
  0x92   :  { %2358 = vmatpush.bf16.msra.mxu0 %v3980_v39 }
  0x93   :  { %2371 = vmatpush.bf16.msra.mxu1 %v3988_v40 }
  0x94   :  { %2384 = vmatpush.bf16.msra.mxu2 %v3996_v41  ;;  %v4009_v41 = vld [vmem:[%s4970_s0 + $0x500] sm:$0xff] }
  0x95   :  { %2397 = vmatpush.bf16.msra.mxu3 %v4004_v42  ;;  %v4017_v42 = vld [vmem:[%s4970_s0 + $0x540] sm:$0xff] }
  0x96   :  { %2359 = vmatpush.bf16.msra.mxu0 %v3979_v43  ;;  %v4025_v43 = vld [vmem:[%s4970_s0 + $0x580] sm:$0xff] }
  0x97   :  { %2372 = vmatpush.bf16.msra.mxu1 %v3987_v44  ;;  %v4033_v44 = vld [vmem:[%s4970_s0 + $0x5c0] sm:$0xff] }
  0x98   :  { %2385 = vmatpush.bf16.msra.mxu2 %v3995_v45  ;;  %v4048_v45 = vld [vmem:[%s4970_s0 + $0x638] sm:$0xff] }
  0x99   :  { %2398 = vmatpush.bf16.msra.mxu3 %v4003_v46  ;;  %v4056_v46 = vld [vmem:[%s4970_s0 + $0x678] sm:$0xff] }
  0x9a   :  { %2360 = vmatpush.bf16.msra.mxu0 %v3978_v47  ;;  %v4064_v47 = vld [vmem:[%s4970_s0 + $0x6b8] sm:$0xff] }
  0x9b   :  { %2373 = vmatpush.bf16.msra.mxu1 %v3986_v48  ;;  %v4072_v48 = vld [vmem:[%s4970_s0 + $0x6f8] sm:$0xff] }
  0x9c   :  { %2386 = vmatpush.bf16.msra.mxu2 %v3994_v49  ;;  %v4047_v49 = vld [vmem:[%s4970_s0 + $0x630] sm:$0xff] }
  0x9d   :  { %2399 = vmatpush.bf16.msra.mxu3 %v4002_v51  ;;  %v4055_v51 = vld [vmem:[%s4970_s0 + $0x670] sm:$0xff] }
  0x9e   :  { %2361 = vmatpush.bf16.msra.mxu0 %v3977_v52  ;;  %v1094_v10 = vpop.f32.mrf.mxu0  ;;  %v4063_v52 = vld [vmem:[%s4970_s0 + $0x6b0] sm:$0xff] }
  0x9f   :  { %2374 = vmatpush.bf16.msra.mxu1 %v3985_v53  ;;  %v1107_v16 = vpop.f32.mrf.mxu1  ;;  %v1095_v17 = vadd.f32 %v1094_v10, %v280_v8  ;;  %v4071_v53 = vld [vmem:[%s4970_s0 + $0x6f0] sm:$0xff] }
  0xa0   :  { %2387 = vmatpush.bf16.msra.mxu2 %v3993_v54  ;;  %v4046_v54 = vld [vmem:[%s4970_s0 + $0x628] sm:$0xff] }
  0xa1   :  { %2400 = vmatpush.bf16.msra.mxu3 %v4001_v55  ;;  %2362 = vmatmul.bf16.vlgmr.msra.gmra.mxu0 %v1553_v62  ;;  %v1108_v21 = vadd.f32 %v1107_v16, %v1095_v17  ;;  %v4054_v55 = vld [vmem:[%s4970_s0 + $0x668] sm:$0xff]  ;;  %v4061_v62 = vld [vmem:[%s4970_s0 + $0x6a0] sm:$0xff] }
  0xa2   :  { %2406 = vmatpush.bf16.msrb.mxu0 %v4016_v56  ;;  %2375 = vmatmul.bf16.vlgmr.msra.gmra.mxu1 %v1554_v1  ;;  %v4062_v56 = vld [vmem:[%s4970_s0 + $0x6a8] sm:$0xff]  ;;  %v4052_v1 = vld [vmem:[%s4970_s0 + $0x658] sm:$0xff] }
  0xa3   :  { %2419 = vmatpush.bf16.msrb.mxu1 %v4024_v57  ;;  %2388 = vmatmul.bf16.vlgmr.msra.gmra.mxu2 %v1555_v61  ;;  %v4070_v57 = vld [vmem:[%s4970_s0 + $0x6e8] sm:$0xff] }
  0xa4   :  { %2432 = vmatpush.bf16.msrb.mxu2 %v4032_v58  ;;  %2401 = vmatmul.bf16.vlgmr.msra.gmra.mxu3 %v1556_v0  ;;  %v4044_v0 = vld [vmem:[%s4970_s0 + $0x618] sm:$0xff]  ;;  %v4066_v16 = vld [vmem:[%s4970_s0 + $0x6c8] sm:$0xff] }
  0xa5   :  { %2445 = vmatpush.bf16.msrb.mxu3 %v4040_v59  ;;  %v4045_v59 = vld [vmem:[%s4970_s0 + $0x620] sm:$0xff] }
  0xa6   :  { %2407 = vmatpush.bf16.msrb.mxu0 %v4015_v60  ;;  %v1120_v25 = vpop.f32.mrf.mxu2  ;;  %v1096_v28 = vpop.f32.mrf.mxu0  ;;  %v4053_v60 = vld [vmem:[%s4970_s0 + $0x660] sm:$0xff] }
  0xa7   :  { %2420 = vmatpush.bf16.msrb.mxu1 %v4023_v63  ;;  %v1121_v26 = vadd.f32 %v1120_v25, %v1108_v21  ;;  %v1133_v27 = vpop.f32.mrf.mxu3  ;;  %v1109_v32 = vpop.f32.mrf.mxu1  ;;  %v4069_v63 = vld [vmem:[%s4970_s0 + $0x6e0] sm:$0xff]  ;;  %v4096_v25 = vld [vmem:[%s4970_s0 + $0x7b8] sm:$0xff] }
  0xa8   :  { %2433 = vmatpush.bf16.msrb.mxu2 %v4031_v20  ;;  %v4060_v20 = vld [vmem:[%s4970_s0 + $0x698] sm:$0xff]  ;;  %v4049_v21 = vld [vmem:[%s4970_s0 + $0x640] sm:$0xff]  ;;  %v4079_v32 = vld [vmem:[%s4970_s0 + $0x730] sm:$0xff] }
  0xa9   :  { %2446 = vmatpush.bf16.msrb.mxu3 %v4039_v2  ;;  %v4719_v31 = vadd.f32 %v1133_v27, %v1121_v26  ;;  %v4068_v2 = vld [vmem:[%s4970_s0 + $0x6d8] sm:$0xff]  ;;  %v1562_v27 = vld [vmem:[#allocation1] sm:$0xff] }
  0xaa   :  { %2408 = vmatpush.bf16.msrb.mxu0 %v4014_v3  ;;  %v4104_v26 = vld [vmem:[%s4970_s0 + $0x7f8] sm:$0xff] }
  0xab   :  { %2421 = vmatpush.bf16.msrb.mxu1 %v4022_v4  ;;  %v1564_v28 = vld [vmem:[#allocation1 + $0x12] sm:$0xff] }
  0xac   :  { %2434 = vmatpush.bf16.msrb.mxu2 %v4030_v6 }
  0xad   :  { %2447 = vmatpush.bf16.msrb.mxu3 %v4038_v7  ;;  %v4043_v7 = vld [vmem:[%s4970_s0 + $0x610] sm:$0xff] }
  0xae   :  { %2409 = vmatpush.bf16.msrb.mxu0 %v4013_v14  ;;  %v1122_v39 = vpop.f32.mrf.mxu2  ;;  %v4050_v14 = vld [vmem:[%s4970_s0 + $0x648] sm:$0xff] }
  0xaf   :  { %2422 = vmatpush.bf16.msrb.mxu1 %v4021_v15  ;;  %v1135_v40 = vpop.f32.mrf.mxu3  ;;  %v4058_v15 = vld [vmem:[%s4970_s0 + $0x688] sm:$0xff] }
  0xb0   :  { %2435 = vmatpush.bf16.msrb.mxu2 %v4029_v18  ;;  %v4102_v39 = vld [vmem:[%s4970_s0 + $0x7e8] sm:$0xff] }
  0xb1   :  { %2448 = vmatpush.bf16.msrb.mxu3 %v4037_v19  ;;  %v4041_v19 = vld [vmem:[%s4970_s0 + $0x600] sm:$0xff] }
  0xb2   :  { %2410 = vmatpush.bf16.msrb.mxu0 %v4012_v22  ;;  %v4057_v22 = vld [vmem:[%s4970_s0 + $0x680] sm:$0xff] }
  0xb3   :  { %2423 = vmatpush.bf16.msrb.mxu1 %v4020_v50  ;;  %v4065_v50 = vld [vmem:[%s4970_s0 + $0x6c0] sm:$0xff] }
  0xb4   :  { %2436 = vmatpush.bf16.msrb.mxu2 %v4028_v23  ;;  %v4080_v23 = vld [vmem:[%s4970_s0 + $0x738] sm:$0xff] }
  0xb5   :  { %2449 = vmatpush.bf16.msrb.mxu3 %v4036_v24  ;;  %v4088_v24 = vld [vmem:[%s4970_s0 + $0x778] sm:$0xff] }
  0xb6   :  { %2411 = vmatpush.bf16.msrb.mxu0 %v4011_v29  ;;  %v1563_v29 = vld [vmem:[#allocation1 + $0x9] sm:$0xff] }
  0xb7   :  { %2424 = vmatpush.bf16.msrb.mxu1 %v4019_v30  ;;  %v1565_v30 = vld [vmem:[#allocation1 + $0x1b] sm:$0xff] }
  0xb8   :  { %2437 = vmatpush.bf16.msrb.mxu2 %v4027_v33  ;;  %v4087_v33 = vld [vmem:[%s4970_s0 + $0x770] sm:$0xff] }
  0xb9   :  { %2450 = vmatpush.bf16.msrb.mxu3 %v4035_v34  ;;  %v4095_v34 = vld [vmem:[%s4970_s0 + $0x7b0] sm:$0xff] }
  0xba   :  { %2412 = vmatpush.bf16.msrb.mxu0 %v4010_v35  ;;  %v4103_v35 = vld [vmem:[%s4970_s0 + $0x7f0] sm:$0xff] }
  0xbb   :  { %2425 = vmatpush.bf16.msrb.mxu1 %v4018_v36  ;;  %v4078_v36 = vld [vmem:[%s4970_s0 + $0x728] sm:$0xff] }
  0xbc   :  { %2438 = vmatpush.bf16.msrb.mxu2 %v4026_v37  ;;  %v4086_v37 = vld [vmem:[%s4970_s0 + $0x768] sm:$0xff] }
  0xbd   :  { %2451 = vmatpush.bf16.msrb.mxu3 %v4034_v38  ;;  %v4094_v38 = vld [vmem:[%s4970_s0 + $0x7a8] sm:$0xff] }
  0xbe   :  { %2413 = vmatpush.bf16.msrb.mxu0 %v4009_v41  ;;  %v4791_v58 = vpop.f32.mrf.mxu0  ;;  %v4077_v41 = vld [vmem:[%s4970_s0 + $0x720] sm:$0xff] }
  0xbf   :  { %2426 = vmatpush.bf16.msrb.mxu1 %v4017_v42  ;;  %v4799_v61 = vpop.f32.mrf.mxu1  ;;  %v4085_v42 = vld [vmem:[%s4970_s0 + $0x760] sm:$0xff] }
  0xc0   :  { %2439 = vmatpush.bf16.msrb.mxu2 %v4025_v43 }
  0xc1   :  { %2452 = vmatpush.bf16.msrb.mxu3 %v4033_v44  ;;  %2414 = vmatmul.bf16.vlgmr.msrb.gmra.mxu0 %v4680_v11  ;;  %v4059_v11 = vld [vmem:[%s4970_s0 + $0x690] sm:$0xff]  ;;  %v4093_v44 = vld [vmem:[%s4970_s0 + $0x7a0] sm:$0xff] }
  0xc2   :  { %2458 = vmatpush.bf16.msra.mxu0 %v4048_v45  ;;  %2427 = vmatmul.bf16.vlgmr.msrb.gmra.mxu1 %v4684_v13  ;;  %v4042_v13 = vld [vmem:[%s4970_s0 + $0x608] sm:$0xff]  ;;  %v4101_v45 = vld [vmem:[%s4970_s0 + $0x7e0] sm:$0xff] }
  0xc3   :  { %2471 = vmatpush.bf16.msra.mxu1 %v4056_v46  ;;  %2440 = vmatmul.bf16.vlgmr.msrb.gmra.mxu2 %v4678_v9  ;;  %v4051_v9 = vld [vmem:[%s4970_s0 + $0x650] sm:$0xff]  ;;  %v1147_v46 = vadd.f32 %v4791_v58, %v4719_v31  ;;  %v4100_v31 = vld [vmem:[%s4970_s0 + $0x7d8] sm:$0xff] }
  0xc4   :  { %2484 = vmatpush.bf16.msra.mxu2 %v4064_v47  ;;  %2453 = vmatmul.bf16.vlgmr.msrb.gmra.mxu3 %v4682_v12  ;;  %v4067_v12 = vld [vmem:[%s4970_s0 + $0x6d0] sm:$0xff]  ;;  %v4076_v47 = vld [vmem:[%s4970_s0 + $0x718] sm:$0xff] }
  0xc5   :  { %2497 = vmatpush.bf16.msra.mxu3 %v4072_v48  ;;  %v4084_v48 = vld [vmem:[%s4970_s0 + $0x758] sm:$0xff]  ;;  %v4091_v58 = vld [vmem:[%s4970_s0 + $0x790] sm:$0xff] }
  0xc6   :  { %2459 = vmatpush.bf16.msra.mxu0 %v4047_v49  ;;  %v4819_v3 = vpop.f32.mrf.mxu2  ;;  %v1148_v6 = vpop.f32.mrf.mxu0  ;;  %v4092_v49 = vld [vmem:[%s4970_s0 + $0x798] sm:$0xff] }
  0xc7   :  { %2472 = vmatpush.bf16.msra.mxu1 %v4055_v51  ;;  %v4821_v4 = vpop.f32.mrf.mxu3  ;;  %v1161_v10 = vpop.f32.mrf.mxu1  ;;  %v4081_v6 = vld [vmem:[%s4970_s0 + $0x740] sm:$0xff] }
  0xc8   :  { %2485 = vmatpush.bf16.msra.mxu2 %v4063_v52  ;;  %v1566_v10 = vld [vmem:[#allocation1 + $0x24] sm:$0xff] }
  0xc9   :  { %2498 = vmatpush.bf16.msra.mxu3 %v4071_v53 }
  0xca   :  { %2460 = vmatpush.bf16.msra.mxu0 %v4046_v54  ;;  %v1160_v54 = vadd.f32 %v4799_v61, %v1147_v46  ;;  %v4074_v61 = vld [vmem:[%s4970_s0 + $0x708] sm:$0xff] }
  0xcb   :  { %2473 = vmatpush.bf16.msra.mxu1 %v4054_v55  ;;  %v4075_v55 = vld [vmem:[%s4970_s0 + $0x710] sm:$0xff] }
  0xcc   :  { %2486 = vmatpush.bf16.msra.mxu2 %v4062_v56  ;;  %v4083_v56 = vld [vmem:[%s4970_s0 + $0x750] sm:$0xff] }
  0xcd   :  { %2499 = vmatpush.bf16.msra.mxu3 %v4070_v57 }
  0xce   :  { %2461 = vmatpush.bf16.msra.mxu0 %v4045_v59  ;;  %v1174_v17 = vpop.f32.mrf.mxu2  ;;  %v4099_v59 = vld [vmem:[%s4970_s0 + $0x7d0] sm:$0xff] }
  0xcf   :  { %2474 = vmatpush.bf16.msra.mxu1 %v4053_v60  ;;  %v1187_v18 = vpop.f32.mrf.mxu3  ;;  %v1173_v60 = vadd.f32 %v4819_v3, %v1160_v54  ;;  %v4073_v3 = vld [vmem:[%s4970_s0 + $0x700] sm:$0xff] }
  0xd0   :  { %2487 = vmatpush.bf16.msra.mxu2 %v4061_v62  ;;  %v4082_v62 = vld [vmem:[%s4970_s0 + $0x748] sm:$0xff] }
  0xd1   :  { %2500 = vmatpush.bf16.msra.mxu3 %v4069_v63  ;;  %v4090_v63 = vld [vmem:[%s4970_s0 + $0x788] sm:$0xff] }
  0xd2   :  { %2462 = vmatpush.bf16.msra.mxu0 %v4044_v0  ;;  %v4098_v0 = vld [vmem:[%s4970_s0 + $0x7c8] sm:$0xff] }
  0xd3   :  { %2475 = vmatpush.bf16.msra.mxu1 %v4052_v1 }
  0xd4   :  { %2488 = vmatpush.bf16.msra.mxu2 %v4060_v20 }
  0xd5   :  { %2501 = vmatpush.bf16.msra.mxu3 %v4068_v2  ;;  %v1186_v2 = vadd.f32 %v4821_v4, %v1173_v60  ;;  %v4097_v4 = vld [vmem:[%s4970_s0 + $0x7c0] sm:$0xff] }
  0xd6   :  { %2463 = vmatpush.bf16.msra.mxu0 %v4043_v7  ;;  %v4089_v7 = vld [vmem:[%s4970_s0 + $0x780] sm:$0xff] }
  0xd7   :  { %2476 = vmatpush.bf16.msra.mxu1 %v4051_v9 }
  0xd8   :  { %2489 = vmatpush.bf16.msra.mxu2 %v4059_v11  ;;  %v1567_v11 = vld [vmem:[#allocation1 + $0x2d] sm:$0xff] }
  0xd9   :  { %2502 = vmatpush.bf16.msra.mxu3 %v4067_v12  ;;  %v1568_v12 = vld [vmem:[#allocation1 + $0x36] sm:$0xff] }
  0xda   :  { %2464 = vmatpush.bf16.msra.mxu0 %v4042_v13  ;;  %v1569_v13 = vld [vmem:[#allocation1 + $0x3f] sm:$0xff] }
  0xdb   :  { %2477 = vmatpush.bf16.msra.mxu1 %v4050_v14 }
  0xdc   :  { %2490 = vmatpush.bf16.msra.mxu2 %v4058_v15 }
  0xdd   :  { %2503 = vmatpush.bf16.msra.mxu3 %v4066_v16 }
  0xde   :  { %2465 = vmatpush.bf16.msra.mxu0 %v4041_v19  ;;  %v1198_v40 = vpop.f32.mrf.mxu0 }
  0xdf   :  { %2478 = vmatpush.bf16.msra.mxu1 %v4049_v21  ;;  %v1211_v43 = vpop.f32.mrf.mxu1  ;;  %v1199_v9 = vadd.f32 %v1198_v40, %v1186_v2 }
  0xe0   :  { %2491 = vmatpush.bf16.msra.mxu2 %v4057_v22 }
  0xe1   :  { %2504 = vmatpush.bf16.msra.mxu3 %v4065_v50  ;;  %2466 = vmatmul.bf16.vlgmr.msra.gmra.mxu0 %v1562_v27  ;;  %v1212_v14 = vadd.f32 %v1211_v43, %v1199_v9 }
  0xe2   :  { %2510 = vmatpush.bf16.msrb.mxu0 %v4080_v23  ;;  %2479 = vmatmul.bf16.vlgmr.msra.gmra.mxu1 %v1563_v29 }
  0xe3   :  { %2523 = vmatpush.bf16.msrb.mxu1 %v4088_v24  ;;  %2492 = vmatmul.bf16.vlgmr.msra.gmra.mxu2 %v1564_v28 }
  0xe4   :  { %2536 = vmatpush.bf16.msrb.mxu2 %v4096_v25  ;;  %2505 = vmatmul.bf16.vlgmr.msra.gmra.mxu3 %v1565_v30 }
  0xe5   :  { %2549 = vmatpush.bf16.msrb.mxu3 %v4104_v26 }
  0xe6   :  { %2511 = vmatpush.bf16.msrb.mxu0 %v4079_v32  ;;  %v1224_v51 = vpop.f32.mrf.mxu2  ;;  %v1200_v53 = vpop.f32.mrf.mxu0 }
  0xe7   :  { %2524 = vmatpush.bf16.msrb.mxu1 %v4087_v33  ;;  %v1237_v52 = vpop.f32.mrf.mxu3  ;;  %v1213_v57 = vpop.f32.mrf.mxu1  ;;  %v1225_v15 = vadd.f32 %v1224_v51, %v1212_v14 }
  0xe8   :  { %2537 = vmatpush.bf16.msrb.mxu2 %v4095_v34 }
  0xe9   :  { %2550 = vmatpush.bf16.msrb.mxu3 %v4103_v35  ;;  %v1238_v16 = vadd.f32 %v1237_v52, %v1225_v15 }
  0xea   :  { %2512 = vmatpush.bf16.msrb.mxu0 %v4078_v36 }
  0xeb   :  { %2525 = vmatpush.bf16.msrb.mxu1 %v4086_v37 }
  0xec   :  { %2538 = vmatpush.bf16.msrb.mxu2 %v4094_v38 }
  0xed   :  { %2551 = vmatpush.bf16.msrb.mxu3 %v4102_v39 }
  0xee   :  { %2513 = vmatpush.bf16.msrb.mxu0 %v4077_v41  ;;  %v1226_v1 = vpop.f32.mrf.mxu2 }
  0xef   :  { %2526 = vmatpush.bf16.msrb.mxu1 %v4085_v42  ;;  %v1239_v20 = vpop.f32.mrf.mxu3 }
  0xf0   :  { %2539 = vmatpush.bf16.msrb.mxu2 %v4093_v44 }
  0xf1   :  { %2552 = vmatpush.bf16.msrb.mxu3 %v4101_v45 }
  0xf2   :  { %2514 = vmatpush.bf16.msrb.mxu0 %v4076_v47 }
  0xf3   :  { %2527 = vmatpush.bf16.msrb.mxu1 %v4084_v48 }
  0xf4   :  { %2540 = vmatpush.bf16.msrb.mxu2 %v4092_v49 }
  0xf5   :  { %2553 = vmatpush.bf16.msrb.mxu3 %v4100_v31 }
  0xf6   :  { %2515 = vmatpush.bf16.msrb.mxu0 %v4075_v55 }
  0xf7   :  { %2528 = vmatpush.bf16.msrb.mxu1 %v4083_v56 }
  0xf8   :  { %2541 = vmatpush.bf16.msrb.mxu2 %v4091_v58 }
  0xf9   :  { %2554 = vmatpush.bf16.msrb.mxu3 %v4099_v59 }
  0xfa   :  { %2516 = vmatpush.bf16.msrb.mxu0 %v4074_v61 }
  0xfb   :  { %2529 = vmatpush.bf16.msrb.mxu1 %v4082_v62 }
  0xfc   :  { %2542 = vmatpush.bf16.msrb.mxu2 %v4090_v63 }
  0xfd   :  { %2555 = vmatpush.bf16.msrb.mxu3 %v4098_v0 }
  0xfe   :  { %2517 = vmatpush.bf16.msrb.mxu0 %v4073_v3  ;;  %v1250_v17 = vpop.f32.mrf.mxu0 }
  0xff   :  { %2530 = vmatpush.bf16.msrb.mxu1 %v4081_v6  ;;  %v1251_v18 = vadd.f32 %v1250_v17, %v1238_v16  ;;  %v1263_v19 = vpop.f32.mrf.mxu1 }
 0x100   :  { %2543 = vmatpush.bf16.msrb.mxu2 %v4089_v7 }
 0x101   :  { %2556 = vmatpush.bf16.msrb.mxu3 %v4097_v4  ;;  %2518 = vmatmul.bf16.vlgmr.msrb.gmra.mxu0 %v1566_v10  ;;  %v1264_v21 = vadd.f32 %v1263_v19, %v1251_v18 }
 0x102   :  { %2531 = vmatmul.bf16.vlgmr.msrb.gmra.mxu1 %v1567_v11 }
 0x103   :  { %2544 = vmatmul.bf16.vlgmr.msrb.gmra.mxu2 %v1568_v12 }
 0x104   :  { %2557 = vmatmul.bf16.vlgmr.msrb.gmra.mxu3 %v1569_v13 }
 0x106   :  { %v1276_v22 = vpop.f32.mrf.mxu2  ;;  %v1252_v24 = vpop.f32.mrf.mxu0 }
 0x107   :  { %v1277_v50 = vadd.f32 %v1276_v22, %v1264_v21  ;;  %v1289_v23 = vpop.f32.mrf.mxu3  ;;  %v1265_v26 = vpop.f32.mrf.mxu1 }
 0x109   :  { %v1290_v25 = vadd.f32 %v1289_v23, %v1277_v50 }
 0x10b   :  { %1294 = vst.msk [vmem:[%s4973_s3] sm:$0x1] %vm1293_vm0, %v1290_v25 }
 0x10e   :  { %v1278_v27 = vpop.f32.mrf.mxu2 }
 0x10f   :  { %v1291_v28 = vpop.f32.mrf.mxu3 }
 0x11e   :  { %v2363_v29 = vpop.f32.mrf.mxu0 }
 0x11f   :  { %v2364_v30 = vadd.f32 %v2363_v29, %v280_v8  ;;  %v2376_v32 = vpop.f32.mrf.mxu1 }
 0x121   :  { %v2377_v33 = vadd.f32 %v2376_v32, %v2364_v30 }
 0x126   :  { %v2389_v34 = vpop.f32.mrf.mxu2  ;;  %v2365_v37 = vpop.f32.mrf.mxu0 }
 0x127   :  { %v2390_v35 = vadd.f32 %v2389_v34, %v2377_v33  ;;  %v2402_v36 = vpop.f32.mrf.mxu3  ;;  %v2378_v39 = vpop.f32.mrf.mxu1 }
 0x129   :  { %v2403_v38 = vadd.f32 %v2402_v36, %v2390_v35 }
 0x12e   :  { %v2391_v40 = vpop.f32.mrf.mxu2 }
 0x12f   :  { %v2404_v41 = vpop.f32.mrf.mxu3 }
 0x13e   :  { %v2415_v42 = vpop.f32.mrf.mxu0 }
 0x13f   :  { %v2428_v43 = vpop.f32.mrf.mxu1  ;;  %v2416_v31 = vadd.f32 %v2415_v42, %v2403_v38 }
 0x141   :  { %v2429_v54 = vadd.f32 %v2428_v43, %v2416_v31 }
 0x146   :  { %v2441_v44 = vpop.f32.mrf.mxu2  ;;  %v2417_v46 = vpop.f32.mrf.mxu0 }
 0x147   :  { %v2454_v45 = vpop.f32.mrf.mxu3  ;;  %v2430_v47 = vpop.f32.mrf.mxu1  ;;  %v2442_v56 = vadd.f32 %v2441_v44, %v2429_v54 }
 0x149   :  { %v2455_v59 = vadd.f32 %v2454_v45, %v2442_v56 }
 0x14e   :  { %v2443_v48 = vpop.f32.mrf.mxu2 }
 0x14f   :  { %v2456_v49 = vpop.f32.mrf.mxu3 }
 0x15e   :  { %v2467_v5 = vpop.f32.mrf.mxu0 }
 0x15f   :  { %v2480_v8 = vpop.f32.mrf.mxu1  ;;  %v2468_v60 = vadd.f32 %v2467_v5, %v2455_v59 }
 0x161   :  { %v2481_v61 = vadd.f32 %v2480_v8, %v2468_v60 }
 0x166   :  { %v2493_v51 = vpop.f32.mrf.mxu2  ;;  %v2469_v53 = vpop.f32.mrf.mxu0 }
 0x167   :  { %v2506_v52 = vpop.f32.mrf.mxu3  ;;  %v2482_v55 = vpop.f32.mrf.mxu1  ;;  %v2494_v62 = vadd.f32 %v2493_v51, %v2481_v61 }
 0x169   :  { %v2507_v63 = vadd.f32 %v2506_v52, %v2494_v62 }
 0x16e   :  { %v2495_v57 = vpop.f32.mrf.mxu2 }
 0x16f   :  { %v2508_v58 = vpop.f32.mrf.mxu3 }
 0x17e   :  { %v2519_v0 = vpop.f32.mrf.mxu0 }
 0x17f   :  { %v2532_v1 = vpop.f32.mrf.mxu1  ;;  %v2520_v20 = vadd.f32 %v2519_v0, %v2507_v63 }
 0x181   :  { %v2533_v2 = vadd.f32 %v2532_v1, %v2520_v20 }
 0x186   :  { %v2545_v3 = vpop.f32.mrf.mxu2  ;;  %v2521_v4 = vpop.f32.mrf.mxu0 }
 0x187   :  { %v2558_v6 = vpop.f32.mrf.mxu3  ;;  %v2546_v7 = vadd.f32 %v2545_v3, %v2533_v2  ;;  %v2534_v9 = vpop.f32.mrf.mxu1 }
 0x189   :  { %v2559_v10 = vadd.f32 %v2558_v6, %v2546_v7 }
 0x18b   :  { %3848 = vst.msk [vmem:[%s4973_s3 + $0x1] sm:$0x1] %vm1293_vm0, %v2559_v10 }
 0x18e   :  { %v2547_v11 = vpop.f32.mrf.mxu2 }
 0x18f   :  { %v2560_v12 = vpop.f32.mrf.mxu3 }

</bundles_post_ra>
